<compile_context>
chip_gen: v7x
topology: tpu7x:2x2x1
jax: 0.10.0
libtpu: 0.0.40
codegen_flags: <defaults>
</compile_context>

<pallas_src>
import functools

import jax
import jax.numpy as jnp
from jax.experimental import pallas as pl
from jax.experimental.pallas import tpu as pltpu


# ----------------------------------------------------------------------------
# Fused DQN forward kernel: one block of B_blk samples per grid step.
# ----------------------------------------------------------------------------
def _make_dqn_kernel(bb, use_y):
    f32 = jnp.float32
    bf16 = jnp.bfloat16

    def kernel(*refs):
        it = iter(refs)
        p1_ref = next(it)                                   # [bb, 4, 64, 256] bf16
        y_ref = next(it) if use_y else None                 # [bb, 48] bf16
        w1_ref = next(it); b1_ref = next(it)                # [256,32] bf16 / [1,32] f32
        w2_ref = next(it); b2_ref = next(it)                # [512,64] / [1,64]
        w3_ref = next(it); b3_ref = next(it)                # [576,64] / [1,64]
        w1a_ref = next(it)                                  # [1024,512] bf16
        w1b_ref = next(it) if use_y else None               # [48,512] bf16
        ba1_ref = next(it)                                  # [1,512] f32
        wa2_ref = next(it); ba2_ref = next(it)              # [512,128] bf16 / [1,128] f32
        out_ref = next(it)                                  # [bb, 128] f32
        act1_ref = next(it)                                 # [bb, 64, 128] bf16
        pan2_ref = next(it)                                 # [bb, 48, 512] bf16
        act2_ref = next(it)                                 # [bb, 48, 64]  bf16
        pan3_ref = next(it)                                 # [bb, 32, 576] bf16
        act3r_ref = next(it)                                # [bb, 32, 64]  bf16
        act3f_ref = next(it)                                # [bb, 1024]    bf16

        # ---- conv1 (8x8 / stride 4): one matmul per stride-parity panel.
        # Panel q = (h%2)*2 + (w%2) of the 14x14 output grid; within-panel row
        # = (h//2)*7 + (w//2) (rows padded 49 -> 64).  Panels live side by side
        # on the lane axis of act1 (columns q*32 + cout).
        for q in range(4):
            xq = p1_ref[:, q].reshape(bb * 64, 256)
            a1 = jnp.dot(xq, w1_ref[...], preferred_element_type=f32)
            a1 = jnp.maximum(a1 + b1_ref[...], 0.0)
            act1_ref[:, :, q * 32:(q + 1) * 32] = a1.reshape(bb, 64, 32).astype(bf16)

        # ---- conv2 (4x4 / stride 2) im2col: 4 contiguous full-lane copies.
        # pan2 row = ho*7 + wo (7x7-grid indexing; rows with wo==6 / >=41 are
        # harmless garbage, never read).  For offset (i,j) = (2*bi+di, 2*bj+dj)
        # the source is panel q = di*2+dj shifted by bi*7+bj rows, so all 4
        # offsets of a (bi,bj) group come from ONE 128-lane slice of act1.
        for bi in range(2):
            for bj in range(2):
                g = bi * 2 + bj
                pan2_ref[:, :, g * 128:(g + 1) * 128] = (
                    act1_ref[:, pl.ds(bi * 7 + bj, 48), :])
        a2 = jnp.dot(pan2_ref[...].reshape(bb * 48, 512), w2_ref[...],
                     preferred_element_type=f32)
        a2 = jnp.maximum(a2 + b2_ref[...], 0.0)
        act2_ref[...] = a2.reshape(bb, 48, 64).astype(bf16)

        # ---- conv3 (3x3 / stride 1) im2col: 9 contiguous copies, K-folded.
        # pan3 row = ho*7 + wo; offset (i,j) -> act2 rows shifted by i*7+j.
        for i in range(3):
            for j in range(3):
                o = i * 3 + j
                pan3_ref[:, :, o * 64:(o + 1) * 64] = (
                    act2_ref[:, pl.ds(i * 7 + j, 32), :])
        a3 = jnp.dot(pan3_ref[...].reshape(bb * 32, 576), w3_ref[...],
                     preferred_element_type=f32)
        a3 = jnp.maximum(a3 + b3_ref[...], 0.0)
        act3r_ref[...] = a3.reshape(bb, 32, 64).astype(bf16)

        # ---- re-pack conv3 output lane-dense: act3f[:, hw*64 + c], hw=ho*4+wo
        # (affine1's weight rows were permuted to this order at init).
        for ho in range(4):
            for wo in range(4):
                hw = ho * 4 + wo
                act3f_ref[:, hw * 64:(hw + 1) * 64] = act3r_ref[:, ho * 7 + wo, :]

        # ---- affine1: single [bb,1024]x[1024,512] matmul (+ optional y path).
        h1 = jnp.dot(act3f_ref[...], w1a_ref[...], preferred_element_type=f32)
        if use_y:
            h1 = h1 + jnp.dot(y_ref[...], w1b_ref[...], preferred_element_type=f32)
        h1 = jnp.maximum(h1 + ba1_ref[...], 0.0).astype(bf16)

        # ---- affine2 (output lanes padded to 128 -> unmasked store).
        out_ref[...] = (jnp.dot(h1, wa2_ref[...], preferred_element_type=f32)
                        + ba2_ref[...]).astype(out_ref.dtype)

    return kernel


# ----------------------------------------------------------------------------
# Wrapper-side conv1 im2col (raw input only) + the fused pallas_call.
# ----------------------------------------------------------------------------
# TODO(synk): conv1's stride-4 im2col stays in XLA; it could move in-kernel by
# DMA-ing the raw [4,60,60] sample and building panels with strided slices.
def _conv1_patches(x):
    """x: [B, 4, 60, 60] NCHW -> [B, 4, 64, 256] bf16 parity-major conv1 patches.

    Panel = (h%2)*2 + (w%2) of the 14x14 conv1 output grid, rows within a
    panel = (h//2)*7 + (w//2) (padded 49 -> 64); patch columns = (cin, kh, kw).
    """
    B = x.shape[0]
    v = x.reshape(B, 4, 15, 4, 15, 4)                              # c, H/4, r4, W/4, c4
    vh = jnp.stack([v[:, :, 0:14], v[:, :, 1:15]], axis=3)         # + ih
    vw = jnp.stack([vh[..., 0:14, :], vh[..., 1:15, :]], axis=6)   # + jh
    # axes: (B, c, h, ih, r4, w, jh, c4)
    p = vw.transpose(0, 2, 5, 1, 3, 4, 6, 7)                       # (B, h, w, c, ih, r4, jh, c4)
    p = p.reshape(B, 14, 14, 256)                                  # k = c*64 + kh*8 + kw
    p = p.reshape(B, 7, 2, 7, 2, 256).transpose(0, 2, 4, 1, 3, 5)  # (B, dh, dw, h2, w2, k)
    p = p.reshape(B, 4, 49, 256)
    p = jnp.pad(p, ((0, 0), (0, 0), (0, 15), (0, 0)))              # rows 49 -> 64
    return p.astype(jnp.bfloat16)


def dqn_forward(params, x, y, *, n_action=4, activate_additional=True, block_b=8):
    B = x.shape[0]
    bf16 = jnp.bfloat16
    p1 = _conv1_patches(x.astype(jnp.float32))                     # [B, 4, 64, 256]
    Bp = ((B + block_b - 1) // block_b) * block_b
    if Bp != B:
        p1 = jnp.pad(p1, ((0, Bp - B), (0, 0), (0, 0), (0, 0)))

    const = lambda b: (0, 0)
    args = [p1]
    in_specs = [pl.BlockSpec((block_b, 4, 64, 256), lambda b: (b, 0, 0, 0))]
    if activate_additional:
        yb = y.reshape(B, 48).astype(bf16)
        if Bp != B:
            yb = jnp.pad(yb, ((0, Bp - B), (0, 0)))
        args.append(yb)
        in_specs.append(pl.BlockSpec((block_b, 48), lambda b: (b, 0)))

    weight_names = ["w1", "b1", "w2", "b2", "w3", "b3", "w1a"]
    if activate_additional:
        weight_names.append("w1b")
    weight_names += ["ba1", "wa2", "ba2"]
    for name in weight_names:
        w = params[name]
        args.append(w)
        in_specs.append(pl.BlockSpec(w.shape, const))              # VMEM-resident weights

    out = pl.pallas_call(
        _make_dqn_kernel(block_b, activate_additional),
        out_shape=jax.ShapeDtypeStruct((Bp, 128), jnp.float32),
        grid_spec=pltpu.PrefetchScalarGridSpec(
            num_scalar_prefetch=0,
            grid=(Bp // block_b,),
            in_specs=in_specs,
            out_specs=pl.BlockSpec((block_b, 128), lambda b: (b, 0)),
            scratch_shapes=[
                pltpu.VMEM((block_b, 64, 128), bf16),   # act1: parity panels on lanes
                pltpu.VMEM((block_b, 48, 512), bf16),   # pan2: conv2 im2col (K-folded)
                pltpu.VMEM((block_b, 48, 64), bf16),    # act2
                pltpu.VMEM((block_b, 32, 576), bf16),   # pan3: conv3 im2col (K-folded)
                pltpu.VMEM((block_b, 32, 64), bf16),    # act3 (row form)
                pltpu.VMEM((block_b, 1024), bf16),      # act3 (lane-dense flatten)
            ],
        ),
        compiler_params=pltpu.CompilerParams(
            dimension_semantics=("parallel",),
            vmem_limit_bytes=32 * 1024 * 1024,
        ),
    )(*args)
    return out[:B, :n_action]


# ----------------------------------------------------------------------------
# Parameter init: PyTorch-layout tensors + one-time conversion to kernel layout.
# ----------------------------------------------------------------------------
def init_dqn_params(key, activate_additional, n_action=4):
    ks = jax.random.split(key, 10)

    def u(k, shape, fan_in):
        bound = 1.0 / float(fan_in) ** 0.5
        return jax.random.uniform(k, shape, jnp.float32, -bound, bound)

    # PyTorch-layout parameters (what nn.Conv2d / nn.Linear hold).
    w1, b1 = u(ks[0], (32, 4, 8, 8), 4 * 8 * 8), u(ks[1], (32,), 4 * 8 * 8)
    w2, b2 = u(ks[2], (64, 32, 4, 4), 32 * 4 * 4), u(ks[3], (64,), 32 * 4 * 4)
    w3, b3 = u(ks[4], (64, 64, 3, 3), 64 * 3 * 3), u(ks[5], (64,), 64 * 3 * 3)
    fc1_in = 1072 if activate_additional else 1024
    wa1, ba1 = u(ks[6], (512, fc1_in), fc1_in), u(ks[7], (512,), fc1_in)
    wa2, ba2 = u(ks[8], (n_action, 512), 512), u(ks[9], (n_action,), 512)
    torch_params = (w1, b1, w2, b2, w3, b3, wa1, ba1, wa2, ba2)

    bf16 = jnp.bfloat16
    # conv1: K = cin*64 + kh*8 + kw (matches _conv1_patches column order).
    w1k = w1.reshape(32, 256).T.astype(bf16)                          # [256, 32]
    # conv2 folded: K2 = (bi*2+bj)*128 + (di*2+dj)*32 + cin, (i,j)=(2bi+di,2bj+dj).
    w2k = (w2.transpose(2, 3, 1, 0)                                   # [i, j, cin, cout]
             .reshape(2, 2, 2, 2, 32, 64)                             # [bi, di, bj, dj, cin, cout]
             .transpose(0, 2, 1, 3, 4, 5)                             # [bi, bj, di, dj, cin, cout]
             .reshape(512, 64).astype(bf16))
    # conv3 folded: K3 = (i*3+j)*64 + cin.
    w3k = w3.transpose(2, 3, 1, 0).reshape(576, 64).astype(bf16)
    # affine1: kernel flatten order is hw*64 + c; PyTorch flatten is c*16 + hw.
    wa1_t = wa1.T                                                     # [fc1_in, 512]
    w1a = (wa1_t[:1024].reshape(64, 16, 512)
           .transpose(1, 0, 2).reshape(1024, 512).astype(bf16))       # [1024, 512]
    # affine2 padded to 128 output lanes for an unmasked store.
    wa2p = jnp.zeros((512, 128), jnp.float32).at[:, :n_action].set(wa2.T).astype(bf16)
    ba2p = jnp.zeros((1, 128), jnp.float32).at[0, :n_action].set(ba2)

    params = {
        "w1": w1k, "b1": b1.reshape(1, 32),
        "w2": w2k, "b2": b2.reshape(1, 64),
        "w3": w3k, "b3": b3.reshape(1, 64),
        "w1a": w1a, "ba1": ba1.reshape(1, 512),
        "wa2": wa2p, "ba2": ba2p,
    }
    if activate_additional:
        params["w1b"] = wa1_t[1024:].astype(bf16)                     # [48, 512]
    return params, torch_params


def dqn_reference(torch_params, x, y, activate_additional):
    """Pure-XLA f32 reference mirroring the PyTorch module (parity check)."""
    w1, b1, w2, b2, w3, b3, wa1, ba1, wa2, ba2 = torch_params
    hp = jax.lax.Precision.HIGHEST

    def conv(h, w, b, s):
        o = jax.lax.conv_general_dilated(
            h, w, (s, s), "VALID",
            dimension_numbers=("NCHW", "OIHW", "NCHW"), precision=hp)
        return jax.nn.relu(o + b.reshape(1, -1, 1, 1))

    h = conv(x, w1, b1, 4)
    h = conv(h, w2, b2, 2)
    h = conv(h, w3, b3, 1)
    h = h.reshape(h.shape[0], -1)
    if activate_additional:
        h = jnp.concatenate([h, y.reshape(h.shape[0], -1)], axis=1)
    h = jax.nn.relu(jnp.dot(h, wa1.T, precision=hp) + ba1)
    return jnp.dot(h, wa2.T, precision=hp) + ba2


if __name__ == "__main__":
    # The conv chain + affine1 (in=1072 = 1024 conv features + 48 extra)
    # implies a 60x60 spatial input and a 48-wide additional feature vector.
    B = 16
    activate_additional = True
    n_action = 4
    key = jax.random.PRNGKey(0)
    kx, ky, kp = jax.random.split(key, 3)

    x = jax.random.normal(kx, (B, 4, 60, 60), jnp.float32)   # NCHW, like PyTorch
    y = jax.random.normal(ky, (B, 48), jnp.float32)          # additional features

    params, torch_params = init_dqn_params(kp, activate_additional, n_action)

    fwd = jax.jit(functools.partial(
        dqn_forward, n_action=n_action,
        activate_additional=activate_additional, block_b=8))
    out = jax.block_until_ready(fwd(params, x, y))
    assert out.shape == (B, n_action), out.shape

    ref = dqn_reference(torch_params, x, y, activate_additional)
    err = float(jnp.max(jnp.abs(out - ref)))
    # bf16 MXU operands with f32 accumulation: expect ~1e-3 abs error.
    assert err < 5e-2, f"max abs error vs f32 reference: {err}"

    print("KERNEL_OK")
</pallas_src>

<mosaic_0001>
module attributes {stable_mosaic.version = 11 : i64} {
  func.func @kernel(%arg0: i32, %arg1: memref<8x4x64x256xbf16, #tpu.memory_space<vmem>>, %arg2: memref<8x48xbf16, #tpu.memory_space<vmem>>, %arg3: memref<256x32xbf16, #tpu.memory_space<vmem>>, %arg4: memref<1x32xf32, #tpu.memory_space<vmem>>, %arg5: memref<512x64xbf16, #tpu.memory_space<vmem>>, %arg6: memref<1x64xf32, #tpu.memory_space<vmem>>, %arg7: memref<576x64xbf16, #tpu.memory_space<vmem>>, %arg8: memref<1x64xf32, #tpu.memory_space<vmem>>, %arg9: memref<1024x512xbf16, #tpu.memory_space<vmem>>, %arg10: memref<48x512xbf16, #tpu.memory_space<vmem>>, %arg11: memref<1x512xf32, #tpu.memory_space<vmem>>, %arg12: memref<512x128xbf16, #tpu.memory_space<vmem>>, %arg13: memref<1x128xf32, #tpu.memory_space<vmem>>, %arg14: memref<8x128xf32, #tpu.memory_space<vmem>>, %arg15: memref<8x64x128xbf16, #tpu.memory_space<vmem>>, %arg16: memref<8x48x512xbf16, #tpu.memory_space<vmem>>, %arg17: memref<8x48x64xbf16, #tpu.memory_space<vmem>>, %arg18: memref<8x32x576xbf16, #tpu.memory_space<vmem>>, %arg19: memref<8x32x64xbf16, #tpu.memory_space<vmem>>, %arg20: memref<8x1024xbf16, #tpu.memory_space<vmem>>) attributes {dimension_semantics = [#tpu.dimension_semantics<parallel>], iteration_bounds = array<i64: 2>, scalar_prefetch = 0 : i64, scratch_operands = 6 : i64, tpu.core_type = #tpu.core_type<tc>, window_params = [{transform_indices = @transform_0, window_bounds = array<i64: 8, 4, 64, 256>}, {transform_indices = @transform_1, window_bounds = array<i64: 8, 48>}, {pipeline_mode = #tpu.pipeline_mode<synchronous>, transform_indices = @transform_2, window_bounds = array<i64: 256, 32>}, {pipeline_mode = #tpu.pipeline_mode<synchronous>, transform_indices = @transform_3, window_bounds = array<i64: 1, 32>}, {pipeline_mode = #tpu.pipeline_mode<synchronous>, transform_indices = @transform_4, window_bounds = array<i64: 512, 64>}, {pipeline_mode = #tpu.pipeline_mode<synchronous>, transform_indices = @transform_5, window_bounds = array<i64: 1, 64>}, {pipeline_mode = #tpu.pipeline_mode<synchronous>, transform_indices = @transform_6, window_bounds = array<i64: 576, 64>}, {pipeline_mode = #tpu.pipeline_mode<synchronous>, transform_indices = @transform_7, window_bounds = array<i64: 1, 64>}, {pipeline_mode = #tpu.pipeline_mode<synchronous>, transform_indices = @transform_8, window_bounds = array<i64: 1024, 512>}, {pipeline_mode = #tpu.pipeline_mode<synchronous>, transform_indices = @transform_9, window_bounds = array<i64: 48, 512>}, {pipeline_mode = #tpu.pipeline_mode<synchronous>, transform_indices = @transform_10, window_bounds = array<i64: 1, 512>}, {pipeline_mode = #tpu.pipeline_mode<synchronous>, transform_indices = @transform_11, window_bounds = array<i64: 512, 128>}, {pipeline_mode = #tpu.pipeline_mode<synchronous>, transform_indices = @transform_12, window_bounds = array<i64: 1, 128>}, {transform_indices = @transform_13, window_bounds = array<i64: 8, 128>}]} {
    %c0 = arith.constant 0 : index
    %c0_0 = arith.constant 0 : index
    %c0_1 = arith.constant 0 : index
    %c0_2 = arith.constant 0 : index
    %0 = vector.load %arg1[%c0, %c0_0, %c0_1, %c0_2] : memref<8x4x64x256xbf16, #tpu.memory_space<vmem>>, vector<8x1x64x256xbf16>
    %1 = vector.shape_cast %0 : vector<8x1x64x256xbf16> to vector<8x64x256xbf16>
    %2 = vector.shape_cast %1 : vector<8x64x256xbf16> to vector<512x256xbf16>
    %c0_3 = arith.constant 0 : index
    %c0_4 = arith.constant 0 : index
    %3 = vector.load %arg3[%c0_3, %c0_4] : memref<256x32xbf16, #tpu.memory_space<vmem>>, vector<256x32xbf16>
    %cst = arith.constant dense<0.000000e+00> : vector<512x32xf32>
    %4 = tpu.matmul %2, %3, %cst {dimension_numbers = #tpu.dot_dimension_numbers<[1], [0], [0], [1], [0, 0, 1, 1], [], []>} : vector<512x256xbf16>, vector<256x32xbf16>, vector<512x32xf32> -> vector<512x32xf32>
    %c0_5 = arith.constant 0 : index
    %c0_6 = arith.constant 0 : index
    %5 = vector.load %arg4[%c0_5, %c0_6] : memref<1x32xf32, #tpu.memory_space<vmem>>, vector<1x32xf32>
    %6 = vector.broadcast %5 : vector<1x32xf32> to vector<512x32xf32>
    %7 = arith.addf %4, %6 : vector<512x32xf32>
    %cst_7 = arith.constant 0.000000e+00 : f32
    %8 = vector.broadcast %cst_7 : f32 to vector<512x32xf32>
    %9 = arith.maximumf %7, %8 : vector<512x32xf32>
    %10 = vector.shape_cast %9 : vector<512x32xf32> to vector<8x64x32xf32>
    %11 = arith.truncf %10 : vector<8x64x32xf32> to vector<8x64x32xbf16>
    %c0_8 = arith.constant 0 : index
    %c0_9 = arith.constant 0 : index
    %c0_10 = arith.constant 0 : index
    %12 = vector.load %arg15[%c0_8, %c0_9, %c0_10] : memref<8x64x128xbf16, #tpu.memory_space<vmem>>, vector<8x64x32xbf16>
    tpu.vector_store %arg15[%c0_8, %c0_9, %c0_10], %11 {strides = array<i32>} : memref<8x64x128xbf16, #tpu.memory_space<vmem>>, vector<8x64x32xbf16>,
    %c0_11 = arith.constant 0 : index
    %c1 = arith.constant 1 : index
    %c0_12 = arith.constant 0 : index
    %c0_13 = arith.constant 0 : index
    %13 = vector.load %arg1[%c0_11, %c1, %c0_12, %c0_13] : memref<8x4x64x256xbf16, #tpu.memory_space<vmem>>, vector<8x1x64x256xbf16>
    %14 = vector.shape_cast %13 : vector<8x1x64x256xbf16> to vector<8x64x256xbf16>
    %15 = vector.shape_cast %14 : vector<8x64x256xbf16> to vector<512x256xbf16>
    %c0_14 = arith.constant 0 : index
    %c0_15 = arith.constant 0 : index
    %16 = vector.load %arg3[%c0_14, %c0_15] : memref<256x32xbf16, #tpu.memory_space<vmem>>, vector<256x32xbf16>
    %cst_16 = arith.constant dense<0.000000e+00> : vector<512x32xf32>
    %17 = tpu.matmul %15, %16, %cst_16 {dimension_numbers = #tpu.dot_dimension_numbers<[1], [0], [0], [1], [0, 0, 1, 1], [], []>} : vector<512x256xbf16>, vector<256x32xbf16>, vector<512x32xf32> -> vector<512x32xf32>
    %c0_17 = arith.constant 0 : index
    %c0_18 = arith.constant 0 : index
    %18 = vector.load %arg4[%c0_17, %c0_18] : memref<1x32xf32, #tpu.memory_space<vmem>>, vector<1x32xf32>
    %19 = vector.broadcast %18 : vector<1x32xf32> to vector<512x32xf32>
    %20 = arith.addf %17, %19 : vector<512x32xf32>
    %cst_19 = arith.constant 0.000000e+00 : f32
    %21 = vector.broadcast %cst_19 : f32 to vector<512x32xf32>
    %22 = arith.maximumf %20, %21 : vector<512x32xf32>
    %23 = vector.shape_cast %22 : vector<512x32xf32> to vector<8x64x32xf32>
    %24 = arith.truncf %23 : vector<8x64x32xf32> to vector<8x64x32xbf16>
    %c0_20 = arith.constant 0 : index
    %c0_21 = arith.constant 0 : index
    %c32 = arith.constant 32 : index
    %25 = vector.load %arg15[%c0_20, %c0_21, %c32] : memref<8x64x128xbf16, #tpu.memory_space<vmem>>, vector<8x64x32xbf16>
    tpu.vector_store %arg15[%c0_20, %c0_21, %c32], %24 {strides = array<i32>} : memref<8x64x128xbf16, #tpu.memory_space<vmem>>, vector<8x64x32xbf16>,
    %c0_22 = arith.constant 0 : index
    %c2 = arith.constant 2 : index
    %c0_23 = arith.constant 0 : index
    %c0_24 = arith.constant 0 : index
    %26 = vector.load %arg1[%c0_22, %c2, %c0_23, %c0_24] : memref<8x4x64x256xbf16, #tpu.memory_space<vmem>>, vector<8x1x64x256xbf16>
    %27 = vector.shape_cast %26 : vector<8x1x64x256xbf16> to vector<8x64x256xbf16>
    %28 = vector.shape_cast %27 : vector<8x64x256xbf16> to vector<512x256xbf16>
    %c0_25 = arith.constant 0 : index
    %c0_26 = arith.constant 0 : index
    %29 = vector.load %arg3[%c0_25, %c0_26] : memref<256x32xbf16, #tpu.memory_space<vmem>>, vector<256x32xbf16>
    %cst_27 = arith.constant dense<0.000000e+00> : vector<512x32xf32>
    %30 = tpu.matmul %28, %29, %cst_27 {dimension_numbers = #tpu.dot_dimension_numbers<[1], [0], [0], [1], [0, 0, 1, 1], [], []>} : vector<512x256xbf16>, vector<256x32xbf16>, vector<512x32xf32> -> vector<512x32xf32>
    %c0_28 = arith.constant 0 : index
    %c0_29 = arith.constant 0 : index
    %31 = vector.load %arg4[%c0_28, %c0_29] : memref<1x32xf32, #tpu.memory_space<vmem>>, vector<1x32xf32>
    %32 = vector.broadcast %31 : vector<1x32xf32> to vector<512x32xf32>
    %33 = arith.addf %30, %32 : vector<512x32xf32>
    %cst_30 = arith.constant 0.000000e+00 : f32
    %34 = vector.broadcast %cst_30 : f32 to vector<512x32xf32>
    %35 = arith.maximumf %33, %34 : vector<512x32xf32>
    %36 = vector.shape_cast %35 : vector<512x32xf32> to vector<8x64x32xf32>
    %37 = arith.truncf %36 : vector<8x64x32xf32> to vector<8x64x32xbf16>
    %c0_31 = arith.constant 0 : index
    %c0_32 = arith.constant 0 : index
    %c64 = arith.constant 64 : index
    %38 = vector.load %arg15[%c0_31, %c0_32, %c64] : memref<8x64x128xbf16, #tpu.memory_space<vmem>>, vector<8x64x32xbf16>
    tpu.vector_store %arg15[%c0_31, %c0_32, %c64], %37 {strides = array<i32>} : memref<8x64x128xbf16, #tpu.memory_space<vmem>>, vector<8x64x32xbf16>,
    %c0_33 = arith.constant 0 : index
    %c3 = arith.constant 3 : index
    %c0_34 = arith.constant 0 : index
    %c0_35 = arith.constant 0 : index
    %39 = vector.load %arg1[%c0_33, %c3, %c0_34, %c0_35] : memref<8x4x64x256xbf16, #tpu.memory_space<vmem>>, vector<8x1x64x256xbf16>
    %40 = vector.shape_cast %39 : vector<8x1x64x256xbf16> to vector<8x64x256xbf16>
    %41 = vector.shape_cast %40 : vector<8x64x256xbf16> to vector<512x256xbf16>
    %c0_36 = arith.constant 0 : index
    %c0_37 = arith.constant 0 : index
    %42 = vector.load %arg3[%c0_36, %c0_37] : memref<256x32xbf16, #tpu.memory_space<vmem>>, vector<256x32xbf16>
    %cst_38 = arith.constant dense<0.000000e+00> : vector<512x32xf32>
    %43 = tpu.matmul %41, %42, %cst_38 {dimension_numbers = #tpu.dot_dimension_numbers<[1], [0], [0], [1], [0, 0, 1, 1], [], []>} : vector<512x256xbf16>, vector<256x32xbf16>, vector<512x32xf32> -> vector<512x32xf32>
    %c0_39 = arith.constant 0 : index
    %c0_40 = arith.constant 0 : index
    %44 = vector.load %arg4[%c0_39, %c0_40] : memref<1x32xf32, #tpu.memory_space<vmem>>, vector<1x32xf32>
    %45 = vector.broadcast %44 : vector<1x32xf32> to vector<512x32xf32>
    %46 = arith.addf %43, %45 : vector<512x32xf32>
    %cst_41 = arith.constant 0.000000e+00 : f32
    %47 = vector.broadcast %cst_41 : f32 to vector<512x32xf32>
    %48 = arith.maximumf %46, %47 : vector<512x32xf32>
    %49 = vector.shape_cast %48 : vector<512x32xf32> to vector<8x64x32xf32>
    %50 = arith.truncf %49 : vector<8x64x32xf32> to vector<8x64x32xbf16>
    %c0_42 = arith.constant 0 : index
    %c0_43 = arith.constant 0 : index
    %c96 = arith.constant 96 : index
    %51 = vector.load %arg15[%c0_42, %c0_43, %c96] : memref<8x64x128xbf16, #tpu.memory_space<vmem>>, vector<8x64x32xbf16>
    tpu.vector_store %arg15[%c0_42, %c0_43, %c96], %50 {strides = array<i32>} : memref<8x64x128xbf16, #tpu.memory_space<vmem>>, vector<8x64x32xbf16>,
    %c0_44 = arith.constant 0 : index
    %c0_45 = arith.constant 0 : index
    %c0_46 = arith.constant 0 : index
    %52 = vector.load %arg15[%c0_44, %c0_45, %c0_46] : memref<8x64x128xbf16, #tpu.memory_space<vmem>>, vector<8x48x128xbf16>
    %c0_47 = arith.constant 0 : index
    %c0_48 = arith.constant 0 : index
    %c0_49 = arith.constant 0 : index
    %53 = vector.load %arg16[%c0_47, %c0_48, %c0_49] : memref<8x48x512xbf16, #tpu.memory_space<vmem>>, vector<8x48x128xbf16>
    tpu.vector_store %arg16[%c0_47, %c0_48, %c0_49], %52 {strides = array<i32>} : memref<8x48x512xbf16, #tpu.memory_space<vmem>>, vector<8x48x128xbf16>,
    %c0_50 = arith.constant 0 : index
    %c1_51 = arith.constant 1 : index
    %c0_52 = arith.constant 0 : index
    %54 = vector.load %arg15[%c0_50, %c1_51, %c0_52] : memref<8x64x128xbf16, #tpu.memory_space<vmem>>, vector<8x48x128xbf16>
    %c0_53 = arith.constant 0 : index
    %c0_54 = arith.constant 0 : index
    %c128 = arith.constant 128 : index
    %55 = vector.load %arg16[%c0_53, %c0_54, %c128] : memref<8x48x512xbf16, #tpu.memory_space<vmem>>, vector<8x48x128xbf16>
    tpu.vector_store %arg16[%c0_53, %c0_54, %c128], %54 {strides = array<i32>} : memref<8x48x512xbf16, #tpu.memory_space<vmem>>, vector<8x48x128xbf16>,
    %c0_55 = arith.constant 0 : index
    %c7 = arith.constant 7 : index
    %c0_56 = arith.constant 0 : index
    %56 = vector.load %arg15[%c0_55, %c7, %c0_56] : memref<8x64x128xbf16, #tpu.memory_space<vmem>>, vector<8x48x128xbf16>
    %c0_57 = arith.constant 0 : index
    %c0_58 = arith.constant 0 : index
    %c256 = arith.constant 256 : index
    %57 = vector.load %arg16[%c0_57, %c0_58, %c256] : memref<8x48x512xbf16, #tpu.memory_space<vmem>>, vector<8x48x128xbf16>
    tpu.vector_store %arg16[%c0_57, %c0_58, %c256], %56 {strides = array<i32>} : memref<8x48x512xbf16, #tpu.memory_space<vmem>>, vector<8x48x128xbf16>,
    %c0_59 = arith.constant 0 : index
    %c8 = arith.constant 8 : index
    %c0_60 = arith.constant 0 : index
    %58 = vector.load %arg15[%c0_59, %c8, %c0_60] : memref<8x64x128xbf16, #tpu.memory_space<vmem>>, vector<8x48x128xbf16>
    %c0_61 = arith.constant 0 : index
    %c0_62 = arith.constant 0 : index
    %c384 = arith.constant 384 : index
    %59 = vector.load %arg16[%c0_61, %c0_62, %c384] : memref<8x48x512xbf16, #tpu.memory_space<vmem>>, vector<8x48x128xbf16>
    tpu.vector_store %arg16[%c0_61, %c0_62, %c384], %58 {strides = array<i32>} : memref<8x48x512xbf16, #tpu.memory_space<vmem>>, vector<8x48x128xbf16>,
    %c0_63 = arith.constant 0 : index
    %c0_64 = arith.constant 0 : index
    %c0_65 = arith.constant 0 : index
    %60 = vector.load %arg16[%c0_63, %c0_64, %c0_65] : memref<8x48x512xbf16, #tpu.memory_space<vmem>>, vector<8x48x512xbf16>
    %61 = vector.shape_cast %60 : vector<8x48x512xbf16> to vector<384x512xbf16>
    %c0_66 = arith.constant 0 : index
    %c0_67 = arith.constant 0 : index
    %62 = vector.load %arg5[%c0_66, %c0_67] : memref<512x64xbf16, #tpu.memory_space<vmem>>, vector<512x64xbf16>
    %cst_68 = arith.constant dense<0.000000e+00> : vector<384x64xf32>
    %63 = tpu.matmul %61, %62, %cst_68 {dimension_numbers = #tpu.dot_dimension_numbers<[1], [0], [0], [1], [0, 0, 1, 1], [], []>} : vector<384x512xbf16>, vector<512x64xbf16>, vector<384x64xf32> -> vector<384x64xf32>
    %c0_69 = arith.constant 0 : index
    %c0_70 = arith.constant 0 : index
    %64 = vector.load %arg6[%c0_69, %c0_70] : memref<1x64xf32, #tpu.memory_space<vmem>>, vector<1x64xf32>
    %65 = vector.broadcast %64 : vector<1x64xf32> to vector<384x64xf32>
    %66 = arith.addf %63, %65 : vector<384x64xf32>
    %cst_71 = arith.constant 0.000000e+00 : f32
    %67 = vector.broadcast %cst_71 : f32 to vector<384x64xf32>
    %68 = arith.maximumf %66, %67 : vector<384x64xf32>
    %69 = vector.shape_cast %68 : vector<384x64xf32> to vector<8x48x64xf32>
    %70 = arith.truncf %69 : vector<8x48x64xf32> to vector<8x48x64xbf16>
    %c0_72 = arith.constant 0 : index
    %c0_73 = arith.constant 0 : index
    %c0_74 = arith.constant 0 : index
    %71 = vector.load %arg17[%c0_72, %c0_73, %c0_74] : memref<8x48x64xbf16, #tpu.memory_space<vmem>>, vector<8x48x64xbf16>
    tpu.vector_store %arg17[%c0_72, %c0_73, %c0_74], %70 {strides = array<i32>} : memref<8x48x64xbf16, #tpu.memory_space<vmem>>, vector<8x48x64xbf16>,
    %c0_75 = arith.constant 0 : index
    %c0_76 = arith.constant 0 : index
    %c0_77 = arith.constant 0 : index
    %72 = vector.load %arg17[%c0_75, %c0_76, %c0_77] : memref<8x48x64xbf16, #tpu.memory_space<vmem>>, vector<8x32x64xbf16>
    %c0_78 = arith.constant 0 : index
    %c0_79 = arith.constant 0 : index
    %c0_80 = arith.constant 0 : index
    %73 = vector.load %arg18[%c0_78, %c0_79, %c0_80] : memref<8x32x576xbf16, #tpu.memory_space<vmem>>, vector<8x32x64xbf16>
    tpu.vector_store %arg18[%c0_78, %c0_79, %c0_80], %72 {strides = array<i32>} : memref<8x32x576xbf16, #tpu.memory_space<vmem>>, vector<8x32x64xbf16>,
    %c0_81 = arith.constant 0 : index
    %c1_82 = arith.constant 1 : index
    %c0_83 = arith.constant 0 : index
    %74 = vector.load %arg17[%c0_81, %c1_82, %c0_83] : memref<8x48x64xbf16, #tpu.memory_space<vmem>>, vector<8x32x64xbf16>
    %c0_84 = arith.constant 0 : index
    %c0_85 = arith.constant 0 : index
    %c64_86 = arith.constant 64 : index
    %75 = vector.load %arg18[%c0_84, %c0_85, %c64_86] : memref<8x32x576xbf16, #tpu.memory_space<vmem>>, vector<8x32x64xbf16>
    tpu.vector_store %arg18[%c0_84, %c0_85, %c64_86], %74 {strides = array<i32>} : memref<8x32x576xbf16, #tpu.memory_space<vmem>>, vector<8x32x64xbf16>,
    %c0_87 = arith.constant 0 : index
    %c2_88 = arith.constant 2 : index
    %c0_89 = arith.constant 0 : index
    %76 = vector.load %arg17[%c0_87, %c2_88, %c0_89] : memref<8x48x64xbf16, #tpu.memory_space<vmem>>, vector<8x32x64xbf16>
    %c0_90 = arith.constant 0 : index
    %c0_91 = arith.constant 0 : index
    %c128_92 = arith.constant 128 : index
    %77 = vector.load %arg18[%c0_90, %c0_91, %c128_92] : memref<8x32x576xbf16, #tpu.memory_space<vmem>>, vector<8x32x64xbf16>
    tpu.vector_store %arg18[%c0_90, %c0_91, %c128_92], %76 {strides = array<i32>} : memref<8x32x576xbf16, #tpu.memory_space<vmem>>, vector<8x32x64xbf16>,
    %c0_93 = arith.constant 0 : index
    %c7_94 = arith.constant 7 : index
    %c0_95 = arith.constant 0 : index
    %78 = vector.load %arg17[%c0_93, %c7_94, %c0_95] : memref<8x48x64xbf16, #tpu.memory_space<vmem>>, vector<8x32x64xbf16>
    %c0_96 = arith.constant 0 : index
    %c0_97 = arith.constant 0 : index
    %c192 = arith.constant 192 : index
    %79 = vector.load %arg18[%c0_96, %c0_97, %c192] : memref<8x32x576xbf16, #tpu.memory_space<vmem>>, vector<8x32x64xbf16>
    tpu.vector_store %arg18[%c0_96, %c0_97, %c192], %78 {strides = array<i32>} : memref<8x32x576xbf16, #tpu.memory_space<vmem>>, vector<8x32x64xbf16>,
    %c0_98 = arith.constant 0 : index
    %c8_99 = arith.constant 8 : index
    %c0_100 = arith.constant 0 : index
    %80 = vector.load %arg17[%c0_98, %c8_99, %c0_100] : memref<8x48x64xbf16, #tpu.memory_space<vmem>>, vector<8x32x64xbf16>
    %c0_101 = arith.constant 0 : index
    %c0_102 = arith.constant 0 : index
    %c256_103 = arith.constant 256 : index
    %81 = vector.load %arg18[%c0_101, %c0_102, %c256_103] : memref<8x32x576xbf16, #tpu.memory_space<vmem>>, vector<8x32x64xbf16>
    tpu.vector_store %arg18[%c0_101, %c0_102, %c256_103], %80 {strides = array<i32>} : memref<8x32x576xbf16, #tpu.memory_space<vmem>>, vector<8x32x64xbf16>,
    %c0_104 = arith.constant 0 : index
    %c9 = arith.constant 9 : index
    %c0_105 = arith.constant 0 : index
    %82 = vector.load %arg17[%c0_104, %c9, %c0_105] : memref<8x48x64xbf16, #tpu.memory_space<vmem>>, vector<8x32x64xbf16>
    %c0_106 = arith.constant 0 : index
    %c0_107 = arith.constant 0 : index
    %c320 = arith.constant 320 : index
    %83 = vector.load %arg18[%c0_106, %c0_107, %c320] : memref<8x32x576xbf16, #tpu.memory_space<vmem>>, vector<8x32x64xbf16>
    tpu.vector_store %arg18[%c0_106, %c0_107, %c320], %82 {strides = array<i32>} : memref<8x32x576xbf16, #tpu.memory_space<vmem>>, vector<8x32x64xbf16>,
    %c0_108 = arith.constant 0 : index
    %c14 = arith.constant 14 : index
    %c0_109 = arith.constant 0 : index
    %84 = vector.load %arg17[%c0_108, %c14, %c0_109] : memref<8x48x64xbf16, #tpu.memory_space<vmem>>, vector<8x32x64xbf16>
    %c0_110 = arith.constant 0 : index
    %c0_111 = arith.constant 0 : index
    %c384_112 = arith.constant 384 : index
    %85 = vector.load %arg18[%c0_110, %c0_111, %c384_112] : memref<8x32x576xbf16, #tpu.memory_space<vmem>>, vector<8x32x64xbf16>
    tpu.vector_store %arg18[%c0_110, %c0_111, %c384_112], %84 {strides = array<i32>} : memref<8x32x576xbf16, #tpu.memory_space<vmem>>, vector<8x32x64xbf16>,
    %c0_113 = arith.constant 0 : index
    %c15 = arith.constant 15 : index
    %c0_114 = arith.constant 0 : index
    %86 = vector.load %arg17[%c0_113, %c15, %c0_114] : memref<8x48x64xbf16, #tpu.memory_space<vmem>>, vector<8x32x64xbf16>
    %c0_115 = arith.constant 0 : index
    %c0_116 = arith.constant 0 : index
    %c448 = arith.constant 448 : index
    %87 = vector.load %arg18[%c0_115, %c0_116, %c448] : memref<8x32x576xbf16, #tpu.memory_space<vmem>>, vector<8x32x64xbf16>
    tpu.vector_store %arg18[%c0_115, %c0_116, %c448], %86 {strides = array<i32>} : memref<8x32x576xbf16, #tpu.memory_space<vmem>>, vector<8x32x64xbf16>,
    %c0_117 = arith.constant 0 : index
    %c16 = arith.constant 16 : index
    %c0_118 = arith.constant 0 : index
    %88 = vector.load %arg17[%c0_117, %c16, %c0_118] : memref<8x48x64xbf16, #tpu.memory_space<vmem>>, vector<8x32x64xbf16>
    %c0_119 = arith.constant 0 : index
    %c0_120 = arith.constant 0 : index
    %c512 = arith.constant 512 : index
    %89 = vector.load %arg18[%c0_119, %c0_120, %c512] : memref<8x32x576xbf16, #tpu.memory_space<vmem>>, vector<8x32x64xbf16>
    tpu.vector_store %arg18[%c0_119, %c0_120, %c512], %88 {strides = array<i32>} : memref<8x32x576xbf16, #tpu.memory_space<vmem>>, vector<8x32x64xbf16>,
    %c0_121 = arith.constant 0 : index
    %c0_122 = arith.constant 0 : index
    %c0_123 = arith.constant 0 : index
    %90 = vector.load %arg18[%c0_121, %c0_122, %c0_123] : memref<8x32x576xbf16, #tpu.memory_space<vmem>>, vector<8x32x576xbf16>
    %91 = vector.shape_cast %90 : vector<8x32x576xbf16> to vector<256x576xbf16>
    %c0_124 = arith.constant 0 : index
    %c0_125 = arith.constant 0 : index
    %92 = vector.load %arg7[%c0_124, %c0_125] : memref<576x64xbf16, #tpu.memory_space<vmem>>, vector<576x64xbf16>
    %cst_126 = arith.constant dense<0.000000e+00> : vector<256x64xf32>
    %93 = tpu.matmul %91, %92, %cst_126 {dimension_numbers = #tpu.dot_dimension_numbers<[1], [0], [0], [1], [0, 0, 1, 1], [], []>} : vector<256x576xbf16>, vector<576x64xbf16>, vector<256x64xf32> -> vector<256x64xf32>
    %c0_127 = arith.constant 0 : index
    %c0_128 = arith.constant 0 : index
    %94 = vector.load %arg8[%c0_127, %c0_128] : memref<1x64xf32, #tpu.memory_space<vmem>>, vector<1x64xf32>
    %95 = vector.broadcast %94 : vector<1x64xf32> to vector<256x64xf32>
    %96 = arith.addf %93, %95 : vector<256x64xf32>
    %cst_129 = arith.constant 0.000000e+00 : f32
    %97 = vector.broadcast %cst_129 : f32 to vector<256x64xf32>
    %98 = arith.maximumf %96, %97 : vector<256x64xf32>
    %99 = vector.shape_cast %98 : vector<256x64xf32> to vector<8x32x64xf32>
    %100 = arith.truncf %99 : vector<8x32x64xf32> to vector<8x32x64xbf16>
    %c0_130 = arith.constant 0 : index
    %c0_131 = arith.constant 0 : index
    %c0_132 = arith.constant 0 : index
    %101 = vector.load %arg19[%c0_130, %c0_131, %c0_132] : memref<8x32x64xbf16, #tpu.memory_space<vmem>>, vector<8x32x64xbf16>
    tpu.vector_store %arg19[%c0_130, %c0_131, %c0_132], %100 {strides = array<i32>} : memref<8x32x64xbf16, #tpu.memory_space<vmem>>, vector<8x32x64xbf16>,
    %c0_133 = arith.constant 0 : index
    %c0_134 = arith.constant 0 : index
    %c0_135 = arith.constant 0 : index
    %102 = vector.load %arg19[%c0_133, %c0_134, %c0_135] : memref<8x32x64xbf16, #tpu.memory_space<vmem>>, vector<8x1x64xbf16>
    %103 = vector.shape_cast %102 : vector<8x1x64xbf16> to vector<8x64xbf16>
    %c0_136 = arith.constant 0 : index
    %c0_137 = arith.constant 0 : index
    %104 = vector.load %arg20[%c0_136, %c0_137] : memref<8x1024xbf16, #tpu.memory_space<vmem>>, vector<8x64xbf16>
    tpu.vector_store %arg20[%c0_136, %c0_137], %103 {strides = array<i32>} : memref<8x1024xbf16, #tpu.memory_space<vmem>>, vector<8x64xbf16>,
    %c0_138 = arith.constant 0 : index
    %c1_139 = arith.constant 1 : index
    %c0_140 = arith.constant 0 : index
    %105 = vector.load %arg19[%c0_138, %c1_139, %c0_140] : memref<8x32x64xbf16, #tpu.memory_space<vmem>>, vector<8x1x64xbf16>
    %106 = vector.shape_cast %105 : vector<8x1x64xbf16> to vector<8x64xbf16>
    %c0_141 = arith.constant 0 : index
    %c64_142 = arith.constant 64 : index
    %107 = vector.load %arg20[%c0_141, %c64_142] : memref<8x1024xbf16, #tpu.memory_space<vmem>>, vector<8x64xbf16>
    tpu.vector_store %arg20[%c0_141, %c64_142], %106 {strides = array<i32>} : memref<8x1024xbf16, #tpu.memory_space<vmem>>, vector<8x64xbf16>,
    %c0_143 = arith.constant 0 : index
    %c2_144 = arith.constant 2 : index
    %c0_145 = arith.constant 0 : index
    %108 = vector.load %arg19[%c0_143, %c2_144, %c0_145] : memref<8x32x64xbf16, #tpu.memory_space<vmem>>, vector<8x1x64xbf16>
    %109 = vector.shape_cast %108 : vector<8x1x64xbf16> to vector<8x64xbf16>
    %c0_146 = arith.constant 0 : index
    %c128_147 = arith.constant 128 : index
    %110 = vector.load %arg20[%c0_146, %c128_147] : memref<8x1024xbf16, #tpu.memory_space<vmem>>, vector<8x64xbf16>
    tpu.vector_store %arg20[%c0_146, %c128_147], %109 {strides = array<i32>} : memref<8x1024xbf16, #tpu.memory_space<vmem>>, vector<8x64xbf16>,
    %c0_148 = arith.constant 0 : index
    %c3_149 = arith.constant 3 : index
    %c0_150 = arith.constant 0 : index
    %111 = vector.load %arg19[%c0_148, %c3_149, %c0_150] : memref<8x32x64xbf16, #tpu.memory_space<vmem>>, vector<8x1x64xbf16>
    %112 = vector.shape_cast %111 : vector<8x1x64xbf16> to vector<8x64xbf16>
    %c0_151 = arith.constant 0 : index
    %c192_152 = arith.constant 192 : index
    %113 = vector.load %arg20[%c0_151, %c192_152] : memref<8x1024xbf16, #tpu.memory_space<vmem>>, vector<8x64xbf16>
    tpu.vector_store %arg20[%c0_151, %c192_152], %112 {strides = array<i32>} : memref<8x1024xbf16, #tpu.memory_space<vmem>>, vector<8x64xbf16>,
    %c0_153 = arith.constant 0 : index
    %c7_154 = arith.constant 7 : index
    %c0_155 = arith.constant 0 : index
    %114 = vector.load %arg19[%c0_153, %c7_154, %c0_155] : memref<8x32x64xbf16, #tpu.memory_space<vmem>>, vector<8x1x64xbf16>
    %115 = vector.shape_cast %114 : vector<8x1x64xbf16> to vector<8x64xbf16>
    %c0_156 = arith.constant 0 : index
    %c256_157 = arith.constant 256 : index
    %116 = vector.load %arg20[%c0_156, %c256_157] : memref<8x1024xbf16, #tpu.memory_space<vmem>>, vector<8x64xbf16>
    tpu.vector_store %arg20[%c0_156, %c256_157], %115 {strides = array<i32>} : memref<8x1024xbf16, #tpu.memory_space<vmem>>, vector<8x64xbf16>,
    %c0_158 = arith.constant 0 : index
    %c8_159 = arith.constant 8 : index
    %c0_160 = arith.constant 0 : index
    %117 = vector.load %arg19[%c0_158, %c8_159, %c0_160] : memref<8x32x64xbf16, #tpu.memory_space<vmem>>, vector<8x1x64xbf16>
    %118 = vector.shape_cast %117 : vector<8x1x64xbf16> to vector<8x64xbf16>
    %c0_161 = arith.constant 0 : index
    %c320_162 = arith.constant 320 : index
    %119 = vector.load %arg20[%c0_161, %c320_162] : memref<8x1024xbf16, #tpu.memory_space<vmem>>, vector<8x64xbf16>
    tpu.vector_store %arg20[%c0_161, %c320_162], %118 {strides = array<i32>} : memref<8x1024xbf16, #tpu.memory_space<vmem>>, vector<8x64xbf16>,
    %c0_163 = arith.constant 0 : index
    %c9_164 = arith.constant 9 : index
    %c0_165 = arith.constant 0 : index
    %120 = vector.load %arg19[%c0_163, %c9_164, %c0_165] : memref<8x32x64xbf16, #tpu.memory_space<vmem>>, vector<8x1x64xbf16>
    %121 = vector.shape_cast %120 : vector<8x1x64xbf16> to vector<8x64xbf16>
    %c0_166 = arith.constant 0 : index
    %c384_167 = arith.constant 384 : index
    %122 = vector.load %arg20[%c0_166, %c384_167] : memref<8x1024xbf16, #tpu.memory_space<vmem>>, vector<8x64xbf16>
    tpu.vector_store %arg20[%c0_166, %c384_167], %121 {strides = array<i32>} : memref<8x1024xbf16, #tpu.memory_space<vmem>>, vector<8x64xbf16>,
    %c0_168 = arith.constant 0 : index
    %c10 = arith.constant 10 : index
    %c0_169 = arith.constant 0 : index
    %123 = vector.load %arg19[%c0_168, %c10, %c0_169] : memref<8x32x64xbf16, #tpu.memory_space<vmem>>, vector<8x1x64xbf16>
    %124 = vector.shape_cast %123 : vector<8x1x64xbf16> to vector<8x64xbf16>
    %c0_170 = arith.constant 0 : index
    %c448_171 = arith.constant 448 : index
    %125 = vector.load %arg20[%c0_170, %c448_171] : memref<8x1024xbf16, #tpu.memory_space<vmem>>, vector<8x64xbf16>
    tpu.vector_store %arg20[%c0_170, %c448_171], %124 {strides = array<i32>} : memref<8x1024xbf16, #tpu.memory_space<vmem>>, vector<8x64xbf16>,
    %c0_172 = arith.constant 0 : index
    %c14_173 = arith.constant 14 : index
    %c0_174 = arith.constant 0 : index
    %126 = vector.load %arg19[%c0_172, %c14_173, %c0_174] : memref<8x32x64xbf16, #tpu.memory_space<vmem>>, vector<8x1x64xbf16>
    %127 = vector.shape_cast %126 : vector<8x1x64xbf16> to vector<8x64xbf16>
    %c0_175 = arith.constant 0 : index
    %c512_176 = arith.constant 512 : index
    %128 = vector.load %arg20[%c0_175, %c512_176] : memref<8x1024xbf16, #tpu.memory_space<vmem>>, vector<8x64xbf16>
    tpu.vector_store %arg20[%c0_175, %c512_176], %127 {strides = array<i32>} : memref<8x1024xbf16, #tpu.memory_space<vmem>>, vector<8x64xbf16>,
    %c0_177 = arith.constant 0 : index
    %c15_178 = arith.constant 15 : index
    %c0_179 = arith.constant 0 : index
    %129 = vector.load %arg19[%c0_177, %c15_178, %c0_179] : memref<8x32x64xbf16, #tpu.memory_space<vmem>>, vector<8x1x64xbf16>
    %130 = vector.shape_cast %129 : vector<8x1x64xbf16> to vector<8x64xbf16>
    %c0_180 = arith.constant 0 : index
    %c576 = arith.constant 576 : index
    %131 = vector.load %arg20[%c0_180, %c576] : memref<8x1024xbf16, #tpu.memory_space<vmem>>, vector<8x64xbf16>
    tpu.vector_store %arg20[%c0_180, %c576], %130 {strides = array<i32>} : memref<8x1024xbf16, #tpu.memory_space<vmem>>, vector<8x64xbf16>,
    %c0_181 = arith.constant 0 : index
    %c16_182 = arith.constant 16 : index
    %c0_183 = arith.constant 0 : index
    %132 = vector.load %arg19[%c0_181, %c16_182, %c0_183] : memref<8x32x64xbf16, #tpu.memory_space<vmem>>, vector<8x1x64xbf16>
    %133 = vector.shape_cast %132 : vector<8x1x64xbf16> to vector<8x64xbf16>
    %c0_184 = arith.constant 0 : index
    %c640 = arith.constant 640 : index
    %134 = vector.load %arg20[%c0_184, %c640] : memref<8x1024xbf16, #tpu.memory_space<vmem>>, vector<8x64xbf16>
    tpu.vector_store %arg20[%c0_184, %c640], %133 {strides = array<i32>} : memref<8x1024xbf16, #tpu.memory_space<vmem>>, vector<8x64xbf16>,
    %c0_185 = arith.constant 0 : index
    %c17 = arith.constant 17 : index
    %c0_186 = arith.constant 0 : index
    %135 = vector.load %arg19[%c0_185, %c17, %c0_186] : memref<8x32x64xbf16, #tpu.memory_space<vmem>>, vector<8x1x64xbf16>
    %136 = vector.shape_cast %135 : vector<8x1x64xbf16> to vector<8x64xbf16>
    %c0_187 = arith.constant 0 : index
    %c704 = arith.constant 704 : index
    %137 = vector.load %arg20[%c0_187, %c704] : memref<8x1024xbf16, #tpu.memory_space<vmem>>, vector<8x64xbf16>
    tpu.vector_store %arg20[%c0_187, %c704], %136 {strides = array<i32>} : memref<8x1024xbf16, #tpu.memory_space<vmem>>, vector<8x64xbf16>,
    %c0_188 = arith.constant 0 : index
    %c21 = arith.constant 21 : index
    %c0_189 = arith.constant 0 : index
    %138 = vector.load %arg19[%c0_188, %c21, %c0_189] : memref<8x32x64xbf16, #tpu.memory_space<vmem>>, vector<8x1x64xbf16>
    %139 = vector.shape_cast %138 : vector<8x1x64xbf16> to vector<8x64xbf16>
    %c0_190 = arith.constant 0 : index
    %c768 = arith.constant 768 : index
    %140 = vector.load %arg20[%c0_190, %c768] : memref<8x1024xbf16, #tpu.memory_space<vmem>>, vector<8x64xbf16>
    tpu.vector_store %arg20[%c0_190, %c768], %139 {strides = array<i32>} : memref<8x1024xbf16, #tpu.memory_space<vmem>>, vector<8x64xbf16>,
    %c0_191 = arith.constant 0 : index
    %c22 = arith.constant 22 : index
    %c0_192 = arith.constant 0 : index
    %141 = vector.load %arg19[%c0_191, %c22, %c0_192] : memref<8x32x64xbf16, #tpu.memory_space<vmem>>, vector<8x1x64xbf16>
    %142 = vector.shape_cast %141 : vector<8x1x64xbf16> to vector<8x64xbf16>
    %c0_193 = arith.constant 0 : index
    %c832 = arith.constant 832 : index
    %143 = vector.load %arg20[%c0_193, %c832] : memref<8x1024xbf16, #tpu.memory_space<vmem>>, vector<8x64xbf16>
    tpu.vector_store %arg20[%c0_193, %c832], %142 {strides = array<i32>} : memref<8x1024xbf16, #tpu.memory_space<vmem>>, vector<8x64xbf16>,
    %c0_194 = arith.constant 0 : index
    %c23 = arith.constant 23 : index
    %c0_195 = arith.constant 0 : index
    %144 = vector.load %arg19[%c0_194, %c23, %c0_195] : memref<8x32x64xbf16, #tpu.memory_space<vmem>>, vector<8x1x64xbf16>
    %145 = vector.shape_cast %144 : vector<8x1x64xbf16> to vector<8x64xbf16>
    %c0_196 = arith.constant 0 : index
    %c896 = arith.constant 896 : index
    %146 = vector.load %arg20[%c0_196, %c896] : memref<8x1024xbf16, #tpu.memory_space<vmem>>, vector<8x64xbf16>
    tpu.vector_store %arg20[%c0_196, %c896], %145 {strides = array<i32>} : memref<8x1024xbf16, #tpu.memory_space<vmem>>, vector<8x64xbf16>,
    %c0_197 = arith.constant 0 : index
    %c24 = arith.constant 24 : index
    %c0_198 = arith.constant 0 : index
    %147 = vector.load %arg19[%c0_197, %c24, %c0_198] : memref<8x32x64xbf16, #tpu.memory_space<vmem>>, vector<8x1x64xbf16>
    %148 = vector.shape_cast %147 : vector<8x1x64xbf16> to vector<8x64xbf16>
    %c0_199 = arith.constant 0 : index
    %c960 = arith.constant 960 : index
    %149 = vector.load %arg20[%c0_199, %c960] : memref<8x1024xbf16, #tpu.memory_space<vmem>>, vector<8x64xbf16>
    tpu.vector_store %arg20[%c0_199, %c960], %148 {strides = array<i32>} : memref<8x1024xbf16, #tpu.memory_space<vmem>>, vector<8x64xbf16>,
    %c0_200 = arith.constant 0 : index
    %c0_201 = arith.constant 0 : index
    %150 = vector.load %arg20[%c0_200, %c0_201] : memref<8x1024xbf16, #tpu.memory_space<vmem>>, vector<8x1024xbf16>
    %c0_202 = arith.constant 0 : index
    %c0_203 = arith.constant 0 : index
    %151 = vector.load %arg9[%c0_202, %c0_203] : memref<1024x512xbf16, #tpu.memory_space<vmem>>, vector<1024x512xbf16>
    %cst_204 = arith.constant dense<0.000000e+00> : vector<8x512xf32>
    %152 = tpu.matmul %150, %151, %cst_204 {dimension_numbers = #tpu.dot_dimension_numbers<[1], [0], [0], [1], [0, 0, 1, 1], [], []>} : vector<8x1024xbf16>, vector<1024x512xbf16>, vector<8x512xf32> -> vector<8x512xf32>
    %c0_205 = arith.constant 0 : index
    %c0_206 = arith.constant 0 : index
    %153 = vector.load %arg2[%c0_205, %c0_206] : memref<8x48xbf16, #tpu.memory_space<vmem>>, vector<8x48xbf16>
    %c0_207 = arith.constant 0 : index
    %c0_208 = arith.constant 0 : index
    %154 = vector.load %arg10[%c0_207, %c0_208] : memref<48x512xbf16, #tpu.memory_space<vmem>>, vector<48x512xbf16>
    %cst_209 = arith.constant dense<0.000000e+00> : vector<8x512xf32>
    %155 = tpu.matmul %153, %154, %cst_209 {dimension_numbers = #tpu.dot_dimension_numbers<[1], [0], [0], [1], [0, 0, 1, 1], [], []>} : vector<8x48xbf16>, vector<48x512xbf16>, vector<8x512xf32> -> vector<8x512xf32>
    %156 = arith.addf %152, %155 : vector<8x512xf32>
    %c0_210 = arith.constant 0 : index
    %c0_211 = arith.constant 0 : index
    %157 = vector.load %arg11[%c0_210, %c0_211] : memref<1x512xf32, #tpu.memory_space<vmem>>, vector<1x512xf32>
    %158 = vector.broadcast %157 : vector<1x512xf32> to vector<8x512xf32>
    %159 = arith.addf %156, %158 : vector<8x512xf32>
    %cst_212 = arith.constant 0.000000e+00 : f32
    %160 = vector.broadcast %cst_212 : f32 to vector<8x512xf32>
    %161 = arith.maximumf %159, %160 : vector<8x512xf32>
    %162 = arith.truncf %161 : vector<8x512xf32> to vector<8x512xbf16>
    %c0_213 = arith.constant 0 : index
    %c0_214 = arith.constant 0 : index
    %163 = vector.load %arg12[%c0_213, %c0_214] : memref<512x128xbf16, #tpu.memory_space<vmem>>, vector<512x128xbf16>
    %cst_215 = arith.constant dense<0.000000e+00> : vector<8x128xf32>
    %164 = tpu.matmul %162, %163, %cst_215 {dimension_numbers = #tpu.dot_dimension_numbers<[1], [0], [0], [1], [0, 0, 1, 1], [], []>} : vector<8x512xbf16>, vector<512x128xbf16>, vector<8x128xf32> -> vector<8x128xf32>
    %c0_216 = arith.constant 0 : index
    %c0_217 = arith.constant 0 : index
    %165 = vector.load %arg13[%c0_216, %c0_217] : memref<1x128xf32, #tpu.memory_space<vmem>>, vector<1x128xf32>
    %166 = vector.broadcast %165 : vector<1x128xf32> to vector<8x128xf32>
    %167 = arith.addf %164, %166 : vector<8x128xf32>
    %c0_218 = arith.constant 0 : index
    %c0_219 = arith.constant 0 : index
    %168 = vector.load %arg14[%c0_218, %c0_219] : memref<8x128xf32, #tpu.memory_space<vmem>>, vector<8x128xf32>
    tpu.vector_store %arg14[%c0_218, %c0_219], %167 {strides = array<i32>} : memref<8x128xf32, #tpu.memory_space<vmem>>, vector<8x128xf32>,
    return
  }
  func.func @transform_0(%arg0: i32) -> (i32, i32, i32, i32) {
    %c0_i32 = arith.constant 0 : i32
    %c0_i32_0 = arith.constant 0 : i32
    %c0_i32_1 = arith.constant 0 : i32
    %c0_i32_2 = arith.constant 0 : i32
    return %arg0, %c0_i32, %c0_i32_0, %c0_i32_1 : i32, i32, i32, i32
  }
  func.func @transform_1(%arg0: i32) -> (i32, i32) {
    %c0_i32 = arith.constant 0 : i32
    %c0_i32_0 = arith.constant 0 : i32
    return %arg0, %c0_i32 : i32, i32
  }
  func.func @transform_2(%arg0: i32) -> (i32, i32) {
    %c0_i32 = arith.constant 0 : i32
    %c0_i32_0 = arith.constant 0 : i32
    %c0_i32_1 = arith.constant 0 : i32
    return %c0_i32, %c0_i32_0 : i32, i32
  }
  func.func @transform_3(%arg0: i32) -> (i32, i32) {
    %c0_i32 = arith.constant 0 : i32
    %c0_i32_0 = arith.constant 0 : i32
    %c0_i32_1 = arith.constant 0 : i32
    return %c0_i32, %c0_i32_0 : i32, i32
  }
  func.func @transform_4(%arg0: i32) -> (i32, i32) {
    %c0_i32 = arith.constant 0 : i32
    %c0_i32_0 = arith.constant 0 : i32
    %c0_i32_1 = arith.constant 0 : i32
    return %c0_i32, %c0_i32_0 : i32, i32
  }
  func.func @transform_5(%arg0: i32) -> (i32, i32) {
    %c0_i32 = arith.constant 0 : i32
    %c0_i32_0 = arith.constant 0 : i32
    %c0_i32_1 = arith.constant 0 : i32
    return %c0_i32, %c0_i32_0 : i32, i32
  }
  func.func @transform_6(%arg0: i32) -> (i32, i32) {
    %c0_i32 = arith.constant 0 : i32
    %c0_i32_0 = arith.constant 0 : i32
    %c0_i32_1 = arith.constant 0 : i32
    return %c0_i32, %c0_i32_0 : i32, i32
  }
  func.func @transform_7(%arg0: i32) -> (i32, i32) {
    %c0_i32 = arith.constant 0 : i32
    %c0_i32_0 = arith.constant 0 : i32
    %c0_i32_1 = arith.constant 0 : i32
    return %c0_i32, %c0_i32_0 : i32, i32
  }
  func.func @transform_8(%arg0: i32) -> (i32, i32) {
    %c0_i32 = arith.constant 0 : i32
    %c0_i32_0 = arith.constant 0 : i32
    %c0_i32_1 = arith.constant 0 : i32
    return %c0_i32, %c0_i32_0 : i32, i32
  }
  func.func @transform_9(%arg0: i32) -> (i32, i32) {
    %c0_i32 = arith.constant 0 : i32
    %c0_i32_0 = arith.constant 0 : i32
    %c0_i32_1 = arith.constant 0 : i32
    return %c0_i32, %c0_i32_0 : i32, i32
  }
  func.func @transform_10(%arg0: i32) -> (i32, i32) {
    %c0_i32 = arith.constant 0 : i32
    %c0_i32_0 = arith.constant 0 : i32
    %c0_i32_1 = arith.constant 0 : i32
    return %c0_i32, %c0_i32_0 : i32, i32
  }
  func.func @transform_11(%arg0: i32) -> (i32, i32) {
    %c0_i32 = arith.constant 0 : i32
    %c0_i32_0 = arith.constant 0 : i32
    %c0_i32_1 = arith.constant 0 : i32
    return %c0_i32, %c0_i32_0 : i32, i32
  }
  func.func @transform_12(%arg0: i32) -> (i32, i32) {
    %c0_i32 = arith.constant 0 : i32
    %c0_i32_0 = arith.constant 0 : i32
    %c0_i32_1 = arith.constant 0 : i32
    return %c0_i32, %c0_i32_0 : i32, i32
  }
  func.func @transform_13(%arg0: i32) -> (i32, i32) {
    %c0_i32 = arith.constant 0 : i32
    %c0_i32_0 = arith.constant 0 : i32
    return %arg0, %c0_i32 : i32, i32
  }
}

</mosaic_0001>

<bundles_post_ra>
// kernel: dqn_forward.1
= control target key start
LH: loop header
LB: loop body
LE: loop exit
PB: predicated region body
PF: predicated region fallthrough
CT: control target
= control target key end

     0   :  { %s15020_s25 = smov 0   ;;  %s18768_s0 = inlined_call_operand.vmem [shape: bf16[16,4,64,256], index: 0, kind: input, shape index: {}]   ;;  %s18769_s1 = inlined_call_operand.vmem [shape: bf16[16,48], index: 1, kind: input, shape index: {}]   ;;  %s18770_s2 = inlined_call_operand.vmem [shape: bf16[256,32], index: 2, kind: input, shape index: {}]   ;;  %s18771_s3 = inlined_call_operand.vmem [shape: f32[1,32], index: 3, kind: input, shape index: {}]   ;;  %s18772_s4 = inlined_call_operand.vmem [shape: bf16[512,64], index: 4, kind: input, shape index: {}]   ;;  %s18773_s5 = inlined_call_operand.vmem [shape: f32[1,64], index: 5, kind: input, shape index: {}]   ;;  %s18774_s6 = inlined_call_operand.vmem [shape: bf16[576,64], index: 6, kind: input, shape index: {}]   ;;  %s18775_s7 = inlined_call_operand.vmem [shape: f32[1,64], index: 7, kind: input, shape index: {}]   ;;  %s18776_s8 = inlined_call_operand.vmem [shape: bf16[1024,512], index: 8, kind: input, shape index: {}]   ;;  %s18777_s9 = inlined_call_operand.vmem [shape: bf16[48,512], index: 9, kind: input, shape index: {}]   ;;  %s18778_s10 = inlined_call_operand.vmem [shape: f32[1,512], index: 10, kind: input, shape index: {}]   ;;  %s18779_s11 = inlined_call_operand.vmem [shape: bf16[512,128], index: 11, kind: input, shape index: {}]   ;;  %s18780_s12 = inlined_call_operand.vmem [shape: f32[1,128], index: 12, kind: input, shape index: {}]   ;;  %s18781_s13 = inlined_call_operand.vmem [shape: f32[16,128], index: 13, kind: output, shape index: {}]  }
   0x1 LB: > { %s15026_s26 = sadd.s32 4294967295, %s14944_s25   ;;  %p12312_p0 = scmp.ge.s32.totalorder %s14944_s25, 1  ;;  %s14944_s25 = sphi %s15020_s25, %s23_s25  }
   0x2   : > { %p398_p1 = scmp.lt.s32.totalorder %s14944_s25, 3 }
   0x4   : > { %p399_p2 = pnand %p12312_p0, %p398_p1 }
   0x5   : > { %v13846_v0 = vld [vmem:[%s18770_s2] sm:$0xff] (!%p399_p2)   ;;  %v14946_v1 = vmov (!%p399_p2), 0   ;;  %v13848_v3 = vld [vmem:[%s18770_s2 + $0x8] sm:$0xff] (!%p399_p2)   ;;  %v13850_v5 = vld [vmem:[%s18770_s2 + $0x10] sm:$0xff] (!%p399_p2)   ;;  %s12313_s15 = sshll.u32 (!%p399_p2), %s15026_s26, 3  ;;  %vm1366_vm0 = vcmask (!%p399_p2), 261120  }
   0x6   : > { %402 = sbr.rel (%p399_p2) target bundleno = 2669 (0xa6d), region = 72  ;;  %981 = vmatprep.subr.bf16.mxu0 (!%p399_p2), %v14946_v1  ;;  %1919 = vmatprep.subr.bf16.mxu1 (!%p399_p2), %v14946_v1  ;;  %v13847_v2 = vld [vmem:[%s18770_s2] sm:$0xff] (!%p399_p2)   ;;  %v13849_v4 = vld [vmem:[%s18770_s2 + $0x8] sm:$0xff] (!%p399_p2)   ;;  %v13851_v6 = vld [vmem:[%s18770_s2 + $0x10] sm:$0xff] (!%p399_p2)   ;;  %p447_p3 = scmp.lt.s32.totalorder (!%p399_p2), %s12313_s15, 15  ;;  %vm2432_vm1 = vcmask (!%p399_p2), 523520  }
   0x7   : > { %982 = vmatpush1.bf16.msra.mxu0 (!%p399_p2), %v13846_v0  ;;  %1920 = vmatpush1.bf16.msra.mxu1 (!%p399_p2), %v13847_v2  ;;  %v13852_v7 = vld [vmem:[%s18770_s2 + $0x18] sm:$0xff] (!%p399_p2)   ;;  %v13854_v9 = vld [vmem:[%s18770_s2 + $0x20] sm:$0xff] (!%p399_p2)   ;;  %v13856_v11 = vld [vmem:[%s18770_s2 + $0x28] sm:$0xff] (!%p399_p2)   ;;  %s14947_s17 = smov (!%p399_p2), 32   ;;  %s14948_s28 = smov (!%p399_p2), 64   ;;  %vm3498_vm2 = vcmask (!%p399_p2), 785920  }
   0x8   : > { %983 = vmatprep.subr.bf16.mxu0 (!%p399_p2), %v14946_v1  ;;  %1921 = vmatprep.subr.bf16.mxu1 (!%p399_p2), %v14946_v1  ;;  %v13853_v8 = vld [vmem:[%s18770_s2 + $0x18] sm:$0xff] (!%p399_p2)   ;;  %v13855_v10 = vld [vmem:[%s18770_s2 + $0x20] sm:$0xff] (!%p399_p2)   ;;  %v13857_v12 = vld [vmem:[%s18770_s2 + $0x28] sm:$0xff] (!%p399_p2)   ;;  %s14949_s29 = smov (!%p399_p2), 96   ;;  %vm4564_vm3 = vcmask (!%p399_p2), 1048320   ;;  %vm5375_vm5 = vcmask (!%p399_p2), 1043456  }
   0x9   : > { %v13858_v13 = vld [vmem:[%s18770_s2 + $0x30] sm:$0xff] (!%p399_p2)   ;;  %v13860_v15 = vld [vmem:[%s18770_s2 + $0x38] sm:$0xff] (!%p399_p2)   ;;  %v13862_v17 = vld [vmem:[%s18770_s2 + $0x40] sm:$0xff] (!%p399_p2)   ;;  %vm4677_vm4 = vsmask.f32 (!%p399_p2), 7424  ;;  %vm6361_vm7 = vcmask (!%p399_p2), 523264  }
   0xa   : > { %v13859_v14 = vld [vmem:[%s18770_s2 + $0x30] sm:$0xff] (!%p399_p2)   ;;  %v13861_v16 = vld [vmem:[%s18770_s2 + $0x38] sm:$0xff] (!%p399_p2)   ;;  %v13863_v18 = vld [vmem:[%s18770_s2 + $0x40] sm:$0xff] (!%p399_p2)   ;;  %vm4982_vm6 = vsmask.f32 (!%p399_p2), 4352  ;;  %vm6715_vm8 = vcmask (!%p399_p2), 1046528  }
   0xb   : > { %984 = vmatpush1.bf16.msra.mxu0 (!%p399_p2), %v13848_v3  ;;  %1922 = vmatpush1.bf16.msra.mxu1 (!%p399_p2), %v13849_v4  ;;  %v13864_v20 = vld [vmem:[%s18770_s2 + $0x48] sm:$0xff] (!%p399_p2)   ;;  %v13866_v23 = vld [vmem:[%s18770_s2 + $0x50] sm:$0xff] (!%p399_p2)   ;;  %v13868_v25 = vld [vmem:[%s18770_s2 + $0x58] sm:$0xff] (!%p399_p2)   ;;  %vm7549_vm9 = vcmask (!%p399_p2), 1040384   ;;  %vm6650_vm10 = vcmask (!%p399_p2), 1048064   ;;  %p453_p4 = scmp.lt.s32.totalorder (!%p399_p2), %s15026_s26, 1 }
   0xc   : > { %985 = vmatprep.subr.bf16.mxu0 (!%p399_p2), %v14946_v1  ;;  %1923 = vmatprep.subr.bf16.mxu1 (!%p399_p2), %v14946_v1  ;;  %v13865_v22 = vld [vmem:[%s18770_s2 + $0x48] sm:$0xff] (!%p399_p2)   ;;  %v13867_v24 = vld [vmem:[%s18770_s2 + $0x50] sm:$0xff] (!%p399_p2)   ;;  %v13869_v26 = vld [vmem:[%s18770_s2 + $0x58] sm:$0xff] (!%p399_p2)   ;;  %vm7228_vm11 = vsmask.f32 (!%p399_p2), 3328  ;;  %vm10143_vm13 = vcmask (!%p399_p2), 392192  }
   0xd   : > { %s18783_s15 = smov (!%p447_p3, %s12313_s15), 15  ;;  %v13870_v27 = vld [vmem:[%s18770_s2 + $0x60] sm:$0xff]   ;;  %v13872_v29 = vld [vmem:[%s18770_s2 + $0x68] sm:$0xff]   ;;  %v13874_v31 = vld [vmem:[%s18770_s2 + $0x70] sm:$0xff]   ;;  %vm7646_vm12 = vsmask.f32 256 }
   0xe   : > { %s13361_s30 = sshll.u32 %s18783_s15, 8  ;;  %v13871_v28 = vld [vmem:[%s18770_s2 + $0x60] sm:$0xff]   ;;  %v13873_v30 = vld [vmem:[%s18770_s2 + $0x68] sm:$0xff]   ;;  %v13875_v32 = vld [vmem:[%s18770_s2 + $0x70] sm:$0xff]   ;;  %s18785_s26 = smov (!%p453_p4, %s15026_s26), 1  ;;  %vm8914_vm14 = vcmask 1041409  }
   0xf   : > { %986 = vmatpush1.bf16.msra.mxu0 %v13850_v5  ;;  %1924 = vmatpush1.bf16.msra.mxu1 %v13851_v6  ;;  %s15101_s19 = scalar_lea.vmem %s18768_s0, %s13361_s30  ;;  %v13876_v33 = vld [vmem:[%s18770_s2 + $0x78] sm:$0xff]   ;;  %v13884_v37 = vld [vmem:[%s18770_s2] sm:$0xff]   ;;  %v13898_v41 = vld [vmem:[%s18770_s2 + $0x8] sm:$0xff]   ;;  %vm8917_vm15 = vcmask 1042434   ;;  %s12317_s24 = sshll.u32 %s18785_s26, 3 }
  0x10   : > { %987 = vmatprep.subr.bf16.mxu0 %v14946_v1  ;;  %1925 = vmatprep.subr.bf16.mxu1 %v14946_v1  ;;  %v13880_v19 = vld [vmem:[%s15101_s19 + $0x4] ss:$8 sps:$4 sm:$0xff]   ;;  %v13877_v34 = vld [vmem:[%s18770_s2 + $0x78] sm:$0xff]   ;;  %v13878_v35 = vld [vmem:[%s15101_s19] ss:$8 sps:$4 sm:$0xff]   ;;  %s460_s14 = scalar_lea.vmem %s18781_s13, %s12317_s24 }
  0x11   : > { %v13883_v21 = vld [vmem:[%s15101_s19 + $0x44] ss:$8 sps:$4 sm:$0xff]   ;;  %1013 = vmatprep.mubr.bf16.mxu0 %v13880_v19  ;;  %v13881_v36 = vld [vmem:[%s15101_s19 + $0x40] ss:$8 sps:$4 sm:$0xff]   ;;  %v13886_v39 = vld [vmem:[%s15101_s19 + $0x14] ss:$8 sps:$4 sm:$0xff]  }
  0x12   : > { %1951 = vmatprep.mubr.bf16.mxu1 %v13883_v21  ;;  %v13885_v38 = vld [vmem:[%s18770_s2] sm:$0xff]   ;;  %v13888_v40 = vld [vmem:[%s15101_s19 + $0x54] ss:$8 sps:$4 sm:$0xff]   ;;  %v13899_v42 = vld [vmem:[%s18770_s2 + $0x8] sm:$0xff]  }
  0x13   : > { %988 = vmatpush1.bf16.msra.mxu0 %v13852_v7  ;;  %1926 = vmatpush1.bf16.msra.mxu1 %v13853_v8  ;;  %v13890_v43 = vld [vmem:[%s15101_s19 + $0x10] ss:$8 sps:$4 sm:$0xff]   ;;  %v13892_v45 = vld [vmem:[%s15101_s19 + $0x24] ss:$8 sps:$4 sm:$0xff]   ;;  %v13896_v49 = vld [vmem:[%s15101_s19 + $0x20] ss:$8 sps:$4 sm:$0xff]  }
  0x14   : > { %989 = vmatprep.subr.bf16.mxu0 %v14946_v1  ;;  %1927 = vmatprep.subr.bf16.mxu1 %v14946_v1  ;;  %v13891_v44 = vld [vmem:[%s15101_s19 + $0x50] ss:$8 sps:$4 sm:$0xff]   ;;  %v13894_v46 = vld [vmem:[%s15101_s19 + $0x64] ss:$8 sps:$4 sm:$0xff]   ;;  %v13897_v52 = vld [vmem:[%s15101_s19 + $0x60] ss:$8 sps:$4 sm:$0xff]  }
  0x15   : > { %v13912_v47 = vld [vmem:[%s18770_s2 + $0x10] sm:$0xff]   ;;  %v13926_v50 = vld [vmem:[%s18770_s2 + $0x18] sm:$0xff]   ;;  %v13940_v55 = vld [vmem:[%s18770_s2 + $0x20] sm:$0xff]  }
  0x16   : > { %v13913_v48 = vld [vmem:[%s18770_s2 + $0x10] sm:$0xff]   ;;  %v13927_v51 = vld [vmem:[%s18770_s2 + $0x18] sm:$0xff]   ;;  %v13941_v56 = vld [vmem:[%s18770_s2 + $0x20] sm:$0xff]  }
  0x17   : > { %990 = vmatpush1.bf16.msra.mxu0 %v13854_v9  ;;  %1928 = vmatpush1.bf16.msra.mxu1 %v13855_v10  ;;  %v13900_v53 = vld [vmem:[%s15101_s19 + $0x34] ss:$8 sps:$4 sm:$0xff]   ;;  %v13954_v57 = vld [vmem:[%s18770_s2 + $0x28] sm:$0xff]   ;;  %v13904_v59 = vld [vmem:[%s15101_s19 + $0x30] ss:$8 sps:$4 sm:$0xff]  }
  0x18   : > { %991 = vmatprep.subr.bf16.mxu0 %v14946_v1  ;;  %1929 = vmatprep.subr.bf16.mxu1 %v14946_v1  ;;  %v13902_v54 = vld [vmem:[%s15101_s19 + $0x74] ss:$8 sps:$4 sm:$0xff]   ;;  %v13955_v58 = vld [vmem:[%s18770_s2 + $0x28] sm:$0xff]   ;;  %v13905_v60 = vld [vmem:[%s15101_s19 + $0x70] ss:$8 sps:$4 sm:$0xff]  }
  0x19   : > { %v13906_v61 = vld [vmem:[%s15101_s19 + $0x104] ss:$8 sps:$4 sm:$0xff]   ;;  %v13968_v63 = vld [vmem:[%s18770_s2 + $0x30] sm:$0xff]   ;;  %v13910_v2 = vld [vmem:[%s15101_s19 + $0x100] ss:$8 sps:$4 sm:$0xff]  }
  0x1a   : > { %v13908_v62 = vld [vmem:[%s15101_s19 + $0x144] ss:$8 sps:$4 sm:$0xff]   ;;  %v13969_v0 = vld [vmem:[%s18770_s2 + $0x30] sm:$0xff]   ;;  %v13982_v3 = vld [vmem:[%s18770_s2 + $0x38] sm:$0xff]  }
  0x1b   : > { %992 = vmatpush1.bf16.msra.mxu0 %v13856_v11  ;;  %1930 = vmatpush1.bf16.msra.mxu1 %v13857_v12  ;;  %v13911_v4 = vld [vmem:[%s15101_s19 + $0x140] ss:$8 sps:$4 sm:$0xff]   ;;  %v13983_v5 = vld [vmem:[%s18770_s2 + $0x38] sm:$0xff]   ;;  %v13920_v12 = vld [vmem:[%s15101_s19 + $0x124] ss:$8 sps:$4 sm:$0xff]  }
  0x1c   : > { %993 = vmatprep.subr.bf16.mxu0 %v14946_v1  ;;  %1931 = vmatprep.subr.bf16.mxu1 %v14946_v1  ;;  %v13914_v6 = vld [vmem:[%s15101_s19 + $0x114] ss:$8 sps:$4 sm:$0xff]   ;;  %v13996_v8 = vld [vmem:[%s18770_s2 + $0x40] sm:$0xff]   ;;  %v13918_v10 = vld [vmem:[%s15101_s19 + $0x110] ss:$8 sps:$4 sm:$0xff]  }
  0x1d   : > { %v13916_v7 = vld [vmem:[%s15101_s19 + $0x154] ss:$8 sps:$4 sm:$0xff]   ;;  %v13997_v9 = vld [vmem:[%s18770_s2 + $0x40] sm:$0xff]   ;;  %v13919_v11 = vld [vmem:[%s15101_s19 + $0x150] ss:$8 sps:$4 sm:$0xff]  }
  0x1e   : > { %v14025_v19 = vld [vmem:[%s18770_s2 + $0x50] sm:$0xff]  }
  0x1f   : > { %994 = vmatpush1.bf16.msra.mxu0 %v13858_v13  ;;  %1932 = vmatpush1.bf16.msra.mxu1 %v13859_v14  ;;  %v14010_v13 = vld [vmem:[%s18770_s2 + $0x48] sm:$0xff]   ;;  %v13930_v21 = vld [vmem:[%s15101_s19 + $0x174] ss:$8 sps:$4 sm:$0xff]  }
  0x20   : > { %995 = vmatprep.subr.bf16.mxu0 %v14946_v1  ;;  %1933 = vmatprep.subr.bf16.mxu1 %v14946_v1  ;;  %v14011_v14 = vld [vmem:[%s18770_s2 + $0x48] sm:$0xff]  }
  0x23   : > { %996 = vmatpush1.bf16.msra.mxu0 %v13860_v15  ;;  %1934 = vmatpush1.bf16.msra.mxu1 %v13861_v16  ;;  %v13922_v15 = vld [vmem:[%s15101_s19 + $0x164] ss:$8 sps:$4 sm:$0xff]   ;;  %v13924_v16 = vld [vmem:[%s15101_s19 + $0x120] ss:$8 sps:$4 sm:$0xff]  }
  0x24   : > { %997 = vmatprep.subr.bf16.mxu0 %v14946_v1  ;;  %1935 = vmatprep.subr.bf16.mxu1 %v14946_v1 }
  0x27   : > { %998 = vmatpush1.bf16.msra.mxu0 %v13862_v17  ;;  %1936 = vmatpush1.bf16.msra.mxu1 %v13863_v18  ;;  %v13925_v17 = vld [vmem:[%s15101_s19 + $0x160] ss:$8 sps:$4 sm:$0xff]   ;;  %v14024_v18 = vld [vmem:[%s18770_s2 + $0x50] sm:$0xff]  }
  0x28   : > { %999 = vmatprep.subr.bf16.mxu0 %v14946_v1  ;;  %1937 = vmatprep.subr.bf16.mxu1 %v14946_v1 }
  0x2b   : > { %1000 = vmatpush1.bf16.msra.mxu0 %v13864_v20  ;;  %1938 = vmatpush1.bf16.msra.mxu1 %v13865_v22  ;;  %v13928_v20 = vld [vmem:[%s15101_s19 + $0x134] ss:$8 sps:$4 sm:$0xff]   ;;  %v13932_v22 = vld [vmem:[%s15101_s19 + $0x130] ss:$8 sps:$4 sm:$0xff]  }
  0x2c   : > { %1001 = vmatprep.subr.bf16.mxu0 %v14946_v1  ;;  %1939 = vmatprep.subr.bf16.mxu1 %v14946_v1 }
  0x2f   : > { %1002 = vmatpush1.bf16.msra.mxu0 %v13866_v23  ;;  %1940 = vmatpush1.bf16.msra.mxu1 %v13867_v24  ;;  %v13933_v23 = vld [vmem:[%s15101_s19 + $0x170] ss:$8 sps:$4 sm:$0xff]  }
  0x30   : > { %1003 = vmatprep.subr.bf16.mxu0 %v14946_v1  ;;  %1941 = vmatprep.subr.bf16.mxu1 %v14946_v1  ;;  %v14038_v24 = vld [vmem:[%s18770_s2 + $0x58] sm:$0xff]  }
  0x33   : > { %1004 = vmatpush1.bf16.msra.mxu0 %v13868_v25  ;;  %1942 = vmatpush1.bf16.msra.mxu1 %v13869_v26  ;;  %v14039_v25 = vld [vmem:[%s18770_s2 + $0x58] sm:$0xff]   ;;  %v13934_v26 = vld [vmem:[%s15101_s19 + $0x204] ss:$8 sps:$4 sm:$0xff]  }
  0x34   : > { %1005 = vmatprep.subr.bf16.mxu0 %v14946_v1  ;;  %1943 = vmatprep.subr.bf16.mxu1 %v14946_v1 }
  0x37   : > { %1006 = vmatpush1.bf16.msra.mxu0 %v13870_v27  ;;  %1944 = vmatpush1.bf16.msra.mxu1 %v13871_v28  ;;  %v13936_v27 = vld [vmem:[%s15101_s19 + $0x244] ss:$8 sps:$4 sm:$0xff]   ;;  %v13938_v28 = vld [vmem:[%s15101_s19 + $0x200] ss:$8 sps:$4 sm:$0xff]  }
  0x38   : > { %1007 = vmatprep.subr.bf16.mxu0 %v14946_v1  ;;  %1945 = vmatprep.subr.bf16.mxu1 %v14946_v1 }
  0x3b   : > { %1008 = vmatpush1.bf16.msra.mxu0 %v13872_v29  ;;  %1946 = vmatpush1.bf16.msra.mxu1 %v13873_v30  ;;  %v13939_v29 = vld [vmem:[%s15101_s19 + $0x240] ss:$8 sps:$4 sm:$0xff]   ;;  %v13942_v30 = vld [vmem:[%s15101_s19 + $0x214] ss:$8 sps:$4 sm:$0xff]  }
  0x3c   : > { %1009 = vmatprep.subr.bf16.mxu0 %v14946_v1  ;;  %1947 = vmatprep.subr.bf16.mxu1 %v14946_v1 }
  0x3f   : > { %1010 = vmatpush1.bf16.msra.mxu0 %v13874_v31  ;;  %1948 = vmatpush1.bf16.msra.mxu1 %v13875_v32  ;;  %v13944_v31 = vld [vmem:[%s15101_s19 + $0x254] ss:$8 sps:$4 sm:$0xff]   ;;  %v14052_v32 = vld [vmem:[%s18770_s2 + $0x60] sm:$0xff]  }
  0x40   : > { %1011 = vmatprep.subr.bf16.mxu0 %v14946_v1  ;;  %1949 = vmatprep.subr.bf16.mxu1 %v14946_v1 }
  0x43   : > { %1012 = vmatpush1.bf16.msra.mxu0 %v13876_v33  ;;  %1950 = vmatpush1.bf16.msra.mxu1 %v13877_v34  ;;  %v14053_v33 = vld [vmem:[%s18770_s2 + $0x60] sm:$0xff]   ;;  %v13946_v34 = vld [vmem:[%s15101_s19 + $0x210] ss:$8 sps:$4 sm:$0xff]  }
  0x44   : > { %2985 = vmatprep.subr.bf16.mxu0 %v14946_v1  ;;  %4051 = vmatprep.subr.bf16.mxu1 %v14946_v1 }
  0x46   : > { %1014 = vmatmul.mubr.bf16.vlgmr.msra.gmra.mrb[0].mxu0 %v13878_v35  ;;  %1952 = vmatmul.mubr.bf16.vlgmr.msra.gmra.mrb[0].mxu1 %v13881_v36  ;;  %v13947_v35 = vld [vmem:[%s15101_s19 + $0x250] ss:$8 sps:$4 sm:$0xff]   ;;  %v13948_v36 = vld [vmem:[%s15101_s19 + $0x224] ss:$8 sps:$4 sm:$0xff]  }
  0x47   : > { %2986 = vmatpush1.bf16.msra.mxu0 %v13884_v37  ;;  %4052 = vmatpush1.bf16.msra.mxu1 %v13885_v38  ;;  %v13950_v37 = vld [vmem:[%s15101_s19 + $0x264] ss:$8 sps:$4 sm:$0xff]   ;;  %v13952_v38 = vld [vmem:[%s15101_s19 + $0x220] ss:$8 sps:$4 sm:$0xff]  }
  0x48   : > { %1021 = vmatprep.mubr.bf16.mxu0 %v13886_v39  ;;  %1959 = vmatprep.mubr.bf16.mxu1 %v13888_v40  ;;  %v13953_v39 = vld [vmem:[%s15101_s19 + $0x260] ss:$8 sps:$4 sm:$0xff]   ;;  %v13956_v40 = vld [vmem:[%s15101_s19 + $0x234] ss:$8 sps:$4 sm:$0xff]  }
  0x49   : > { %2987 = vmatprep.subr.bf16.mxu0 %v14946_v1  ;;  %4053 = vmatprep.subr.bf16.mxu1 %v14946_v1 }
  0x4b   : > { %2988 = vmatpush1.bf16.msra.mxu0 %v13898_v41  ;;  %4054 = vmatpush1.bf16.msra.mxu1 %v13899_v42  ;;  %v13958_v41 = vld [vmem:[%s15101_s19 + $0x274] ss:$8 sps:$4 sm:$0xff]   ;;  %v14066_v42 = vld [vmem:[%s18770_s2 + $0x68] sm:$0xff]  }
  0x4c   : > { %2989 = vmatprep.subr.bf16.mxu0 %v14946_v1  ;;  %4055 = vmatprep.subr.bf16.mxu1 %v14946_v1 }
  0x4e   : > { %1022 = vmatmul.mubr.bf16.gmra.mrb[4].mxu0 %v13890_v43  ;;  %1960 = vmatmul.mubr.bf16.gmra.mrb[4].mxu1 %v13891_v44  ;;  %v14067_v43 = vld [vmem:[%s18770_s2 + $0x68] sm:$0xff]   ;;  %v13960_v44 = vld [vmem:[%s15101_s19 + $0x230] ss:$8 sps:$4 sm:$0xff]  }
  0x4f   : > { %1029 = vmatprep.mubr.bf16.mxu0 %v13892_v45  ;;  %1967 = vmatprep.mubr.bf16.mxu1 %v13894_v46  ;;  %v13961_v45 = vld [vmem:[%s15101_s19 + $0x270] ss:$8 sps:$4 sm:$0xff]   ;;  %v13962_v46 = vld [vmem:[%s15101_s19 + $0x304] ss:$8 sps:$4 sm:$0xff]  }
  0x50   : > { %2990 = vmatpush1.bf16.msra.mxu0 %v13912_v47  ;;  %4056 = vmatpush1.bf16.msra.mxu1 %v13913_v48  ;;  %v13964_v47 = vld [vmem:[%s15101_s19 + $0x344] ss:$8 sps:$4 sm:$0xff]   ;;  %v13966_v48 = vld [vmem:[%s15101_s19 + $0x300] ss:$8 sps:$4 sm:$0xff]  }
  0x51   : > { %2991 = vmatprep.subr.bf16.mxu0 %v14946_v1  ;;  %4057 = vmatprep.subr.bf16.mxu1 %v14946_v1 }
  0x54   : > { %2992 = vmatpush1.bf16.msra.mxu0 %v13926_v50  ;;  %4058 = vmatpush1.bf16.msra.mxu1 %v13927_v51  ;;  %v13970_v50 = vld [vmem:[%s15101_s19 + $0x314] ss:$8 sps:$4 sm:$0xff]  }
  0x55   : > { %2993 = vmatprep.subr.bf16.mxu0 %v14946_v1  ;;  %4059 = vmatprep.subr.bf16.mxu1 %v14946_v1  ;;  %v13972_v51 = vld [vmem:[%s15101_s19 + $0x354] ss:$8 sps:$4 sm:$0xff]  }
  0x56   : > { %1030 = vmatmul.mubr.bf16.gmra.mrb[8].mxu0 %v13896_v49  ;;  %1968 = vmatmul.mubr.bf16.gmra.mrb[8].mxu1 %v13897_v52  ;;  %v13967_v49 = vld [vmem:[%s15101_s19 + $0x340] ss:$8 sps:$4 sm:$0xff]   ;;  %v14080_v52 = vld [vmem:[%s18770_s2 + $0x70] sm:$0xff]  }
  0x57   : > { %1037 = vmatprep.mubr.bf16.mxu0 %v13900_v53  ;;  %1975 = vmatprep.mubr.bf16.mxu1 %v13902_v54  ;;  %v14081_v53 = vld [vmem:[%s18770_s2 + $0x70] sm:$0xff]  }
  0x58   : > { %2994 = vmatpush1.bf16.msra.mxu0 %v13940_v55  ;;  %4060 = vmatpush1.bf16.msra.mxu1 %v13941_v56  ;;  %v13974_v54 = vld [vmem:[%s15101_s19 + $0x310] ss:$8 sps:$4 sm:$0xff]   ;;  %v13976_v56 = vld [vmem:[%s15101_s19 + $0x324] ss:$8 sps:$4 sm:$0xff]  }
  0x59   : > { %2995 = vmatprep.subr.bf16.mxu0 %v14946_v1  ;;  %4061 = vmatprep.subr.bf16.mxu1 %v14946_v1  ;;  %v13975_v55 = vld [vmem:[%s15101_s19 + $0x350] ss:$8 sps:$4 sm:$0xff]  }
  0x5c   : > { %2996 = vmatpush1.bf16.msra.mxu0 %v13954_v57  ;;  %4062 = vmatpush1.bf16.msra.mxu1 %v13955_v58  ;;  %v13978_v57 = vld [vmem:[%s15101_s19 + $0x364] ss:$8 sps:$4 sm:$0xff]   ;;  %v13980_v58 = vld [vmem:[%s15101_s19 + $0x320] ss:$8 sps:$4 sm:$0xff]  }
  0x5d   : > { %2997 = vmatprep.subr.bf16.mxu0 %v14946_v1  ;;  %4063 = vmatprep.subr.bf16.mxu1 %v14946_v1 }
  0x5e   : > { %1038 = vmatmul.mubr.bf16.gmra.mrb[12].mxu0 %v13904_v59  ;;  %1976 = vmatmul.mubr.bf16.gmra.mrb[12].mxu1 %v13905_v60  ;;  %v13981_v59 = vld [vmem:[%s15101_s19 + $0x360] ss:$8 sps:$4 sm:$0xff]   ;;  %v13984_v60 = vld [vmem:[%s15101_s19 + $0x334] ss:$8 sps:$4 sm:$0xff]  }
  0x5f   : > { %1045 = vmatprep.mubr.bf16.mxu0 %v13906_v61  ;;  %1983 = vmatprep.mubr.bf16.mxu1 %v13908_v62  ;;  %v13986_v61 = vld [vmem:[%s15101_s19 + $0x374] ss:$8 sps:$4 sm:$0xff]  }
  0x60   : > { %2998 = vmatpush1.bf16.msra.mxu0 %v13968_v63  ;;  %4064 = vmatpush1.bf16.msra.mxu1 %v13969_v0  ;;  %v14094_v62 = vld [vmem:[%s18770_s2 + $0x78] sm:$0xff]  }
  0x61   : > { %2999 = vmatprep.subr.bf16.mxu0 %v14946_v1  ;;  %4065 = vmatprep.subr.bf16.mxu1 %v14946_v1  ;;  %v14095_v63 = vld [vmem:[%s18770_s2 + $0x78] sm:$0xff]  }
  0x62   : > { %v13988_v0 = vld [vmem:[%s15101_s19 + $0x330] ss:$8 sps:$4 sm:$0xff]  }
  0x64   : > { %3000 = vmatpush1.bf16.msra.mxu0 %v13982_v3  ;;  %4066 = vmatpush1.bf16.msra.mxu1 %v13983_v5  ;;  %v13990_v3 = vld [vmem:[%s15101_s19 + $0x404] ss:$8 sps:$4 sm:$0xff]   ;;  %v13994_v5 = vld [vmem:[%s15101_s19 + $0x400] ss:$8 sps:$4 sm:$0xff]  }
  0x65   : > { %3001 = vmatprep.subr.bf16.mxu0 %v14946_v1  ;;  %4067 = vmatprep.subr.bf16.mxu1 %v14946_v1 }
  0x66   : > { %1046 = vmatmul.mubr.bf16.gmra.mrb[16].mxu0 %v13910_v2  ;;  %1984 = vmatmul.mubr.bf16.gmra.mrb[16].mxu1 %v13911_v4  ;;  %v13989_v2 = vld [vmem:[%s15101_s19 + $0x370] ss:$8 sps:$4 sm:$0xff]   ;;  %v13992_v4 = vld [vmem:[%s15101_s19 + $0x444] ss:$8 sps:$4 sm:$0xff]  }
  0x67   : > { %1053 = vmatprep.mubr.bf16.mxu0 %v13914_v6  ;;  %1991 = vmatprep.mubr.bf16.mxu1 %v13916_v7  ;;  %v13995_v6 = vld [vmem:[%s15101_s19 + $0x440] ss:$8 sps:$4 sm:$0xff]   ;;  %v13998_v7 = vld [vmem:[%s15101_s19 + $0x414] ss:$8 sps:$4 sm:$0xff]  }
  0x68   : > { %3002 = vmatpush1.bf16.msra.mxu0 %v13996_v8  ;;  %4068 = vmatpush1.bf16.msra.mxu1 %v13997_v9  ;;  %v14000_v8 = vld [vmem:[%s15101_s19 + $0x454] ss:$8 sps:$4 sm:$0xff]   ;;  %v14002_v9 = vld [vmem:[%s15101_s19 + $0x410] ss:$8 sps:$4 sm:$0xff]  }
  0x69   : > { %3003 = vmatprep.subr.bf16.mxu0 %v14946_v1  ;;  %4069 = vmatprep.subr.bf16.mxu1 %v14946_v1 }
  0x6c   : > { %3004 = vmatpush1.bf16.msra.mxu0 %v14010_v13  ;;  %4070 = vmatpush1.bf16.msra.mxu1 %v14011_v14  ;;  %v14008_v13 = vld [vmem:[%s15101_s19 + $0x420] ss:$8 sps:$4 sm:$0xff]  }
  0x6d   : > { %3005 = vmatprep.subr.bf16.mxu0 %v14946_v1  ;;  %4071 = vmatprep.subr.bf16.mxu1 %v14946_v1  ;;  %v14009_v14 = vld [vmem:[%s15101_s19 + $0x460] ss:$8 sps:$4 sm:$0xff]  }
  0x6e   : > { %1054 = vmatmul.mubr.bf16.gmra.mrb[20].mxu0 %v13918_v10  ;;  %1992 = vmatmul.mubr.bf16.gmra.mrb[20].mxu1 %v13919_v11  ;;  %v14003_v10 = vld [vmem:[%s15101_s19 + $0x450] ss:$8 sps:$4 sm:$0xff]   ;;  %v14004_v11 = vld [vmem:[%s15101_s19 + $0x424] ss:$8 sps:$4 sm:$0xff]  }
  0x6f   : > { %1061 = vmatprep.mubr.bf16.mxu0 %v13920_v12  ;;  %1999 = vmatprep.mubr.bf16.mxu1 %v13922_v15  ;;  %v14006_v12 = vld [vmem:[%s15101_s19 + $0x464] ss:$8 sps:$4 sm:$0xff]   ;;  %v14012_v15 = vld [vmem:[%s15101_s19 + $0x434] ss:$8 sps:$4 sm:$0xff]  }
  0x70   : > { %3006 = vmatpush1.bf16.msra.mxu0 %v14024_v18  ;;  %4072 = vmatpush1.bf16.msra.mxu1 %v14025_v19  ;;  %v14017_v18 = vld [vmem:[%s15101_s19 + $0x470] ss:$8 sps:$4 sm:$0xff]   ;;  %v14018_v19 = vld [vmem:[%s15101_s19 + $0x504] ss:$8 sps:$4 sm:$0xff]  }
  0x71   : > { %3007 = vmatprep.subr.bf16.mxu0 %v14946_v1  ;;  %4073 = vmatprep.subr.bf16.mxu1 %v14946_v1 }
  0x74   : > { %3008 = vmatpush1.bf16.msra.mxu0 %v14038_v24  ;;  %4074 = vmatpush1.bf16.msra.mxu1 %v14039_v25  ;;  %v14028_v24 = vld [vmem:[%s15101_s19 + $0x554] ss:$8 sps:$4 sm:$0xff]   ;;  %v14030_v25 = vld [vmem:[%s15101_s19 + $0x510] ss:$8 sps:$4 sm:$0xff]  }
  0x75   : > { %3009 = vmatprep.subr.bf16.mxu0 %v14946_v1  ;;  %4075 = vmatprep.subr.bf16.mxu1 %v14946_v1 }
  0x76   : > { %1062 = vmatmul.mubr.bf16.gmra.mrb[24].mxu0 %v13924_v16  ;;  %2000 = vmatmul.mubr.bf16.gmra.mrb[24].mxu1 %v13925_v17  ;;  %v14014_v16 = vld [vmem:[%s15101_s19 + $0x474] ss:$8 sps:$4 sm:$0xff]   ;;  %v14016_v17 = vld [vmem:[%s15101_s19 + $0x430] ss:$8 sps:$4 sm:$0xff]  }
  0x77   : > { %1069 = vmatprep.mubr.bf16.mxu0 %v13928_v20  ;;  %2007 = vmatprep.mubr.bf16.mxu1 %v13930_v21  ;;  %v14020_v20 = vld [vmem:[%s15101_s19 + $0x544] ss:$8 sps:$4 sm:$0xff]   ;;  %v14022_v21 = vld [vmem:[%s15101_s19 + $0x500] ss:$8 sps:$4 sm:$0xff]  }
  0x78   : > { %3010 = vmatpush1.bf16.msra.mxu0 %v14052_v32  ;;  %4076 = vmatpush1.bf16.msra.mxu1 %v14053_v33  ;;  %v14042_v32 = vld [vmem:[%s15101_s19 + $0x574] ss:$8 sps:$4 sm:$0xff]   ;;  %v14044_v33 = vld [vmem:[%s15101_s19 + $0x530] ss:$8 sps:$4 sm:$0xff]  }
  0x79   : > { %3011 = vmatprep.subr.bf16.mxu0 %v14946_v1  ;;  %4077 = vmatprep.subr.bf16.mxu1 %v14946_v1 }
  0x7c   : > { %3012 = vmatpush1.bf16.msra.mxu0 %v14066_v42  ;;  %4078 = vmatpush1.bf16.msra.mxu1 %v14067_v43  ;;  %v14059_v42 = vld [vmem:[%s15101_s19 + $0x650] ss:$8 sps:$4 sm:$0xff]   ;;  %v14060_v43 = vld [vmem:[%s15101_s19 + $0x624] ss:$8 sps:$4 sm:$0xff]  }
  0x7d   : > { %3013 = vmatprep.subr.bf16.mxu0 %v14946_v1  ;;  %4079 = vmatprep.subr.bf16.mxu1 %v14946_v1 }
  0x7e   : > { %1070 = vmatmul.mubr.bf16.gmra.mrb[28].mxu0 %v13932_v22  ;;  %2008 = vmatmul.mubr.bf16.gmra.mrb[28].mxu1 %v13933_v23  ;;  %v14023_v22 = vld [vmem:[%s15101_s19 + $0x540] ss:$8 sps:$4 sm:$0xff]   ;;  %v14026_v23 = vld [vmem:[%s15101_s19 + $0x514] ss:$8 sps:$4 sm:$0xff]  }
  0x7f   : > { %1077 = vmatprep.mubr.bf16.mxu0 %v13934_v26  ;;  %2015 = vmatprep.mubr.bf16.mxu1 %v13936_v27  ;;  %v14031_v26 = vld [vmem:[%s15101_s19 + $0x550] ss:$8 sps:$4 sm:$0xff]   ;;  %v14032_v27 = vld [vmem:[%s15101_s19 + $0x524] ss:$8 sps:$4 sm:$0xff]  }
  0x80   : > { %3014 = vmatpush1.bf16.msra.mxu0 %v14080_v52  ;;  %4080 = vmatpush1.bf16.msra.mxu1 %v14081_v53  ;;  %v14073_v52 = vld [vmem:[%s15101_s19 + $0x670] ss:$8 sps:$4 sm:$0xff]   ;;  %v14074_v53 = vld [vmem:[%s15101_s19 + $0x704] ss:$8 sps:$4 sm:$0xff]  }
  0x81   : > { %3015 = vmatprep.subr.bf16.mxu0 %v14946_v1  ;;  %4081 = vmatprep.subr.bf16.mxu1 %v14946_v1 }
  0x84   : > { %3016 = vmatpush1.bf16.msra.mxu0 %v14094_v62  ;;  %4082 = vmatpush1.bf16.msra.mxu1 %v14095_v63  ;;  %v14076_v63 = vld [vmem:[%s15101_s19 + $0x744] ss:$8 sps:$4 sm:$0xff]  }
  0x85   : > { %5839 = vmatprep.subr.bf16.mxu0 %v14946_v1 }
  0x86   : > { %1078 = vmatmul.mubr.bf16.gmra.mrb[32].mxu0 %v13938_v28  ;;  %2016 = vmatmul.mubr.bf16.gmra.mrb[32].mxu1 %v13939_v29  ;;  %v14034_v28 = vld [vmem:[%s15101_s19 + $0x564] ss:$8 sps:$4 sm:$0xff]   ;;  %v14036_v29 = vld [vmem:[%s15101_s19 + $0x520] ss:$8 sps:$4 sm:$0xff]  }
  0x87   : > { %1085 = vmatprep.mubr.bf16.mxu0 %v13942_v30  ;;  %2023 = vmatprep.mubr.bf16.mxu1 %v13944_v31  ;;  %v14037_v30 = vld [vmem:[%s15101_s19 + $0x560] ss:$8 sps:$4 sm:$0xff]   ;;  %v14040_v31 = vld [vmem:[%s15101_s19 + $0x534] ss:$8 sps:$4 sm:$0xff]  }
  0x8e   : > { %1086 = vmatmul.mubr.bf16.gmra.mrb[36].mxu0 %v13946_v34  ;;  %2024 = vmatmul.mubr.bf16.gmra.mrb[36].mxu1 %v13947_v35  ;;  %v14045_v34 = vld [vmem:[%s15101_s19 + $0x570] ss:$8 sps:$4 sm:$0xff]   ;;  %v14046_v35 = vld [vmem:[%s15101_s19 + $0x604] ss:$8 sps:$4 sm:$0xff]  }
  0x8f   : > { %1093 = vmatprep.mubr.bf16.mxu0 %v13948_v36  ;;  %2031 = vmatprep.mubr.bf16.mxu1 %v13950_v37  ;;  %v14048_v36 = vld [vmem:[%s15101_s19 + $0x644] ss:$8 sps:$4 sm:$0xff]   ;;  %v14050_v37 = vld [vmem:[%s15101_s19 + $0x600] ss:$8 sps:$4 sm:$0xff]  }
  0x96   : > { %1094 = vmatmul.mubr.bf16.gmra.mrb[40].mxu0 %v13952_v38  ;;  %2032 = vmatmul.mubr.bf16.gmra.mrb[40].mxu1 %v13953_v39  ;;  %v14051_v38 = vld [vmem:[%s15101_s19 + $0x640] ss:$8 sps:$4 sm:$0xff]   ;;  %v14054_v39 = vld [vmem:[%s15101_s19 + $0x614] ss:$8 sps:$4 sm:$0xff]  }
  0x97   : > { %1101 = vmatprep.mubr.bf16.mxu0 %v13956_v40  ;;  %2039 = vmatprep.mubr.bf16.mxu1 %v13958_v41  ;;  %v14056_v40 = vld [vmem:[%s15101_s19 + $0x654] ss:$8 sps:$4 sm:$0xff]   ;;  %v14058_v41 = vld [vmem:[%s15101_s19 + $0x610] ss:$8 sps:$4 sm:$0xff]  }
  0x9e   : > { %1102 = vmatmul.mubr.bf16.gmra.mrb[44].mxu0 %v13960_v44  ;;  %2040 = vmatmul.mubr.bf16.gmra.mrb[44].mxu1 %v13961_v45  ;;  %v14062_v44 = vld [vmem:[%s15101_s19 + $0x664] ss:$8 sps:$4 sm:$0xff]   ;;  %v14064_v45 = vld [vmem:[%s15101_s19 + $0x620] ss:$8 sps:$4 sm:$0xff]  }
  0x9f   : > { %1109 = vmatprep.mubr.bf16.mxu0 %v13962_v46  ;;  %2047 = vmatprep.mubr.bf16.mxu1 %v13964_v47  ;;  %v14065_v46 = vld [vmem:[%s15101_s19 + $0x660] ss:$8 sps:$4 sm:$0xff]   ;;  %v14068_v47 = vld [vmem:[%s15101_s19 + $0x634] ss:$8 sps:$4 sm:$0xff]  }
  0xa6   : > { %1110 = vmatmul.mubr.bf16.gmra.mrb[48].mxu0 %v13966_v48  ;;  %2048 = vmatmul.mubr.bf16.gmra.mrb[48].mxu1 %v13967_v49  ;;  %v14070_v48 = vld [vmem:[%s15101_s19 + $0x674] ss:$8 sps:$4 sm:$0xff]   ;;  %v15406_v49 = vld [vmem:[%s18771_s3] ss:$0 sm:$0xff] }
  0xa7   : > { %1117 = vmatprep.mubr.bf16.mxu0 %v13970_v50  ;;  %2055 = vmatprep.mubr.bf16.mxu1 %v13972_v51  ;;  %v14072_v50 = vld [vmem:[%s15101_s19 + $0x630] ss:$8 sps:$4 sm:$0xff]  }
  0xae   : > { %1118 = vmatmul.mubr.bf16.gmra.mrb[52].mxu0 %v13974_v54  ;;  %2056 = vmatmul.mubr.bf16.gmra.mrb[52].mxu1 %v13975_v55 }
  0xaf   : > { %1125 = vmatprep.mubr.bf16.mxu0 %v13976_v56  ;;  %2063 = vmatprep.mubr.bf16.mxu1 %v13978_v57 }
  0xb6   : > { %1126 = vmatmul.mubr.bf16.gmra.mrb[56].mxu0 %v13980_v58  ;;  %2064 = vmatmul.mubr.bf16.gmra.mrb[56].mxu1 %v13981_v59 }
  0xb7   : > { %1133 = vmatprep.mubr.bf16.mxu0 %v13984_v60  ;;  %2071 = vmatprep.mubr.bf16.mxu1 %v13986_v61 }
  0xbe   : > { %1134 = vmatmul.mubr.bf16.gmra.mrb[60].mxu0 %v13988_v0  ;;  %2072 = vmatmul.mubr.bf16.gmra.mrb[60].mxu1 %v13989_v2 }
  0xbf   : > { %1141 = vmatprep.mubr.bf16.mxu0 %v13990_v3  ;;  %2079 = vmatprep.mubr.bf16.mxu1 %v13992_v4 }
  0xc6   : > { %1142 = vmatmul.mubr.bf16.gmra.mrb[64].mxu0 %v13994_v5  ;;  %2080 = vmatmul.mubr.bf16.gmra.mrb[64].mxu1 %v13995_v6 }
  0xc7   : > { %1149 = vmatprep.mubr.bf16.mxu0 %v13998_v7  ;;  %2087 = vmatprep.mubr.bf16.mxu1 %v14000_v8  ;;  %v14078_v7 = vld [vmem:[%s15101_s19 + $0x700] ss:$8 sps:$4 sm:$0xff]  }
  0xce   : > { %1150 = vmatmul.mubr.bf16.gmra.mrb[68].mxu0 %v14002_v9  ;;  %2088 = vmatmul.mubr.bf16.gmra.mrb[68].mxu1 %v14003_v10 }
  0xcf   : > { %1157 = vmatprep.mubr.bf16.mxu0 %v14004_v11  ;;  %2095 = vmatprep.mubr.bf16.mxu1 %v14006_v12  ;;  %v14079_v11 = vld [vmem:[%s15101_s19 + $0x740] ss:$8 sps:$4 sm:$0xff]   ;;  %v14082_v12 = vld [vmem:[%s15101_s19 + $0x714] ss:$8 sps:$4 sm:$0xff]  }
  0xd6   : > { %1158 = vmatmul.mubr.bf16.gmra.mrb[72].mxu0 %v14008_v13  ;;  %2096 = vmatmul.mubr.bf16.gmra.mrb[72].mxu1 %v14009_v14 }
  0xd7   : > { %1165 = vmatprep.mubr.bf16.mxu0 %v14012_v15  ;;  %2103 = vmatprep.mubr.bf16.mxu1 %v14014_v16 }
  0xde   : > { %1166 = vmatmul.mubr.bf16.gmra.mrb[76].mxu0 %v14016_v17  ;;  %2104 = vmatmul.mubr.bf16.gmra.mrb[76].mxu1 %v14017_v18 }
  0xdf   : > { %1173 = vmatprep.mubr.bf16.mxu0 %v14018_v19  ;;  %2111 = vmatprep.mubr.bf16.mxu1 %v14020_v20 }
  0xe6   : > { %1174 = vmatmul.mubr.bf16.gmra.mrb[80].mxu0 %v14022_v21  ;;  %2112 = vmatmul.mubr.bf16.gmra.mrb[80].mxu1 %v14023_v22  ;;  %v14084_v22 = vld [vmem:[%s15101_s19 + $0x754] ss:$8 sps:$4 sm:$0xff]  }
  0xe7   : > { %1181 = vmatprep.mubr.bf16.mxu0 %v14026_v23  ;;  %2119 = vmatprep.mubr.bf16.mxu1 %v14028_v24 }
  0xee   : > { %1182 = vmatmul.mubr.bf16.gmra.mrb[84].mxu0 %v14030_v25  ;;  %2120 = vmatmul.mubr.bf16.gmra.mrb[84].mxu1 %v14031_v26 }
  0xef   : > { %1189 = vmatprep.mubr.bf16.mxu0 %v14032_v27  ;;  %2127 = vmatprep.mubr.bf16.mxu1 %v14034_v28 }
  0xf6   : > { %1190 = vmatmul.mubr.bf16.gmra.mrb[88].mxu0 %v14036_v29  ;;  %2128 = vmatmul.mubr.bf16.gmra.mrb[88].mxu1 %v14037_v30  ;;  %v14086_v29 = vld [vmem:[%s15101_s19 + $0x710] ss:$8 sps:$4 sm:$0xff]  }
  0xf7   : > { %1197 = vmatprep.mubr.bf16.mxu0 %v14040_v31  ;;  %2135 = vmatprep.mubr.bf16.mxu1 %v14042_v32 }
  0xfe   : > { %1198 = vmatmul.mubr.bf16.gmra.mrb[92].mxu0 %v14044_v33  ;;  %2136 = vmatmul.mubr.bf16.gmra.mrb[92].mxu1 %v14045_v34  ;;  %v14087_v33 = vld [vmem:[%s15101_s19 + $0x750] ss:$8 sps:$4 sm:$0xff]   ;;  %v14088_v34 = vld [vmem:[%s15101_s19 + $0x724] ss:$8 sps:$4 sm:$0xff]  }
  0xff   : > { %1205 = vmatprep.mubr.bf16.mxu0 %v14046_v35  ;;  %2143 = vmatprep.mubr.bf16.mxu1 %v14048_v36 }
 0x106   : > { %1206 = vmatmul.mubr.bf16.gmra.mrb[96].mxu0 %v14050_v37  ;;  %2144 = vmatmul.mubr.bf16.gmra.mrb[96].mxu1 %v14051_v38 }
 0x107   : > { %1213 = vmatprep.mubr.bf16.mxu0 %v14054_v39  ;;  %2151 = vmatprep.mubr.bf16.mxu1 %v14056_v40 }
 0x10e   : > { %1214 = vmatmul.mubr.bf16.gmra.mrb[100].mxu0 %v14058_v41  ;;  %2152 = vmatmul.mubr.bf16.gmra.mrb[100].mxu1 %v14059_v42 }
 0x10f   : > { %1221 = vmatprep.mubr.bf16.mxu0 %v14060_v43  ;;  %2159 = vmatprep.mubr.bf16.mxu1 %v14062_v44  ;;  %v14090_v44 = vld [vmem:[%s15101_s19 + $0x764] ss:$8 sps:$4 sm:$0xff]  }
 0x116   : > { %1222 = vmatmul.mubr.bf16.gmra.mrb[104].mxu0 %v14064_v45  ;;  %2160 = vmatmul.mubr.bf16.gmra.mrb[104].mxu1 %v14065_v46 }
 0x117   : > { %1229 = vmatprep.mubr.bf16.mxu0 %v14068_v47  ;;  %2167 = vmatprep.mubr.bf16.mxu1 %v14070_v48 }
 0x119   : > { %v1015_v51 = vpop.f32.mrb[0].mxu0  ;;  %v1953_v55 = vpop.f32.mrb[0].mxu1 }
 0x11a   : > { %v1016_v54 = vadd.f32 %v15406_v49, %v1015_v51  ;;  %v1017_v56 = vpop.f32.mrb[1].mxu0  ;;  %v1954_v57 = vadd.f32 %v15406_v49, %v1953_v55  ;;  %v1955_v58 = vpop.f32.mrb[1].mxu1  ;;  %v14093_v55 = vld [vmem:[%s15101_s19 + $0x760] ss:$8 sps:$4 sm:$0xff]  }
 0x11b   : > { %v1018_v59 = vpop.f32.mrb[2].mxu0  ;;  %v1956_v61 = vpop.f32.mrb[2].mxu1  ;;  %v14096_v56 = vld [vmem:[%s15101_s19 + $0x734] ss:$8 sps:$4 sm:$0xff]  }
 0x11c   : > { %v1019_v60 = vadd.f32 %v15406_v49, %v1018_v59  ;;  %v1020_v62 = vpop.f32.mrb[3].mxu0  ;;  %v1957_v0 = vadd.f32 %v15406_v49, %v1956_v61  ;;  %v1958_v2 = vpop.f32.mrb[3].mxu1  ;;  %v2208_v3 = vmax.f32 %v1954_v57, 0.0  ;;  %v1270_v4 = vmax.f32 %v1016_v54, 0.0 }
 0x11e   : > { %v1271_v5 = vmax.f32 %v1019_v60, 0.0  ;;  %1230 = vmatmul.mubr.bf16.gmra.mrb[108].mxu0 %v14072_v50  ;;  %2168 = vmatmul.mubr.bf16.gmra.mrb[108].mxu1 %v14073_v52  ;;  %v2209_v6 = vmax.f32 %v1957_v0, 0.0  ;;  %v14092_v52 = vld [vmem:[%s15101_s19 + $0x720] ss:$8 sps:$4 sm:$0xff]  }
 0x11f   : > { %1237 = vmatprep.mubr.bf16.mxu0 %v14074_v53  ;;  %2175 = vmatprep.mubr.bf16.mxu1 %v14076_v63 }
 0x120   : > { %v1334_v8 = vpack.c.bf16 %v1271_v5, %v1270_v4  ;;  %v2272_v10 = vpack.c.bf16 %v2209_v6, %v2208_v3  ;;  %v14098_v4 = vld [vmem:[%s15101_s19 + $0x774] ss:$8 sps:$4 sm:$0xff]  }
 0x121   : > { %v1023_v9 = vpop.f32.mrb[4].mxu0  ;;  %v1961_v14 = vpop.f32.mrb[4].mxu1 }
 0x122   : > { %v1024_v13 = vadd.f32 %v15406_v49, %v1023_v9  ;;  %v1025_v15 = vpop.f32.mrb[5].mxu0  ;;  %1367 = vst.msk [vmem:[#allocation2] sm:$0xff] %vm1366_vm0, %v1334_v8  ;;  %v1962_v16 = vadd.f32 %v15406_v49, %v1961_v14  ;;  %v1963_v17 = vpop.f32.mrb[5].mxu1  ;;  %2336 = vrot.lane.b32.xlu0 %v2272_v10, %s14947_s17  ;;  %v14101_v14 = vld [vmem:[%s15101_s19 + $0x770] ss:$8 sps:$4 sm:$0xff]  }
 0x123   : > { %v1026_v18 = vpop.f32.mrb[6].mxu0  ;;  %v1964_v20 = vpop.f32.mrb[6].mxu1  ;;  %v14104_v15 = vld [vmem:[%s15101_s19 + $0x84] ss:$8 sps:$4 sm:$0xff]  }
 0x124   : > { %v1027_v19 = vadd.f32 %v15406_v49, %v1026_v18  ;;  %v1028_v21 = vpop.f32.mrb[7].mxu0  ;;  %v1965_v23 = vadd.f32 %v15406_v49, %v1964_v20  ;;  %v1966_v24 = vpop.f32.mrb[7].mxu1  ;;  %v2210_v25 = vmax.f32 %v1962_v16, 0.0  ;;  %v1272_v26 = vmax.f32 %v1024_v13, 0.0 }
 0x126   : > { %v1273_v27 = vmax.f32 %v1027_v19, 0.0  ;;  %1238 = vmatmul.mubr.bf16.gmra.mrb[112].mxu0 %v14078_v7  ;;  %2176 = vmatmul.mubr.bf16.gmra.mrb[112].mxu1 %v14079_v11  ;;  %v2211_v28 = vmax.f32 %v1965_v23, 0.0  ;;  %v14100_v11 = vld [vmem:[%s15101_s19 + $0x730] ss:$8 sps:$4 sm:$0xff]  }
 0x127   : > { %1245 = vmatprep.mubr.bf16.mxu0 %v14082_v12  ;;  %2183 = vmatprep.mubr.bf16.mxu1 %v14084_v22 }
 0x128   : > { %v1335_v30 = vpack.c.bf16 %v1273_v27, %v1272_v26  ;;  %v2273_v32 = vpack.c.bf16 %v2211_v28, %v2210_v25  ;;  %v14107_v26 = vld [vmem:[%s15101_s19 + $0xc4] ss:$8 sps:$4 sm:$0xff]  }
 0x129   : > { %v1031_v31 = vpop.f32.mrb[8].mxu0  ;;  %v1969_v36 = vpop.f32.mrb[8].mxu1 }
 0x12a   : > { %v1032_v35 = vadd.f32 %v15406_v49, %v1031_v31  ;;  %v1033_v37 = vpop.f32.mrb[9].mxu0  ;;  %1368 = vst.msk [vmem:[#allocation2 + $0x8] sm:$0xff] %vm1366_vm0, %v1335_v30  ;;  %v1970_v38 = vadd.f32 %v15406_v49, %v1969_v36  ;;  %v1971_v39 = vpop.f32.mrb[9].mxu1  ;;  %2338 = vrot.lane.b32.xlu1 %v2273_v32, %s14947_s17  ;;  %v14105_v36 = vld [vmem:[%s15101_s19 + $0xc0] ss:$8 sps:$4 sm:$0xff]  }
 0x12b   : > { %v1034_v40 = vpop.f32.mrb[10].mxu0  ;;  %v1972_v42 = vpop.f32.mrb[10].mxu1  ;;  %v14108_v37 = vld [vmem:[%s15101_s19 + $0x94] ss:$8 sps:$4 sm:$0xff]  }
 0x12c   : > { %v1035_v41 = vadd.f32 %v15406_v49, %v1034_v40  ;;  %v1036_v43 = vpop.f32.mrb[11].mxu0  ;;  %v2212_v45 = vmax.f32 %v1970_v38, 0.0  ;;  %v1973_v46 = vadd.f32 %v15406_v49, %v1972_v42  ;;  %v1974_v47 = vpop.f32.mrb[11].mxu1  ;;  %v1274_v48 = vmax.f32 %v1032_v35, 0.0 }
 0x12e   : > { %v1275_v50 = vmax.f32 %v1035_v41, 0.0  ;;  %1246 = vmatmul.mubr.bf16.gmra.mrb[116].mxu0 %v14086_v29  ;;  %v2213_v51 = vmax.f32 %v1973_v46, 0.0  ;;  %2184 = vmatmul.mubr.bf16.gmra.mrb[116].mxu1 %v14087_v33  ;;  %v14102_v33 = vld [vmem:[%s15101_s19 + $0x80] ss:$8 sps:$4 sm:$0xff]  }
 0x12f   : > { %1253 = vmatprep.mubr.bf16.mxu0 %v14088_v34  ;;  %2191 = vmatprep.mubr.bf16.mxu1 %v14090_v44 }
 0x130   : > { %v1336_v53 = vpack.c.bf16 %v1275_v50, %v1274_v48  ;;  %v15439_v57 = vpack.c.bf16 %v2213_v51, %v2212_v45  ;;  %v14110_v48 = vld [vmem:[%s15101_s19 + $0xd4] ss:$8 sps:$4 sm:$0xff]  }
 0x131   : > { %v1039_v54 = vpop.f32.mrb[12].mxu0  ;;  %v1977_v59 = vpop.f32.mrb[12].mxu1 }
 0x132   : > { %v1040_v58 = vadd.f32 %v15406_v49, %v1039_v54  ;;  %v1041_v60 = vpop.f32.mrb[13].mxu0  ;;  %1369 = vst.msk [vmem:[#allocation2 + $0x10] sm:$0xff] %vm1366_vm0, %v1336_v53  ;;  %v1978_v61 = vadd.f32 %v15406_v49, %v1977_v59  ;;  %v1979_v62 = vpop.f32.mrb[13].mxu1 }
 0x133   : > { %v1042_v63 = vpop.f32.mrb[14].mxu0  ;;  %v1980_v2 = vpop.f32.mrb[14].mxu1  ;;  %v14113_v60 = vld [vmem:[%s15101_s19 + $0xd0] ss:$8 sps:$4 sm:$0xff]  }
 0x134   : > { %v1043_v0 = vadd.f32 %v15406_v49, %v1042_v63  ;;  %v1044_v3 = vpop.f32.mrb[15].mxu0  ;;  %v2214_v5 = vmax.f32 %v1978_v61, 0.0  ;;  %v1981_v6 = vadd.f32 %v15406_v49, %v1980_v2  ;;  %v1982_v7 = vpop.f32.mrb[15].mxu1  ;;  %v1276_v8 = vmax.f32 %v1040_v58, 0.0  ;;  %v14114_v61 = vld [vmem:[%s15101_s19 + $0xa4] ss:$8 sps:$4 sm:$0xff]  }
 0x136   : > { %v1277_v9 = vmax.f32 %v1043_v0, 0.0  ;;  %1254 = vmatmul.mubr.bf16.gmra.mrb[120].mxu0 %v14092_v52  ;;  %v2215_v10 = vmax.f32 %v1981_v6, 0.0  ;;  %2192 = vmatmul.mubr.bf16.gmra.mrb[120].mxu1 %v14093_v55 }
 0x137   : > { %1261 = vmatprep.mubr.bf16.mxu0 %v14096_v56  ;;  %2199 = vmatprep.mubr.bf16.mxu1 %v14098_v4  ;;  %v14112_v56 = vld [vmem:[%s15101_s19 + $0x90] ss:$8 sps:$4 sm:$0xff]  }
 0x138   : > { %v1337_v12 = vpack.c.bf16 %v1277_v9, %v1276_v8  ;;  %v15450_v16 = vpack.c.bf16 %v2215_v10, %v2214_v5  ;;  %v14116_v9 = vld [vmem:[%s15101_s19 + $0xe4] ss:$8 sps:$4 sm:$0xff]  }
 0x139   : > { %v1047_v13 = vpop.f32.mrb[16].mxu0  ;;  %v1985_v18 = vpop.f32.mrb[16].mxu1 }
 0x13a   : > { %v1048_v17 = vadd.f32 %v15406_v49, %v1047_v13  ;;  %v1049_v19 = vpop.f32.mrb[17].mxu0  ;;  %1370 = vst.msk [vmem:[#allocation2 + $0x18] sm:$0xff] %vm1366_vm0, %v1337_v12  ;;  %v1986_v20 = vadd.f32 %v15406_v49, %v1985_v18  ;;  %v1987_v21 = vpop.f32.mrb[17].mxu1 }
 0x13b   : > { %v1050_v22 = vpop.f32.mrb[18].mxu0  ;;  %v1988_v24 = vpop.f32.mrb[18].mxu1  ;;  %v14120_v21 = vld [vmem:[%s15101_s19 + $0xb4] ss:$8 sps:$4 sm:$0xff]  }
 0x13c   : > { %v1051_v23 = vadd.f32 %v15406_v49, %v1050_v22  ;;  %v1052_v25 = vpop.f32.mrb[19].mxu0  ;;  %v2216_v27 = vmax.f32 %v1986_v20, 0.0  ;;  %v1989_v28 = vadd.f32 %v15406_v49, %v1988_v24  ;;  %v1990_v29 = vpop.f32.mrb[19].mxu1  ;;  %v1278_v30 = vmax.f32 %v1048_v17, 0.0  ;;  %v14118_v17 = vld [vmem:[%s15101_s19 + $0xa0] ss:$8 sps:$4 sm:$0xff]  }
 0x13d   : > { %v14119_v20 = vld [vmem:[%s15101_s19 + $0xe0] ss:$8 sps:$4 sm:$0xff]  }
 0x13e   : > { %v1279_v31 = vmax.f32 %v1051_v23, 0.0  ;;  %1262 = vmatmul.mubr.bf16.gmra.mrb[124].mxu0 %v14100_v11  ;;  %v2217_v32 = vmax.f32 %v1989_v28, 0.0  ;;  %2200 = vmatmul.mubr.bf16.gmra.mrb[124].mxu1 %v14101_v14 }
 0x13f   : > { %3017 = vmatprep.mubr.bf16.mxu0 %v14104_v15  ;;  %4083 = vmatprep.mubr.bf16.mxu1 %v14107_v26 }
 0x140   : > { %v1338_v34 = vpack.c.bf16 %v1279_v31, %v1278_v30  ;;  %v15461_v38 = vpack.c.bf16 %v2217_v32, %v2216_v27  ;;  %v14122_v32 = vld [vmem:[%s15101_s19 + $0xf4] ss:$8 sps:$4 sm:$0xff]  }
 0x141   : > { %v1055_v35 = vpop.f32.mrb[20].mxu0  ;;  %v1993_v40 = vpop.f32.mrb[20].mxu1 }
 0x142   : > { %v1056_v39 = vadd.f32 %v15406_v49, %v1055_v35  ;;  %v1057_v41 = vpop.f32.mrb[21].mxu0  ;;  %1371 = vst.msk [vmem:[#allocation2 + $0x20] sm:$0xff] %vm1366_vm0, %v1338_v34  ;;  %v1994_v42 = vadd.f32 %v15406_v49, %v1993_v40  ;;  %v1995_v43 = vpop.f32.mrb[21].mxu1  ;;  %v14124_v40 = vld [vmem:[%s15101_s19 + $0xb0] ss:$8 sps:$4 sm:$0xff]  }
 0x143   : > { %v1058_v44 = vpop.f32.mrb[22].mxu0  ;;  %v1996_v46 = vpop.f32.mrb[22].mxu1  ;;  %v14125_v43 = vld [vmem:[%s15101_s19 + $0xf0] ss:$8 sps:$4 sm:$0xff]  }
 0x144   : > { %v1059_v45 = vadd.f32 %v15406_v49, %v1058_v44  ;;  %v1060_v47 = vpop.f32.mrb[23].mxu0  ;;  %v2218_v50 = vmax.f32 %v1994_v42, 0.0  ;;  %v1997_v51 = vadd.f32 %v15406_v49, %v1996_v46  ;;  %v1998_v52 = vpop.f32.mrb[23].mxu1  ;;  %v1280_v53 = vmax.f32 %v1056_v39, 0.0  ;;  %v14126_v44 = vld [vmem:[%s15101_s19 + $0x184] ss:$8 sps:$4 sm:$0xff]  }
 0x146   : > { %v1281_v54 = vmax.f32 %v1059_v45, 0.0  ;;  %3018 = vmatmul.mubr.bf16.vlgmr.msra.gmra.mrb[128].mxu0 %v14102_v33  ;;  %v2219_v55 = vmax.f32 %v1997_v51, 0.0  ;;  %4084 = vmatmul.mubr.bf16.vlgmr.msra.gmra.mrb[128].mxu1 %v14105_v36 }
 0x147   : > { %3025 = vmatprep.mubr.bf16.mxu0 %v14108_v37  ;;  %4091 = vmatprep.mubr.bf16.mxu1 %v14110_v48 }
 0x148   : > { %v1339_v58 = vpack.c.bf16 %v1281_v54, %v1280_v53  ;;  %v15472_v62 = vpack.c.bf16 %v2219_v55, %v2218_v50 }
 0x149   : > { %v1063_v59 = vpop.f32.mrb[24].mxu0  ;;  %v2001_v0 = vpop.f32.mrb[24].mxu1 }
 0x14a   : > { %v1064_v63 = vadd.f32 %v15406_v49, %v1063_v59  ;;  %v1065_v2 = vpop.f32.mrb[25].mxu0  ;;  %1372 = vst.msk [vmem:[#allocation2 + $0x28] sm:$0xff] %vm1366_vm0, %v1339_v58  ;;  %v2002_v3 = vadd.f32 %v15406_v49, %v2001_v0  ;;  %v2003_v4 = vpop.f32.mrb[25].mxu1 }
 0x14b   : > { %v1066_v5 = vpop.f32.mrb[26].mxu0  ;;  %v2004_v7 = vpop.f32.mrb[26].mxu1  ;;  %v14130_v2 = vld [vmem:[%s15101_s19 + $0x180] ss:$8 sps:$4 sm:$0xff]  }
 0x14c   : > { %v1067_v6 = vadd.f32 %v15406_v49, %v1066_v5  ;;  %v1068_v8 = vpop.f32.mrb[27].mxu0  ;;  %v2220_v10 = vmax.f32 %v2002_v3, 0.0  ;;  %v2005_v11 = vadd.f32 %v15406_v49, %v2004_v7  ;;  %v2006_v12 = vpop.f32.mrb[27].mxu1  ;;  %v1282_v13 = vmax.f32 %v1064_v63, 0.0  ;;  %v14131_v5 = vld [vmem:[%s15101_s19 + $0x1c0] ss:$8 sps:$4 sm:$0xff]  }
 0x14e   : > { %v1283_v14 = vmax.f32 %v1067_v6, 0.0  ;;  %3026 = vmatmul.mubr.bf16.gmra.mrb[132].mxu0 %v14112_v56  ;;  %v2221_v15 = vmax.f32 %v2005_v11, 0.0  ;;  %4092 = vmatmul.mubr.bf16.gmra.mrb[132].mxu1 %v14113_v60  ;;  %v14128_v56 = vld [vmem:[%s15101_s19 + $0x1c4] ss:$8 sps:$4 sm:$0xff]   ;;  %v14132_v6 = vld [vmem:[%s15101_s19 + $0x194] ss:$8 sps:$4 sm:$0xff]  }
 0x14f   : > { %3033 = vmatprep.mubr.bf16.mxu0 %v14114_v61  ;;  %4099 = vmatprep.mubr.bf16.mxu1 %v14116_v9 }
 0x150   : > { %v1340_v18 = vpack.c.bf16 %v1283_v14, %v1282_v13  ;;  %v15483_v22 = vpack.c.bf16 %v2221_v15, %v2220_v10 }
 0x151   : > { %v1071_v19 = vpop.f32.mrb[28].mxu0  ;;  %v2009_v24 = vpop.f32.mrb[28].mxu1 }
 0x152   : > { %v1072_v23 = vadd.f32 %v15406_v49, %v1071_v19  ;;  %v1073_v25 = vpop.f32.mrb[29].mxu0  ;;  %1373 = vst.msk [vmem:[#allocation2 + $0x30] sm:$0xff] %vm1366_vm0, %v1340_v18  ;;  %v2010_v26 = vadd.f32 %v15406_v49, %v2009_v24  ;;  %v2011_v27 = vpop.f32.mrb[29].mxu1  ;;  %v14134_v18 = vld [vmem:[%s15101_s19 + $0x1d4] ss:$8 sps:$4 sm:$0xff]  }
 0x153   : > { %v1074_v28 = vpop.f32.mrb[30].mxu0  ;;  %v2012_v30 = vpop.f32.mrb[30].mxu1  ;;  %v14136_v27 = vld [vmem:[%s15101_s19 + $0x190] ss:$8 sps:$4 sm:$0xff]  }
 0x154   : > { %v1075_v29 = vadd.f32 %v15406_v49, %v1074_v28  ;;  %v1076_v31 = vpop.f32.mrb[31].mxu0  ;;  %v2222_v33 = vmax.f32 %v2010_v26, 0.0  ;;  %v2013_v34 = vadd.f32 %v15406_v49, %v2012_v30  ;;  %v2014_v35 = vpop.f32.mrb[31].mxu1  ;;  %v1284_v36 = vmax.f32 %v1072_v23, 0.0  ;;  %v14226_v26 = vld [vmem:[%s18772_s4] sm:$0xff]  }
 0x155   : > { %v14137_v30 = vld [vmem:[%s15101_s19 + $0x1d0] ss:$8 sps:$4 sm:$0xff]   ;;  %v14138_v31 = vld [vmem:[%s15101_s19 + $0x1a4] ss:$8 sps:$4 sm:$0xff]   ;;  %5840 = vmatpush1.bf16.msra.mxu0 %v14226_v26 }
 0x156   : > { %v1285_v37 = vmax.f32 %v1075_v29, 0.0  ;;  %3034 = vmatmul.mubr.bf16.gmra.mrb[136].mxu0 %v14118_v17  ;;  %v2223_v39 = vmax.f32 %v2013_v34, 0.0  ;;  %4100 = vmatmul.mubr.bf16.gmra.mrb[136].mxu1 %v14119_v20 }
 0x157   : > { %3041 = vmatprep.mubr.bf16.mxu0 %v14120_v21  ;;  %4107 = vmatprep.mubr.bf16.mxu1 %v14122_v32 }
 0x158   : > { %v1341_v41 = vpack.c.bf16 %v1285_v37, %v1284_v36  ;;  %v15494_v45 = vpack.c.bf16 %v2223_v39, %v2222_v33  ;;  %5841 = vmatprep.subr.bf16.mxu0 %v14946_v1 }
 0x159   : > { %v1079_v42 = vpop.f32.mrb[32].mxu0  ;;  %v2017_v47 = vpop.f32.mrb[32].mxu1 }
 0x15a   : > { %v1080_v46 = vadd.f32 %v15406_v49, %v1079_v42  ;;  %v1081_v48 = vpop.f32.mrb[33].mxu0  ;;  %1374 = vst.msk [vmem:[#allocation2 + $0x38] sm:$0xff] %vm1366_vm0, %v1341_v41  ;;  %v2018_v50 = vadd.f32 %v15406_v49, %v2017_v47  ;;  %v2019_v51 = vpop.f32.mrb[33].mxu1 }
 0x15b   : > { %v1082_v52 = vpop.f32.mrb[34].mxu0  ;;  %v2020_v54 = vpop.f32.mrb[34].mxu1 }
 0x15c   : > { %v1083_v53 = vadd.f32 %v15406_v49, %v1082_v52  ;;  %v1084_v55 = vpop.f32.mrb[35].mxu0  ;;  %v2224_v58 = vmax.f32 %v2018_v50, 0.0  ;;  %v2021_v59 = vadd.f32 %v15406_v49, %v2020_v54  ;;  %v2022_v60 = vpop.f32.mrb[35].mxu1  ;;  %v1286_v61 = vmax.f32 %v1080_v46, 0.0  ;;  %v14142_v52 = vld [vmem:[%s15101_s19 + $0x1a0] ss:$8 sps:$4 sm:$0xff]  }
 0x15d   : > { %v14143_v55 = vld [vmem:[%s15101_s19 + $0x1e0] ss:$8 sps:$4 sm:$0xff]  }
 0x15e   : > { %v1287_v63 = vmax.f32 %v1083_v53, 0.0  ;;  %3042 = vmatmul.mubr.bf16.gmra.mrb[140].mxu0 %v14124_v40  ;;  %v2225_v0 = vmax.f32 %v2021_v59, 0.0  ;;  %4108 = vmatmul.mubr.bf16.gmra.mrb[140].mxu1 %v14125_v43  ;;  %v14140_v43 = vld [vmem:[%s15101_s19 + $0x1e4] ss:$8 sps:$4 sm:$0xff]  }
 0x15f   : > { %3049 = vmatprep.mubr.bf16.mxu0 %v14126_v44  ;;  %4115 = vmatprep.mubr.bf16.mxu1 %v14128_v56  ;;  %v14144_v56 = vld [vmem:[%s15101_s19 + $0x1b4] ss:$8 sps:$4 sm:$0xff]  }
 0x160   : > { %v1342_v3 = vpack.c.bf16 %v1287_v63, %v1286_v61  ;;  %v15505_v7 = vpack.c.bf16 %v2225_v0, %v2224_v58 }
 0x161   : > { %v1087_v4 = vpop.f32.mrb[36].mxu0  ;;  %v2025_v9 = vpop.f32.mrb[36].mxu1 }
 0x162   : > { %v1088_v8 = vadd.f32 %v15406_v49, %v1087_v4  ;;  %v1089_v10 = vpop.f32.mrb[37].mxu0  ;;  %1375 = vst.msk [vmem:[#allocation2 + $0x40] sm:$0xff] %vm1366_vm0, %v1342_v3  ;;  %v2026_v11 = vadd.f32 %v15406_v49, %v2025_v9  ;;  %v2027_v12 = vpop.f32.mrb[37].mxu1 }
 0x163   : > { %v1090_v13 = vpop.f32.mrb[38].mxu0  ;;  %v2028_v15 = vpop.f32.mrb[38].mxu1 }
 0x164   : > { %v1091_v14 = vadd.f32 %v15406_v49, %v1090_v13  ;;  %v1092_v17 = vpop.f32.mrb[39].mxu0  ;;  %v2226_v19 = vmax.f32 %v2026_v11, 0.0  ;;  %v2029_v20 = vadd.f32 %v15406_v49, %v2028_v15  ;;  %v2030_v21 = vpop.f32.mrb[39].mxu1  ;;  %v1288_v23 = vmax.f32 %v1088_v8, 0.0  ;;  %v14148_v15 = vld [vmem:[%s15101_s19 + $0x1b0] ss:$8 sps:$4 sm:$0xff]  }
 0x166   : > { %v1289_v24 = vmax.f32 %v1091_v14, 0.0  ;;  %3050 = vmatmul.mubr.bf16.gmra.mrb[144].mxu0 %v14130_v2  ;;  %v2227_v25 = vmax.f32 %v2029_v20, 0.0  ;;  %4116 = vmatmul.mubr.bf16.gmra.mrb[144].mxu1 %v14131_v5  ;;  %v14239_v14 = vld [vmem:[%s18772_s4 + $0x8] sm:$0xff]  }
 0x167   : > { %3057 = vmatprep.mubr.bf16.mxu0 %v14132_v6  ;;  %4123 = vmatprep.mubr.bf16.mxu1 %v14134_v18  ;;  %v14146_v6 = vld [vmem:[%s15101_s19 + $0x1f4] ss:$8 sps:$4 sm:$0xff]   ;;  %v14150_v20 = vld [vmem:[%s15101_s19 + $0x284] ss:$8 sps:$4 sm:$0xff]  }
 0x168   : > { %v1343_v28 = vpack.c.bf16 %v1289_v24, %v1288_v23  ;;  %v15519_v32 = vpack.c.bf16 %v2227_v25, %v2226_v19  ;;  %v14149_v19 = vld [vmem:[%s15101_s19 + $0x1f0] ss:$8 sps:$4 sm:$0xff]   ;;  %5842 = vmatpush1.bf16.msra.mxu0 %v14239_v14 }
 0x169   : > { %v1095_v29 = vpop.f32.mrb[40].mxu0  ;;  %v2033_v34 = vpop.f32.mrb[40].mxu1  ;;  %5843 = vmatprep.subr.bf16.mxu0 %v14946_v1 }
 0x16a   : > { %v1096_v33 = vadd.f32 %v15406_v49, %v1095_v29  ;;  %v1097_v35 = vpop.f32.mrb[41].mxu0  ;;  %1376 = vst.msk [vmem:[#allocation2 + $0x48] sm:$0xff] %vm1366_vm0, %v1343_v28  ;;  %v2034_v36 = vadd.f32 %v15406_v49, %v2033_v34  ;;  %v2035_v37 = vpop.f32.mrb[41].mxu1 }
 0x16b   : > { %v1098_v39 = vpop.f32.mrb[42].mxu0  ;;  %v2036_v41 = vpop.f32.mrb[42].mxu1 }
 0x16c   : > { %v1099_v40 = vadd.f32 %v15406_v49, %v1098_v39  ;;  %v1100_v42 = vpop.f32.mrb[43].mxu0  ;;  %v2228_v44 = vmax.f32 %v2034_v36, 0.0  ;;  %v2037_v46 = vadd.f32 %v15406_v49, %v2036_v41  ;;  %v2038_v47 = vpop.f32.mrb[43].mxu1  ;;  %v1290_v48 = vmax.f32 %v1096_v33, 0.0  ;;  %v15536_v49 = vld [vmem:[%s18771_s3] ss:$0 sm:$0xff] }
 0x16d   : > { %v14152_v33 = vld [vmem:[%s15101_s19 + $0x2c4] ss:$8 sps:$4 sm:$0xff]   ;;  %v14154_v41 = vld [vmem:[%s15101_s19 + $0x280] ss:$8 sps:$4 sm:$0xff]  }
 0x16e   : > { %v1291_v50 = vmax.f32 %v1099_v40, 0.0  ;;  %3058 = vmatmul.mubr.bf16.gmra.mrb[148].mxu0 %v14136_v27  ;;  %v2229_v51 = vmax.f32 %v2037_v46, 0.0  ;;  %4124 = vmatmul.mubr.bf16.gmra.mrb[148].mxu1 %v14137_v30  ;;  %v14156_v46 = vld [vmem:[%s15101_s19 + $0x294] ss:$8 sps:$4 sm:$0xff]  }
 0x16f   : > { %3065 = vmatprep.mubr.bf16.mxu0 %v14138_v31  ;;  %4131 = vmatprep.mubr.bf16.mxu1 %v14140_v43 }
 0x170   : > { %v1344_v53 = vpack.c.bf16 %v1291_v50, %v1290_v48  ;;  %v15531_v58 = vpack.c.bf16 %v2229_v51, %v2228_v44  ;;  %v14155_v44 = vld [vmem:[%s15101_s19 + $0x2c0] ss:$8 sps:$4 sm:$0xff]  }
 0x171   : > { %v1103_v54 = vpop.f32.mrb[44].mxu0  ;;  %v2041_v60 = vpop.f32.mrb[44].mxu1 }
 0x172   : > { %v1104_v59 = vadd.f32 %v15536_v49, %v1103_v54  ;;  %v1105_v61 = vpop.f32.mrb[45].mxu0  ;;  %1377 = vst.msk [vmem:[#allocation2 + $0x50] sm:$0xff] %vm1366_vm0, %v1344_v53  ;;  %v2042_v63 = vadd.f32 %v15536_v49, %v2041_v60  ;;  %v2043_v0 = vpop.f32.mrb[45].mxu1  ;;  %v14158_v60 = vld [vmem:[%s15101_s19 + $0x2d4] ss:$8 sps:$4 sm:$0xff]  }
 0x173   : > { %v1106_v2 = vpop.f32.mrb[46].mxu0  ;;  %v2044_v4 = vpop.f32.mrb[46].mxu1 }
 0x174   : > { %v1107_v3 = vadd.f32 %v15536_v49, %v1106_v2  ;;  %v1108_v5 = vpop.f32.mrb[47].mxu0  ;;  %v2230_v8 = vmax.f32 %v2042_v63, 0.0  ;;  %v2045_v9 = vadd.f32 %v15536_v49, %v2044_v4  ;;  %v2046_v10 = vpop.f32.mrb[47].mxu1  ;;  %v1292_v11 = vmax.f32 %v1104_v59, 0.0 }
 0x175   : > { %v14160_v5 = vld [vmem:[%s15101_s19 + $0x290] ss:$8 sps:$4 sm:$0xff]   ;;  %v14162_v10 = vld [vmem:[%s15101_s19 + $0x2a4] ss:$8 sps:$4 sm:$0xff]  }
 0x176   : > { %v1293_v12 = vmax.f32 %v1107_v3, 0.0  ;;  %3066 = vmatmul.mubr.bf16.gmra.mrb[152].mxu0 %v14142_v52  ;;  %v2231_v13 = vmax.f32 %v2045_v9, 0.0  ;;  %4132 = vmatmul.mubr.bf16.gmra.mrb[152].mxu1 %v14143_v55  ;;  %v14161_v9 = vld [vmem:[%s15101_s19 + $0x2d0] ss:$8 sps:$4 sm:$0xff]  }
 0x177   : > { %3073 = vmatprep.mubr.bf16.mxu0 %v14144_v56  ;;  %4139 = vmatprep.mubr.bf16.mxu1 %v14146_v6 }
 0x178   : > { %v1345_v17 = vpack.c.bf16 %v1293_v12, %v1292_v11  ;;  %v15550_v21 = vpack.c.bf16 %v2231_v13, %v2230_v8 }
 0x179   : > { %v1111_v18 = vpop.f32.mrb[48].mxu0  ;;  %v2049_v24 = vpop.f32.mrb[48].mxu1 }
 0x17a   : > { %v1112_v23 = vadd.f32 %v15536_v49, %v1111_v18  ;;  %v1113_v25 = vpop.f32.mrb[49].mxu0  ;;  %1378 = vst.msk [vmem:[#allocation2 + $0x58] sm:$0xff] %vm1366_vm0, %v1345_v17  ;;  %v2050_v26 = vadd.f32 %v15536_v49, %v2049_v24  ;;  %v2051_v27 = vpop.f32.mrb[49].mxu1 }
 0x17b   : > { %v1114_v28 = vpop.f32.mrb[50].mxu0  ;;  %v2052_v30 = vpop.f32.mrb[50].mxu1  ;;  %v14164_v25 = vld [vmem:[%s15101_s19 + $0x2e4] ss:$8 sps:$4 sm:$0xff]  }
 0x17c   : > { %v1115_v29 = vadd.f32 %v15536_v49, %v1114_v28  ;;  %v1116_v31 = vpop.f32.mrb[51].mxu0  ;;  %v2232_v34 = vmax.f32 %v2050_v26, 0.0  ;;  %v2053_v35 = vadd.f32 %v15536_v49, %v2052_v30  ;;  %v2054_v36 = vpop.f32.mrb[51].mxu1  ;;  %v1294_v37 = vmax.f32 %v1112_v23, 0.0 }
 0x17d   : > { %v14167_v36 = vld [vmem:[%s15101_s19 + $0x2e0] ss:$8 sps:$4 sm:$0xff]  }
 0x17e   : > { %v1295_v39 = vmax.f32 %v1115_v29, 0.0  ;;  %3074 = vmatmul.mubr.bf16.gmra.mrb[156].mxu0 %v14148_v15  ;;  %v2233_v40 = vmax.f32 %v2053_v35, 0.0  ;;  %4140 = vmatmul.mubr.bf16.gmra.mrb[156].mxu1 %v14149_v19  ;;  %v14252_v15 = vld [vmem:[%s18772_s4 + $0x10] sm:$0xff]  }
 0x17f   : > { %3081 = vmatprep.mubr.bf16.mxu0 %v14150_v20  ;;  %4147 = vmatprep.mubr.bf16.mxu1 %v14152_v33  ;;  %v14166_v33 = vld [vmem:[%s15101_s19 + $0x2a0] ss:$8 sps:$4 sm:$0xff]  }
 0x180   : > { %v1346_v42 = vpack.c.bf16 %v1295_v39, %v1294_v37  ;;  %v15562_v47 = vpack.c.bf16 %v2233_v40, %v2232_v34  ;;  %5844 = vmatpush1.bf16.msra.mxu0 %v14252_v15  ;;  %v14168_v37 = vld [vmem:[%s15101_s19 + $0x2b4] ss:$8 sps:$4 sm:$0xff]  }
 0x181   : > { %v1119_v43 = vpop.f32.mrb[52].mxu0  ;;  %v2057_v50 = vpop.f32.mrb[52].mxu1  ;;  %5845 = vmatprep.subr.bf16.mxu0 %v14946_v1 }
 0x182   : > { %v1120_v48 = vadd.f32 %v15536_v49, %v1119_v43  ;;  %v1121_v51 = vpop.f32.mrb[53].mxu0  ;;  %1379 = vst.msk [vmem:[#allocation2 + $0x60] sm:$0xff] %vm1366_vm0, %v1346_v42  ;;  %v2058_v52 = vadd.f32 %v15536_v49, %v2057_v50  ;;  %v2059_v53 = vpop.f32.mrb[53].mxu1 }
 0x183   : > { %v1122_v54 = vpop.f32.mrb[54].mxu0  ;;  %v2060_v56 = vpop.f32.mrb[54].mxu1 }
 0x184   : > { %v1123_v55 = vadd.f32 %v15536_v49, %v1122_v54  ;;  %v1124_v59 = vpop.f32.mrb[55].mxu0  ;;  %v2234_v61 = vmax.f32 %v2058_v52, 0.0  ;;  %v2061_v63 = vadd.f32 %v15536_v49, %v2060_v56  ;;  %v2062_v0 = vpop.f32.mrb[55].mxu1  ;;  %v1296_v2 = vmax.f32 %v1120_v48, 0.0  ;;  %v14170_v52 = vld [vmem:[%s15101_s19 + $0x2f4] ss:$8 sps:$4 sm:$0xff]  }
 0x186   : > { %v1297_v3 = vmax.f32 %v1123_v55, 0.0  ;;  %3082 = vmatmul.mubr.bf16.gmra.mrb[160].mxu0 %v14154_v41  ;;  %v2235_v4 = vmax.f32 %v2061_v63, 0.0  ;;  %4148 = vmatmul.mubr.bf16.gmra.mrb[160].mxu1 %v14155_v44  ;;  %v14172_v63 = vld [vmem:[%s15101_s19 + $0x2b0] ss:$8 sps:$4 sm:$0xff]  }
 0x187   : > { %3089 = vmatprep.mubr.bf16.mxu0 %v14156_v46  ;;  %4155 = vmatprep.mubr.bf16.mxu1 %v14158_v60 }
 0x188   : > { %v1347_v6 = vpack.c.bf16 %v1297_v3, %v1296_v2  ;;  %v15573_v11 = vpack.c.bf16 %v2235_v4, %v2234_v61  ;;  %v14173_v3 = vld [vmem:[%s15101_s19 + $0x2f0] ss:$8 sps:$4 sm:$0xff]  }
 0x189   : > { %v1127_v8 = vpop.f32.mrb[56].mxu0  ;;  %v2065_v13 = vpop.f32.mrb[56].mxu1 }
 0x18a   : > { %v1128_v12 = vadd.f32 %v15536_v49, %v1127_v8  ;;  %v1129_v14 = vpop.f32.mrb[57].mxu0  ;;  %1380 = vst.msk [vmem:[#allocation2 + $0x68] sm:$0xff] %vm1366_vm0, %v1347_v6  ;;  %v2066_v17 = vadd.f32 %v15536_v49, %v2065_v13  ;;  %v2067_v18 = vpop.f32.mrb[57].mxu1 }
 0x18b   : > { %v1130_v19 = vpop.f32.mrb[58].mxu0  ;;  %v2068_v23 = vpop.f32.mrb[58].mxu1 }
 0x18c   : > { %v1131_v20 = vadd.f32 %v15536_v49, %v1130_v19  ;;  %v1132_v24 = vpop.f32.mrb[59].mxu0  ;;  %v2236_v26 = vmax.f32 %v2066_v17, 0.0  ;;  %v2069_v27 = vadd.f32 %v15536_v49, %v2068_v23  ;;  %v2070_v28 = vpop.f32.mrb[59].mxu1  ;;  %v1298_v29 = vmax.f32 %v1128_v12, 0.0  ;;  %v14176_v19 = vld [vmem:[%s15101_s19 + $0x3c4] ss:$8 sps:$4 sm:$0xff]  }
 0x18e   : > { %v1299_v30 = vmax.f32 %v1131_v20, 0.0  ;;  %3090 = vmatmul.mubr.bf16.gmra.mrb[164].mxu0 %v14160_v5  ;;  %v2237_v31 = vmax.f32 %v2069_v27, 0.0  ;;  %4156 = vmatmul.mubr.bf16.gmra.mrb[164].mxu1 %v14161_v9  ;;  %v14174_v9 = vld [vmem:[%s15101_s19 + $0x384] ss:$8 sps:$4 sm:$0xff]  }
 0x18f   : > { %3097 = vmatprep.mubr.bf16.mxu0 %v14162_v10  ;;  %4163 = vmatprep.mubr.bf16.mxu1 %v14164_v25  ;;  %v14265_v10 = vld [vmem:[%s18772_s4 + $0x18] sm:$0xff]  }
 0x190   : > { %v1348_v34 = vpack.c.bf16 %v1299_v30, %v1298_v29  ;;  %v15588_v39 = vpack.c.bf16 %v2237_v31, %v2236_v26  ;;  %5846 = vmatpush1.bf16.msra.mxu0 %v14265_v10  ;;  %v14185_v10 = vld [vmem:[%s15101_s19 + $0x3d0] ss:$8 sps:$4 sm:$0xff]  }
 0x191   : > { %v1135_v35 = vpop.f32.mrb[60].mxu0  ;;  %v2073_v41 = vpop.f32.mrb[60].mxu1  ;;  %5847 = vmatprep.subr.bf16.mxu0 %v14946_v1 }
 0x192   : > { %v1136_v40 = vadd.f32 %v15536_v49, %v1135_v35  ;;  %v1137_v42 = vpop.f32.mrb[61].mxu0  ;;  %1381 = vst.msk [vmem:[#allocation2 + $0x70] sm:$0xff] %vm1366_vm0, %v1348_v34  ;;  %v2074_v43 = vadd.f32 %v15536_v49, %v2073_v41  ;;  %v2075_v44 = vpop.f32.mrb[61].mxu1 }
 0x193   : > { %v1138_v46 = vpop.f32.mrb[62].mxu0  ;;  %v2076_v50 = vpop.f32.mrb[62].mxu1  ;;  %v14179_v42 = vld [vmem:[%s15101_s19 + $0x3c0] ss:$8 sps:$4 sm:$0xff]  }
 0x194   : > { %v1139_v48 = vadd.f32 %v15536_v49, %v1138_v46  ;;  %v1140_v51 = vpop.f32.mrb[63].mxu0  ;;  %v2238_v53 = vmax.f32 %v2074_v43, 0.0  ;;  %v2077_v54 = vadd.f32 %v15536_v49, %v2076_v50  ;;  %v2078_v55 = vpop.f32.mrb[63].mxu1  ;;  %v1300_v59 = vmax.f32 %v1136_v40, 0.0  ;;  %v14180_v43 = vld [vmem:[%s15101_s19 + $0x394] ss:$8 sps:$4 sm:$0xff]  }
 0x195   : > { %v2337_v56 = vpop.permute.xlu0 %2336  ;;  %v14182_v50 = vld [vmem:[%s15101_s19 + $0x3d4] ss:$8 sps:$4 sm:$0xff]  }
 0x196   : > { %v1301_v60 = vmax.f32 %v1139_v48, 0.0  ;;  %2433 = vst.msk [vmem:[#allocation2] sm:$0xff] %vm2432_vm1, %v2337_v56  ;;  %3098 = vmatmul.mubr.bf16.gmra.mrb[168].mxu0 %v14166_v33  ;;  %v2239_v61 = vmax.f32 %v2077_v54, 0.0  ;;  %4164 = vmatmul.mubr.bf16.gmra.mrb[168].mxu1 %v14167_v36  ;;  %v14178_v36 = vld [vmem:[%s15101_s19 + $0x380] ss:$8 sps:$4 sm:$0xff]  }
 0x197   : > { %3105 = vmatprep.mubr.bf16.mxu0 %v14168_v37  ;;  %4171 = vmatprep.mubr.bf16.mxu1 %v14170_v52 }
 0x198   : > { %v1349_v0 = vpack.c.bf16 %v1301_v60, %v1300_v59  ;;  %v15599_v4 = vpack.c.bf16 %v2239_v61, %v2238_v53  ;;  %v14278_v59 = vld [vmem:[%s18772_s4 + $0x20] sm:$0xff]  }
 0x199   : > { %v1143_v2 = vpop.f32.mrb[64].mxu0  ;;  %v2081_v6 = vpop.f32.mrb[64].mxu1  ;;  %5848 = vmatpush1.bf16.msra.mxu0 %v14278_v59 }
 0x19a   : > { %v1144_v5 = vadd.f32 %v15536_v49, %v1143_v2  ;;  %v1145_v8 = vpop.f32.mrb[65].mxu0  ;;  %1382 = vst.msk [vmem:[#allocation2 + $0x78] sm:$0xff] %vm1366_vm0, %v1349_v0  ;;  %v2082_v12 = vadd.f32 %v15536_v49, %v2081_v6  ;;  %v2083_v13 = vpop.f32.mrb[65].mxu1  ;;  %5849 = vmatprep.subr.bf16.mxu0 %v14946_v1 }
 0x19b   : > { %v1146_v14 = vpop.f32.mrb[66].mxu0  ;;  %v2084_v17 = vpop.f32.mrb[66].mxu1 }
 0x19c   : > { %v1147_v15 = vadd.f32 %v15536_v49, %v1146_v14  ;;  %v1148_v18 = vpop.f32.mrb[67].mxu0  ;;  %v2240_v20 = vmax.f32 %v2082_v12, 0.0  ;;  %v2085_v23 = vadd.f32 %v15536_v49, %v2084_v17  ;;  %v2086_v24 = vpop.f32.mrb[67].mxu1  ;;  %v1302_v26 = vmax.f32 %v1144_v5, 0.0  ;;  %v14184_v5 = vld [vmem:[%s15101_s19 + $0x390] ss:$8 sps:$4 sm:$0xff]  }
 0x19d   : > { %v2339_v25 = vpop.permute.xlu1 %2338  ;;  %v14186_v12 = vld [vmem:[%s15101_s19 + $0x3a4] ss:$8 sps:$4 sm:$0xff]  }
 0x19e   : > { %v1303_v27 = vmax.f32 %v1147_v15, 0.0  ;;  %2434 = vst.msk [vmem:[#allocation2 + $0x8] sm:$0xff] %vm2432_vm1, %v2339_v25  ;;  %3106 = vmatmul.mubr.bf16.gmra.mrb[172].mxu0 %v14172_v63  ;;  %v2241_v28 = vmax.f32 %v2085_v23, 0.0  ;;  %4172 = vmatmul.mubr.bf16.gmra.mrb[172].mxu1 %v14173_v3  ;;  %v14188_v17 = vld [vmem:[%s15101_s19 + $0x3e4] ss:$8 sps:$4 sm:$0xff]  }
 0x19f   : > { %3113 = vmatprep.mubr.bf16.mxu0 %v14174_v9  ;;  %4179 = vmatprep.mubr.bf16.mxu1 %v14176_v19 }
 0x1a0   : > { %v1350_v29 = vpack.c.bf16 %v1303_v27, %v1302_v26  ;;  %v15613_v31 = vpack.c.bf16 %v2241_v28, %v2240_v20 }
 0x1a1   : > { %v1151_v30 = vpop.f32.mrb[68].mxu0  ;;  %v2089_v34 = vpop.f32.mrb[68].mxu1 }
 0x1a2   : > { %v1152_v33 = vadd.f32 %v15536_v49, %v1151_v30  ;;  %v1153_v35 = vpop.f32.mrb[69].mxu0  ;;  %1383 = vst.msk [vmem:[#allocation2 + $0x80] sm:$0xff] %vm1366_vm0, %v1350_v29  ;;  %v2090_v37 = vadd.f32 %v15536_v49, %v2089_v34  ;;  %v2091_v40 = vpop.f32.mrb[69].mxu1  ;;  %v14190_v34 = vld [vmem:[%s15101_s19 + $0x3a0] ss:$8 sps:$4 sm:$0xff]  }
 0x1a3   : > { %v1154_v41 = vpop.f32.mrb[70].mxu0  ;;  %v2092_v46 = vpop.f32.mrb[70].mxu1  ;;  %v14191_v40 = vld [vmem:[%s15101_s19 + $0x3e0] ss:$8 sps:$4 sm:$0xff]  }
 0x1a4   : > { %v1155_v44 = vadd.f32 %v15536_v49, %v1154_v41  ;;  %v1156_v48 = vpop.f32.mrb[71].mxu0  ;;  %v2242_v51 = vmax.f32 %v2090_v37, 0.0  ;;  %v2093_v52 = vadd.f32 %v15536_v49, %v2092_v46  ;;  %v2094_v53 = vpop.f32.mrb[71].mxu1  ;;  %v1304_v54 = vmax.f32 %v1152_v33, 0.0  ;;  %v14192_v41 = vld [vmem:[%s15101_s19 + $0x3b4] ss:$8 sps:$4 sm:$0xff]  }
 0x1a5   : > { %v14194_v46 = vld [vmem:[%s15101_s19 + $0x3f4] ss:$8 sps:$4 sm:$0xff]  }
 0x1a6   : > { %v1305_v55 = vmax.f32 %v1155_v44, 0.0  ;;  %3114 = vmatmul.mubr.bf16.gmra.mrb[176].mxu0 %v14178_v36  ;;  %v2243_v56 = vmax.f32 %v2093_v52, 0.0  ;;  %4180 = vmatmul.mubr.bf16.gmra.mrb[176].mxu1 %v14179_v42 }
 0x1a7   : > { %3121 = vmatprep.mubr.bf16.mxu0 %v14180_v43  ;;  %4187 = vmatprep.mubr.bf16.mxu1 %v14182_v50 }
 0x1a8   : > { %v1351_v60 = vpack.c.bf16 %v1305_v55, %v1304_v54  ;;  %v15627_v63 = vpack.c.bf16 %v2243_v56, %v2242_v51  ;;  %v14291_v55 = vld [vmem:[%s18772_s4 + $0x28] sm:$0xff]  }
 0x1a9   : > { %v1159_v61 = vpop.f32.mrb[72].mxu0  ;;  %v2097_v2 = vpop.f32.mrb[72].mxu1  ;;  %5850 = vmatpush1.bf16.msra.mxu0 %v14291_v55  ;;  %v14300_v55 = vld [vmem:[%s18772_s4 + $0x30] sm:$0xff]  }
 0x1aa   : > { %v1160_v0 = vadd.f32 %v15536_v49, %v1159_v61  ;;  %v1161_v3 = vpop.f32.mrb[73].mxu0  ;;  %1384 = vst.msk [vmem:[#allocation2 + $0x88] sm:$0xff] %vm1366_vm0, %v1351_v60  ;;  %v2098_v6 = vadd.f32 %v15536_v49, %v2097_v2  ;;  %v2099_v8 = vpop.f32.mrb[73].mxu1  ;;  %5851 = vmatprep.subr.bf16.mxu0 %v14946_v1 }
 0x1ab   : > { %v1162_v9 = vpop.f32.mrb[74].mxu0  ;;  %v2100_v14 = vpop.f32.mrb[74].mxu1  ;;  %v14196_v3 = vld [vmem:[%s15101_s19 + $0x3b0] ss:$8 sps:$4 sm:$0xff]  }
 0x1ac   : > { %v1163_v13 = vadd.f32 %v15536_v49, %v1162_v9  ;;  %v1164_v15 = vpop.f32.mrb[75].mxu0  ;;  %v2244_v18 = vmax.f32 %v2098_v6, 0.0  ;;  %v2101_v19 = vadd.f32 %v15536_v49, %v2100_v14  ;;  %v2102_v20 = vpop.f32.mrb[75].mxu1  ;;  %v1306_v23 = vmax.f32 %v1160_v0, 0.0  ;;  %v14197_v9 = vld [vmem:[%s15101_s19 + $0x3f0] ss:$8 sps:$4 sm:$0xff]  }
 0x1ad   : > { %v14200_v15 = vld [vmem:[%s15101_s19 + $0x4c4] ss:$8 sps:$4 sm:$0xff]   ;;  %5852 = vmatpush1.bf16.msra.mxu0 %v14300_v55 }
 0x1ae   : > { %v1307_v24 = vmax.f32 %v1163_v13, 0.0  ;;  %3122 = vmatmul.mubr.bf16.gmra.mrb[180].mxu0 %v14184_v5  ;;  %v2245_v25 = vmax.f32 %v2101_v19, 0.0  ;;  %4188 = vmatmul.mubr.bf16.gmra.mrb[180].mxu1 %v14185_v10  ;;  %v14198_v10 = vld [vmem:[%s15101_s19 + $0x484] ss:$8 sps:$4 sm:$0xff]  }
 0x1af   : > { %3129 = vmatprep.mubr.bf16.mxu0 %v14186_v12  ;;  %4195 = vmatprep.mubr.bf16.mxu1 %v14188_v17 }
 0x1b0   : > { %v1352_v26 = vpack.c.bf16 %v1307_v24, %v1306_v23  ;;  %v15639_v28 = vpack.c.bf16 %v2245_v25, %v2244_v18  ;;  %5853 = vmatprep.subr.bf16.mxu0 %v14946_v1 }
 0x1b1   : > { %v1167_v27 = vpop.f32.mrb[76].mxu0  ;;  %v2105_v30 = vpop.f32.mrb[76].mxu1 }
 0x1b2   : > { %v1168_v29 = vadd.f32 %v15536_v49, %v1167_v27  ;;  %v1169_v33 = vpop.f32.mrb[77].mxu0  ;;  %1385 = vst.msk [vmem:[#allocation2 + $0x90] sm:$0xff] %vm1366_vm0, %v1352_v26  ;;  %v2106_v35 = vadd.f32 %v15536_v49, %v2105_v30  ;;  %v2107_v36 = vpop.f32.mrb[77].mxu1 }
 0x1b3   : > { %v1170_v37 = vpop.f32.mrb[78].mxu0  ;;  %v2108_v43 = vpop.f32.mrb[78].mxu1 }
 0x1b4   : > { %v1171_v42 = vadd.f32 %v15536_v49, %v1170_v37  ;;  %v1172_v44 = vpop.f32.mrb[79].mxu0  ;;  %v2246_v48 = vmax.f32 %v2106_v35, 0.0  ;;  %v2109_v50 = vadd.f32 %v15536_v49, %v2108_v43  ;;  %v2110_v51 = vpop.f32.mrb[79].mxu1  ;;  %v1308_v52 = vmax.f32 %v1168_v29, 0.0 }
 0x1b6   : > { %v1309_v53 = vmax.f32 %v1171_v42, 0.0  ;;  %3130 = vmatmul.mubr.bf16.gmra.mrb[184].mxu0 %v14190_v34  ;;  %v2247_v54 = vmax.f32 %v2109_v50, 0.0  ;;  %4196 = vmatmul.mubr.bf16.gmra.mrb[184].mxu1 %v14191_v40  ;;  %v14202_v34 = vld [vmem:[%s15101_s19 + $0x480] ss:$8 sps:$4 sm:$0xff]  }
 0x1b7   : > { %3137 = vmatprep.mubr.bf16.mxu0 %v14192_v41  ;;  %4203 = vmatprep.mubr.bf16.mxu1 %v14194_v46  ;;  %v14203_v40 = vld [vmem:[%s15101_s19 + $0x4c0] ss:$8 sps:$4 sm:$0xff]   ;;  %v14204_v41 = vld [vmem:[%s15101_s19 + $0x494] ss:$8 sps:$4 sm:$0xff]  }
 0x1b8   : > { %v1353_v56 = vpack.c.bf16 %v1309_v53, %v1308_v52  ;;  %v15653_v60 = vpack.c.bf16 %v2247_v54, %v2246_v48  ;;  %v14206_v46 = vld [vmem:[%s15101_s19 + $0x4d4] ss:$8 sps:$4 sm:$0xff]  }
 0x1b9   : > { %v1175_v59 = vpop.f32.mrb[80].mxu0  ;;  %v2113_v0 = vpop.f32.mrb[80].mxu1 }
 0x1ba   : > { %v1176_v61 = vadd.f32 %v15536_v49, %v1175_v59  ;;  %v1177_v2 = vpop.f32.mrb[81].mxu0  ;;  %1386 = vst.msk [vmem:[#allocation2 + $0x98] sm:$0xff] %vm1366_vm0, %v1353_v56  ;;  %v2114_v5 = vadd.f32 %v15536_v49, %v2113_v0  ;;  %v2115_v6 = vpop.f32.mrb[81].mxu1 }
 0x1bb   : > { %v1178_v8 = vpop.f32.mrb[82].mxu0  ;;  %v2116_v13 = vpop.f32.mrb[82].mxu1 }
 0x1bc   : > { %v1179_v12 = vadd.f32 %v15536_v49, %v1178_v8  ;;  %v1180_v14 = vpop.f32.mrb[83].mxu0  ;;  %v2248_v17 = vmax.f32 %v2114_v5, 0.0  ;;  %v2117_v18 = vadd.f32 %v15536_v49, %v2116_v13  ;;  %v2118_v19 = vpop.f32.mrb[83].mxu1  ;;  %v1310_v20 = vmax.f32 %v1176_v61, 0.0  ;;  %v14208_v5 = vld [vmem:[%s15101_s19 + $0x490] ss:$8 sps:$4 sm:$0xff]  }
 0x1be   : > { %v1311_v23 = vmax.f32 %v1179_v12, 0.0  ;;  %3138 = vmatmul.mubr.bf16.gmra.mrb[188].mxu0 %v14196_v3  ;;  %v2249_v24 = vmax.f32 %v2117_v18, 0.0  ;;  %4204 = vmatmul.mubr.bf16.gmra.mrb[188].mxu1 %v14197_v9  ;;  %v14210_v12 = vld [vmem:[%s15101_s19 + $0x4a4] ss:$8 sps:$4 sm:$0xff]  }
 0x1bf   : > { %3145 = vmatprep.mubr.bf16.mxu0 %v14198_v10  ;;  %4211 = vmatprep.mubr.bf16.mxu1 %v14200_v15  ;;  %v14209_v10 = vld [vmem:[%s15101_s19 + $0x4d0] ss:$8 sps:$4 sm:$0xff]  }
 0x1c0   : > { %v1354_v25 = vpack.c.bf16 %v1311_v23, %v1310_v20  ;;  %v15665_v27 = vpack.c.bf16 %v2249_v24, %v2248_v17  ;;  %v14212_v17 = vld [vmem:[%s15101_s19 + $0x4e4] ss:$8 sps:$4 sm:$0xff]  }
 0x1c1   : > { %v1183_v26 = vpop.f32.mrb[84].mxu0  ;;  %v2121_v30 = vpop.f32.mrb[84].mxu1 }
 0x1c2   : > { %v1184_v29 = vadd.f32 %v15536_v49, %v1183_v26  ;;  %v1185_v33 = vpop.f32.mrb[85].mxu0  ;;  %1387 = vst.msk [vmem:[#allocation2 + $0xa0] sm:$0xff] %vm1366_vm0, %v1354_v25  ;;  %v2122_v35 = vadd.f32 %v15536_v49, %v2121_v30  ;;  %v2123_v36 = vpop.f32.mrb[85].mxu1 }
 0x1c3   : > { %v1186_v37 = vpop.f32.mrb[86].mxu0  ;;  %v2124_v43 = vpop.f32.mrb[86].mxu1  ;;  %v14214_v36 = vld [vmem:[%s15101_s19 + $0x4a0] ss:$8 sps:$4 sm:$0xff]  }
 0x1c4   : > { %v1187_v42 = vadd.f32 %v15536_v49, %v1186_v37  ;;  %v1188_v44 = vpop.f32.mrb[87].mxu0  ;;  %v2250_v48 = vmax.f32 %v2122_v35, 0.0  ;;  %v2125_v50 = vadd.f32 %v15536_v49, %v2124_v43  ;;  %v2126_v51 = vpop.f32.mrb[87].mxu1  ;;  %v1312_v52 = vmax.f32 %v1184_v29, 0.0  ;;  %v14216_v43 = vld [vmem:[%s15101_s19 + $0x4b4] ss:$8 sps:$4 sm:$0xff]  }
 0x1c6   : > { %v1313_v53 = vmax.f32 %v1187_v42, 0.0  ;;  %3146 = vmatmul.mubr.bf16.gmra.mrb[192].mxu0 %v14202_v34  ;;  %v2251_v54 = vmax.f32 %v2125_v50, 0.0  ;;  %4212 = vmatmul.mubr.bf16.gmra.mrb[192].mxu1 %v14203_v40  ;;  %v14215_v42 = vld [vmem:[%s15101_s19 + $0x4e0] ss:$8 sps:$4 sm:$0xff]   ;;  %v14218_v50 = vld [vmem:[%s15101_s19 + $0x4f4] ss:$8 sps:$4 sm:$0xff]  }
 0x1c7   : > { %3153 = vmatprep.mubr.bf16.mxu0 %v14204_v41  ;;  %4219 = vmatprep.mubr.bf16.mxu1 %v14206_v46 }
 0x1c8   : > { %v1355_v56 = vpack.c.bf16 %v1313_v53, %v1312_v52  ;;  %v15679_v61 = vpack.c.bf16 %v2251_v54, %v2250_v48 }
 0x1c9   : > { %v1191_v59 = vpop.f32.mrb[88].mxu0  ;;  %v2129_v2 = vpop.f32.mrb[88].mxu1 }
 0x1ca   : > { %v1192_v0 = vadd.f32 %v15536_v49, %v1191_v59  ;;  %v1193_v3 = vpop.f32.mrb[89].mxu0  ;;  %1388 = vst.msk [vmem:[#allocation2 + $0xa8] sm:$0xff] %vm1366_vm0, %v1355_v56  ;;  %v2130_v6 = vadd.f32 %v15536_v49, %v2129_v2  ;;  %v2131_v8 = vpop.f32.mrb[89].mxu1  ;;  %v14301_v59 = vld [vmem:[%s18772_s4 + $0x38] sm:$0xff]  }
 0x1cb   : > { %v1194_v9 = vpop.f32.mrb[90].mxu0  ;;  %v2132_v14 = vpop.f32.mrb[90].mxu1  ;;  %5854 = vmatpush1.bf16.msra.mxu0 %v14301_v59 }
 0x1cc   : > { %v1195_v13 = vadd.f32 %v15536_v49, %v1194_v9  ;;  %v1196_v15 = vpop.f32.mrb[91].mxu0  ;;  %v2252_v18 = vmax.f32 %v2130_v6, 0.0  ;;  %v2133_v19 = vadd.f32 %v15536_v49, %v2132_v14  ;;  %v2134_v20 = vpop.f32.mrb[91].mxu1  ;;  %v1314_v23 = vmax.f32 %v1192_v0, 0.0  ;;  %v14220_v9 = vld [vmem:[%s15101_s19 + $0x4b0] ss:$8 sps:$4 sm:$0xff]   ;;  %5855 = vmatprep.subr.bf16.mxu0 %v14946_v1 }
 0x1cd   : > { %v14221_v14 = vld [vmem:[%s15101_s19 + $0x4f0] ss:$8 sps:$4 sm:$0xff]   ;;  %v14222_v15 = vld [vmem:[%s15101_s19 + $0x584] ss:$8 sps:$4 sm:$0xff]  }
 0x1ce   : > { %v1315_v24 = vmax.f32 %v1195_v13, 0.0  ;;  %3154 = vmatmul.mubr.bf16.gmra.mrb[196].mxu0 %v14208_v5  ;;  %v2253_v25 = vmax.f32 %v2133_v19, 0.0  ;;  %4220 = vmatmul.mubr.bf16.gmra.mrb[196].mxu1 %v14209_v10  ;;  %v14224_v20 = vld [vmem:[%s15101_s19 + $0x5c4] ss:$8 sps:$4 sm:$0xff]  }
 0x1cf   : > { %3161 = vmatprep.mubr.bf16.mxu0 %v14210_v12  ;;  %4227 = vmatprep.mubr.bf16.mxu1 %v14212_v17 }
 0x1d0   : > { %v1356_v26 = vpack.c.bf16 %v1315_v24, %v1314_v23  ;;  %v15691_v30 = vpack.c.bf16 %v2253_v25, %v2252_v18 }
 0x1d1   : > { %v1199_v29 = vpop.f32.mrb[92].mxu0  ;;  %v2137_v34 = vpop.f32.mrb[92].mxu1 }
 0x1d2   : > { %v1200_v33 = vadd.f32 %v15536_v49, %v1199_v29  ;;  %v1201_v35 = vpop.f32.mrb[93].mxu0  ;;  %1389 = vst.msk [vmem:[#allocation2 + $0xb0] sm:$0xff] %vm1366_vm0, %v1356_v26  ;;  %v2138_v37 = vadd.f32 %v15536_v49, %v2137_v34  ;;  %v2139_v40 = vpop.f32.mrb[93].mxu1 }
 0x1d3   : > { %v1202_v41 = vpop.f32.mrb[94].mxu0  ;;  %v2140_v46 = vpop.f32.mrb[94].mxu1 }
 0x1d4   : > { %v1203_v44 = vadd.f32 %v15536_v49, %v1202_v41  ;;  %v1204_v48 = vpop.f32.mrb[95].mxu0  ;;  %v2254_v51 = vmax.f32 %v2138_v37, 0.0  ;;  %v2141_v52 = vadd.f32 %v15536_v49, %v2140_v46  ;;  %v2142_v53 = vpop.f32.mrb[95].mxu1  ;;  %v1316_v54 = vmax.f32 %v1200_v33, 0.0 }
 0x1d5   : > { %v14228_v48 = vld [vmem:[%s15101_s19 + $0x5c0] ss:$8 sps:$4 sm:$0xff]  }
 0x1d6   : > { %v1317_v55 = vmax.f32 %v1203_v44, 0.0  ;;  %3162 = vmatmul.mubr.bf16.gmra.mrb[200].mxu0 %v14214_v36  ;;  %v2255_v56 = vmax.f32 %v2141_v52, 0.0  ;;  %4228 = vmatmul.mubr.bf16.gmra.mrb[200].mxu1 %v14215_v42  ;;  %v14227_v42 = vld [vmem:[%s15101_s19 + $0x580] ss:$8 sps:$4 sm:$0xff]  }
 0x1d7   : > { %3169 = vmatprep.mubr.bf16.mxu0 %v14216_v43  ;;  %4235 = vmatprep.mubr.bf16.mxu1 %v14218_v50  ;;  %v14229_v50 = vld [vmem:[%s15101_s19 + $0x594] ss:$8 sps:$4 sm:$0xff]  }
 0x1d8   : > { %v1357_v0 = vpack.c.bf16 %v1317_v55, %v1316_v54  ;;  %v15705_v3 = vpack.c.bf16 %v2255_v56, %v2254_v51  ;;  %v14231_v54 = vld [vmem:[%s15101_s19 + $0x5d4] ss:$8 sps:$4 sm:$0xff]  }
 0x1d9   : > { %v1207_v2 = vpop.f32.mrb[96].mxu0  ;;  %v2145_v6 = vpop.f32.mrb[96].mxu1 }
 0x1da   : > { %v1208_v5 = vadd.f32 %v15536_v49, %v1207_v2  ;;  %v1209_v8 = vpop.f32.mrb[97].mxu0  ;;  %1390 = vst.msk [vmem:[#allocation2 + $0xb8] sm:$0xff] %vm1366_vm0, %v1357_v0  ;;  %v2146_v10 = vadd.f32 %v15536_v49, %v2145_v6  ;;  %v2147_v12 = vpop.f32.mrb[97].mxu1  ;;  %v14302_v6 = vld [vmem:[%s18772_s4 + $0x40] sm:$0xff]  }
 0x1db   : > { %v1210_v13 = vpop.f32.mrb[98].mxu0  ;;  %v2148_v18 = vpop.f32.mrb[98].mxu1  ;;  %5856 = vmatpush1.bf16.msra.mxu0 %v14302_v6 }
 0x1dc   : > { %v1211_v17 = vadd.f32 %v15536_v49, %v1210_v13  ;;  %v1212_v19 = vpop.f32.mrb[99].mxu0  ;;  %v2256_v23 = vmax.f32 %v2146_v10, 0.0  ;;  %v2149_v24 = vadd.f32 %v15536_v49, %v2148_v18  ;;  %v2150_v25 = vpop.f32.mrb[99].mxu1  ;;  %v1318_v26 = vmax.f32 %v1208_v5, 0.0  ;;  %5857 = vmatprep.subr.bf16.mxu0 %v14946_v1 }
 0x1de   : > { %v1319_v29 = vmax.f32 %v1211_v17, 0.0  ;;  %3170 = vmatmul.mubr.bf16.gmra.mrb[204].mxu0 %v14220_v9  ;;  %v2257_v33 = vmax.f32 %v2149_v24, 0.0  ;;  %4236 = vmatmul.mubr.bf16.gmra.mrb[204].mxu1 %v14221_v14 }
 0x1df   : > { %3177 = vmatprep.mubr.bf16.mxu0 %v14222_v15  ;;  %4243 = vmatprep.mubr.bf16.mxu1 %v14224_v20  ;;  %v14233_v15 = vld [vmem:[%s15101_s19 + $0x590] ss:$8 sps:$4 sm:$0xff]  }
 0x1e0   : > { %v1358_v34 = vpack.c.bf16 %v1319_v29, %v1318_v26  ;;  %v15717_v36 = vpack.c.bf16 %v2257_v33, %v2256_v23  ;;  %v14234_v20 = vld [vmem:[%s15101_s19 + $0x5d0] ss:$8 sps:$4 sm:$0xff]   ;;  %v14235_v23 = vld [vmem:[%s15101_s19 + $0x5a4] ss:$8 sps:$4 sm:$0xff]  }
 0x1e1   : > { %v1215_v35 = vpop.f32.mrb[100].mxu0  ;;  %v2153_v40 = vpop.f32.mrb[100].mxu1  ;;  %v14237_v29 = vld [vmem:[%s15101_s19 + $0x5e4] ss:$8 sps:$4 sm:$0xff]  }
 0x1e2   : > { %v1216_v37 = vadd.f32 %v15536_v49, %v1215_v35  ;;  %v1217_v41 = vpop.f32.mrb[101].mxu0  ;;  %1391 = vst.msk [vmem:[#allocation2 + $0xc0] sm:$0xff] %vm1366_vm0, %v1358_v34  ;;  %v2154_v43 = vadd.f32 %v15536_v49, %v2153_v40  ;;  %v2155_v44 = vpop.f32.mrb[101].mxu1 }
 0x1e3   : > { %v1218_v46 = vpop.f32.mrb[102].mxu0  ;;  %v2156_v52 = vpop.f32.mrb[102].mxu1 }
 0x1e4   : > { %v1219_v51 = vadd.f32 %v15536_v49, %v1218_v46  ;;  %v1220_v53 = vpop.f32.mrb[103].mxu0  ;;  %v2258_v55 = vmax.f32 %v2154_v43, 0.0  ;;  %v2157_v56 = vadd.f32 %v15536_v49, %v2156_v52  ;;  %v2158_v59 = vpop.f32.mrb[103].mxu1  ;;  %v1320_v0 = vmax.f32 %v1216_v37, 0.0 }
 0x1e6   : > { %v1321_v2 = vmax.f32 %v1219_v51, 0.0  ;;  %3178 = vmatmul.mubr.bf16.gmra.mrb[208].mxu0 %v14227_v42  ;;  %v2259_v5 = vmax.f32 %v2157_v56, 0.0  ;;  %4244 = vmatmul.mubr.bf16.gmra.mrb[208].mxu1 %v14228_v48  ;;  %v14240_v51 = vld [vmem:[%s15101_s19 + $0x5a0] ss:$8 sps:$4 sm:$0xff]   ;;  %v14242_v56 = vld [vmem:[%s15101_s19 + $0x5b4] ss:$8 sps:$4 sm:$0xff]  }
 0x1e7   : > { %3185 = vmatprep.mubr.bf16.mxu0 %v14229_v50  ;;  %4251 = vmatprep.mubr.bf16.mxu1 %v14231_v54 }
 0x1e8   : > { %v1359_v8 = vpack.c.bf16 %v1321_v2, %v1320_v0  ;;  %v15731_v10 = vpack.c.bf16 %v2259_v5, %v2258_v55  ;;  %v14241_v55 = vld [vmem:[%s15101_s19 + $0x5e0] ss:$8 sps:$4 sm:$0xff]   ;;  %v14244_v5 = vld [vmem:[%s15101_s19 + $0x5f4] ss:$8 sps:$4 sm:$0xff]  }
 0x1e9   : > { %v1223_v9 = vpop.f32.mrb[104].mxu0  ;;  %v2161_v13 = vpop.f32.mrb[104].mxu1 }
 0x1ea   : > { %v1224_v12 = vadd.f32 %v15536_v49, %v1223_v9  ;;  %v1225_v14 = vpop.f32.mrb[105].mxu0  ;;  %1392 = vst.msk [vmem:[#allocation2 + $0xc8] sm:$0xff] %vm1366_vm0, %v1359_v8  ;;  %v2162_v17 = vadd.f32 %v15536_v49, %v2161_v13  ;;  %v2163_v18 = vpop.f32.mrb[105].mxu1 }
 0x1eb   : > { %v1226_v19 = vpop.f32.mrb[106].mxu0  ;;  %v2164_v25 = vpop.f32.mrb[106].mxu1 }
 0x1ec   : > { %v1227_v24 = vadd.f32 %v15536_v49, %v1226_v19  ;;  %v1228_v26 = vpop.f32.mrb[107].mxu0  ;;  %v2260_v33 = vmax.f32 %v2162_v17, 0.0  ;;  %v2165_v34 = vadd.f32 %v15536_v49, %v2164_v25  ;;  %v2166_v35 = vpop.f32.mrb[107].mxu1  ;;  %v1322_v37 = vmax.f32 %v1224_v12, 0.0  ;;  %v15748_v49 = vld [vmem:[%s18771_s3] ss:$0 sm:$0xff] }
 0x1ed   : > { %v14246_v25 = vld [vmem:[%s15101_s19 + $0x5b0] ss:$8 sps:$4 sm:$0xff]   ;;  %v14248_v35 = vld [vmem:[%s15101_s19 + $0x684] ss:$8 sps:$4 sm:$0xff]  }
 0x1ee   : > { %v1323_v40 = vmax.f32 %v1227_v24, 0.0  ;;  %3186 = vmatmul.mubr.bf16.gmra.mrb[212].mxu0 %v14233_v15  ;;  %v2261_v41 = vmax.f32 %v2165_v34, 0.0  ;;  %4252 = vmatmul.mubr.bf16.gmra.mrb[212].mxu1 %v14234_v20  ;;  %v14303_v15 = vld [vmem:[%s18772_s4 + $0x48] sm:$0xff]   ;;  %v14247_v34 = vld [vmem:[%s15101_s19 + $0x5f0] ss:$8 sps:$4 sm:$0xff]  }
 0x1ef   : > { %3193 = vmatprep.mubr.bf16.mxu0 %v14235_v23  ;;  %4259 = vmatprep.mubr.bf16.mxu1 %v14237_v29 }
 0x1f0   : > { %v1360_v42 = vpack.c.bf16 %v1323_v40, %v1322_v37  ;;  %v15743_v44 = vpack.c.bf16 %v2261_v41, %v2260_v33  ;;  %5858 = vmatpush1.bf16.msra.mxu0 %v14303_v15 }
 0x1f1   : > { %v1231_v43 = vpop.f32.mrb[108].mxu0  ;;  %v2169_v48 = vpop.f32.mrb[108].mxu1  ;;  %5859 = vmatprep.subr.bf16.mxu0 %v14946_v1 }
 0x1f2   : > { %v1232_v46 = vadd.f32 %v15748_v49, %v1231_v43  ;;  %v1233_v50 = vpop.f32.mrb[109].mxu0  ;;  %1393 = vst.msk [vmem:[#allocation2 + $0xd0] sm:$0xff] %vm1366_vm0, %v1360_v42  ;;  %v2170_v52 = vadd.f32 %v15748_v49, %v2169_v48  ;;  %v2171_v53 = vpop.f32.mrb[109].mxu1  ;;  %v14250_v42 = vld [vmem:[%s15101_s19 + $0x6c4] ss:$8 sps:$4 sm:$0xff]  }
 0x1f3   : > { %v1234_v54 = vpop.f32.mrb[110].mxu0  ;;  %v2172_v0 = vpop.f32.mrb[110].mxu1 }
 0x1f4   : > { %v1235_v59 = vadd.f32 %v15748_v49, %v1234_v54  ;;  %v1236_v2 = vpop.f32.mrb[111].mxu0  ;;  %v2262_v6 = vmax.f32 %v2170_v52, 0.0  ;;  %v2173_v8 = vadd.f32 %v15748_v49, %v2172_v0  ;;  %v2174_v9 = vpop.f32.mrb[111].mxu1  ;;  %v1324_v12 = vmax.f32 %v1232_v46, 0.0 }
 0x1f5   : > { %v14253_v2 = vld [vmem:[%s15101_s19 + $0x680] ss:$8 sps:$4 sm:$0xff]  }
 0x1f6   : > { %v1325_v13 = vmax.f32 %v1235_v59, 0.0  ;;  %3194 = vmatmul.mubr.bf16.gmra.mrb[216].mxu0 %v14240_v51  ;;  %v2263_v14 = vmax.f32 %v2173_v8, 0.0  ;;  %4260 = vmatmul.mubr.bf16.gmra.mrb[216].mxu1 %v14241_v55  ;;  %v14254_v9 = vld [vmem:[%s15101_s19 + $0x6c0] ss:$8 sps:$4 sm:$0xff]  }
 0x1f7   : > { %3201 = vmatprep.mubr.bf16.mxu0 %v14242_v56  ;;  %4267 = vmatprep.mubr.bf16.mxu1 %v14244_v5 }
 0x1f8   : > { %v1361_v17 = vpack.c.bf16 %v1325_v13, %v1324_v12  ;;  %v15762_v19 = vpack.c.bf16 %v2263_v14, %v2262_v6  ;;  %v14255_v12 = vld [vmem:[%s15101_s19 + $0x694] ss:$8 sps:$4 sm:$0xff]  }
 0x1f9   : > { %v1239_v18 = vpop.f32.mrb[112].mxu0  ;;  %v2177_v23 = vpop.f32.mrb[112].mxu1 }
 0x1fa   : > { %v1240_v20 = vadd.f32 %v15748_v49, %v1239_v18  ;;  %v1241_v24 = vpop.f32.mrb[113].mxu0  ;;  %1394 = vst.msk [vmem:[#allocation2 + $0xd8] sm:$0xff] %vm1366_vm0, %v1361_v17  ;;  %v2178_v26 = vadd.f32 %v15748_v49, %v2177_v23  ;;  %v2179_v29 = vpop.f32.mrb[113].mxu1  ;;  %v14257_v17 = vld [vmem:[%s15101_s19 + $0x6d4] ss:$8 sps:$4 sm:$0xff]  }
 0x1fb   : > { %v1242_v33 = vpop.f32.mrb[114].mxu0  ;;  %v2180_v40 = vpop.f32.mrb[114].mxu1 }
 0x1fc   : > { %v1243_v37 = vadd.f32 %v15748_v49, %v1242_v33  ;;  %v1244_v41 = vpop.f32.mrb[115].mxu0  ;;  %v2264_v43 = vmax.f32 %v2178_v26, 0.0  ;;  %v2181_v46 = vadd.f32 %v15748_v49, %v2180_v40  ;;  %v2182_v48 = vpop.f32.mrb[115].mxu1  ;;  %v1326_v50 = vmax.f32 %v1240_v20, 0.0  ;;  %v14304_v33 = vld [vmem:[%s18772_s4 + $0x50] sm:$0xff]  }
 0x1fd   : > { %5860 = vmatpush1.bf16.msra.mxu0 %v14304_v33 }
 0x1fe   : > { %v1327_v51 = vmax.f32 %v1243_v37, 0.0  ;;  %3202 = vmatmul.mubr.bf16.gmra.mrb[220].mxu0 %v14246_v25  ;;  %v2265_v52 = vmax.f32 %v2181_v46, 0.0  ;;  %4268 = vmatmul.mubr.bf16.gmra.mrb[220].mxu1 %v14247_v34 }
 0x1ff   : > { %3209 = vmatprep.mubr.bf16.mxu0 %v14248_v35  ;;  %4275 = vmatprep.mubr.bf16.mxu1 %v14250_v42  ;;  %v14259_v42 = vld [vmem:[%s15101_s19 + $0x690] ss:$8 sps:$4 sm:$0xff]  }
 0x200   : > { %v1362_v53 = vpack.c.bf16 %v1327_v51, %v1326_v50  ;;  %v15774_v55 = vpack.c.bf16 %v2265_v52, %v2264_v43  ;;  %v14260_v50 = vld [vmem:[%s15101_s19 + $0x6d0] ss:$8 sps:$4 sm:$0xff]   ;;  %v14261_v51 = vld [vmem:[%s15101_s19 + $0x6a4] ss:$8 sps:$4 sm:$0xff]   ;;  %5861 = vmatprep.subr.bf16.mxu0 %v14946_v1 }
 0x201   : > { %v1247_v54 = vpop.f32.mrb[116].mxu0  ;;  %v2185_v59 = vpop.f32.mrb[116].mxu1 }
 0x202   : > { %v1248_v56 = vadd.f32 %v15748_v49, %v1247_v54  ;;  %v1249_v0 = vpop.f32.mrb[117].mxu0  ;;  %1395 = vst.msk [vmem:[#allocation2 + $0xe0] sm:$0xff] %vm1366_vm0, %v1362_v53  ;;  %v2186_v5 = vadd.f32 %v15748_v49, %v2185_v59  ;;  %v2187_v6 = vpop.f32.mrb[117].mxu1 }
 0x203   : > { %v1250_v8 = vpop.f32.mrb[118].mxu0  ;;  %v2188_v14 = vpop.f32.mrb[118].mxu1 }
 0x204   : > { %v1251_v13 = vadd.f32 %v15748_v49, %v1250_v8  ;;  %v1252_v15 = vpop.f32.mrb[119].mxu0  ;;  %v2266_v18 = vmax.f32 %v2186_v5, 0.0  ;;  %v2189_v20 = vadd.f32 %v15748_v49, %v2188_v14  ;;  %v2190_v23 = vpop.f32.mrb[119].mxu1  ;;  %v1328_v24 = vmax.f32 %v1248_v56, 0.0  ;;  %v14263_v56 = vld [vmem:[%s15101_s19 + $0x6e4] ss:$8 sps:$4 sm:$0xff]  }
 0x206   : > { %v1329_v25 = vmax.f32 %v1251_v13, 0.0  ;;  %3210 = vmatmul.mubr.bf16.gmra.mrb[224].mxu0 %v14253_v2  ;;  %v2267_v26 = vmax.f32 %v2189_v20, 0.0  ;;  %4276 = vmatmul.mubr.bf16.gmra.mrb[224].mxu1 %v14254_v9 }
 0x207   : > { %3217 = vmatprep.mubr.bf16.mxu0 %v14255_v12  ;;  %4283 = vmatprep.mubr.bf16.mxu1 %v14257_v17 }
 0x208   : > { %v1363_v29 = vpack.c.bf16 %v1329_v25, %v1328_v24  ;;  %v15788_v35 = vpack.c.bf16 %v2267_v26, %v2266_v18  ;;  %v14266_v18 = vld [vmem:[%s15101_s19 + $0x6a0] ss:$8 sps:$4 sm:$0xff]   ;;  %v14268_v26 = vld [vmem:[%s15101_s19 + $0x6b4] ss:$8 sps:$4 sm:$0xff]  }
 0x209   : > { %v1255_v34 = vpop.f32.mrb[120].mxu0  ;;  %v2193_v40 = vpop.f32.mrb[120].mxu1  ;;  %v14267_v25 = vld [vmem:[%s15101_s19 + $0x6e0] ss:$8 sps:$4 sm:$0xff]  }
 0x20a   : > { %1396 = vst.msk [vmem:[#allocation2 + $0xe8] sm:$0xff] %vm1366_vm0, %v1363_v29  ;;  %v1256_v37 = vadd.f32 %v15748_v49, %v1255_v34  ;;  %v1257_v41 = vpop.f32.mrb[121].mxu0  ;;  %v2194_v43 = vadd.f32 %v15748_v49, %v2193_v40  ;;  %v2195_v46 = vpop.f32.mrb[121].mxu1 }
 0x20b   : > { %v1258_v48 = vpop.f32.mrb[122].mxu0  ;;  %v2196_v53 = vpop.f32.mrb[122].mxu1 }
 0x20c   : > { %v1259_v52 = vadd.f32 %v15748_v49, %v1258_v48  ;;  %v1260_v54 = vpop.f32.mrb[123].mxu0  ;;  %v2268_v59 = vmax.f32 %v2194_v43, 0.0  ;;  %v2197_v0 = vadd.f32 %v15748_v49, %v2196_v53  ;;  %v2198_v2 = vpop.f32.mrb[123].mxu1  ;;  %v1330_v5 = vmax.f32 %v1256_v37, 0.0  ;;  %v14270_v37 = vld [vmem:[%s15101_s19 + $0x6f4] ss:$8 sps:$4 sm:$0xff]  }
 0x20e   : > { %v1331_v6 = vmax.f32 %v1259_v52, 0.0  ;;  %3218 = vmatmul.mubr.bf16.gmra.mrb[228].mxu0 %v14259_v42  ;;  %v2269_v8 = vmax.f32 %v2197_v0, 0.0  ;;  %4284 = vmatmul.mubr.bf16.gmra.mrb[228].mxu1 %v14260_v50  ;;  %v15814_v50 = vld [vmem:[%s18771_s3] ss:$0 sm:$0xff]  ;;  %v14272_v0 = vld [vmem:[%s15101_s19 + $0x6b0] ss:$8 sps:$4 sm:$0xff]  }
 0x20f   : > { %3225 = vmatprep.mubr.bf16.mxu0 %v14261_v51  ;;  %4291 = vmatprep.mubr.bf16.mxu1 %v14263_v56 }
 0x210   : > { %v1364_v9 = vpack.c.bf16 %v1331_v6, %v1330_v5  ;;  %v15800_v13 = vpack.c.bf16 %v2269_v8, %v2268_v59  ;;  %v14273_v8 = vld [vmem:[%s15101_s19 + $0x6f0] ss:$8 sps:$4 sm:$0xff]  }
 0x211   : > { %v1263_v12 = vpop.f32.mrb[124].mxu0  ;;  %v2201_v15 = vpop.f32.mrb[124].mxu1 }
 0x212   : > { %1397 = vst.msk [vmem:[#allocation2 + $0xf0] sm:$0xff] %vm1366_vm0, %v1364_v9  ;;  %v1264_v14 = vadd.f32 %v15748_v49, %v1263_v12  ;;  %v1265_v17 = vpop.f32.mrb[125].mxu0  ;;  %v2202_v20 = vadd.f32 %v15748_v49, %v2201_v15  ;;  %v2203_v23 = vpop.f32.mrb[125].mxu1  ;;  %v14274_v9 = vld [vmem:[%s15101_s19 + $0x784] ss:$8 sps:$4 sm:$0xff]  }
 0x213   : > { %v1266_v24 = vpop.f32.mrb[126].mxu0  ;;  %v2204_v33 = vpop.f32.mrb[126].mxu1  ;;  %v14276_v17 = vld [vmem:[%s15101_s19 + $0x7c4] ss:$8 sps:$4 sm:$0xff]  }
 0x214   : > { %v1267_v29 = vadd.f32 %v15748_v49, %v1266_v24  ;;  %v1268_v34 = vpop.f32.mrb[127].mxu0  ;;  %v2270_v40 = vmax.f32 %v2202_v20, 0.0  ;;  %v2205_v41 = vadd.f32 %v15748_v49, %v2204_v33  ;;  %v2206_v42 = vpop.f32.mrb[127].mxu1  ;;  %v1332_v43 = vmax.f32 %v1264_v14, 0.0  ;;  %v14305_v49 = vld [vmem:[%s18772_s4 + $0x58] sm:$0xff]   ;;  %v14306_v24 = vld [vmem:[%s18772_s4 + $0x60] sm:$0xff]  }
 0x215   : > { %5862 = vmatpush1.bf16.msra.mxu0 %v14305_v49  ;;  %v14280_v49 = vld [vmem:[%s15101_s19 + $0x7c0] ss:$8 sps:$4 sm:$0xff]  }
 0x216   : > { %v1333_v46 = vmax.f32 %v1267_v29, 0.0  ;;  %3226 = vmatmul.mubr.bf16.gmra.mrb[232].mxu0 %v14266_v18  ;;  %v2271_v48 = vmax.f32 %v2205_v41, 0.0  ;;  %4292 = vmatmul.mubr.bf16.gmra.mrb[232].mxu1 %v14267_v25 }
 0x217   : > { %3233 = vmatprep.mubr.bf16.mxu0 %v14268_v26  ;;  %4299 = vmatprep.mubr.bf16.mxu1 %v14270_v37 }
 0x218   : > { %v1365_v51 = vpack.c.bf16 %v1333_v46, %v1332_v43  ;;  %v15819_v53 = vpack.c.bf16 %v2271_v48, %v2270_v40  ;;  %5863 = vmatprep.subr.bf16.mxu0 %v14946_v1  ;;  %v14307_v40 = vld [vmem:[%s18772_s4 + $0x68] sm:$0xff]  }
 0x219   : > { %v3019_v52 = vpop.f32.mrb[128].mxu0  ;;  %v4085_v56 = vpop.f32.mrb[128].mxu1  ;;  %5864 = vmatpush1.bf16.msra.mxu0 %v14306_v24  ;;  %v14279_v46 = vld [vmem:[%s15101_s19 + $0x780] ss:$8 sps:$4 sm:$0xff]  }
 0x21a   : > { %1398 = vst.msk [vmem:[#allocation2 + $0xf8] sm:$0xff] %vm1366_vm0, %v1365_v51  ;;  %v3020_v54 = vadd.f32 %v15814_v50, %v3019_v52  ;;  %v3021_v59 = vpop.f32.mrb[129].mxu0  ;;  %v4086_v2 = vadd.f32 %v15814_v50, %v4085_v56  ;;  %v4087_v5 = vpop.f32.mrb[129].mxu1  ;;  %5865 = vmatprep.subr.bf16.mxu0 %v14946_v1  ;;  %vm8920_vm0 = vcmask 1043459  }
 0x21b   : > { %v3022_v6 = vpop.f32.mrb[130].mxu0  ;;  %v4088_v14 = vpop.f32.mrb[130].mxu1 }
 0x21c   : > { %v3023_v12 = vadd.f32 %v15814_v50, %v3022_v6  ;;  %v3024_v15 = vpop.f32.mrb[131].mxu0  ;;  %v4340_v18 = vmax.f32 %v4086_v2, 0.0  ;;  %v4089_v20 = vadd.f32 %v15814_v50, %v4088_v14  ;;  %v4090_v23 = vpop.f32.mrb[131].mxu1  ;;  %v3274_v25 = vmax.f32 %v3020_v54, 0.0  ;;  %v14281_v54 = vld [vmem:[%s15101_s19 + $0x794] ss:$8 sps:$4 sm:$0xff]  }
 0x21d   : > { %v14283_v2 = vld [vmem:[%s15101_s19 + $0x7d4] ss:$8 sps:$4 sm:$0xff]   ;;  %5866 = vmatpush1.bf16.msra.mxu0 %v14307_v40  ;;  %v14286_v40 = vld [vmem:[%s15101_s19 + $0x7d0] ss:$8 sps:$4 sm:$0xff]  }
 0x21e   : > { %v3275_v26 = vmax.f32 %v3023_v12, 0.0  ;;  %3234 = vmatmul.mubr.bf16.gmra.mrb[236].mxu0 %v14272_v0  ;;  %v4341_v29 = vmax.f32 %v4089_v20, 0.0  ;;  %4300 = vmatmul.mubr.bf16.gmra.mrb[236].mxu1 %v14273_v8  ;;  %v14309_v23 = vld [vmem:[%s18772_s4 + $0x78] sm:$0xff]  }
 0x21f   : > { %3241 = vmatprep.mubr.bf16.mxu0 %v14274_v9  ;;  %4307 = vmatprep.mubr.bf16.mxu1 %v14276_v17  ;;  %v14308_v9 = vld [vmem:[%s18772_s4 + $0x70] sm:$0xff]  }
 0x220   : > { %v3338_v33 = vpack.c.bf16 %v3275_v26, %v3274_v25  ;;  %v4404_v37 = vpack.c.bf16 %v4341_v29, %v4340_v18  ;;  %5867 = vmatprep.subr.bf16.mxu0 %v14946_v1  ;;  %v14285_v29 = vld [vmem:[%s15101_s19 + $0x790] ss:$8 sps:$4 sm:$0xff]  }
 0x221   : > { %v3027_v34 = vpop.f32.mrb[132].mxu0  ;;  %v4093_v42 = vpop.f32.mrb[132].mxu1  ;;  %5868 = vmatpush1.bf16.msra.mxu0 %v14308_v9 }
 0x222   : > { %v3028_v41 = vadd.f32 %v15814_v50, %v3027_v34  ;;  %v3029_v43 = vpop.f32.mrb[133].mxu0  ;;  %3402 = vrot.lane.b32.xlu0 %v3338_v33, %s14948_s28  ;;  %v4094_v48 = vadd.f32 %v15814_v50, %v4093_v42  ;;  %v4095_v51 = vpop.f32.mrb[133].mxu1  ;;  %4468 = vrot.lane.b32.xlu1 %v4404_v37, %s14949_s29 }
 0x223   : > { %v3030_v52 = vpop.f32.mrb[134].mxu0  ;;  %v4096_v59 = vpop.f32.mrb[134].mxu1  ;;  %5869 = vmatprep.subr.bf16.mxu0 %v14946_v1 }
 0x224   : > { %v3031_v56 = vadd.f32 %v15814_v50, %v3030_v52  ;;  %v3032_v0 = vpop.f32.mrb[135].mxu0  ;;  %v4342_v5 = vmax.f32 %v4094_v48, 0.0  ;;  %v4097_v6 = vadd.f32 %v15814_v50, %v4096_v59  ;;  %v4098_v8 = vpop.f32.mrb[135].mxu1  ;;  %v3276_v12 = vmax.f32 %v3028_v41, 0.0  ;;  %v14287_v41 = vld [vmem:[%s15101_s19 + $0x7a4] ss:$8 sps:$4 sm:$0xff]  }
 0x225   : > { %v14289_v48 = vld [vmem:[%s15101_s19 + $0x7e4] ss:$8 sps:$4 sm:$0xff]   ;;  %5870 = vmatpush1.bf16.msra.mxu0 %v14309_v23 }
 0x226   : > { %v3277_v14 = vmax.f32 %v3031_v56, 0.0  ;;  %3242 = vmatmul.mubr.bf16.gmra.mrb[240].mxu0 %v14279_v46  ;;  %v4343_v15 = vmax.f32 %v4097_v6, 0.0  ;;  %4308 = vmatmul.mubr.bf16.gmra.mrb[240].mxu1 %v14280_v49 }
 0x227   : > { %3249 = vmatprep.mubr.bf16.mxu0 %v14281_v54  ;;  %4315 = vmatprep.mubr.bf16.mxu1 %v14283_v2 }
 0x228   : > { %v3339_v17 = vpack.c.bf16 %v3277_v14, %v3276_v12  ;;  %v4405_v20 = vpack.c.bf16 %v4343_v15, %v4342_v5  ;;  %6064 = vmatprep.subr.bf16.mxu0 %v14946_v1  ;;  %v14292_v12 = vld [vmem:[%s15101_s19 + $0x7a0] ss:$8 sps:$4 sm:$0xff]  }
 0x229   : > { %v3035_v18 = vpop.f32.mrb[136].mxu0  ;;  %v4101_v25 = vpop.f32.mrb[136].mxu1 }
 0x22a   : > { %v3036_v24 = vadd.f32 %v15814_v50, %v3035_v18  ;;  %v3037_v26 = vpop.f32.mrb[137].mxu0  ;;  %3404 = vrot.lane.b32.xlu0 %v3339_v17, %s14948_s28  ;;  %v4102_v33 = vadd.f32 %v15814_v50, %v4101_v25  ;;  %v4103_v34 = vpop.f32.mrb[137].mxu1  ;;  %4470 = vrot.lane.b32.xlu1 %v4405_v20, %s14949_s29  ;;  %v14293_v17 = vld [vmem:[%s15101_s19 + $0x7e0] ss:$8 sps:$4 sm:$0xff]   ;;  %v14296_v25 = vld [vmem:[%s15101_s19 + $0x7f4] ss:$8 sps:$4 sm:$0xff]  }
 0x22b   : > { %v3038_v37 = vpop.f32.mrb[138].mxu0  ;;  %v4104_v43 = vpop.f32.mrb[138].mxu1 }
 0x22c   : > { %v3039_v42 = vadd.f32 %v15814_v50, %v3038_v37  ;;  %v3040_v46 = vpop.f32.mrb[139].mxu0  ;;  %v4344_v51 = vmax.f32 %v4102_v33, 0.0  ;;  %v4105_v52 = vadd.f32 %v15814_v50, %v4104_v43  ;;  %v4106_v49 = vpop.f32.mrb[139].mxu1  ;;  %v3278_v54 = vmax.f32 %v3036_v24, 0.0  ;;  %v14294_v24 = vld [vmem:[%s15101_s19 + $0x7b4] ss:$8 sps:$4 sm:$0xff]  }
 0x22e   : > { %v3279_v56 = vmax.f32 %v3039_v42, 0.0  ;;  %3250 = vmatmul.mubr.bf16.gmra.mrb[244].mxu0 %v14285_v29  ;;  %2340 = vrot.lane.b32.xlu0 %v15439_v57, %s14947_s17  ;;  %v4345_v59 = vmax.f32 %v4105_v52, 0.0  ;;  %v14298_v52 = vld [vmem:[%s15101_s19 + $0x7b0] ss:$8 sps:$4 sm:$0xff]  }
 0x22f   : > { %4316 = vmatmul.mubr.bf16.gmra.mrb[244].mxu1 %v14286_v40  ;;  %3257 = vmatprep.mubr.bf16.mxu0 %v14287_v41 }
 0x230   : > { %v3340_v0 = vpack.c.bf16 %v3279_v56, %v3278_v54  ;;  %4323 = vmatprep.mubr.bf16.mxu1 %v14289_v48  ;;  %v4406_v5 = vpack.c.bf16 %v4345_v59, %v4344_v51  ;;  %v14299_v56 = vld [vmem:[%s15101_s19 + $0x7f0] ss:$8 sps:$4 sm:$0xff]   ;;  %s12316_s19 = sshll.u32 %s18785_s26, 2 }
 0x231   : > { %v3043_v2 = vpop.f32.mrb[140].mxu0  ;;  %v4109_v8 = vpop.f32.mrb[140].mxu1  ;;  %s456_s27 = scalar_lea.vmem %s18769_s1, %s12316_s19 }
 0x232   : > { %v3044_v6 = vadd.f32 %v15814_v50, %v3043_v2  ;;  %v3045_v9 = vpop.f32.mrb[141].mxu0  ;;  %3406 = vrot.lane.b32.xlu1 %v3340_v0, %s14948_s28  ;;  %v4110_v14 = vadd.f32 %v15814_v50, %v4109_v8  ;;  %v4111_v57 = vpop.f32.mrb[141].mxu1  ;;  %4472 = vrot.lane.b32.xlu0 %v4406_v5, %s14949_s29 }
 0x233   : > { %v3046_v15 = vpop.f32.mrb[142].mxu0  ;;  %v4112_v20 = vpop.f32.mrb[142].mxu1 }
 0x234   : > { %v3047_v18 = vadd.f32 %v15814_v50, %v3046_v15  ;;  %v3048_v23 = vpop.f32.mrb[143].mxu0  ;;  %v4346_v26 = vmax.f32 %v4110_v14, 0.0  ;;  %v4113_v29 = vadd.f32 %v15814_v50, %v4112_v20  ;;  %v4114_v33 = vpop.f32.mrb[143].mxu1  ;;  %v3280_v34 = vmax.f32 %v3044_v6, 0.0 }
 0x236   : > { %v3281_v37 = vmax.f32 %v3047_v18, 0.0  ;;  %3258 = vmatmul.mubr.bf16.gmra.mrb[248].mxu0 %v14292_v12  ;;  %2342 = vrot.lane.b32.xlu1 %v15450_v16, %s14947_s17  ;;  %v4347_v40 = vmax.f32 %v4113_v29, 0.0 }
 0x237   : > { %4324 = vmatmul.mubr.bf16.gmra.mrb[248].mxu1 %v14293_v17  ;;  %2344 = vrot.lane.b32.xlu0 %v15461_v38, %s14947_s17 }
 0x238   : > { %v3341_v41 = vpack.c.bf16 %v3281_v37, %v3280_v34  ;;  %3265 = vmatprep.mubr.bf16.mxu0 %v14294_v24  ;;  %4331 = vmatprep.mubr.bf16.mxu1 %v14296_v25  ;;  %v4407_v43 = vpack.c.bf16 %v4347_v40, %v4346_v26 }
 0x239   : > { %v3051_v42 = vpop.f32.mrb[144].mxu0  ;;  %v4117_v48 = vpop.f32.mrb[144].mxu1 }
 0x23a   : > { %v3052_v46 = vadd.f32 %v15814_v50, %v3051_v42  ;;  %v3053_v51 = vpop.f32.mrb[145].mxu0  ;;  %v4118_v49 = vadd.f32 %v15814_v50, %v4117_v48  ;;  %v4119_v54 = vpop.f32.mrb[145].mxu1  ;;  %4474 = vrot.lane.b32.xlu1 %v4407_v43, %s14949_s29 }
 0x23b   : > { %3408 = vrot.lane.b32.xlu0 %v3341_v41, %s14948_s28  ;;  %v3054_v16 = vpop.f32.mrb[146].mxu0  ;;  %v4120_v59 = vpop.f32.mrb[146].mxu1 }
 0x23c   : > { %v3055_v38 = vadd.f32 %v15814_v50, %v3054_v16  ;;  %v3056_v0 = vpop.f32.mrb[147].mxu0  ;;  %v4348_v2 = vmax.f32 %v4118_v49, 0.0  ;;  %v4121_v5 = vadd.f32 %v15814_v50, %v4120_v59  ;;  %v4122_v6 = vpop.f32.mrb[147].mxu1  ;;  %v3282_v8 = vmax.f32 %v3052_v46, 0.0 }
 0x23e   : > { %v3283_v9 = vmax.f32 %v3055_v38, 0.0  ;;  %3266 = vmatmul.mubr.bf16.gmra.mrb[252].mxu0 %v14298_v52  ;;  %v4349_v12 = vmax.f32 %v4121_v5, 0.0 }
 0x23f   : > { %4332 = vmatmul.mubr.bf16.gmra.mrb[252].mxu1 %v14299_v56  ;;  %2346 = vrot.lane.b32.xlu0 %v15472_v62, %s14947_s17 }
 0x240   : > { %v3342_v14 = vpack.c.bf16 %v3283_v9, %v3282_v8  ;;  %v4408_v15 = vpack.c.bf16 %v4349_v12, %v4348_v2 }
 0x241   : > { %v3059_v57 = vpop.f32.mrb[148].mxu0  ;;  %v4125_v18 = vpop.f32.mrb[148].mxu1 }
 0x242   : > { %v3060_v17 = vadd.f32 %v15814_v50, %v3059_v57  ;;  %v3061_v20 = vpop.f32.mrb[149].mxu0  ;;  %3410 = vrot.lane.b32.xlu1 %v3342_v14, %s14948_s28  ;;  %v4126_v23 = vadd.f32 %v15814_v50, %v4125_v18  ;;  %v4127_v24 = vpop.f32.mrb[149].mxu1 }
 0x243   : > { %v3062_v25 = vpop.f32.mrb[150].mxu0  ;;  %v4128_v29 = vpop.f32.mrb[150].mxu1 }
 0x244   : > { %v3063_v26 = vadd.f32 %v15814_v50, %v3062_v25  ;;  %v3064_v33 = vpop.f32.mrb[151].mxu0  ;;  %v4350_v34 = vmax.f32 %v4126_v23, 0.0  ;;  %v4129_v62 = vadd.f32 %v15814_v50, %v4128_v29  ;;  %v4130_v37 = vpop.f32.mrb[151].mxu1  ;;  %v3284_v40 = vmax.f32 %v3060_v17, 0.0 }
 0x246   : > { %v3285_v41 = vmax.f32 %v3063_v26, 0.0  ;;  %4476 = vrot.lane.b32.xlu1 %v4408_v15, %s14949_s29  ;;  %v4351_v42 = vmax.f32 %v4129_v62, 0.0 }
 0x248   : > { %v3343_v43 = vpack.c.bf16 %v3285_v41, %v3284_v40  ;;  %v4409_v48 = vpack.c.bf16 %v4351_v42, %v4350_v34 }
 0x249   : > { %v3067_v46 = vpop.f32.mrb[152].mxu0  ;;  %v4133_v52 = vpop.f32.mrb[152].mxu1 }
 0x24a   : > { %v3068_v51 = vadd.f32 %v15814_v50, %v3067_v46  ;;  %v3069_v49 = vpop.f32.mrb[153].mxu0  ;;  %3412 = vrot.lane.b32.xlu0 %v3343_v43, %s14948_s28  ;;  %v4134_v54 = vadd.f32 %v15814_v50, %v4133_v52  ;;  %v4135_v16 = vpop.f32.mrb[153].mxu1  ;;  %4478 = vrot.lane.b32.xlu1 %v4409_v48, %s14949_s29 }
 0x24b   : > { %v3070_v56 = vpop.f32.mrb[154].mxu0  ;;  %v4136_v59 = vpop.f32.mrb[154].mxu1 }
 0x24c   : > { %v3071_v38 = vadd.f32 %v15814_v50, %v3070_v56  ;;  %v3072_v0 = vpop.f32.mrb[155].mxu0  ;;  %v4352_v2 = vmax.f32 %v4134_v54, 0.0  ;;  %v4137_v5 = vadd.f32 %v15814_v50, %v4136_v59  ;;  %v4138_v6 = vpop.f32.mrb[155].mxu1  ;;  %v3286_v8 = vmax.f32 %v3068_v51, 0.0 }
 0x24e   : > { %v3287_v9 = vmax.f32 %v3071_v38, 0.0  ;;  %2348 = vrot.lane.b32.xlu0 %v15483_v22, %s14947_s17  ;;  %v4353_v12 = vmax.f32 %v4137_v5, 0.0 }
 0x250   : > { %v3344_v14 = vpack.c.bf16 %v3287_v9, %v3286_v8  ;;  %v4410_v15 = vpack.c.bf16 %v4353_v12, %v4352_v2 }
 0x251   : > { %v3075_v57 = vpop.f32.mrb[156].mxu0  ;;  %v4141_v18 = vpop.f32.mrb[156].mxu1 }
 0x252   : > { %v3076_v17 = vadd.f32 %v15814_v50, %v3075_v57  ;;  %v3077_v20 = vpop.f32.mrb[157].mxu0  ;;  %3414 = vrot.lane.b32.xlu1 %v3344_v14, %s14948_s28  ;;  %v4142_v23 = vadd.f32 %v15814_v50, %v4141_v18  ;;  %v4143_v24 = vpop.f32.mrb[157].mxu1  ;;  %4480 = vrot.lane.b32.xlu0 %v4410_v15, %s14949_s29 }
 0x253   : > { %v3078_v25 = vpop.f32.mrb[158].mxu0  ;;  %v4144_v29 = vpop.f32.mrb[158].mxu1 }
 0x254   : > { %v3079_v26 = vadd.f32 %v15814_v50, %v3078_v25  ;;  %v3080_v22 = vpop.f32.mrb[159].mxu0  ;;  %v4354_v33 = vmax.f32 %v4142_v23, 0.0  ;;  %v4145_v34 = vadd.f32 %v15814_v50, %v4144_v29  ;;  %v4146_v62 = vpop.f32.mrb[159].mxu1  ;;  %v3288_v37 = vmax.f32 %v3076_v17, 0.0 }
 0x256   : > { %v3289_v40 = vmax.f32 %v3079_v26, 0.0  ;;  %2350 = vrot.lane.b32.xlu1 %v15494_v45, %s14947_s17  ;;  %v4355_v41 = vmax.f32 %v4145_v34, 0.0  ;;  %2352 = vrot.lane.b32.xlu0 %v15505_v7, %s14947_s17 }
 0x258   : > { %v3345_v42 = vpack.c.bf16 %v3289_v40, %v3288_v37  ;;  %v4411_v46 = vpack.c.bf16 %v4355_v41, %v4354_v33 }
 0x259   : > { %v3083_v43 = vpop.f32.mrb[160].mxu0  ;;  %v4149_v51 = vpop.f32.mrb[160].mxu1 }
 0x25a   : > { %v3084_v48 = vadd.f32 %v15814_v50, %v3083_v43  ;;  %v3085_v52 = vpop.f32.mrb[161].mxu0  ;;  %v4150_v49 = vadd.f32 %v15814_v50, %v4149_v51  ;;  %v4151_v54 = vpop.f32.mrb[161].mxu1  ;;  %4482 = vrot.lane.b32.xlu1 %v4411_v46, %s14949_s29  ;;  %3416 = vrot.lane.b32.xlu0 %v3345_v42, %s14948_s28 }
 0x25b   : > { %v3086_v16 = vpop.f32.mrb[162].mxu0  ;;  %v4152_v56 = vpop.f32.mrb[162].mxu1 }
 0x25c   : > { %v3087_v45 = vadd.f32 %v15814_v50, %v3086_v16  ;;  %v3088_v38 = vpop.f32.mrb[163].mxu0  ;;  %v4356_v7 = vmax.f32 %v4150_v49, 0.0  ;;  %v4153_v59 = vadd.f32 %v15814_v50, %v4152_v56  ;;  %v4154_v0 = vpop.f32.mrb[163].mxu1  ;;  %v3290_v2 = vmax.f32 %v3084_v48, 0.0 }
 0x25e   : > { %v3291_v5 = vmax.f32 %v3087_v45, 0.0  ;;  %v4357_v6 = vmax.f32 %v4153_v59, 0.0  ;;  %2354 = vrot.lane.b32.xlu0 %v15519_v32, %s14947_s17 }
 0x260   : > { %v3346_v8 = vpack.c.bf16 %v3291_v5, %v3290_v2  ;;  %v4412_v12 = vpack.c.bf16 %v4357_v6, %v4356_v7 }
 0x261   : > { %v3091_v9 = vpop.f32.mrb[164].mxu0  ;;  %v4157_v57 = vpop.f32.mrb[164].mxu1 }
 0x262   : > { %v3092_v14 = vadd.f32 %v15814_v50, %v3091_v9  ;;  %v3093_v15 = vpop.f32.mrb[165].mxu0  ;;  %3418 = vrot.lane.b32.xlu1 %v3346_v8, %s14948_s28  ;;  %v4158_v17 = vadd.f32 %v15814_v50, %v4157_v57  ;;  %v4159_v18 = vpop.f32.mrb[165].mxu1 }
 0x263   : > { %v3094_v20 = vpop.f32.mrb[166].mxu0  ;;  %v4160_v24 = vpop.f32.mrb[166].mxu1 }
 0x264   : > { %v3095_v23 = vadd.f32 %v15814_v50, %v3094_v20  ;;  %v3096_v25 = vpop.f32.mrb[167].mxu0  ;;  %v4358_v26 = vmax.f32 %v4158_v17, 0.0  ;;  %v4161_v32 = vadd.f32 %v15814_v50, %v4160_v24  ;;  %v4162_v29 = vpop.f32.mrb[167].mxu1  ;;  %v3292_v22 = vmax.f32 %v3092_v14, 0.0 }
 0x266   : > { %v3293_v33 = vmax.f32 %v3095_v23, 0.0  ;;  %4484 = vrot.lane.b32.xlu1 %v4412_v12, %s14949_s29  ;;  %v4359_v34 = vmax.f32 %v4161_v32, 0.0 }
 0x268   : > { %v3347_v62 = vpack.c.bf16 %v3293_v33, %v3292_v22  ;;  %v4413_v40 = vpack.c.bf16 %v4359_v34, %v4358_v26 }
 0x269   : > { %v3099_v37 = vpop.f32.mrb[168].mxu0  ;;  %v4165_v42 = vpop.f32.mrb[168].mxu1 }
 0x26a   : > { %v3100_v41 = vadd.f32 %v15814_v50, %v3099_v37  ;;  %v3101_v43 = vpop.f32.mrb[169].mxu0  ;;  %3420 = vrot.lane.b32.xlu0 %v3347_v62, %s14948_s28  ;;  %v4166_v46 = vadd.f32 %v15814_v50, %v4165_v42  ;;  %v4167_v48 = vpop.f32.mrb[169].mxu1  ;;  %4486 = vrot.lane.b32.xlu1 %v4413_v40, %s14949_s29 }
 0x26b   : > { %v3102_v51 = vpop.f32.mrb[170].mxu0  ;;  %v4168_v49 = vpop.f32.mrb[170].mxu1 }
 0x26c   : > { %v3103_v52 = vadd.f32 %v15814_v50, %v3102_v51  ;;  %v3104_v54 = vpop.f32.mrb[171].mxu0  ;;  %v4360_v16 = vmax.f32 %v4166_v46, 0.0  ;;  %v4169_v45 = vadd.f32 %v15814_v50, %v4168_v49  ;;  %v4170_v56 = vpop.f32.mrb[171].mxu1  ;;  %v3294_v38 = vmax.f32 %v3100_v41, 0.0 }
 0x26e   : > { %v3295_v7 = vmax.f32 %v3103_v52, 0.0  ;;  %2356 = vrot.lane.b32.xlu0 %v15531_v58, %s14947_s17  ;;  %v4361_v59 = vmax.f32 %v4169_v45, 0.0 }
 0x270   : > { %v3348_v0 = vpack.c.bf16 %v3295_v7, %v3294_v38  ;;  %v4414_v5 = vpack.c.bf16 %v4361_v59, %v4360_v16 }
 0x271   : > { %v3107_v2 = vpop.f32.mrb[172].mxu0  ;;  %v4173_v8 = vpop.f32.mrb[172].mxu1 }
 0x272   : > { %v3108_v6 = vadd.f32 %v15814_v50, %v3107_v2  ;;  %v3109_v9 = vpop.f32.mrb[173].mxu0  ;;  %3422 = vrot.lane.b32.xlu1 %v3348_v0, %s14948_s28  ;;  %v4174_v12 = vadd.f32 %v15814_v50, %v4173_v8  ;;  %v4175_v14 = vpop.f32.mrb[173].mxu1  ;;  %4488 = vrot.lane.b32.xlu0 %v4414_v5, %s14949_s29 }
 0x273   : > { %v3110_v57 = vpop.f32.mrb[174].mxu0  ;;  %v4176_v17 = vpop.f32.mrb[174].mxu1 }
 0x274   : > { %v3111_v15 = vadd.f32 %v15814_v50, %v3110_v57  ;;  %v3112_v58 = vpop.f32.mrb[175].mxu0  ;;  %v4362_v18 = vmax.f32 %v4174_v12, 0.0  ;;  %v4177_v20 = vadd.f32 %v15814_v50, %v4176_v17  ;;  %v4178_v23 = vpop.f32.mrb[175].mxu1  ;;  %v3296_v24 = vmax.f32 %v3108_v6, 0.0 }
 0x276   : > { %v3297_v25 = vmax.f32 %v3111_v15, 0.0  ;;  %2358 = vrot.lane.b32.xlu1 %v15550_v21, %s14947_s17  ;;  %v4363_v26 = vmax.f32 %v4177_v20, 0.0  ;;  %2360 = vrot.lane.b32.xlu0 %v15562_v47, %s14947_s17 }
 0x278   : > { %v3349_v32 = vpack.c.bf16 %v3297_v25, %v3296_v24  ;;  %v4415_v22 = vpack.c.bf16 %v4363_v26, %v4362_v18 }
 0x279   : > { %v3115_v29 = vpop.f32.mrb[176].mxu0  ;;  %v4181_v34 = vpop.f32.mrb[176].mxu1 }
 0x27a   : > { %v3116_v33 = vadd.f32 %v15814_v50, %v3115_v29  ;;  %v3117_v62 = vpop.f32.mrb[177].mxu0  ;;  %v4182_v37 = vadd.f32 %v15814_v50, %v4181_v34  ;;  %v4183_v40 = vpop.f32.mrb[177].mxu1  ;;  %4490 = vrot.lane.b32.xlu1 %v4415_v22, %s14949_s29  ;;  %3424 = vrot.lane.b32.xlu0 %v3349_v32, %s14948_s28 }
 0x27b   : > { %v3118_v41 = vpop.f32.mrb[178].mxu0  ;;  %v4184_v42 = vpop.f32.mrb[178].mxu1 }
 0x27c   : > { %v3119_v21 = vadd.f32 %v15814_v50, %v3118_v41  ;;  %v3120_v43 = vpop.f32.mrb[179].mxu0  ;;  %v4364_v47 = vmax.f32 %v4182_v37, 0.0  ;;  %v4185_v46 = vadd.f32 %v15814_v50, %v4184_v42  ;;  %v4186_v48 = vpop.f32.mrb[179].mxu1  ;;  %v3298_v51 = vmax.f32 %v3116_v33, 0.0 }
 0x27e   : > { %v3299_v52 = vmax.f32 %v3119_v21, 0.0  ;;  %v4365_v49 = vmax.f32 %v4185_v46, 0.0  ;;  %2362 = vrot.lane.b32.xlu0 %v15573_v11, %s14947_s17 }
 0x280   : > { %v3350_v54 = vpack.c.bf16 %v3299_v52, %v3298_v51  ;;  %v4416_v45 = vpack.c.bf16 %v4365_v49, %v4364_v47 }
 0x281   : > { %v3123_v16 = vpop.f32.mrb[180].mxu0  ;;  %v4189_v38 = vpop.f32.mrb[180].mxu1 }
 0x282   : > { %v3124_v56 = vadd.f32 %v15814_v50, %v3123_v16  ;;  %v3125_v7 = vpop.f32.mrb[181].mxu0  ;;  %3426 = vrot.lane.b32.xlu1 %v3350_v54, %s14948_s28  ;;  %v4190_v59 = vadd.f32 %v15814_v50, %v4189_v38  ;;  %v4191_v0 = vpop.f32.mrb[181].mxu1 }
 0x283   : > { %v3126_v2 = vpop.f32.mrb[182].mxu0  ;;  %v4192_v6 = vpop.f32.mrb[182].mxu1 }
 0x284   : > { %v3127_v5 = vadd.f32 %v15814_v50, %v3126_v2  ;;  %v3128_v8 = vpop.f32.mrb[183].mxu0  ;;  %v4366_v9 = vmax.f32 %v4190_v59, 0.0  ;;  %v4193_v11 = vadd.f32 %v15814_v50, %v4192_v6  ;;  %v4194_v12 = vpop.f32.mrb[183].mxu1  ;;  %v3300_v14 = vmax.f32 %v3124_v56, 0.0 }
 0x286   : > { %v3301_v57 = vmax.f32 %v3127_v5, 0.0  ;;  %4492 = vrot.lane.b32.xlu1 %v4416_v45, %s14949_s29  ;;  %v4367_v15 = vmax.f32 %v4193_v11, 0.0 }
 0x288   : > { %v3351_v17 = vpack.c.bf16 %v3301_v57, %v3300_v14  ;;  %v4417_v18 = vpack.c.bf16 %v4367_v15, %v4366_v9 }
 0x289   : > { %v3131_v58 = vpop.f32.mrb[184].mxu0  ;;  %v4197_v23 = vpop.f32.mrb[184].mxu1 }
 0x28a   : > { %v3132_v20 = vadd.f32 %v15814_v50, %v3131_v58  ;;  %v3133_v24 = vpop.f32.mrb[185].mxu0  ;;  %3428 = vrot.lane.b32.xlu0 %v3351_v17, %s14948_s28  ;;  %v4198_v25 = vadd.f32 %v15814_v50, %v4197_v23  ;;  %v4199_v26 = vpop.f32.mrb[185].mxu1  ;;  %4494 = vrot.lane.b32.xlu1 %v4417_v18, %s14949_s29 }
 0x28b   : > { %v3134_v32 = vpop.f32.mrb[186].mxu0  ;;  %v4200_v22 = vpop.f32.mrb[186].mxu1 }
 0x28c   : > { %v3135_v29 = vadd.f32 %v15814_v50, %v3134_v32  ;;  %v3136_v33 = vpop.f32.mrb[187].mxu0  ;;  %v4368_v34 = vmax.f32 %v4198_v25, 0.0  ;;  %v4201_v62 = vadd.f32 %v15814_v50, %v4200_v22  ;;  %v4202_v37 = vpop.f32.mrb[187].mxu1  ;;  %v3302_v40 = vmax.f32 %v3132_v20, 0.0 }
 0x28e   : > { %v3303_v41 = vmax.f32 %v3135_v29, 0.0  ;;  %2364 = vrot.lane.b32.xlu0 %v15588_v39, %s14947_s17  ;;  %v4369_v21 = vmax.f32 %v4201_v62, 0.0 }
 0x290   : > { %v3352_v42 = vpack.c.bf16 %v3303_v41, %v3302_v40  ;;  %v4418_v47 = vpack.c.bf16 %v4369_v21, %v4368_v34 }
 0x291   : > { %v3139_v43 = vpop.f32.mrb[188].mxu0  ;;  %v4205_v48 = vpop.f32.mrb[188].mxu1 }
 0x292   : > { %v3140_v46 = vadd.f32 %v15814_v50, %v3139_v43  ;;  %v3141_v51 = vpop.f32.mrb[189].mxu0  ;;  %3430 = vrot.lane.b32.xlu1 %v3352_v42, %s14948_s28  ;;  %v4206_v52 = vadd.f32 %v15814_v50, %v4205_v48  ;;  %v4207_v49 = vpop.f32.mrb[189].mxu1  ;;  %4496 = vrot.lane.b32.xlu0 %v4418_v47, %s14949_s29 }
 0x293   : > { %v3142_v54 = vpop.f32.mrb[190].mxu0  ;;  %v4208_v45 = vpop.f32.mrb[190].mxu1 }
 0x294   : > { %v3143_v16 = vadd.f32 %v15814_v50, %v3142_v54  ;;  %v3144_v39 = vpop.f32.mrb[191].mxu0  ;;  %v4370_v56 = vmax.f32 %v4206_v52, 0.0  ;;  %v4209_v38 = vadd.f32 %v15814_v50, %v4208_v45  ;;  %v4210_v7 = vpop.f32.mrb[191].mxu1  ;;  %v3304_v0 = vmax.f32 %v3140_v46, 0.0 }
 0x295   : > { %v4469_v59 = vpop.permute.xlu1 %4468  ;;  %v3403_v5 = vpop.permute.xlu0 %3402 }
 0x296   : > { %v3305_v2 = vmax.f32 %v3143_v16, 0.0  ;;  %2366 = vrot.lane.b32.xlu1 %v15599_v4, %s14947_s17  ;;  %v4371_v6 = vmax.f32 %v4209_v38, 0.0  ;;  %3499 = vst.msk [vmem:[#allocation2] sm:$0xff] %vm3498_vm2, %v3403_v5  ;;  %2368 = vrot.lane.b32.xlu0 %v15613_v31, %s14947_s17 }
 0x297   : > { %4565 = vst.msk [vmem:[#allocation2] sm:$0xff] %vm4564_vm3, %v4469_v59 }
 0x298   : > { %v3353_v8 = vpack.c.bf16 %v3305_v2, %v3304_v0  ;;  %v4419_v9 = vpack.c.bf16 %v4371_v6, %v4370_v56 }
 0x299   : > { %v3147_v11 = vpop.f32.mrb[192].mxu0  ;;  %v4213_v14 = vpop.f32.mrb[192].mxu1 }
 0x29a   : > { %v3148_v12 = vadd.f32 %v15814_v50, %v3147_v11  ;;  %v3149_v57 = vpop.f32.mrb[193].mxu0  ;;  %v4214_v15 = vadd.f32 %v15814_v50, %v4213_v14  ;;  %v4215_v17 = vpop.f32.mrb[193].mxu1  ;;  %4498 = vrot.lane.b32.xlu1 %v4419_v9, %s14949_s29  ;;  %3432 = vrot.lane.b32.xlu0 %v3353_v8, %s14948_s28 }
 0x29b   : > { %v3150_v4 = vpop.f32.mrb[194].mxu0  ;;  %v4216_v31 = vpop.f32.mrb[194].mxu1 }
 0x29c   : > { %v3151_v58 = vadd.f32 %v15814_v50, %v3150_v4  ;;  %v3152_v18 = vpop.f32.mrb[195].mxu0  ;;  %v4372_v20 = vmax.f32 %v4214_v15, 0.0  ;;  %v4217_v23 = vadd.f32 %v15814_v50, %v4216_v31  ;;  %v4218_v24 = vpop.f32.mrb[195].mxu1  ;;  %v3306_v26 = vmax.f32 %v3148_v12, 0.0 }
 0x29d   : > { %v4471_v25 = vpop.permute.xlu1 %4470  ;;  %v3405_v29 = vpop.permute.xlu0 %3404 }
 0x29e   : > { %v3307_v32 = vmax.f32 %v3151_v58, 0.0  ;;  %v4373_v22 = vmax.f32 %v4217_v23, 0.0  ;;  %3500 = vst.msk [vmem:[#allocation2 + $0x8] sm:$0xff] %vm3498_vm2, %v3405_v29  ;;  %2370 = vrot.lane.b32.xlu0 %v15627_v63, %s14947_s17  ;;  %v4645_v33 = vld [vmem:[#allocation2] sm:$0xff] }
 0x29f   : > { %4566 = vst.msk [vmem:[#allocation2 + $0x8] sm:$0xff] %vm4564_vm3, %v4471_v25  ;;  %v4681_v21 = vshll.u32 %v4645_v33, 16  ;;  %v4679_v2 = vshrl.u32 %v4645_v33, 16  ;;  %v14310_v58 = vld [vmem:[%s18772_s4 + $0x80] sm:$0xff]  }
 0x2a0   : > { %v3354_v34 = vpack.c.bf16 %v3307_v32, %v3306_v26  ;;  %v4420_v62 = vpack.c.bf16 %v4373_v22, %v4372_v20 }
 0x2a1   : > { %v3155_v37 = vpop.f32.mrb[196].mxu0  ;;  %v2341_v40 = vpop.permute.xlu0 %2340  ;;  %v4683_v56 = vrot.slane %v4681_v21, 1  ;;  %v14311_v21 = vld [vmem:[%s18772_s4 + $0x88] sm:$0xff]  }
 0x2a2   : > { %v4221_v41 = vpop.f32.mrb[196].mxu1  ;;  %3434 = vrot.lane.b32.xlu1 %v3354_v34, %s14948_s28  ;;  %2435 = vst.msk [vmem:[#allocation2 + $0x10] sm:$0xff] %vm2432_vm1, %v2341_v40  ;;  %v3156_v42 = vadd.f32 %v15814_v50, %v3155_v37  ;;  %v3157_v47 = vpop.f32.mrb[197].mxu0 }
 0x2a3   : > { %v4222_v43 = vadd.f32 %v15814_v50, %v4221_v41  ;;  %v4223_v46 = vpop.f32.mrb[197].mxu1  ;;  %v3158_v63 = vpop.f32.mrb[198].mxu0  ;;  %v4684_v14 = vor.u32 %v4683_v56, %v4679_v2 }
 0x2a4   : > { %v4224_v48 = vpop.f32.mrb[198].mxu1  ;;  %v3159_v52 = vadd.f32 %v15814_v50, %v3158_v63  ;;  %v3160_v54 = vpop.f32.mrb[199].mxu0  ;;  %v3308_v38 = vmax.f32 %v3156_v42, 0.0 }
 0x2a5   : > { %v4374_v51 = vmax.f32 %v4222_v43, 0.0  ;;  %v4225_v49 = vadd.f32 %v15814_v50, %v4224_v48  ;;  %v4226_v16 = vpop.f32.mrb[199].mxu1  ;;  %v3407_v45 = vpop.permute.xlu1 %3406 }
 0x2a6   : > { %v4473_v39 = vpop.permute.xlu0 %4472  ;;  %4500 = vrot.lane.b32.xlu1 %v4420_v62, %s14949_s29  ;;  %v3309_v7 = vmax.f32 %v3159_v52, 0.0  ;;  %3501 = vst.msk [vmem:[#allocation2 + $0x10] sm:$0xff] %vm3498_vm2, %v3407_v45  ;;  %v16001_v0 = vld [vmem:[#allocation2 + $0x8] sm:$0xff] }
 0x2a7   : > { %v4375_v59 = vmax.f32 %v4225_v49, 0.0  ;;  %4567 = vst.msk [vmem:[#allocation2 + $0x10] sm:$0xff] %vm4564_vm3, %v4473_v39  ;;  %v4686_v5 = vshll.u32 %v16001_v0, 16  ;;  %v4690_v43 = vshrl.u32 %v16001_v0, 16  ;;  %v14312_v39 = vld [vmem:[%s18772_s4 + $0x90] sm:$0xff]  }
 0x2a8   : > { %v3355_v6 = vpack.c.bf16 %v3309_v7, %v3308_v38 }
 0x2a9   : > { %v4421_v8 = vpack.c.bf16 %v4375_v59, %v4374_v51  ;;  %v3163_v9 = vpop.f32.mrb[200].mxu0  ;;  %v2343_v11 = vpop.permute.xlu1 %2342  ;;  %v4688_v57 = vrot.slane %v4686_v5, 1 }
 0x2aa   : > { %v2345_v12 = vpop.permute.xlu0 %2344  ;;  %2436 = vst.msk [vmem:[#allocation2 + $0x18] sm:$0xff] %vm2432_vm1, %v2343_v11  ;;  %v3164_v15 = vadd.f32 %v15814_v50, %v3163_v9  ;;  %v4229_v17 = vpop.f32.mrb[200].mxu1  ;;  %3436 = vrot.lane.b32.xlu0 %v3355_v6, %s14948_s28 }
 0x2ab   : > { %2437 = vst.msk [vmem:[#allocation2 + $0x20] sm:$0xff] %vm2432_vm1, %v2345_v12  ;;  %v3165_v4 = vpop.f32.mrb[201].mxu0  ;;  %4502 = vrot.lane.b32.xlu1 %v4421_v8, %s14949_s29  ;;  %v4230_v31 = vadd.f32 %v15814_v50, %v4229_v17  ;;  %v4231_v18 = vpop.f32.mrb[201].mxu1  ;;  %v4689_v23 = vsel %vm4677_vm4, %v4684_v14, %v4688_v57  ;;  %v4692_v51 = vor.u32 %v4690_v43, %v4688_v57  ;;  %v14313_v57 = vld [vmem:[%s18772_s4 + $0x98] sm:$0xff]  }
 0x2ac   : > { %v3166_v20 = vpop.f32.mrb[202].mxu0  ;;  %v4232_v25 = vpop.f32.mrb[202].mxu1  ;;  %5871 = vmatprep.mubr.bf16.mxu0 %v4689_v23  ;;  %v3310_v62 = vmax.f32 %v3164_v15, 0.0 }
 0x2ad   : > { %v3167_v24 = vadd.f32 %v15814_v50, %v3166_v20  ;;  %v3168_v26 = vpop.f32.mrb[203].mxu0  ;;  %v4376_v32 = vmax.f32 %v4230_v31, 0.0  ;;  %v4233_v29 = vadd.f32 %v15814_v50, %v4232_v25  ;;  %v4234_v22 = vpop.f32.mrb[203].mxu1  ;;  %5872 = vmatmul.mubr.bf16.vlgmr.msra.gmra.mrb[0].mxu0 %v4645_v33 }
 0x2ae   : > { %v4475_v34 = vpop.permute.xlu1 %4474  ;;  %v3409_v40 = vpop.permute.xlu0 %3408  ;;  %2372 = vrot.lane.b32.xlu0 %v15639_v28, %s14947_s17  ;;  %v16019_v41 = vld [vmem:[#allocation2 + $0x10] sm:$0xff]  ;;  %6065 = vmatpush1.bf16.msra.mxu0 %v14310_v58  ;;  %v14314_v22 = vld [vmem:[%s18772_s4 + $0xa0] sm:$0xff]  }
 0x2af   : > { %v3311_v37 = vmax.f32 %v3167_v24, 0.0  ;;  %v4377_v42 = vmax.f32 %v4233_v29, 0.0  ;;  %3502 = vst.msk [vmem:[#allocation2 + $0x18] sm:$0xff] %vm3498_vm2, %v3409_v40  ;;  %v4694_v33 = vshll.u32 %v16019_v41, 16  ;;  %6066 = vmatprep.subr.bf16.mxu0 %v14946_v1  ;;  %v4698_v58 = vshrl.u32 %v16019_v41, 16 }
 0x2b0   : > { %4568 = vst.msk [vmem:[#allocation2 + $0x18] sm:$0xff] %vm4564_vm3, %v4475_v34 }
 0x2b1   : > { %v3356_v47 = vpack.c.bf16 %v3311_v37, %v3310_v62  ;;  %v3171_v28 = vpop.f32.mrb[204].mxu0  ;;  %v4422_v46 = vpack.c.bf16 %v4377_v42, %v4376_v32  ;;  %v4237_v63 = vpop.f32.mrb[204].mxu1  ;;  %v4696_v52 = vrot.slane %v4694_v33, 1 }
 0x2b2   : > { %v3173_v48 = vpop.f32.mrb[205].mxu0  ;;  %v2347_v49 = vpop.permute.xlu0 %2346  ;;  %v3172_v54 = vadd.f32 %v15814_v50, %v3171_v28  ;;  %v4238_v16 = vadd.f32 %v15814_v50, %v4237_v63  ;;  %6067 = vmatpush1.bf16.msra.mxu0 %v14311_v21  ;;  %v16042_v50 = vld [vmem:[%s18771_s3] ss:$0 sm:$0xff]  ;;  %v14315_v63 = vld [vmem:[%s18772_s4 + $0xa8] sm:$0xff]  }
 0x2b3   : > { %v4239_v45 = vpop.f32.mrb[205].mxu1  ;;  %3438 = vrot.lane.b32.xlu1 %v3356_v47, %s14948_s28  ;;  %2438 = vst.msk [vmem:[#allocation2 + $0x28] sm:$0xff] %vm2432_vm1, %v2347_v49  ;;  %4504 = vrot.lane.b32.xlu0 %v4422_v46, %s14949_s29  ;;  %v3174_v56 = vpop.f32.mrb[206].mxu0  ;;  %v4697_v7 = vsel %vm4677_vm4, %v4692_v51, %v4696_v52 }
 0x2b4   : > { %v4240_v38 = vpop.f32.mrb[206].mxu1  ;;  %6068 = vmatprep.subr.bf16.mxu0 %v14946_v1  ;;  %v4378_v59 = vmax.f32 %v4238_v16, 0.0  ;;  %v3175_v2 = vadd.f32 %v16042_v50, %v3174_v56  ;;  %5879 = vmatprep.mubr.bf16.mxu0 %v4697_v7  ;;  %v3176_v6 = vpop.f32.mrb[207].mxu0  ;;  %v3312_v11 = vmax.f32 %v3172_v54, 0.0 }
 0x2b5   : > { %v4241_v5 = vadd.f32 %v16042_v50, %v4240_v38  ;;  %v4242_v8 = vpop.f32.mrb[207].mxu1  ;;  %v3411_v9 = vpop.permute.xlu1 %3410  ;;  %5880 = vmatmul.mubr.bf16.gmra.mrb[4].mxu0 %v16001_v0 }
 0x2b6   : > { %v3313_v12 = vmax.f32 %v3175_v2, 0.0  ;;  %3503 = vst.msk [vmem:[#allocation2 + $0x20] sm:$0xff] %vm3498_vm2, %v3411_v9  ;;  %6069 = vmatpush1.bf16.msra.mxu0 %v14312_v39 }
 0x2b7   : > { %v4379_v14 = vmax.f32 %v4241_v5, 0.0  ;;  %2374 = vrot.lane.b32.xlu1 %v15653_v60, %s14947_s17  ;;  %2376 = vrot.lane.b32.xlu0 %v15665_v27, %s14947_s17  ;;  %v4648_v15 = vld [vmem:[#allocation2 + $0x18] sm:$0x1]  ;;  %v4700_v27 = vor.u32 %v4698_v58, %v4696_v52 }
 0x2b8   : > { %6070 = vmatprep.subr.bf16.mxu0 %v14946_v1  ;;  %v3357_v0 = vpack.c.bf16 %v3313_v12, %v3312_v11  ;;  %v4702_v31 = vshll.u32 %v4648_v15, 16 }
 0x2b9   : > { %v4423_v17 = vpack.c.bf16 %v4379_v14, %v4378_v59  ;;  %v3179_v4 = vpop.f32.mrb[208].mxu0  ;;  %v4477_v18 = vpop.permute.xlu1 %4476  ;;  %v14316_v59 = vld [vmem:[%s18772_s4 + $0xb0] sm:$0xff]  }
 0x2ba   : > { %v4245_v20 = vpop.f32.mrb[208].mxu1  ;;  %4569 = vst.msk [vmem:[#allocation2 + $0x20] sm:$0xff] %vm4564_vm3, %v4477_v18  ;;  %v3180_v60 = vadd.f32 %v16042_v50, %v3179_v4  ;;  %v3181_v24 = vpop.f32.mrb[209].mxu0  ;;  %v4704_v26 = vrot.slane %v4702_v31, 1  ;;  %6071 = vmatpush1.bf16.msra.mxu0 %v14313_v57  ;;  %v14317_v31 = vld [vmem:[%s18772_s4 + $0xb8] sm:$0xff]  }
 0x2bb   : > { %v4246_v23 = vadd.f32 %v16042_v50, %v4245_v20  ;;  %v4247_v25 = vpop.f32.mrb[209].mxu1  ;;  %4506 = vrot.lane.b32.xlu1 %v4423_v17, %s14949_s29  ;;  %3440 = vrot.lane.b32.xlu0 %v3357_v0, %s14948_s28  ;;  %v3182_v32 = vpop.f32.mrb[210].mxu0 }
 0x2bc   : > { %v4248_v29 = vpop.f32.mrb[210].mxu1  ;;  %6072 = vmatprep.subr.bf16.mxu0 %v14946_v1  ;;  %v3183_v62 = vadd.f32 %v16042_v50, %v3182_v32  ;;  %v4705_v40 = vsel %vm4677_vm4, %v4700_v27, %v4704_v26  ;;  %v3184_v21 = vpop.f32.mrb[211].mxu0  ;;  %v3314_v47 = vmax.f32 %v3180_v60, 0.0 }
 0x2bd   : > { %v4380_v34 = vmax.f32 %v4246_v23, 0.0  ;;  %v4249_v37 = vadd.f32 %v16042_v50, %v4248_v29  ;;  %v4250_v42 = vpop.f32.mrb[211].mxu1  ;;  %5887 = vmatprep.mubr.bf16.mxu0 %v4705_v40  ;;  %v4479_v43 = vpop.permute.xlu1 %4478  ;;  %v14318_v40 = vld [vmem:[%s18772_s4 + $0xc0] sm:$0xff]  }
 0x2be   : > { %v3413_v33 = vpop.permute.xlu0 %3412  ;;  %v3315_v28 = vmax.f32 %v3183_v62, 0.0  ;;  %5888 = vmatmul.mubr.bf16.gmra.mrb[8].mxu0 %v16019_v41 }
 0x2bf   : > { %v4381_v46 = vmax.f32 %v4249_v37, 0.0  ;;  %3504 = vst.msk [vmem:[#allocation2 + $0x28] sm:$0xff] %vm3498_vm2, %v3413_v33  ;;  %2378 = vrot.lane.b32.xlu0 %v15679_v61, %s14947_s17  ;;  %6073 = vmatpush1.bf16.msra.mxu0 %v14314_v22 }
 0x2c0   : > { %4570 = vst.msk [vmem:[#allocation2 + $0x28] sm:$0xff] %vm4564_vm3, %v4479_v43  ;;  %v3358_v48 = vpack.c.bf16 %v3315_v28, %v3314_v47  ;;  %6074 = vmatprep.subr.bf16.mxu0 %v14946_v1 }
 0x2c1   : > { %v4424_v51 = vpack.c.bf16 %v4381_v46, %v4380_v34  ;;  %v3187_v52 = vpop.f32.mrb[212].mxu0  ;;  %v4253_v54 = vpop.f32.mrb[212].mxu1  ;;  %v4649_v16 = vld [vmem:[#allocation2 + $0x20] sm:$0xff] }
 0x2c2   : > { %v2349_v49 = vpop.permute.xlu0 %2348  ;;  %v3188_v41 = vadd.f32 %v16042_v50, %v3187_v52  ;;  %v4254_v45 = vadd.f32 %v16042_v50, %v4253_v54  ;;  %v3189_v61 = vpop.f32.mrb[213].mxu0  ;;  %3442 = vrot.lane.b32.xlu1 %v3358_v48, %s14948_s28  ;;  %v4709_v56 = vshll.u32 %v4649_v16, 16  ;;  %v4707_v4 = vshrl.u32 %v4649_v16, 16 }
 0x2c3   : > { %2439 = vst.msk [vmem:[#allocation2 + $0x30] sm:$0xff] %vm2432_vm1, %v2349_v49  ;;  %v4255_v39 = vpop.f32.mrb[213].mxu1  ;;  %v3190_v38 = vpop.f32.mrb[214].mxu0  ;;  %6075 = vmatpush1.bf16.msra.mxu0 %v14315_v63 }
 0x2c4   : > { %v4256_v7 = vpop.f32.mrb[214].mxu1  ;;  %v4382_v2 = vmax.f32 %v4254_v45, 0.0  ;;  %v3191_v5 = vadd.f32 %v16042_v50, %v3190_v38  ;;  %v3192_v8 = vpop.f32.mrb[215].mxu0  ;;  %6076 = vmatprep.subr.bf16.mxu0 %v14946_v1  ;;  %v4711_v14 = vrot.slane %v4709_v56, 1  ;;  %v3316_v57 = vmax.f32 %v3188_v41, 0.0 }
 0x2c5   : > { %v4257_v6 = vadd.f32 %v16042_v50, %v4256_v7  ;;  %v4258_v9 = vpop.f32.mrb[215].mxu1  ;;  %v3415_v11 = vpop.permute.xlu1 %3414 }
 0x2c6   : > { %v4481_v12 = vpop.permute.xlu0 %4480  ;;  %v3317_v15 = vmax.f32 %v3191_v5, 0.0  ;;  %3505 = vst.msk [vmem:[#allocation2 + $0x30] sm:$0xff] %vm3498_vm2, %v3415_v11  ;;  %4508 = vrot.lane.b32.xlu1 %v4424_v51, %s14949_s29  ;;  %v4712_v25 = vor.u32 %v4711_v14, %v4707_v4 }
 0x2c7   : > { %v4383_v0 = vmax.f32 %v4257_v6, 0.0  ;;  %v16090_v17 = vld [vmem:[#allocation2 + $0x28] sm:$0xff]  ;;  %4571 = vst.msk [vmem:[#allocation2 + $0x30] sm:$0xff] %vm4564_vm3, %v4481_v12  ;;  %6077 = vmatpush1.bf16.msra.mxu0 %v14316_v59 }
 0x2c8   : > { %v4714_v58 = vshll.u32 %v16090_v17, 16  ;;  %v3359_v18 = vpack.c.bf16 %v3317_v15, %v3316_v57  ;;  %6078 = vmatprep.subr.bf16.mxu0 %v14946_v1  ;;  %v4718_v54 = vshrl.u32 %v16090_v17, 16  ;;  %v14319_v6 = vld [vmem:[%s18772_s4 + $0xc8] sm:$0xff]  }
 0x2c9   : > { %v4425_v20 = vpack.c.bf16 %v4383_v0, %v4382_v2  ;;  %v3195_v60 = vpop.f32.mrb[216].mxu0  ;;  %v2351_v23 = vpop.permute.xlu1 %2350 }
 0x2ca   : > { %v2353_v24 = vpop.permute.xlu0 %2352  ;;  %v4716_v27 = vrot.slane %v4714_v58, 1  ;;  %2440 = vst.msk [vmem:[#allocation2 + $0x38] sm:$0xff] %vm2432_vm1, %v2351_v23  ;;  %v3196_v26 = vadd.f32 %v16042_v50, %v3195_v60  ;;  %v4261_v32 = vpop.f32.mrb[216].mxu1  ;;  %3444 = vrot.lane.b32.xlu0 %v3359_v18, %s14948_s28 }
 0x2cb   : > { %2441 = vst.msk [vmem:[#allocation2 + $0x40] sm:$0xff] %vm2432_vm1, %v2353_v24  ;;  %v3197_v29 = vpop.f32.mrb[217].mxu0  ;;  %4510 = vrot.lane.b32.xlu1 %v4425_v20, %s14949_s29  ;;  %v4262_v22 = vadd.f32 %v16042_v50, %v4261_v32  ;;  %v4263_v34 = vpop.f32.mrb[217].mxu1  ;;  %6079 = vmatpush1.bf16.msra.mxu0 %v14317_v31 }
 0x2cc   : > { %v3198_v62 = vpop.f32.mrb[218].mxu0  ;;  %v4717_v37 = vsel %vm4677_vm4, %v4712_v25, %v4716_v27  ;;  %v4264_v42 = vpop.f32.mrb[218].mxu1  ;;  %6080 = vmatprep.subr.bf16.mxu0 %v14946_v1  ;;  %v3318_v63 = vmax.f32 %v3196_v26, 0.0 }
 0x2cd   : > { %v3199_v21 = vadd.f32 %v16042_v50, %v3198_v62  ;;  %5895 = vmatprep.mubr.bf16.mxu0 %v4717_v37  ;;  %v3200_v43 = vpop.f32.mrb[219].mxu0  ;;  %v4384_v33 = vmax.f32 %v4262_v22, 0.0  ;;  %v4265_v47 = vadd.f32 %v16042_v50, %v4264_v42  ;;  %v4266_v28 = vpop.f32.mrb[219].mxu1 }
 0x2ce   : > { %v4483_v46 = vpop.permute.xlu1 %4482  ;;  %5896 = vmatmul.mubr.bf16.gmra.mrb[12].mxu0 %v4649_v16  ;;  %v3417_v51 = vpop.permute.xlu0 %3416  ;;  %2380 = vrot.lane.b32.xlu0 %v15691_v30, %s14947_s17  ;;  %v16113_v52 = vld [vmem:[#allocation2 + $0x30] sm:$0xff]  ;;  %v4720_v30 = vor.u32 %v4718_v54, %v4716_v27 }
 0x2cf   : > { %v3319_v48 = vmax.f32 %v3199_v21, 0.0  ;;  %v4385_v49 = vmax.f32 %v4265_v47, 0.0  ;;  %3506 = vst.msk [vmem:[#allocation2 + $0x38] sm:$0xff] %vm3498_vm2, %v3417_v51  ;;  %v4722_v41 = vshll.u32 %v16113_v52, 16  ;;  %6081 = vmatpush1.bf16.msra.mxu0 %v14318_v40  ;;  %v4726_v25 = vshrl.u32 %v16113_v52, 16 }
 0x2d0   : > { %4572 = vst.msk [vmem:[#allocation2 + $0x38] sm:$0xff] %vm4564_vm3, %v4483_v46  ;;  %6082 = vmatprep.subr.bf16.mxu0 %v14946_v1 }
 0x2d1   : > { %v3360_v45 = vpack.c.bf16 %v3319_v48, %v3318_v63  ;;  %v3203_v16 = vpop.f32.mrb[220].mxu0  ;;  %v4426_v61 = vpack.c.bf16 %v4385_v49, %v4384_v33  ;;  %v4269_v39 = vpop.f32.mrb[220].mxu1  ;;  %v4724_v38 = vrot.slane %v4722_v41, 1  ;;  %v14320_v49 = vld [vmem:[%s18772_s4 + $0xd0] sm:$0xff]  }
 0x2d2   : > { %v3205_v56 = vpop.f32.mrb[221].mxu0  ;;  %v2355_v7 = vpop.permute.xlu0 %2354  ;;  %v3204_v59 = vadd.f32 %v16042_v50, %v3203_v16  ;;  %v4270_v2 = vadd.f32 %v16042_v50, %v4269_v39 }
 0x2d3   : > { %v4271_v5 = vpop.f32.mrb[221].mxu1  ;;  %3446 = vrot.lane.b32.xlu1 %v3360_v45, %s14948_s28  ;;  %2442 = vst.msk [vmem:[#allocation2 + $0x48] sm:$0xff] %vm2432_vm1, %v2355_v7  ;;  %4512 = vrot.lane.b32.xlu0 %v4426_v61, %s14949_s29  ;;  %v3206_v8 = vpop.f32.mrb[222].mxu0  ;;  %v4725_v11 = vsel %vm4677_vm4, %v4720_v30, %v4724_v38 }
 0x2d4   : > { %v4272_v9 = vpop.f32.mrb[222].mxu1  ;;  %v4386_v12 = vmax.f32 %v4270_v2, 0.0  ;;  %v3207_v14 = vadd.f32 %v16042_v50, %v3206_v8  ;;  %5903 = vmatprep.mubr.bf16.mxu0 %v4725_v11  ;;  %v3208_v15 = vpop.f32.mrb[223].mxu0  ;;  %6083 = vmatpush1.bf16.msra.mxu0 %v14319_v6  ;;  %v3320_v58 = vmax.f32 %v3204_v59, 0.0 }
 0x2d5   : > { %v4273_v57 = vadd.f32 %v16042_v50, %v4272_v9  ;;  %v4274_v0 = vpop.f32.mrb[223].mxu1  ;;  %v3419_v4 = vpop.permute.xlu1 %3418  ;;  %6084 = vmatprep.subr.bf16.mxu0 %v14946_v1 }
 0x2d6   : > { %5904 = vmatmul.mubr.bf16.gmra.mrb[16].mxu0 %v16090_v17  ;;  %v3321_v31 = vmax.f32 %v3207_v14, 0.0  ;;  %3507 = vst.msk [vmem:[#allocation2 + $0x40] sm:$0xff] %vm3498_vm2, %v3419_v4 }
 0x2d7   : > { %v4387_v18 = vmax.f32 %v4273_v57, 0.0  ;;  %2382 = vrot.lane.b32.xlu1 %v15705_v3, %s14947_s17  ;;  %2384 = vrot.lane.b32.xlu0 %v15717_v36, %s14947_s17  ;;  %v4652_v20 = vld [vmem:[#allocation2 + $0x38] sm:$0x1]  ;;  %v4728_v36 = vor.u32 %v4726_v25, %v4724_v38 }
 0x2d8   : > { %v3361_v60 = vpack.c.bf16 %v3321_v31, %v3320_v58  ;;  %v4730_v17 = vshll.u32 %v4652_v20, 16  ;;  %6085 = vmatpush1.bf16.msra.mxu0 %v14320_v49 }
 0x2d9   : > { %v4427_v23 = vpack.c.bf16 %v4387_v18, %v4386_v12  ;;  %v3211_v24 = vpop.f32.mrb[224].mxu0  ;;  %v4485_v27 = vpop.permute.xlu1 %4484  ;;  %6086 = vmatprep.subr.bf16.mxu0 %v14946_v1 }
 0x2da   : > { %v4277_v26 = vpop.f32.mrb[224].mxu1  ;;  %4573 = vst.msk [vmem:[#allocation2 + $0x40] sm:$0xff] %vm4564_vm3, %v4485_v27  ;;  %v3212_v32 = vadd.f32 %v16042_v50, %v3211_v24  ;;  %v3213_v22 = vpop.f32.mrb[225].mxu0  ;;  %v4732_v34 = vrot.slane %v4730_v17, 1 }
 0x2db   : > { %v4278_v29 = vadd.f32 %v16042_v50, %v4277_v26  ;;  %v4279_v3 = vpop.f32.mrb[225].mxu1  ;;  %4514 = vrot.lane.b32.xlu1 %v4427_v23, %s14949_s29  ;;  %3448 = vrot.lane.b32.xlu0 %v3361_v60, %s14948_s28  ;;  %v3214_v62 = vpop.f32.mrb[226].mxu0 }
 0x2dc   : > { %v4280_v37 = vpop.f32.mrb[226].mxu1  ;;  %v3215_v21 = vadd.f32 %v16042_v50, %v3214_v62  ;;  %v4733_v43 = vsel %vm4677_vm4, %v4728_v36, %v4732_v34  ;;  %v3216_v33 = vpop.f32.mrb[227].mxu0  ;;  %v3322_v63 = vmax.f32 %v3212_v32, 0.0 }
 0x2dd   : > { %v4388_v40 = vmax.f32 %v4278_v29, 0.0  ;;  %v4281_v42 = vadd.f32 %v16042_v50, %v4280_v37  ;;  %v4282_v47 = vpop.f32.mrb[227].mxu1  ;;  %5911 = vmatprep.mubr.bf16.mxu0 %v4733_v43  ;;  %v4487_v28 = vpop.permute.xlu1 %4486  ;;  %v14321_v29 = vld [vmem:[%s18772_s4 + $0xd8] sm:$0xff]  }
 0x2de   : > { %v3421_v46 = vpop.permute.xlu0 %3420  ;;  %v3323_v48 = vmax.f32 %v3215_v21, 0.0  ;;  %5912 = vmatmul.mubr.bf16.gmra.mrb[20].mxu0 %v16113_v52 }
 0x2df   : > { %v4389_v51 = vmax.f32 %v4281_v42, 0.0  ;;  %3508 = vst.msk [vmem:[#allocation2 + $0x48] sm:$0xff] %vm3498_vm2, %v3421_v46  ;;  %2386 = vrot.lane.b32.xlu0 %v15731_v10, %s14947_s17  ;;  %6087 = vmatpush1.bf16.msra.mxu0 %v14321_v29 }
 0x2e0   : > { %4574 = vst.msk [vmem:[#allocation2 + $0x48] sm:$0xff] %vm4564_vm3, %v4487_v28  ;;  %v3362_v54 = vpack.c.bf16 %v3323_v48, %v3322_v63  ;;  %6088 = vmatprep.subr.bf16.mxu0 %v14946_v1 }
 0x2e1   : > { %v4428_v41 = vpack.c.bf16 %v4389_v51, %v4388_v40  ;;  %v3219_v45 = vpop.f32.mrb[228].mxu0  ;;  %v4285_v61 = vpop.f32.mrb[228].mxu1  ;;  %v4653_v39 = vld [vmem:[#allocation2 + $0x40] sm:$0xff] }
 0x2e2   : > { %v2357_v16 = vpop.permute.xlu0 %2356  ;;  %v3220_v52 = vadd.f32 %v16042_v50, %v3219_v45  ;;  %v4286_v56 = vadd.f32 %v16042_v50, %v4285_v61  ;;  %v3221_v30 = vpop.f32.mrb[229].mxu0  ;;  %3450 = vrot.lane.b32.xlu1 %v3362_v54, %s14948_s28  ;;  %v4737_v10 = vshll.u32 %v4653_v39, 16  ;;  %v4735_v58 = vshrl.u32 %v4653_v39, 16 }
 0x2e3   : > { %2443 = vst.msk [vmem:[#allocation2 + $0x50] sm:$0xff] %vm2432_vm1, %v2357_v16  ;;  %v4287_v38 = vpop.f32.mrb[229].mxu1  ;;  %v3222_v7 = vpop.f32.mrb[230].mxu0 }
 0x2e4   : > { %v4288_v59 = vpop.f32.mrb[230].mxu1  ;;  %v4390_v2 = vmax.f32 %v4286_v56, 0.0  ;;  %v3223_v5 = vadd.f32 %v16042_v50, %v3222_v7  ;;  %v3224_v8 = vpop.f32.mrb[231].mxu0  ;;  %v4739_v14 = vrot.slane %v4737_v10, 1  ;;  %v3324_v57 = vmax.f32 %v3220_v52, 0.0 }
 0x2e5   : > { %v4289_v6 = vadd.f32 %v16042_v50, %v4288_v59  ;;  %v4290_v9 = vpop.f32.mrb[231].mxu1  ;;  %v3423_v11 = vpop.permute.xlu1 %3422 }
 0x2e6   : > { %v4489_v12 = vpop.permute.xlu0 %4488  ;;  %v3325_v15 = vmax.f32 %v3223_v5, 0.0  ;;  %3509 = vst.msk [vmem:[#allocation2 + $0x50] sm:$0xff] %vm3498_vm2, %v3423_v11  ;;  %4516 = vrot.lane.b32.xlu1 %v4428_v41, %s14949_s29  ;;  %v4740_v25 = vor.u32 %v4739_v14, %v4735_v58 }
 0x2e7   : > { %v4391_v0 = vmax.f32 %v4289_v6, 0.0  ;;  %v16164_v4 = vld [vmem:[#allocation2 + $0x48] sm:$0xff]  ;;  %4575 = vst.msk [vmem:[#allocation2 + $0x50] sm:$0xff] %vm4564_vm3, %v4489_v12  ;;  %v14322_v12 = vld [vmem:[%s18772_s4 + $0xe0] sm:$0xff]  }
 0x2e8   : > { %v4742_v31 = vshll.u32 %v16164_v4, 16  ;;  %v3363_v18 = vpack.c.bf16 %v3325_v15, %v3324_v57  ;;  %v4746_v51 = vshrl.u32 %v16164_v4, 16  ;;  %6089 = vmatpush1.bf16.msra.mxu0 %v14322_v12 }
 0x2e9   : > { %v4429_v20 = vpack.c.bf16 %v4391_v0, %v4390_v2  ;;  %v3227_v60 = vpop.f32.mrb[232].mxu0  ;;  %v2359_v23 = vpop.permute.xlu1 %2358  ;;  %6090 = vmatprep.subr.bf16.mxu0 %v14946_v1 }
 0x2ea   : > { %v2361_v24 = vpop.permute.xlu0 %2360  ;;  %v4744_v17 = vrot.slane %v4742_v31, 1  ;;  %2444 = vst.msk [vmem:[#allocation2 + $0x58] sm:$0xff] %vm2432_vm1, %v2359_v23  ;;  %v3228_v27 = vadd.f32 %v16042_v50, %v3227_v60  ;;  %v4293_v26 = vpop.f32.mrb[232].mxu1  ;;  %3452 = vrot.lane.b32.xlu0 %v3363_v18, %s14948_s28 }
 0x2eb   : > { %2445 = vst.msk [vmem:[#allocation2 + $0x60] sm:$0xff] %vm2432_vm1, %v2361_v24  ;;  %v3229_v32 = vpop.f32.mrb[233].mxu0  ;;  %4518 = vrot.lane.b32.xlu1 %v4429_v20, %s14949_s29  ;;  %v4294_v22 = vadd.f32 %v16042_v50, %v4293_v26  ;;  %v4295_v3 = vpop.f32.mrb[233].mxu1 }
 0x2ec   : > { %v3230_v36 = vpop.f32.mrb[234].mxu0  ;;  %v4745_v34 = vsel %vm4677_vm4, %v4740_v25, %v4744_v17  ;;  %v4296_v37 = vpop.f32.mrb[234].mxu1  ;;  %v3326_v47 = vmax.f32 %v3228_v27, 0.0 }
 0x2ed   : > { %v3231_v62 = vadd.f32 %v16042_v50, %v3230_v36  ;;  %5919 = vmatprep.mubr.bf16.mxu0 %v4745_v34  ;;  %v3232_v40 = vpop.f32.mrb[235].mxu0  ;;  %v4392_v21 = vmax.f32 %v4294_v22, 0.0  ;;  %v4297_v42 = vadd.f32 %v16042_v50, %v4296_v37  ;;  %v4298_v43 = vpop.f32.mrb[235].mxu1 }
 0x2ee   : > { %v4491_v33 = vpop.permute.xlu1 %4490  ;;  %5920 = vmatmul.mubr.bf16.gmra.mrb[24].mxu0 %v4653_v39  ;;  %v3425_v46 = vpop.permute.xlu0 %3424  ;;  %2388 = vrot.lane.b32.xlu0 %v15743_v44, %s14947_s17  ;;  %v16183_v63 = vld [vmem:[#allocation2 + $0x50] sm:$0xff]  ;;  %v4748_v39 = vor.u32 %v4746_v51, %v4744_v17 }
 0x2ef   : > { %v3327_v28 = vmax.f32 %v3231_v62, 0.0  ;;  %v4393_v48 = vmax.f32 %v4297_v42, 0.0  ;;  %3510 = vst.msk [vmem:[#allocation2 + $0x58] sm:$0xff] %vm3498_vm2, %v3425_v46  ;;  %v4750_v49 = vshll.u32 %v16183_v63, 16  ;;  %v4754_v18 = vshrl.u32 %v16183_v63, 16 }
 0x2f0   : > { %4576 = vst.msk [vmem:[#allocation2 + $0x58] sm:$0xff] %vm4564_vm3, %v4491_v33 }
 0x2f1   : > { %v3364_v54 = vpack.c.bf16 %v3327_v28, %v3326_v47  ;;  %v3235_v41 = vpop.f32.mrb[236].mxu0  ;;  %v4430_v45 = vpack.c.bf16 %v4393_v48, %v4392_v21  ;;  %v4301_v16 = vpop.f32.mrb[236].mxu1  ;;  %v4752_v52 = vrot.slane %v4750_v49, 1  ;;  %v14323_v49 = vld [vmem:[%s18772_s4 + $0xe8] sm:$0xff]  }
 0x2f2   : > { %v3237_v61 = vpop.f32.mrb[237].mxu0  ;;  %v2363_v56 = vpop.permute.xlu0 %2362  ;;  %v3236_v44 = vadd.f32 %v16042_v50, %v3235_v41  ;;  %v4302_v30 = vadd.f32 %v16042_v50, %v4301_v16  ;;  %6091 = vmatpush1.bf16.msra.mxu0 %v14323_v49 }
 0x2f3   : > { %v4303_v38 = vpop.f32.mrb[237].mxu1  ;;  %3454 = vrot.lane.b32.xlu1 %v3364_v54, %s14948_s28  ;;  %2446 = vst.msk [vmem:[#allocation2 + $0x68] sm:$0xff] %vm2432_vm1, %v2363_v56  ;;  %4520 = vrot.lane.b32.xlu0 %v4430_v45, %s14949_s29  ;;  %v3238_v10 = vpop.f32.mrb[238].mxu0  ;;  %v4753_v59 = vsel %vm4677_vm4, %v4748_v39, %v4752_v52  ;;  %v4756_v17 = vor.u32 %v4754_v18, %v4752_v52 }
 0x2f4   : > { %v4304_v7 = vpop.f32.mrb[238].mxu1  ;;  %v4394_v2 = vmax.f32 %v4302_v30, 0.0  ;;  %v3239_v5 = vadd.f32 %v16042_v50, %v3238_v10  ;;  %5927 = vmatprep.mubr.bf16.mxu0 %v4753_v59  ;;  %v3240_v8 = vpop.f32.mrb[239].mxu0  ;;  %v3328_v14 = vmax.f32 %v3236_v44, 0.0  ;;  %6092 = vmatprep.subr.bf16.mxu0 %v14946_v1 }
 0x2f5   : > { %v4305_v6 = vadd.f32 %v16042_v50, %v4304_v7  ;;  %v4306_v9 = vpop.f32.mrb[239].mxu1  ;;  %v3427_v11 = vpop.permute.xlu1 %3426 }
 0x2f6   : > { %5928 = vmatmul.mubr.bf16.gmra.mrb[28].mxu0 %v16164_v4  ;;  %v3329_v57 = vmax.f32 %v3239_v5, 0.0  ;;  %3511 = vst.msk [vmem:[#allocation2 + $0x60] sm:$0xff] %vm3498_vm2, %v3427_v11 }
 0x2f7   : > { %v4395_v15 = vmax.f32 %v4305_v6, 0.0  ;;  %2390 = vrot.lane.b32.xlu1 %v15762_v19, %s14947_s17  ;;  %2392 = vrot.lane.b32.xlu0 %v15774_v55, %s14947_s17  ;;  %v4656_v0 = vld [vmem:[#allocation2 + $0x58] sm:$0x1] }
 0x2f8   : > { %v3365_v58 = vpack.c.bf16 %v3329_v57, %v3328_v14  ;;  %v4758_v20 = vshll.u32 %v4656_v0, 16 }
 0x2f9   : > { %v4431_v31 = vpack.c.bf16 %v4395_v15, %v4394_v2  ;;  %v3243_v4 = vpop.f32.mrb[240].mxu0  ;;  %v4493_v60 = vpop.permute.xlu1 %4492 }
 0x2fa   : > { %v4309_v23 = vpop.f32.mrb[240].mxu1  ;;  %4577 = vst.msk [vmem:[#allocation2 + $0x60] sm:$0xff] %vm4564_vm3, %v4493_v60  ;;  %v3244_v24 = vadd.f32 %v16042_v50, %v3243_v4  ;;  %v3245_v25 = vpop.f32.mrb[241].mxu0  ;;  %v4760_v27 = vrot.slane %v4758_v20, 1 }
 0x2fb   : > { %v4310_v19 = vadd.f32 %v16042_v50, %v4309_v23  ;;  %v4311_v55 = vpop.f32.mrb[241].mxu1  ;;  %4522 = vrot.lane.b32.xlu1 %v4431_v31, %s14949_s29  ;;  %3456 = vrot.lane.b32.xlu0 %v3365_v58, %s14948_s28  ;;  %v3246_v26 = vpop.f32.mrb[242].mxu0 }
 0x2fc   : > { %v4312_v32 = vpop.f32.mrb[242].mxu1  ;;  %v3247_v22 = vadd.f32 %v16042_v50, %v3246_v26  ;;  %v4761_v36 = vsel %vm4677_vm4, %v4756_v17, %v4760_v27  ;;  %v3248_v34 = vpop.f32.mrb[243].mxu0  ;;  %v3330_v21 = vmax.f32 %v3244_v24, 0.0 }
 0x2fd   : > { %v4396_v29 = vmax.f32 %v4310_v19, 0.0  ;;  %v4313_v3 = vadd.f32 %v16042_v50, %v4312_v32  ;;  %v4314_v62 = vpop.f32.mrb[243].mxu1  ;;  %5935 = vmatprep.mubr.bf16.mxu0 %v4761_v36  ;;  %v4495_v37 = vpop.permute.xlu1 %4494 }
 0x2fe   : > { %v3429_v40 = vpop.permute.xlu0 %3428  ;;  %v3331_v42 = vmax.f32 %v3247_v22, 0.0  ;;  %5936 = vmatmul.mubr.bf16.gmra.mrb[32].mxu0 %v16183_v63 }
 0x2ff   : > { %v4397_v43 = vmax.f32 %v4313_v3, 0.0  ;;  %3512 = vst.msk [vmem:[#allocation2 + $0x68] sm:$0xff] %vm3498_vm2, %v3429_v40  ;;  %2394 = vrot.lane.b32.xlu0 %v15788_v35, %s14947_s17 }
 0x300   : > { %4578 = vst.msk [vmem:[#allocation2 + $0x68] sm:$0xff] %vm4564_vm3, %v4495_v37  ;;  %v3366_v33 = vpack.c.bf16 %v3331_v42, %v3330_v21  ;;  %v14324_v21 = vld [vmem:[%s18772_s4 + $0xf0] sm:$0xff]  }
 0x301   : > { %v4432_v47 = vpack.c.bf16 %v4397_v43, %v4396_v29  ;;  %v3251_v28 = vpop.f32.mrb[244].mxu0  ;;  %v4657_v51 = vld [vmem:[#allocation2 + $0x60] sm:$0xff]  ;;  %6093 = vmatpush1.bf16.msra.mxu0 %v14324_v21 }
 0x302   : > { %v2365_v46 = vpop.permute.xlu0 %2364  ;;  %v4317_v48 = vpop.f32.mrb[244].mxu1  ;;  %v3252_v54 = vadd.f32 %v16042_v50, %v3251_v28  ;;  %3458 = vrot.lane.b32.xlu1 %v3366_v33, %s14948_s28  ;;  %v4765_v35 = vshll.u32 %v4657_v51, 16  ;;  %v4763_v8 = vshrl.u32 %v4657_v51, 16  ;;  %6094 = vmatprep.subr.bf16.mxu0 %v14946_v1 }
 0x303   : > { %2447 = vst.msk [vmem:[#allocation2 + $0x70] sm:$0xff] %vm2432_vm1, %v2365_v46  ;;  %v4318_v63 = vadd.f32 %v16042_v50, %v4317_v48  ;;  %v3253_v41 = vpop.f32.mrb[245].mxu0  ;;  %v4319_v45 = vpop.f32.mrb[245].mxu1 }
 0x304   : > { %v3254_v16 = vpop.f32.mrb[246].mxu0  ;;  %v4320_v61 = vpop.f32.mrb[246].mxu1  ;;  %v4767_v7 = vrot.slane %v4765_v35, 1  ;;  %v3332_v59 = vmax.f32 %v3252_v54, 0.0 }
 0x305   : > { %v4398_v39 = vmax.f32 %v4318_v63, 0.0  ;;  %v3255_v52 = vadd.f32 %v16042_v50, %v3254_v16  ;;  %v4321_v56 = vadd.f32 %v16042_v50, %v4320_v61  ;;  %v3256_v44 = vpop.f32.mrb[247].mxu0  ;;  %v4322_v30 = vpop.f32.mrb[247].mxu1 }
 0x306   : > { %v3431_v38 = vpop.permute.xlu1 %3430  ;;  %v4497_v10 = vpop.permute.xlu0 %4496  ;;  %4524 = vrot.lane.b32.xlu1 %v4432_v47, %s14949_s29  ;;  %v4768_v58 = vor.u32 %v4767_v7, %v4763_v8 }
 0x307   : > { %v3333_v2 = vmax.f32 %v3255_v52, 0.0  ;;  %v4399_v5 = vmax.f32 %v4321_v56, 0.0  ;;  %3513 = vst.msk [vmem:[#allocation2 + $0x70] sm:$0xff] %vm3498_vm2, %v3431_v38  ;;  %v16233_v6 = vld [vmem:[#allocation2 + $0x68] sm:$0xff] }
 0x308   : > { %4579 = vst.msk [vmem:[#allocation2 + $0x70] sm:$0xff] %vm4564_vm3, %v4497_v10  ;;  %v4770_v9 = vshll.u32 %v16233_v6, 16  ;;  %v4774_v11 = vshrl.u32 %v16233_v6, 16  ;;  %v5398_v42 = vrot.slane %v16233_v6, 4 }
 0x309   : > { %v3367_v12 = vpack.c.bf16 %v3333_v2, %v3332_v59  ;;  %v4433_v14 = vpack.c.bf16 %v4399_v5, %v4398_v39  ;;  %v3259_v57 = vpop.f32.mrb[248].mxu0  ;;  %v14325_v5 = vld [vmem:[%s18772_s4 + $0xf8] sm:$0xff]  }
 0x30a   : > { %v2367_v15 = vpop.permute.xlu1 %2366  ;;  %v2369_v0 = vpop.permute.xlu0 %2368  ;;  %v4772_v31 = vrot.slane %v4770_v9, 1  ;;  %v5099_v4 = vrot.slane %v4774_v11, 3  ;;  %v3260_v18 = vadd.f32 %v16042_v50, %v3259_v57  ;;  %v5102_v23 = vrot.slane %v4770_v9, 4  ;;  %6095 = vmatpush1.bf16.msra.mxu0 %v14325_v5 }
 0x30b   : > { %2448 = vst.msk [vmem:[#allocation2 + $0x78] sm:$0xff] %vm2432_vm1, %v2367_v15  ;;  %2449 = vst.msk [vmem:[#allocation2 + $0x80] sm:$0xff] %vm2432_vm1, %v2369_v0  ;;  %v4325_v20 = vpop.f32.mrb[248].mxu1  ;;  %v3261_v60 = vpop.f32.mrb[249].mxu0  ;;  %4526 = vrot.lane.b32.xlu1 %v4433_v14, %s14949_s29  ;;  %3460 = vrot.lane.b32.xlu0 %v3367_v12, %s14948_s28 }
 0x30c   : > { %v4326_v24 = vadd.f32 %v16042_v50, %v4325_v20  ;;  %v4327_v19 = vpop.f32.mrb[249].mxu1  ;;  %v3262_v25 = vpop.f32.mrb[250].mxu0  ;;  %v4773_v55 = vsel %vm4677_vm4, %v4768_v58, %v4772_v31  ;;  %v16246_v32 = vor.u32 %v5102_v23, %v5099_v4  ;;  %v3334_v34 = vmax.f32 %v3260_v18, 0.0 }
 0x30d   : > { %v3263_v17 = vadd.f32 %v16042_v50, %v3262_v25  ;;  %v4328_v27 = vpop.f32.mrb[250].mxu1  ;;  %5943 = vmatprep.mubr.bf16.mxu0 %v4773_v55  ;;  %v3264_v26 = vpop.f32.mrb[251].mxu0  ;;  %v4776_v54 = vor.u32 %v4774_v11, %v4772_v31 }
 0x30e   : > { %v4400_v29 = vmax.f32 %v4326_v24, 0.0  ;;  %v4329_v22 = vadd.f32 %v16042_v50, %v4328_v27  ;;  %v4330_v3 = vpop.f32.mrb[251].mxu1  ;;  %v4499_v36 = vpop.permute.xlu1 %4498  ;;  %5944 = vmatmul.mubr.bf16.gmra.mrb[36].mxu0 %v4657_v51 }
 0x30f   : > { %v3335_v62 = vmax.f32 %v3263_v17, 0.0  ;;  %v3433_v37 = vpop.permute.xlu0 %3432  ;;  %2396 = vrot.lane.b32.xlu0 %v15800_v13, %s14947_s17  ;;  %v16251_v40 = vld [vmem:[#allocation2 + $0x70] sm:$0xff] }
 0x310   : > { %v4401_v43 = vmax.f32 %v4329_v22, 0.0  ;;  %3514 = vst.msk [vmem:[#allocation2 + $0x78] sm:$0xff] %vm3498_vm2, %v3433_v37  ;;  %v4778_v33 = vshll.u32 %v16251_v40, 16  ;;  %v4782_v47 = vshrl.u32 %v16251_v40, 16  ;;  %v5400_v28 = vrot.slane %v16251_v40, 4 }
 0x311   : > { %v3368_v46 = vpack.c.bf16 %v3335_v62, %v3334_v34  ;;  %4580 = vst.msk [vmem:[#allocation2 + $0x78] sm:$0xff] %vm4564_vm3, %v4499_v36  ;;  %v3267_v13 = vpop.f32.mrb[252].mxu0 }
 0x312   : > { %v4434_v48 = vpack.c.bf16 %v4401_v43, %v4400_v29  ;;  %v4333_v51 = vpop.f32.mrb[252].mxu1  ;;  %v3269_v49 = vpop.f32.mrb[253].mxu0  ;;  %v4780_v63 = vrot.slane %v4778_v33, 1  ;;  %v16268_v41 = vsel %vm5375_vm5, %v5398_v42, %v5400_v28  ;;  %v3268_v35 = vadd.f32 %v16042_v50, %v3267_v13 }
 0x313   : > { %v2371_v45 = vpop.permute.xlu0 %2370  ;;  %v4334_v16 = vadd.f32 %v16042_v50, %v4333_v51  ;;  %v4335_v61 = vpop.f32.mrb[253].mxu1  ;;  %3462 = vrot.lane.b32.xlu1 %v3368_v46, %s14948_s28  ;;  %v5108_v39 = vrot.slane %v4782_v47, 3  ;;  %v5111_v52 = vrot.slane %v4778_v33, 4 }
 0x314   : > { %2450 = vst.msk [vmem:[#allocation2 + $0x88] sm:$0xff] %vm2432_vm1, %v2371_v45  ;;  %4528 = vrot.lane.b32.xlu0 %v4434_v48, %s14949_s29  ;;  %v3270_v56 = vpop.f32.mrb[254].mxu0  ;;  %v4336_v44 = vpop.f32.mrb[254].mxu1  ;;  %v4781_v30 = vsel %vm4677_vm4, %v4776_v54, %v4780_v63  ;;  %v3336_v11 = vmax.f32 %v3268_v35, 0.0  ;;  %v4784_v4 = vor.u32 %v4782_v47, %v4780_v63 }
 0x315   : > { %v4402_v38 = vmax.f32 %v4334_v16, 0.0  ;;  %v3271_v10 = vadd.f32 %v16042_v50, %v3270_v56  ;;  %v4337_v7 = vadd.f32 %v16042_v50, %v4336_v44  ;;  %5951 = vmatprep.mubr.bf16.mxu0 %v4781_v30  ;;  %v3272_v59 = vpop.f32.mrb[255].mxu0  ;;  %v4338_v2 = vpop.f32.mrb[255].mxu1  ;;  %v16281_v8 = vor.u32 %v5111_v52, %v5108_v39 }
 0x316   : > { %v3435_v9 = vpop.permute.xlu1 %3434  ;;  %5952 = vmatmul.mubr.bf16.gmra.mrb[40].mxu0 %v16233_v6 }
 0x317   : > { %v3337_v12 = vmax.f32 %v3271_v10, 0.0  ;;  %v4403_v14 = vmax.f32 %v4337_v7, 0.0  ;;  %3515 = vst.msk [vmem:[#allocation2 + $0x80] sm:$0xff] %vm3498_vm2, %v3435_v9  ;;  %2398 = vrot.lane.b32.xlu1 %v15819_v53, %s14947_s17  ;;  %v16290_v50 = vsel %vm4982_vm6, %v16246_v32, %v16281_v8 }
 0x318   : > { %v4660_v57 = vld [vmem:[#allocation2 + $0x78] sm:$0x1] }
 0x319   : > { %v3369_v15 = vpack.c.bf16 %v3337_v12, %v3336_v11  ;;  %v4435_v0 = vpack.c.bf16 %v4403_v14, %v4402_v38  ;;  %v4786_v58 = vshll.u32 %v4660_v57, 16 }
 0x31a   : > { %v4501_v31 = vpop.permute.xlu1 %4500 }
 0x31b   : > { %4581 = vst.msk [vmem:[#allocation2 + $0x80] sm:$0xff] %vm4564_vm3, %v4501_v31  ;;  %4530 = vrot.lane.b32.xlu1 %v4435_v0, %s14949_s29  ;;  %3464 = vrot.lane.b32.xlu0 %v3369_v15, %s14948_s28  ;;  %v4788_v18 = vrot.slane %v4786_v58, 1 }
 0x31c   : > { %v3437_v20 = vpop.permute.xlu0 %3436 }
 0x31d   : > { %v4789_v53 = vsel %vm4677_vm4, %v4784_v4, %v4788_v18  ;;  %3516 = vst.msk [vmem:[#allocation2 + $0x88] sm:$0xff] %vm3498_vm2, %v3437_v20 }
 0x31e   : > { %5959 = vmatprep.mubr.bf16.mxu0 %v4789_v53  ;;  %v4503_v60 = vpop.permute.xlu1 %4502 }
 0x31f   : > { %4582 = vst.msk [vmem:[#allocation2 + $0x88] sm:$0xff] %vm4564_vm3, %v4503_v60  ;;  %5960 = vmatmul.mubr.bf16.gmra.mrb[44].mxu0 %v16251_v40 }
 0x320   : > { %v2373_v23 = vpop.permute.xlu0 %2372 }
 0x321   : > { %2451 = vst.msk [vmem:[#allocation2 + $0x90] sm:$0xff] %vm2432_vm1, %v2373_v23 }
 0x322   : > { %v4661_v24 = vld [vmem:[#allocation2 + $0x80] sm:$0xff] }
 0x323   : > { %v4793_v19 = vshll.u32 %v4661_v24, 16  ;;  %v4791_v26 = vshrl.u32 %v4661_v24, 16 }
 0x325   : > { %v3439_v25 = vpop.permute.xlu1 %3438  ;;  %v4795_v55 = vrot.slane %v4793_v19, 1  ;;  %v4505_v17 = vpop.permute.xlu0 %4504 }
 0x326   : > { %3517 = vst.msk [vmem:[#allocation2 + $0x90] sm:$0xff] %vm3498_vm2, %v3439_v25  ;;  %v16301_v27 = vld [vmem:[#allocation2 + $0x88] sm:$0xff] }
 0x327   : > { %4583 = vst.msk [vmem:[#allocation2 + $0x90] sm:$0xff] %vm4564_vm3, %v4505_v17  ;;  %v4798_v29 = vshll.u32 %v16301_v27, 16  ;;  %v4802_v22 = vshrl.u32 %v16301_v27, 16  ;;  %v4796_v36 = vor.u32 %v4795_v55, %v4791_v26  ;;  %v5405_v49 = vrot.slane %v16301_v27, 4 }
 0x329   : > { %v2375_v3 = vpop.permute.xlu1 %2374  ;;  %v4800_v34 = vrot.slane %v4798_v29, 1  ;;  %v5134_v62 = vrot.slane %v4802_v22, 3  ;;  %v5137_v37 = vrot.slane %v4798_v29, 4  ;;  %v2377_v21 = vpop.permute.xlu0 %2376 }
 0x32a   : > { %2452 = vst.msk [vmem:[#allocation2 + $0x98] sm:$0xff] %vm2432_vm1, %v2375_v3  ;;  %2453 = vst.msk [vmem:[#allocation2 + $0xa0] sm:$0xff] %vm2432_vm1, %v2377_v21 }
 0x32b   : > { %v4801_v43 = vsel %vm4677_vm4, %v4796_v36, %v4800_v34  ;;  %v16309_v33 = vor.u32 %v5137_v37, %v5134_v62  ;;  %v4804_v63 = vor.u32 %v4802_v22, %v4800_v34 }
 0x32c   : > { %5967 = vmatprep.mubr.bf16.mxu0 %v4801_v43 }
 0x32d   : > { %v4507_v47 = vpop.permute.xlu1 %4506  ;;  %5968 = vmatmul.mubr.bf16.gmra.mrb[48].mxu0 %v4661_v24  ;;  %v3441_v46 = vpop.permute.xlu0 %3440 }
 0x32e   : > { %v16311_v13 = vld [vmem:[#allocation2 + $0x90] sm:$0xff]  ;;  %3518 = vst.msk [vmem:[#allocation2 + $0x98] sm:$0xff] %vm3498_vm2, %v3441_v46 }
 0x32f   : > { %v4806_v48 = vshll.u32 %v16311_v13, 16  ;;  %v4810_v51 = vshrl.u32 %v16311_v13, 16  ;;  %v5407_v54 = vrot.slane %v16311_v13, 4  ;;  %4584 = vst.msk [vmem:[#allocation2 + $0x98] sm:$0xff] %vm4564_vm3, %v4507_v47 }
 0x331   : > { %v4808_v45 = vrot.slane %v4806_v48, 1  ;;  %v16324_v35 = vsel %vm5375_vm5, %v5405_v49, %v5407_v54  ;;  %v5143_v16 = vrot.slane %v4810_v51, 3  ;;  %v5146_v61 = vrot.slane %v4806_v48, 4  ;;  %v2379_v39 = vpop.permute.xlu0 %2378 }
 0x332   : > { %2454 = vst.msk [vmem:[#allocation2 + $0xa8] sm:$0xff] %vm2432_vm1, %v2379_v39 }
 0x333   : > { %v4809_v52 = vsel %vm4677_vm4, %v4804_v63, %v4808_v45  ;;  %v16328_v56 = vor.u32 %v5146_v61, %v5143_v16  ;;  %v4812_v59 = vor.u32 %v4810_v51, %v4808_v45 }
 0x334   : > { %5975 = vmatprep.mubr.bf16.mxu0 %v4809_v52  ;;  %v3443_v44 = vpop.permute.xlu1 %3442 }
 0x335   : > { %5976 = vmatmul.mubr.bf16.gmra.mrb[52].mxu0 %v16301_v27  ;;  %v16334_v30 = vsel %vm4982_vm6, %v16309_v33, %v16328_v56  ;;  %3519 = vst.msk [vmem:[#allocation2 + $0xa0] sm:$0xff] %vm3498_vm2, %v3443_v44 }
 0x336   : > { %v4664_v38 = vld [vmem:[#allocation2 + $0x98] sm:$0x1] }
 0x337   : > { %v4814_v10 = vshll.u32 %v4664_v38, 16 }
 0x338   : > { %v4509_v7 = vpop.permute.xlu1 %4508 }
 0x339   : > { %4585 = vst.msk [vmem:[#allocation2 + $0xa0] sm:$0xff] %vm4564_vm3, %v4509_v7  ;;  %v4816_v2 = vrot.slane %v4814_v10, 1 }
 0x33b   : > { %v4817_v5 = vsel %vm4677_vm4, %v4812_v59, %v4816_v2 }
 0x33c   : > { %5983 = vmatprep.mubr.bf16.mxu0 %v4817_v5  ;;  %v3445_v11 = vpop.permute.xlu0 %3444 }
 0x33d   : > { %v4511_v9 = vpop.permute.xlu1 %4510  ;;  %3520 = vst.msk [vmem:[#allocation2 + $0xa8] sm:$0xff] %vm3498_vm2, %v3445_v11  ;;  %5984 = vmatmul.mubr.bf16.gmra.mrb[56].mxu0 %v16311_v13 }
 0x33e   : > { %4586 = vst.msk [vmem:[#allocation2 + $0xa8] sm:$0xff] %vm4564_vm3, %v4511_v9 }
 0x340   : > { %v2381_v12 = vpop.permute.xlu0 %2380  ;;  %v4665_v14 = vld [vmem:[#allocation2 + $0xa0] sm:$0xff] }
 0x341   : > { %2455 = vst.msk [vmem:[#allocation2 + $0xb0] sm:$0xff] %vm2432_vm1, %v2381_v12  ;;  %v4821_v57 = vshll.u32 %v4665_v14, 16  ;;  %v4819_v4 = vshrl.u32 %v4665_v14, 16 }
 0x343   : > { %v4823_v0 = vrot.slane %v4821_v57, 1 }
 0x345   : > { %v3447_v15 = vpop.permute.xlu1 %3446  ;;  %v4513_v58 = vpop.permute.xlu0 %4512  ;;  %v16344_v31 = vld [vmem:[#allocation2 + $0xa8] sm:$0xff]  ;;  %v4824_v60 = vor.u32 %v4823_v0, %v4819_v4 }
 0x346   : > { %3521 = vst.msk [vmem:[#allocation2 + $0xb0] sm:$0xff] %vm3498_vm2, %v3447_v15  ;;  %v4826_v18 = vshll.u32 %v16344_v31, 16  ;;  %v4830_v53 = vshrl.u32 %v16344_v31, 16  ;;  %v5412_v34 = vrot.slane %v16344_v31, 4 }
 0x347   : > { %4587 = vst.msk [vmem:[#allocation2 + $0xb0] sm:$0xff] %vm4564_vm3, %v4513_v58 }
 0x348   : > { %v4828_v23 = vrot.slane %v4826_v18, 1  ;;  %v5169_v24 = vrot.slane %v4830_v53, 3  ;;  %v5172_v19 = vrot.slane %v4826_v18, 4 }
 0x349   : > { %v2383_v20 = vpop.permute.xlu1 %2382  ;;  %v2385_v25 = vpop.permute.xlu0 %2384 }
 0x34a   : > { %2456 = vst.msk [vmem:[#allocation2 + $0xb8] sm:$0xff] %vm2432_vm1, %v2383_v20  ;;  %2457 = vst.msk [vmem:[#allocation2 + $0xc0] sm:$0xff] %vm2432_vm1, %v2385_v25  ;;  %v4829_v55 = vsel %vm4677_vm4, %v4824_v60, %v4828_v23  ;;  %v16352_v17 = vor.u32 %v5172_v19, %v5169_v24  ;;  %v4832_v37 = vor.u32 %v4830_v53, %v4828_v23 }
 0x34b   : > { %5991 = vmatprep.mubr.bf16.mxu0 %v4829_v55 }
 0x34c   : > { %5992 = vmatmul.mubr.bf16.gmra.mrb[60].mxu0 %v4665_v14 }
 0x34d   : > { %v4515_v26 = vpop.permute.xlu1 %4514  ;;  %v3449_v29 = vpop.permute.xlu0 %3448 }
 0x34e   : > { %v16354_v22 = vld [vmem:[#allocation2 + $0xb0] sm:$0xff]  ;;  %3522 = vst.msk [vmem:[#allocation2 + $0xb8] sm:$0xff] %vm3498_vm2, %v3449_v29 }
 0x34f   : > { %v4834_v3 = vshll.u32 %v16354_v22, 16  ;;  %v4838_v36 = vshrl.u32 %v16354_v22, 16  ;;  %v5414_v62 = vrot.slane %v16354_v22, 4  ;;  %4588 = vst.msk [vmem:[#allocation2 + $0xb8] sm:$0xff] %vm4564_vm3, %v4515_v26 }
 0x351   : > { %v4836_v21 = vrot.slane %v4834_v3, 1  ;;  %v16367_v43 = vsel %vm5375_vm5, %v5412_v34, %v5414_v62  ;;  %v5178_v47 = vrot.slane %v4838_v36, 3  ;;  %v5181_v46 = vrot.slane %v4834_v3, 4  ;;  %v2387_v48 = vpop.permute.xlu0 %2386 }
 0x352   : > { %2458 = vst.msk [vmem:[#allocation2 + $0xc8] sm:$0xff] %vm2432_vm1, %v2387_v48 }
 0x353   : > { %v4837_v51 = vsel %vm4677_vm4, %v4832_v37, %v4836_v21  ;;  %v16371_v63 = vor.u32 %v5181_v46, %v5178_v47  ;;  %v4840_v44 = vor.u32 %v4838_v36, %v4836_v21 }
 0x354   : > { %5999 = vmatprep.mubr.bf16.mxu0 %v4837_v51  ;;  %v3451_v45 = vpop.permute.xlu1 %3450 }
 0x355   : > { %6000 = vmatmul.mubr.bf16.gmra.mrb[64].mxu0 %v16344_v31  ;;  %v16377_v16 = vsel %vm4982_vm6, %v16352_v17, %v16371_v63  ;;  %3523 = vst.msk [vmem:[#allocation2 + $0xc0] sm:$0xff] %vm3498_vm2, %v3451_v45 }
 0x356   : > { %v4668_v61 = vld [vmem:[#allocation2 + $0xb8] sm:$0x1] }
 0x357   : > { %v4842_v39 = vshll.u32 %v4668_v61, 16  ;;  %v4973_v31 = vld [vmem:[#allocation2 + $0xb8] sm:$0xf] }
 0x358   : > { %v4517_v52 = vpop.permute.xlu1 %4516 }
 0x359   : > { %4589 = vst.msk [vmem:[#allocation2 + $0xc0] sm:$0xff] %vm4564_vm3, %v4517_v52  ;;  %v4844_v38 = vrot.slane %v4842_v39, 1 }
 0x35b   : > { %v4845_v10 = vsel %vm4677_vm4, %v4840_v44, %v4844_v38 }
 0x35c   : > { %6007 = vmatprep.mubr.bf16.mxu0 %v4845_v10  ;;  %v3453_v59 = vpop.permute.xlu0 %3452 }
 0x35d   : > { %v4519_v7 = vpop.permute.xlu1 %4518  ;;  %3524 = vst.msk [vmem:[#allocation2 + $0xc8] sm:$0xff] %vm3498_vm2, %v3453_v59  ;;  %6008 = vmatmul.mubr.bf16.gmra.mrb[68].mxu0 %v16354_v22 }
 0x35e   : > { %4590 = vst.msk [vmem:[#allocation2 + $0xc8] sm:$0xff] %vm4564_vm3, %v4519_v7 }
 0x360   : > { %v2389_v2 = vpop.permute.xlu0 %2388  ;;  %v4669_v5 = vld [vmem:[#allocation2 + $0xc0] sm:$0xff] }
 0x361   : > { %2459 = vst.msk [vmem:[#allocation2 + $0xd0] sm:$0xff] %vm2432_vm1, %v2389_v2  ;;  %v4849_v9 = vshll.u32 %v4669_v5, 16  ;;  %v4847_v15 = vshrl.u32 %v4669_v5, 16 }
 0x363   : > { %v4851_v12 = vrot.slane %v4849_v9, 1 }
 0x365   : > { %v3455_v11 = vpop.permute.xlu1 %3454  ;;  %v4521_v14 = vpop.permute.xlu0 %4520  ;;  %v16387_v57 = vld [vmem:[#allocation2 + $0xc8] sm:$0xff]  ;;  %v4852_v18 = vor.u32 %v4851_v12, %v4847_v15 }
 0x366   : > { %3525 = vst.msk [vmem:[#allocation2 + $0xd0] sm:$0xff] %vm3498_vm2, %v3455_v11  ;;  %v4854_v0 = vshll.u32 %v16387_v57, 16  ;;  %v4858_v58 = vshrl.u32 %v16387_v57, 16  ;;  %v5419_v36 = vrot.slane %v16387_v57, 4 }
 0x367   : > { %4591 = vst.msk [vmem:[#allocation2 + $0xd0] sm:$0xff] %vm4564_vm3, %v4521_v14 }
 0x368   : > { %v4856_v53 = vrot.slane %v4854_v0, 1  ;;  %v5204_v20 = vrot.slane %v4858_v58, 3  ;;  %v5207_v60 = vrot.slane %v4854_v0, 4 }
 0x369   : > { %v2391_v4 = vpop.permute.xlu1 %2390  ;;  %v2393_v23 = vpop.permute.xlu0 %2392 }
 0x36a   : > { %2460 = vst.msk [vmem:[#allocation2 + $0xd8] sm:$0xff] %vm2432_vm1, %v2391_v4  ;;  %2461 = vst.msk [vmem:[#allocation2 + $0xe0] sm:$0xff] %vm2432_vm1, %v2393_v23  ;;  %v4857_v24 = vsel %vm4677_vm4, %v4852_v18, %v4856_v53  ;;  %v16395_v19 = vor.u32 %v5207_v60, %v5204_v20  ;;  %v4860_v21 = vor.u32 %v4858_v58, %v4856_v53 }
 0x36b   : > { %6015 = vmatprep.mubr.bf16.mxu0 %v4857_v24 }
 0x36c   : > { %6016 = vmatmul.mubr.bf16.gmra.mrb[72].mxu0 %v4669_v5 }
 0x36d   : > { %v4523_v25 = vpop.permute.xlu1 %4522  ;;  %v3457_v55 = vpop.permute.xlu0 %3456 }
 0x36e   : > { %v16397_v26 = vld [vmem:[#allocation2 + $0xd0] sm:$0xff]  ;;  %3526 = vst.msk [vmem:[#allocation2 + $0xd8] sm:$0xff] %vm3498_vm2, %v3457_v55 }
 0x36f   : > { %v4862_v29 = vshll.u32 %v16397_v26, 16  ;;  %v4866_v3 = vshrl.u32 %v16397_v26, 16  ;;  %v5421_v37 = vrot.slane %v16397_v26, 4  ;;  %4592 = vst.msk [vmem:[#allocation2 + $0xd8] sm:$0xff] %vm4564_vm3, %v4523_v25 }
 0x371   : > { %v4864_v47 = vrot.slane %v4862_v29, 1  ;;  %v16410_v46 = vsel %vm5375_vm5, %v5419_v36, %v5421_v37  ;;  %v5213_v48 = vrot.slane %v4866_v3, 3  ;;  %v5216_v51 = vrot.slane %v4862_v29, 4  ;;  %v2395_v45 = vpop.permute.xlu0 %2394 }
 0x372   : > { %2462 = vst.msk [vmem:[#allocation2 + $0xe8] sm:$0xff] %vm2432_vm1, %v2395_v45 }
 0x373   : > { %v4865_v61 = vsel %vm4677_vm4, %v4860_v21, %v4864_v47  ;;  %v16414_v39 = vor.u32 %v5216_v51, %v5213_v48  ;;  %v4868_v59 = vor.u32 %v4866_v3, %v4864_v47 }
 0x374   : > { %6023 = vmatprep.mubr.bf16.mxu0 %v4865_v61  ;;  %v3459_v52 = vpop.permute.xlu1 %3458 }
 0x375   : > { %6024 = vmatmul.mubr.bf16.gmra.mrb[76].mxu0 %v16387_v57  ;;  %v16420_v44 = vsel %vm4982_vm6, %v16395_v19, %v16414_v39  ;;  %3527 = vst.msk [vmem:[#allocation2 + $0xe0] sm:$0xff] %vm3498_vm2, %v3459_v52 }
 0x376   : > { %v4672_v38 = vld [vmem:[#allocation2 + $0xd8] sm:$0x1] }
 0x377   : > { %v4870_v10 = vshll.u32 %v4672_v38, 16  ;;  %v4977_v57 = vld [vmem:[#allocation2 + $0xd8] sm:$0xf] }
 0x378   : > { %v4525_v7 = vpop.permute.xlu1 %4524 }
 0x379   : > { %4593 = vst.msk [vmem:[#allocation2 + $0xe0] sm:$0xff] %vm4564_vm3, %v4525_v7  ;;  %v4872_v2 = vrot.slane %v4870_v10, 1 }
 0x37b   : > { %v4873_v5 = vsel %vm4677_vm4, %v4868_v59, %v4872_v2 }
 0x37c   : > { %6031 = vmatprep.mubr.bf16.mxu0 %v4873_v5 }
 0x37d   : > { %v4527_v9 = vpop.permute.xlu1 %4526  ;;  %v3461_v11 = vpop.permute.xlu0 %3460  ;;  %6032 = vmatmul.mubr.bf16.gmra.mrb[80].mxu0 %v16397_v26 }
 0x37e   : > { %3528 = vst.msk [vmem:[#allocation2 + $0xe8] sm:$0xff] %vm3498_vm2, %v3461_v11 }
 0x37f   : > { %4594 = vst.msk [vmem:[#allocation2 + $0xe8] sm:$0xff] %vm4564_vm3, %v4527_v9 }
 0x380   : > { %v4673_v14 = vld [vmem:[#allocation2 + $0xe0] sm:$0xff] }
 0x381   : > { %v2397_v12 = vpop.permute.xlu0 %2396  ;;  %v4877_v15 = vshll.u32 %v4673_v14, 16  ;;  %v4875_v53 = vshrl.u32 %v4673_v14, 16 }
 0x382   : > { %2463 = vst.msk [vmem:[#allocation2 + $0xf0] sm:$0xff] %vm2432_vm1, %v2397_v12  ;;  %v5312_v12 = vld [vmem:[#allocation2 + $0x8] sm:$0xff] }
 0x383   : > { %v4879_v58 = vrot.slane %v4877_v15, 1 }
 0x385   : > { %v3463_v0 = vpop.permute.xlu1 %3462  ;;  %v4880_v24 = vor.u32 %v4879_v58, %v4875_v53  ;;  %v4950_v58 = vld [vmem:[#allocation2] sm:$0xf8]  ;;  %v4992_v53 = vshrl.u32 %v5312_v12, 16 }
 0x386   : > { %3529 = vst.msk [vmem:[#allocation2 + $0xf0] sm:$0xff] %vm3498_vm2, %v3463_v0  ;;  %v4529_v4 = vpop.permute.xlu0 %4528  ;;  %v16430_v18 = vld [vmem:[#allocation2 + $0xe8] sm:$0xff] }
 0x387   : > { %4595 = vst.msk [vmem:[#allocation2 + $0xf0] sm:$0xff] %vm4564_vm3, %v4529_v4  ;;  %v4882_v20 = vshll.u32 %v16430_v18, 16  ;;  %v4886_v60 = vshrl.u32 %v16430_v18, 16  ;;  %v5426_v52 = vrot.slane %v16430_v18, 4  ;;  %v5311_v4 = vld [vmem:[#allocation2] sm:$0xf0] }
 0x389   : > { %v2399_v23 = vpop.permute.xlu1 %2398  ;;  %v4884_v25 = vrot.slane %v4882_v20, 1  ;;  %v5239_v55 = vrot.slane %v4886_v60, 3  ;;  %v5242_v29 = vrot.slane %v4882_v20, 4  ;;  %v4995_v20 = vshll.u32 %v5312_v12, 16 }
 0x38a   : > { %2464 = vst.msk [vmem:[#allocation2 + $0xf8] sm:$0xff] %vm2432_vm1, %v2399_v23  ;;  %vm8923_vm1 = vcmask 1044484  }
 0x38b   : > { %v4885_v3 = vsel %vm4677_vm4, %v4880_v24, %v4884_v25  ;;  %v16437_v21 = vor.u32 %v5242_v29, %v5239_v55  ;;  %v4888_v10 = vor.u32 %v4886_v60, %v4884_v25  ;;  %v5377_v24 = vrot.slane %v5312_v12, 4 }
 0x38c   : > { %6039 = vmatprep.mubr.bf16.mxu0 %v4885_v3  ;;  %v4984_v25 = vshrl.u32 %v4950_v58, 16  ;;  %v4987_v55 = vshll.u32 %v4950_v58, 16  ;;  %v5376_v3 = vrot.slane %v5311_v4, 4 }
 0x38d   : > { %v4531_v47 = vpop.permute.xlu1 %4530  ;;  %v3465_v48 = vpop.permute.xlu0 %3464  ;;  %6040 = vmatmul.mubr.bf16.gmra.mrb[84].mxu0 %v4673_v14 }
 0x38e   : > { %3530 = vst.msk [vmem:[#allocation2 + $0xf8] sm:$0xff] %vm3498_vm2, %v3465_v48  ;;  %v16440_v51 = vld [vmem:[#allocation2 + $0xf0] sm:$0xff]  ;;  %v4997_v48 = vrot.slane %v4995_v20, 4  ;;  %v4953_v20 = vld [vmem:[#allocation2 + $0x18] sm:$0xf]  ;;  %vm8926_vm2 = vcmask 1045509  }
 0x38f   : > { %4596 = vst.msk [vmem:[#allocation2 + $0xf8] sm:$0xff] %vm4564_vm3, %v4531_v47  ;;  %v4890_v45 = vshll.u32 %v16440_v51, 16  ;;  %v4894_v61 = vshrl.u32 %v16440_v51, 16  ;;  %v5428_v38 = vrot.slane %v16440_v51, 4  ;;  %v4994_v47 = vrot.slane %v4992_v53, 3 }
 0x390   : > { %vm8929_vm3 = vcmask 1046534  }
 0x391   : > { %v4892_v7 = vrot.slane %v4890_v45, 1  ;;  %v16452_v59 = vsel %vm5375_vm5, %v5426_v52, %v5428_v38  ;;  %v5248_v2 = vrot.slane %v4894_v61, 3  ;;  %v5251_v5 = vrot.slane %v4890_v45, 4 }
 0x392   : > { %v5378_v45 = vsel %vm5375_vm5, %v5376_v3, %v5377_v24  ;;  %v5013_v3 = vshll.u32 %v4953_v20, 16 }
 0x393   : > { %v4893_v9 = vsel %vm4677_vm4, %v4888_v10, %v4892_v7  ;;  %v16455_v11 = vor.u32 %v5251_v5, %v5248_v2  ;;  %v4896_v60 = vor.u32 %v4894_v61, %v4892_v7  ;;  %v5313_v10 = vld [vmem:[#allocation2 + $0x10] sm:$0xff]  ;;  %v4986_v2 = vrot.slane %v4984_v25, 3 }
 0x394   : > { %6047 = vmatprep.mubr.bf16.mxu0 %v4893_v9  ;;  %v4989_v5 = vrot.slane %v4987_v55, 4  ;;  %v4998_v9 = vor.u32 %v4997_v48, %v4994_v47  ;;  %v5001_v61 = vshrl.u32 %v5313_v10, 16  ;;  %v5004_v7 = vshll.u32 %v5313_v10, 16 }
 0x395   : > { %6048 = vmatmul.mubr.bf16.gmra.mrb[88].mxu0 %v16430_v18  ;;  %v16461_v14 = vsel %vm4982_vm6, %v16437_v21, %v16455_v11  ;;  %v5379_v12 = vrot.slane %v5313_v10, 4  ;;  %v5015_v48 = vrot.slane %v5013_v3, 4  ;;  %v5316_v10 = vld [vmem:[#allocation2 + $0x28] sm:$0xff]  ;;  %v14334_v18 = vld [vmem:[%s18774_s6 + $0x60] sm:$0xff]  }
 0x396   : > { %v4676_v15 = vld [vmem:[#allocation2 + $0xf8] sm:$0x1]  ;;  %v5003_v58 = vrot.slane %v5001_v61, 3  ;;  %v5006_v4 = vrot.slane %v5004_v7, 4  ;;  %v5315_v61 = vld [vmem:[#allocation2 + $0x20] sm:$0xf0] }
 0x397   : > { %v4898_v0 = vshll.u32 %v4676_v15, 16  ;;  %v4990_v15 = vor.u32 %v4989_v5, %v4986_v2  ;;  %v5380_v53 = vsel %vm5375_vm5, %v5377_v24, %v5379_v12  ;;  %v4954_v2 = vld [vmem:[#allocation2 + $0x20] sm:$0xf8]  ;;  %v5027_v24 = vshrl.u32 %v5316_v10, 16 }
 0x398   : > { %v5030_v7 = vshll.u32 %v5316_v10, 16 }
 0x399   : > { %v4900_v23 = vrot.slane %v4898_v0, 1  ;;  %v4999_v0 = vsel %vm4982_vm6, %v4990_v15, %v4998_v9  ;;  %v5384_v15 = vrot.slane %v5316_v10, 4 }
 0x39b   : > { %v4901_v29 = vsel %vm4677_vm4, %v4896_v60, %v4900_v23  ;;  %v5314_v60 = vld [vmem:[#allocation2 + $0x18] sm:$0xf]  ;;  %v5007_v23 = vor.u32 %v5006_v4, %v5003_v58  ;;  %v5022_v58 = vshll.u32 %v4954_v2, 16  ;;  %v5383_v4 = vrot.slane %v5315_v61, 4 }
 0x39c   : > { %6055 = vmatprep.mubr.bf16.mxu0 %v4901_v29  ;;  %v5010_v29 = vshrl.u32 %v4953_v20, 16  ;;  %v5381_v25 = vrot.slane %v5314_v60, 4  ;;  %v5029_v20 = vrot.slane %v5027_v24, 3  ;;  %v5318_v24 = vld [vmem:[#allocation2 + $0x38] sm:$0xf] }
 0x39d   : > { %6056 = vmatmul.mubr.bf16.gmra.mrb[92].mxu0 %v16440_v51  ;;  %v5008_v55 = vsel %vm4982_vm6, %v4998_v9, %v5007_v23  ;;  %v5032_v9 = vrot.slane %v5030_v7, 4  ;;  %v5385_v60 = vsel %vm5375_vm5, %v5383_v4, %v5384_v15  ;;  %v5024_v3 = vrot.slane %v5022_v58, 4  ;;  %v14336_v51 = vld [vmem:[%s18774_s6 + $0x68] sm:$0xff]  }
 0x39e   : > { %6096 = vmatprep.mubr.bf16.mxu0 %v5378_v45  ;;  %v5012_v47 = vrot.slane %v5010_v29, 3  ;;  %v5382_v45 = vsel %vm5375_vm5, %v5379_v12, %v5381_v25  ;;  %v5317_v29 = vld [vmem:[#allocation2 + $0x30] sm:$0xff] }
 0x39f   : > { %v5033_v25 = vor.u32 %v5032_v9, %v5029_v20 }
 0x3a0   : > { %v5016_v5 = vor.u32 %v5015_v48, %v5012_v47  ;;  %v5039_v47 = vshll.u32 %v5317_v29, 16  ;;  %v5386_v48 = vrot.slane %v5317_v29, 4 }
 0x3a2   : > { %v5041_v61 = vrot.slane %v5039_v47, 4 }
 0x3a5   : > { %6097 = vmatmul.mubr.bf16.vlgmr.msra.gmra.mrb[0].mxu0 %v4999_v0  ;;  %v5019_v0 = vshrl.u32 %v4954_v2, 16 }
 0x3a6   : > { %6104 = vmatprep.mubr.bf16.mxu0 %v5380_v53  ;;  %v5017_v53 = vsel %vm4982_vm6, %v5007_v23, %v5016_v5  ;;  %v5387_v23 = vsel %vm5375_vm5, %v5384_v15, %v5386_v48  ;;  %v4957_v5 = vld [vmem:[#allocation2 + $0x38] sm:$0xf]  ;;  %v14326_v15 = vld [vmem:[%s18774_s6 + $0x40] sm:$0xff]  }
 0x3a7   : > { %v5021_v12 = vrot.slane %v5019_v0, 3  ;;  %v5045_v4 = vshrl.u32 %v4957_v5, 16  ;;  %v5388_v0 = vrot.slane %v5318_v24, 4  ;;  %13362 = vmatprep.subr.bf16.mxu1 %v14326_v15 }
 0x3a9   : > { %v5047_v20 = vrot.slane %v5045_v4, 3  ;;  %v5321_v4 = vld [vmem:[#allocation2 + $0x50] sm:$0xff] }
 0x3ad   : > { %6105 = vmatmul.mubr.bf16.gmra.mrb[4].mxu0 %v5008_v55  ;;  %v5036_v55 = vshrl.u32 %v5317_v29, 16  ;;  %v5320_v29 = vld [vmem:[#allocation2 + $0x48] sm:$0xff] }
 0x3ae   : > { %6112 = vmatprep.mubr.bf16.mxu0 %v5382_v45  ;;  %v5025_v45 = vor.u32 %v5024_v3, %v5021_v12  ;;  %v4958_v12 = vld [vmem:[#allocation2 + $0x40] sm:$0xf8]  ;;  %v5062_v47 = vshrl.u32 %v5320_v29, 16 }
 0x3af   : > { %v5038_v2 = vrot.slane %v5036_v55, 3  ;;  %v5319_v55 = vld [vmem:[#allocation2 + $0x40] sm:$0xf0] }
 0x3b0   : > { %v5034_v10 = vsel %vm4982_vm6, %v5025_v45, %v5033_v25  ;;  %v5065_v45 = vshll.u32 %v5320_v29, 16 }
 0x3b1   : > { %v5042_v7 = vor.u32 %v5041_v61, %v5038_v2  ;;  %v5054_v2 = vshrl.u32 %v4958_v12, 16  ;;  %v5390_v61 = vrot.slane %v5319_v55, 4 }
 0x3b3   : > { %v5043_v58 = vsel %vm4982_vm6, %v5033_v25, %v5042_v7  ;;  %v5057_v25 = vshll.u32 %v4958_v12, 16 }
 0x3b5   : > { %6113 = vmatmul.mubr.bf16.gmra.mrb[8].mxu0 %v5017_v53  ;;  %v5048_v53 = vshll.u32 %v4957_v5, 16  ;;  %v5064_v5 = vrot.slane %v5062_v47, 3  ;;  %v4961_v47 = vld [vmem:[#allocation2 + $0x58] sm:$0xf] }
 0x3b6   : > { %6120 = vmatprep.mubr.bf16.mxu0 %v5385_v60  ;;  %v5389_v60 = vsel %vm5375_vm5, %v5386_v48, %v5388_v0  ;;  %v5067_v48 = vrot.slane %v5065_v45, 4  ;;  %v5056_v0 = vrot.slane %v5054_v2, 3  ;;  %v5322_v45 = vld [vmem:[#allocation2 + $0x58] sm:$0xf]  ;;  %v5083_v2 = vshll.u32 %v4961_v47, 16 }
 0x3b7   : > { %v5050_v9 = vrot.slane %v5048_v53, 4  ;;  %v14327_v53 = vld [vmem:[%s18774_s6] sm:$0xff]  }
 0x3b8   : > { %13363 = vmatpush3.bf16.msra.mxu1 %v14327_v53  ;;  %v14328_v53 = vld [vmem:[%s18774_s6 + $0x48] sm:$0xff]  }
 0x3b9   : > { %v5051_v3 = vor.u32 %v5050_v9, %v5047_v20  ;;  %v5068_v20 = vor.u32 %v5067_v48, %v5064_v5  ;;  %v5071_v9 = vshrl.u32 %v5321_v4, 16  ;;  %13364 = vmatprep.subr.bf16.mxu1 %v14328_v53 }
 0x3bb   : > { %v5073_v12 = vrot.slane %v5071_v9, 3  ;;  %v5323_v9 = vld [vmem:[#allocation2 + $0x60] sm:$0xf0] }
 0x3bd   : > { %6121 = vmatmul.mubr.bf16.gmra.mrb[12].mxu0 %v5034_v10  ;;  %v5391_v10 = vrot.slane %v5320_v29, 4  ;;  %v5393_v29 = vrot.slane %v5321_v4, 4 }
 0x3be   : > { %6128 = vmatprep.mubr.bf16.mxu0 %v5387_v23  ;;  %v5052_v23 = vsel %vm4982_vm6, %v5042_v7, %v5051_v3 }
 0x3bf   : > { %v5392_v24 = vsel %vm5375_vm5, %v5390_v61, %v5391_v10  ;;  %v5394_v55 = vsel %vm5375_vm5, %v5391_v10, %v5393_v29  ;;  %v14329_v10 = vld [vmem:[%s18774_s6 + $0x8] sm:$0xff]  }
 0x3c0   : > { %13365 = vmatpush3.bf16.msra.mxu1 %v14329_v10 }
 0x3c5   : > { %6129 = vmatmul.mubr.bf16.gmra.mrb[16].mxu0 %v5043_v58  ;;  %v5059_v58 = vrot.slane %v5057_v25, 4  ;;  %v5395_v25 = vrot.slane %v5322_v45, 4  ;;  %v4965_v45 = vld [vmem:[#allocation2 + $0x78] sm:$0xf] }
 0x3c6   : > { %6136 = vmatprep.mubr.bf16.mxu0 %v5389_v60  ;;  %v5074_v60 = vshll.u32 %v5321_v4, 16 }
 0x3c7   : > { %v5060_v15 = vor.u32 %v5059_v58, %v5056_v0  ;;  %v5396_v4 = vsel %vm5375_vm5, %v5393_v29, %v5395_v25  ;;  %v4962_v0 = vld [vmem:[#allocation2 + $0x60] sm:$0xf8]  ;;  %v5118_v25 = vshll.u32 %v4965_v45, 16 }
 0x3c8   : > { %v5076_v3 = vrot.slane %v5074_v60, 4  ;;  %v5092_v60 = vshll.u32 %v4962_v0, 16 }
 0x3c9   : > { %v5069_v7 = vsel %vm4982_vm6, %v5060_v15, %v5068_v20  ;;  %v5397_v15 = vrot.slane %v5323_v9, 4  ;;  %v4969_v9 = vld [vmem:[#allocation2 + $0x98] sm:$0xf] }
 0x3ca   : > { %v5077_v61 = vor.u32 %v5076_v3, %v5073_v12  ;;  %v5094_v3 = vrot.slane %v5092_v60, 4  ;;  %v5150_v60 = vshrl.u32 %v4969_v9, 16 }
 0x3cb   : > { %v5399_v29 = vsel %vm5375_vm5, %v5397_v15, %v5398_v42  ;;  %v4966_v42 = vld [vmem:[#allocation2 + $0x80] sm:$0xf8]  ;;  %v5153_v15 = vshll.u32 %v4969_v9, 16 }
 0x3cc   : > { %v5078_v5 = vsel %vm4982_vm6, %v5068_v20, %v5077_v61  ;;  %v5089_v20 = vshrl.u32 %v4962_v0, 16  ;;  %v5127_v53 = vshll.u32 %v4966_v42, 16 }
 0x3cd   : > { %6137 = vmatmul.mubr.bf16.gmra.mrb[20].mxu0 %v5052_v23  ;;  %v5080_v23 = vshrl.u32 %v4961_v47, 16 }
 0x3ce   : > { %6144 = vmatprep.mubr.bf16.mxu0 %v5392_v24  ;;  %v5085_v24 = vrot.slane %v5083_v2, 4  ;;  %v5091_v12 = vrot.slane %v5089_v20, 3  ;;  %v5115_v2 = vshrl.u32 %v4965_v45, 16  ;;  %v5129_v40 = vrot.slane %v5127_v53, 4  ;;  %v5330_v20 = vld [vmem:[#allocation2 + $0x98] sm:$0xf] }
 0x3cf   : > { %v5082_v48 = vrot.slane %v5080_v23, 3  ;;  %v5326_v23 = vld [vmem:[#allocation2 + $0x78] sm:$0xf] }
 0x3d1   : > { %v5086_v58 = vor.u32 %v5085_v24, %v5082_v48  ;;  %v5120_v48 = vrot.slane %v5118_v25, 4  ;;  %v5185_v25 = vshrl.u32 %v4973_v31, 16 }
 0x3d5   : > { %6145 = vmatmul.mubr.bf16.gmra.mrb[24].mxu0 %v5069_v7  ;;  %v5087_v7 = vsel %vm4982_vm6, %v5077_v61, %v5086_v58  ;;  %v5402_v61 = vrot.slane %v5326_v23, 4  ;;  %v14331_v23 = vld [vmem:[%s18774_s6 + $0x10] sm:$0xff]  }
 0x3d6   : > { %6152 = vmatprep.mubr.bf16.mxu0 %v5394_v55  ;;  %v5095_v55 = vor.u32 %v5094_v3, %v5091_v12 }
 0x3d7   : > { %v5403_v6 = vsel %vm5375_vm5, %v5400_v28, %v5402_v61  ;;  %v5188_v61 = vshll.u32 %v4973_v31, 16 }
 0x3d8   : > { %v5104_v47 = vsel %vm4982_vm6, %v5095_v55, %v16246_v32  ;;  %v5327_v32 = vld [vmem:[#allocation2 + $0x80] sm:$0xf0] }
 0x3d9   : > { %v5404_v10 = vrot.slane %v5327_v32, 4  ;;  %v5335_v32 = vld [vmem:[#allocation2 + $0xc0] sm:$0xf0] }
 0x3db   : > { %v5406_v0 = vsel %vm5375_vm5, %v5404_v10, %v5405_v49  ;;  %v4970_v49 = vld [vmem:[#allocation2 + $0xa0] sm:$0xf8]  ;;  %v5418_v10 = vrot.slane %v5335_v32, 4 }
 0x3dc   : > { %v5159_v3 = vshrl.u32 %v4970_v49, 16  ;;  %v5162_v55 = vshll.u32 %v4970_v49, 16 }
 0x3dd   : > { %6153 = vmatmul.mubr.bf16.gmra.mrb[28].mxu0 %v5078_v5  ;;  %v5117_v5 = vrot.slane %v5115_v2, 3 }
 0x3de   : > { %6160 = vmatprep.mubr.bf16.mxu0 %v5396_v4  ;;  %v5124_v4 = vshrl.u32 %v4966_v42, 16  ;;  %v5164_v13 = vrot.slane %v5162_v55, 4 }
 0x3df   : > { %v5121_v24 = vor.u32 %v5120_v48, %v5117_v5  ;;  %v5187_v48 = vrot.slane %v5185_v25, 3 }
 0x3e5   : > { %6161 = vmatmul.mubr.bf16.gmra.mrb[32].mxu0 %v5087_v7  ;;  %v5152_v7 = vrot.slane %v5150_v60, 3 }
 0x3e6   : > { %6168 = vmatprep.mubr.bf16.mxu0 %v5399_v29  ;;  %v5155_v29 = vrot.slane %v5153_v15, 4  ;;  %v4978_v15 = vld [vmem:[#allocation2 + $0xe0] sm:$0xf8] }
 0x3e8   : > { %v5156_v12 = vor.u32 %v5155_v29, %v5152_v7  ;;  %v5229_v7 = vshrl.u32 %v4978_v15, 16  ;;  %v5232_v29 = vshll.u32 %v4978_v15, 16 }
 0x3ea   : > { %v5234_v26 = vrot.slane %v5232_v29, 4 }
 0x3ed   : > { %6169 = vmatmul.mubr.bf16.gmra.mrb[36].mxu0 %v5104_v47 }
 0x3ee   : > { %6176 = vmatprep.mubr.bf16.mxu0 %v16268_v41  ;;  %v5122_v41 = vsel %vm4982_vm6, %v16281_v8, %v5121_v24  ;;  %v5409_v8 = vrot.slane %v5330_v20, 4  ;;  %v4974_v24 = vld [vmem:[#allocation2 + $0xc0] sm:$0xf8] }
 0x3ef   : > { %v5197_v53 = vshll.u32 %v4974_v24, 16 }
 0x3f0   : > { %v5410_v27 = vsel %vm5375_vm5, %v5407_v54, %v5409_v8  ;;  %v14330_v54 = vld [vmem:[%s18774_s6 + $0x50] sm:$0xff]   ;;  %v5339_v8 = vld [vmem:[#allocation2 + $0xe0] sm:$0xf0] }
 0x3f1   : > { %13366 = vmatprep.subr.bf16.mxu1 %v14330_v54  ;;  %v5199_v22 = vrot.slane %v5197_v53, 4 }
 0x3f2   : > { %13367 = vmatpush3.bf16.msra.mxu1 %v14331_v23 }
 0x3f5   : > { %6177 = vmatmul.mubr.bf16.gmra.mrb[40].mxu0 %v16290_v50  ;;  %v5126_v50 = vrot.slane %v5124_v4, 3  ;;  %v5194_v4 = vshrl.u32 %v4974_v24, 16 }
 0x3f6   : > { %6184 = vmatprep.mubr.bf16.mxu0 %v5403_v6  ;;  %v5190_v6 = vrot.slane %v5188_v61, 4 }
 0x3f7   : > { %v5130_v58 = vor.u32 %v5129_v40, %v5126_v50  ;;  %v5220_v40 = vshrl.u32 %v4977_v57, 16 }
 0x3f9   : > { %v5139_v28 = vsel %vm4982_vm6, %v5130_v58, %v16309_v33  ;;  %v5331_v33 = vld [vmem:[#allocation2 + $0xa0] sm:$0xf0]  ;;  %v5223_v58 = vshll.u32 %v4977_v57, 16  ;;  %v5222_v9 = vrot.slane %v5220_v40, 3 }
 0x3fa   : > { %v5411_v47 = vrot.slane %v5331_v33, 4  ;;  %v4981_v33 = vld [vmem:[#allocation2 + $0xf8] sm:$0xf] }
 0x3fb   : > { %v5225_v20 = vrot.slane %v5223_v58, 4  ;;  %v5255_v55 = vshrl.u32 %v4981_v33, 16 }
 0x3fc   : > { %v5413_v45 = vsel %vm5375_vm5, %v5411_v47, %v5412_v34  ;;  %v5334_v34 = vld [vmem:[#allocation2 + $0xb8] sm:$0xf]  ;;  %v5258_v47 = vshll.u32 %v4981_v33, 16 }
 0x3fd   : > { %6185 = vmatmul.mubr.bf16.gmra.mrb[44].mxu0 %v5122_v41  ;;  %v5416_v5 = vrot.slane %v5334_v34, 4  ;;  %v5420_v41 = vsel %vm5375_vm5, %v5418_v10, %v5419_v36  ;;  %v5338_v36 = vld [vmem:[#allocation2 + $0xd8] sm:$0xf] }
 0x3fe   : > { %6192 = vmatprep.mubr.bf16.mxu0 %v5406_v0  ;;  %v14333_v0 = vld [vmem:[%s18774_s6 + $0x18] sm:$0xff]  }
 0x3ff   : > { %v5417_v42 = vsel %vm5375_vm5, %v5414_v62, %v5416_v5  ;;  %v14332_v62 = vld [vmem:[%s18774_s6 + $0x58] sm:$0xff]  }
 0x400   : > { %13368 = vmatprep.subr.bf16.mxu1 %v14332_v62 }
 0x401   : > { %13369 = vmatpush3.bf16.msra.mxu1 %v14333_v0 }
 0x402   : > { %13370 = vmatprep.subr.bf16.mxu1 %v14334_v18 }
 0x405   : > { %6193 = vmatmul.mubr.bf16.gmra.mrb[48].mxu0 %v5139_v28  ;;  %v5423_v28 = vrot.slane %v5338_v36, 4 }
 0x406   : > { %6200 = vmatprep.mubr.bf16.mxu0 %v16324_v35  ;;  %v5157_v35 = vsel %vm4982_vm6, %v16328_v56, %v5156_v12 }
 0x407   : > { %v5424_v60 = vsel %vm5375_vm5, %v5421_v37, %v5423_v28 }
 0x40d   : > { %6201 = vmatmul.mubr.bf16.gmra.mrb[52].mxu0 %v16334_v30  ;;  %v5161_v30 = vrot.slane %v5159_v3, 3  ;;  %v5342_v3 = vld [vmem:[#allocation2 + $0xf8] sm:$0xf] }
 0x40e   : > { %6208 = vmatprep.mubr.bf16.mxu0 %v5410_v27  ;;  %v5425_v27 = vrot.slane %v5339_v8, 4 }
 0x40f   : > { %v5165_v2 = vor.u32 %v5164_v13, %v5161_v30  ;;  %v16576_v13 = vld [vmem:[%s18773_s5] ss:$0 sm:$0xff] }
 0x410   : > { %v5427_v49 = vsel %vm5375_vm5, %v5425_v27, %v5426_v52  ;;  %v14335_v52 = vld [vmem:[%s18774_s6 + $0x20] sm:$0xff]  }
 0x411   : > { %v5174_v56 = vsel %vm4982_vm6, %v5165_v2, %v16352_v17  ;;  %v5191_v17 = vor.u32 %v5190_v6, %v5187_v48  ;;  %13371 = vmatpush3.bf16.msra.mxu1 %v14335_v52 }
 0x412   : > { %13372 = vmatprep.subr.bf16.mxu1 %v14336_v51 }
 0x415   : > { %6209 = vmatmul.mubr.bf16.gmra.mrb[56].mxu0 %v5157_v35  ;;  %v5257_v35 = vrot.slane %v5255_v55, 3 }
 0x416   : > { %6216 = vmatprep.mubr.bf16.mxu0 %v5413_v45  ;;  %v5260_v45 = vrot.slane %v5258_v47, 4 }
 0x41d   : > { %6217 = vmatmul.mubr.bf16.gmra.mrb[60].mxu0 %v5174_v56 }
 0x41e   : > { %6224 = vmatprep.mubr.bf16.mxu0 %v16367_v43  ;;  %v5192_v43 = vsel %vm4982_vm6, %v16371_v63, %v5191_v17 }
 0x425   : > { %6225 = vmatmul.mubr.bf16.gmra.mrb[64].mxu0 %v16377_v16  ;;  %v5196_v16 = vrot.slane %v5194_v4, 3 }
 0x426   : > { %6232 = vmatprep.mubr.bf16.mxu0 %v5417_v42 }
 0x427   : > { %v5200_v50 = vor.u32 %v5199_v22, %v5196_v16 }
 0x429   : > { %v5209_v63 = vsel %vm4982_vm6, %v5200_v50, %v16395_v19  ;;  %v5226_v19 = vor.u32 %v5225_v20, %v5222_v9 }
 0x42d   : > { %6233 = vmatmul.mubr.bf16.gmra.mrb[68].mxu0 %v5192_v43 }
 0x42e   : > { %6240 = vmatprep.mubr.bf16.mxu0 %v5420_v41 }
 0x435   : > { %6241 = vmatmul.mubr.bf16.gmra.mrb[72].mxu0 %v5209_v63 }
 0x436   : > { %6248 = vmatprep.mubr.bf16.mxu0 %v16410_v46  ;;  %v5227_v46 = vsel %vm4982_vm6, %v16414_v39, %v5226_v19  ;;  %v5430_v39 = vrot.slane %v5342_v3, 4 }
 0x43d   : > { %6249 = vmatmul.mubr.bf16.gmra.mrb[76].mxu0 %v16420_v44  ;;  %v5231_v44 = vrot.slane %v5229_v7, 3  ;;  %v14339_v7 = vld [vmem:[%s18774_s6 + $0x30] sm:$0xff]  }
 0x43e   : > { %6256 = vmatprep.mubr.bf16.mxu0 %v5424_v60  ;;  %v14338_v60 = vld [vmem:[%s18774_s6 + $0x70] sm:$0xff]  }
 0x43f   : > { %v5235_v12 = vor.u32 %v5234_v26, %v5231_v44 }
 0x441   : > { %v5244_v37 = vsel %vm4982_vm6, %v5235_v12, %v16437_v21  ;;  %v5431_v21 = vsel %vm5375_vm5, %v5428_v38, %v5430_v39  ;;  %v14337_v38 = vld [vmem:[%s18774_s6 + $0x28] sm:$0xff]  }
 0x442   : > { %13373 = vmatpush3.bf16.msra.mxu1 %v14337_v38 }
 0x443   : > { %13374 = vmatprep.subr.bf16.mxu1 %v14338_v60 }
 0x445   : > { %6257 = vmatmul.mubr.bf16.gmra.mrb[80].mxu0 %v5227_v46 }
 0x446   : > { %6264 = vmatprep.mubr.bf16.mxu0 %v5427_v49  ;;  %13375 = vmatpush3.bf16.msra.mxu1 %v14339_v7 }
 0x44d   : > { %6265 = vmatmul.mubr.bf16.gmra.mrb[84].mxu0 %v5244_v37 }
 0x44e   : > { %6272 = vmatprep.mubr.bf16.mxu0 %v16452_v59  ;;  %v5261_v59 = vor.u32 %v5260_v45, %v5257_v35 }
 0x450   : > { %v5262_v30 = vsel %vm4982_vm6, %v16455_v11, %v5261_v59  ;;  %v14341_v59 = vld [vmem:[%s18774_s6 + $0x38] sm:$0xff]  }
 0x455   : > { %6273 = vmatmul.mubr.bf16.gmra.mrb[88].mxu0 %v16461_v14 }
 0x456   : > { %6280 = vmatprep.mubr.bf16.mxu0 %v5431_v21  ;;  %v14340_v21 = vld [vmem:[%s18774_s6 + $0x78] sm:$0xff]  }
 0x457   : > { %13376 = vmatprep.subr.bf16.mxu1 %v14340_v21 }
 0x458   : > { %13377 = vmatpush3.bf16.msra.mxu1 %v14341_v59 }
 0x45d   : > { %6281 = vmatmul.mubr.bf16.gmra.mrb[92].mxu0 %v5262_v30 }
 0x478   : > { %v6098_v54 = vpop.f32.mrb[0].mxu0 }
 0x479   : > { %v13690_v23 = vadd.f32 %v16576_v13, %v6098_v54  ;;  %v6100_v2 = vpop.f32.mrb[1].mxu0 }
 0x47a   : > { %v6101_v14 = vpop.f32.mrb[2].mxu0 }
 0x47b   : > { %v13691_v11 = vadd.f32 %v16576_v13, %v6101_v14  ;;  %v6103_v56 = vpop.f32.mrb[3].mxu0  ;;  %v6289_v31 = vmax.f32 %v13690_v23, 0.0 }
 0x47d   : > { %v6290_v34 = vmax.f32 %v13691_v11, 0.0 }
 0x47f   : > { %v6337_v25 = vpack.c.bf16 %v6290_v34, %v6289_v31 }
 0x480   : > { %v6106_v61 = vpop.f32.mrb[4].mxu0 }
 0x481   : > { %6362 = vst.msk [vmem:[#allocation4] sm:$0xff] %vm6361_vm7, %v6337_v25  ;;  %v13692_v5 = vadd.f32 %v16576_v13, %v6106_v61  ;;  %v6108_v48 = vpop.f32.mrb[5].mxu0 }
 0x482   : > { %v6109_v6 = vpop.f32.mrb[6].mxu0 }
 0x483   : > { %v13693_v42 = vadd.f32 %v16576_v13, %v6109_v6  ;;  %v6111_v24 = vpop.f32.mrb[7].mxu0  ;;  %v6291_v17 = vmax.f32 %v13692_v5, 0.0 }
 0x485   : > { %v6292_v32 = vmax.f32 %v13693_v42, 0.0 }
 0x487   : > { %v6338_v4 = vpack.c.bf16 %v6292_v32, %v6291_v17 }
 0x488   : > { %v6114_v53 = vpop.f32.mrb[8].mxu0  ;;  %v6418_v10 = vld [vmem:[#allocation4] sm:$0xff] }
 0x489   : > { %6363 = vst.msk [vmem:[#allocation4 + $0x8] sm:$0xff] %vm6361_vm7, %v6338_v4  ;;  %v13694_v43 = vadd.f32 %v16576_v13, %v6114_v53  ;;  %v6116_v41 = vpop.f32.mrb[9].mxu0  ;;  %6402 = vst.msk [vmem:[#allocation5] sm:$0xff] %vm6361_vm7, %v6418_v10  ;;  %v6445_v22 = vshll.u32 %v6418_v10, 16  ;;  %v6788_v50 = vld [vmem:[#allocation4] sm:$0xf8] }
 0x48a   : > { %v6117_v16 = vpop.f32.mrb[10].mxu0  ;;  %v6667_v36 = vld [vmem:[#allocation4] sm:$0xfe]  ;;  %v6813_v58 = vshrl.u32 %v6788_v50, 16  ;;  %v6816_v28 = vshll.u32 %v6788_v50, 16  ;;  %v6443_v20 = vshrl.u32 %v6418_v10, 16 }
 0x48b   : > { %v13695_v62 = vadd.f32 %v16576_v13, %v6117_v16  ;;  %v6119_v0 = vpop.f32.mrb[11].mxu0  ;;  %v6293_v63 = vmax.f32 %v13694_v43, 0.0  ;;  %v6447_v40 = vrot.slane %v6445_v22, 1  ;;  %v6716_v8 = vrot.slane %v6667_v36, 1  ;;  %v7084_v29 = vld [vmem:[#allocation4] sm:$0xf0] }
 0x48c   : > { %v6815_v3 = vrot.slane %v6813_v58, 3  ;;  %v6818_v55 = vrot.slane %v6816_v28, 4  ;;  %v7501_v39 = vld [vmem:[#allocation4] sm:$0x80]  ;;  %v7132_v2 = vrot.slane %v7084_v29, 4 }
 0x48d   : > { %v6294_v57 = vmax.f32 %v13695_v62, 0.0  ;;  %v6448_v33 = vor.u32 %v6447_v40, %v6443_v20  ;;  %v7550_v11 = vrot.slane %v7501_v39, 7 }
 0x48e   : > { %v6819_v56 = vor.u32 %v6818_v55, %v6815_v3 }
 0x48f   : > { %v6339_v9 = vpack.c.bf16 %v6294_v57, %v6293_v63 }
 0x490   : > { %v6122_v15 = vpop.f32.mrb[12].mxu0  ;;  %v16596_v19 = vld [vmem:[#allocation4 + $0x8] sm:$0xff] }
 0x491   : > { %6364 = vst.msk [vmem:[#allocation4 + $0x10] sm:$0xff] %vm6361_vm7, %v6339_v9  ;;  %v13696_v27 = vadd.f32 %v16576_v13, %v6122_v15  ;;  %v6124_v46 = vpop.f32.mrb[13].mxu0  ;;  %v6450_v49 = vshll.u32 %v16596_v19, 16  ;;  %v6454_v44 = vshrl.u32 %v16596_v19, 16  ;;  %v6717_v26 = vrot.slane %v16596_v19, 1  ;;  %6403 = vst.msk [vmem:[#allocation5 + $0x28] sm:$0xff] %vm6361_vm7, %v16596_v19 }
 0x492   : > { %v16608_v12 = vld [vmem:[#allocation4 + $0x8] sm:$0xff]  ;;  %v6125_v37 = vpop.f32.mrb[14].mxu0 }
 0x493   : > { %v7133_v47 = vrot.slane %v16608_v12, 4  ;;  %7887 = vst.msk [vmem:[#allocation5 + $0x20] sm:$0xff] %vm6361_vm7, %v16608_v12  ;;  %v13697_v18 = vadd.f32 %v16576_v13, %v6125_v37  ;;  %v6127_v52 = vpop.f32.mrb[15].mxu0  ;;  %v6452_v35 = vrot.slane %v6450_v49, 1  ;;  %v6823_v45 = vrot.slane %v6454_v44, 3 }
 0x494   : > { %v7551_v30 = vrot.slane %v16608_v12, 7  ;;  %v6826_v54 = vrot.slane %v6450_v49, 4  ;;  %v6718_v23 = vsel %vm6715_vm8, %v6716_v8, %v6717_v26  ;;  %v6295_v51 = vmax.f32 %v13696_v27, 0.0 }
 0x495   : > { %v6296_v38 = vmax.f32 %v13697_v18, 0.0  ;;  %v6453_v14 = vsel %vm4677_vm4, %v6448_v33, %v6452_v35  ;;  %6772 = vst.msk [vmem:[#allocation5 + $0x8] sm:$0xff] %vm6361_vm7, %v6718_v23  ;;  %v7134_v34 = vsel %vm5375_vm5, %v7132_v2, %v7133_v47  ;;  %v6456_v0 = vor.u32 %v6454_v44, %v6452_v35 }
 0x496   : > { %6602 = vrot.lane.b32.xlu1 %v6453_v14, %s14948_s28  ;;  %v6827_v31 = vor.u32 %v6826_v54, %v6823_v45  ;;  %7188 = vst.msk [vmem:[#allocation5 + $0x10] sm:$0xff] %vm6361_vm7, %v7134_v34  ;;  %v7552_v61 = vsel %vm7549_vm9, %v7550_v11, %v7551_v30 }
 0x497   : > { %v6340_v25 = vpack.c.bf16 %v6296_v38, %v6295_v51  ;;  %7606 = vst.msk [vmem:[#allocation5 + $0x18] sm:$0xff] %vm6361_vm7, %v7552_v61 }
 0x498   : > { %v7872_v5 = vld [vmem:[#allocation4 + $0x10] sm:$0xff]  ;;  %v6130_v48 = vpop.f32.mrb[16].mxu0  ;;  %v6828_v6 = vsel %vm4982_vm6, %v6819_v56, %v6827_v31 }
 0x499   : > { %v6420_v42 = vld [vmem:[#allocation4 + $0x10] sm:$0x1]  ;;  %7888 = vst.msk [vmem:[#allocation5 + $0x48] sm:$0xff] %vm6361_vm7, %v7872_v5  ;;  %6365 = vst.msk [vmem:[#allocation4 + $0x18] sm:$0xff] %vm6361_vm7, %v6340_v25  ;;  %v13698_v17 = vadd.f32 %v16576_v13, %v6130_v48  ;;  %7020 = vrot.lane.b32.xlu0 %v6828_v6, %s14948_s28  ;;  %v6132_v32 = vpop.f32.mrb[17].mxu0 }
 0x49a   : > { %v6790_v24 = vld [vmem:[#allocation4 + $0x10] sm:$0xf]  ;;  %v6458_v4 = vshll.u32 %v6420_v42, 16  ;;  %v6133_v41 = vpop.f32.mrb[18].mxu0 }
 0x49b   : > { %v6830_v53 = vshrl.u32 %v6790_v24, 16  ;;  %v6833_v10 = vshll.u32 %v6790_v24, 16  ;;  %v6669_v43 = vld [vmem:[#allocation4 + $0x10] sm:$0x1]  ;;  %v13699_v22 = vadd.f32 %v16576_v13, %v6133_v41  ;;  %v6135_v62 = vpop.f32.mrb[19].mxu0  ;;  %v6297_v58 = vmax.f32 %v13698_v17, 0.0 }
 0x49c   : > { %v6719_v16 = vrot.slane %v6669_v43, 1  ;;  %v6460_v50 = vrot.slane %v6458_v4, 1  ;;  %v7086_v57 = vld [vmem:[#allocation4 + $0x10] sm:$0xf] }
 0x49d   : > { %v6832_v63 = vrot.slane %v6830_v53, 3  ;;  %v6835_v36 = vrot.slane %v6833_v10, 4  ;;  %v6298_v28 = vmax.f32 %v13699_v22, 0.0  ;;  %v7135_v60 = vrot.slane %v7086_v57, 4  ;;  %v7503_v15 = vld [vmem:[#allocation4 + $0x10] sm:$0x7f] }
 0x49e   : > { %v6720_v40 = vsel %vm6715_vm8, %v6717_v26, %v6719_v16  ;;  %v6461_v9 = vsel %vm4677_vm4, %v6456_v0, %v6460_v50  ;;  %v7553_v44 = vrot.slane %v7503_v15, 7 }
 0x49f   : > { %6773 = vst.msk [vmem:[#allocation5 + $0x30] sm:$0xff] %vm6361_vm7, %v6720_v40  ;;  %6604 = vrot.lane.b32.xlu1 %v6461_v9, %s14948_s28  ;;  %v6836_v20 = vor.u32 %v6835_v36, %v6832_v63  ;;  %v6341_v19 = vpack.c.bf16 %v6298_v28, %v6297_v58  ;;  %v7136_v27 = vsel %vm5375_vm5, %v7133_v47, %v7135_v60 }
 0x4a0   : > { %v6138_v8 = vpop.f32.mrb[20].mxu0  ;;  %v6421_v29 = vld [vmem:[#allocation4 + $0x18] sm:$0xff]  ;;  %7189 = vst.msk [vmem:[#allocation5 + $0x38] sm:$0xff] %vm6361_vm7, %v7136_v27  ;;  %v7554_v52 = vsel %vm7549_vm9, %v7551_v30, %v7553_v44 }
 0x4a1   : > { %v6837_v7 = vsel %vm4982_vm6, %v6827_v31, %v6836_v20  ;;  %6366 = vst.msk [vmem:[#allocation4 + $0x20] sm:$0xff] %vm6361_vm7, %v6341_v19  ;;  %v13700_v46 = vadd.f32 %v16576_v13, %v6138_v8  ;;  %v6140_v49 = vpop.f32.mrb[21].mxu0  ;;  %6404 = vst.msk [vmem:[#allocation5 + $0x50] sm:$0xff] %vm6361_vm7, %v6421_v29  ;;  %v6465_v3 = vshll.u32 %v6421_v29, 16  ;;  %v6791_v55 = vld [vmem:[#allocation4 + $0x18] sm:$0xf8] }
 0x4a2   : > { %7022 = vrot.lane.b32.xlu0 %v6837_v7, %s14948_s28  ;;  %v6141_v26 = vpop.f32.mrb[22].mxu0  ;;  %v6670_v18 = vld [vmem:[#allocation4 + $0x18] sm:$0xfe]  ;;  %v6839_v35 = vshrl.u32 %v6791_v55, 16  ;;  %v6842_v45 = vshll.u32 %v6791_v55, 16  ;;  %7607 = vst.msk [vmem:[#allocation5 + $0x40] sm:$0xff] %vm6361_vm7, %v7554_v52 }
 0x4a3   : > { %v13701_v37 = vadd.f32 %v16576_v13, %v6141_v26  ;;  %v6143_v33 = vpop.f32.mrb[23].mxu0  ;;  %v6299_v39 = vmax.f32 %v13700_v46, 0.0  ;;  %v6467_v59 = vrot.slane %v6465_v3, 1  ;;  %v7087_v54 = vld [vmem:[#allocation4 + $0x18] sm:$0xf0]  ;;  %v6463_v51 = vshrl.u32 %v6421_v29, 16 }
 0x4a4   : > { %v6721_v38 = vrot.slane %v6670_v18, 1  ;;  %v7504_v25 = vld [vmem:[#allocation4 + $0x18] sm:$0x80]  ;;  %v6841_v5 = vrot.slane %v6839_v35, 3  ;;  %v6844_v48 = vrot.slane %v6842_v45, 4  ;;  %v7137_v41 = vrot.slane %v7087_v54, 4 }
 0x4a5   : > { %v6300_v47 = vmax.f32 %v13701_v37, 0.0  ;;  %v6468_v32 = vor.u32 %v6467_v59, %v6463_v51  ;;  %v7555_v16 = vrot.slane %v7504_v25, 7 }
 0x4a6   : > { %v6845_v50 = vor.u32 %v6844_v48, %v6841_v5 }
 0x4a7   : > { %v6342_v21 = vpack.c.bf16 %v6300_v47, %v6299_v39 }
 0x4a8   : > { %v6146_v23 = vpop.f32.mrb[24].mxu0  ;;  %v16657_v2 = vld [vmem:[#allocation4 + $0x20] sm:$0xff] }
 0x4a9   : > { %v16659_v14 = vld [vmem:[#allocation4 + $0x20] sm:$0xff]  ;;  %6367 = vst.msk [vmem:[#allocation4 + $0x28] sm:$0xff] %vm6361_vm7, %v6342_v21  ;;  %v13702_v12 = vadd.f32 %v16576_v13, %v6146_v23  ;;  %v6148_v30 = vpop.f32.mrb[25].mxu0  ;;  %v6470_v56 = vshll.u32 %v16657_v2, 16  ;;  %v6847_v31 = vshrl.u32 %v16657_v2, 16  ;;  %v6722_v34 = vrot.slane %v16657_v2, 1 }
 0x4aa   : > { %v7873_v11 = vld [vmem:[#allocation4 + $0x20] sm:$0xff]  ;;  %6405 = vst.msk [vmem:[#allocation5 + $0x78] sm:$0xff] %vm6361_vm7, %v16657_v2  ;;  %v6149_v61 = vpop.f32.mrb[26].mxu0  ;;  %v7138_v6 = vrot.slane %v16659_v14, 4  ;;  %v7556_v42 = vrot.slane %v16659_v14, 7 }
 0x4ab   : > { %7889 = vst.msk [vmem:[#allocation5 + $0x70] sm:$0xff] %vm6361_vm7, %v7873_v11  ;;  %v13703_v24 = vadd.f32 %v16576_v13, %v6149_v61  ;;  %v6151_v17 = vpop.f32.mrb[27].mxu0  ;;  %v6472_v4 = vrot.slane %v6470_v56, 1  ;;  %v6849_v53 = vrot.slane %v6847_v31, 3  ;;  %v6852_v10 = vrot.slane %v6470_v56, 4 }
 0x4ac   : > { %v6723_v43 = vsel %vm6715_vm8, %v6721_v38, %v6722_v34  ;;  %v6301_v22 = vmax.f32 %v13702_v12, 0.0  ;;  %v7139_v57 = vsel %vm5375_vm5, %v7137_v41, %v7138_v6  ;;  %v7557_v36 = vsel %vm7549_vm9, %v7555_v16, %v7556_v42 }
 0x4ad   : > { %v6302_v62 = vmax.f32 %v13703_v24, 0.0  ;;  %v6473_v0 = vsel %vm4677_vm4, %v6468_v32, %v6472_v4  ;;  %6774 = vst.msk [vmem:[#allocation5 + $0x58] sm:$0xff] %vm6361_vm7, %v6723_v43  ;;  %v6853_v63 = vor.u32 %v6852_v10, %v6849_v53  ;;  %7190 = vst.msk [vmem:[#allocation5 + $0x60] sm:$0xff] %vm6361_vm7, %v7139_v57  ;;  %v6476_v37 = vor.u32 %v6847_v31, %v6472_v4 }
 0x4ae   : > { %6606 = vrot.lane.b32.xlu1 %v6473_v0, %s14948_s28  ;;  %7608 = vst.msk [vmem:[#allocation5 + $0x68] sm:$0xff] %vm6361_vm7, %v7557_v36 }
 0x4af   : > { %v6343_v40 = vpack.c.bf16 %v6302_v62, %v6301_v22  ;;  %v6854_v9 = vsel %vm4982_vm6, %v6845_v50, %v6853_v63 }
 0x4b0   : > { %v7874_v58 = vld [vmem:[#allocation4 + $0x28] sm:$0xff]  ;;  %v6154_v28 = vpop.f32.mrb[28].mxu0  ;;  %7024 = vrot.lane.b32.xlu0 %v6854_v9, %s14948_s28 }
 0x4b1   : > { %v6423_v20 = vld [vmem:[#allocation4 + $0x28] sm:$0x1]  ;;  %7890 = vst.msk [vmem:[#allocation5 + $0x98] sm:$0xff] %vm6361_vm7, %v7874_v58  ;;  %6368 = vst.msk [vmem:[#allocation4 + $0x30] sm:$0xff] %vm6361_vm7, %v6343_v40  ;;  %v13704_v15 = vadd.f32 %v16576_v13, %v6154_v28  ;;  %v6156_v19 = vpop.f32.mrb[29].mxu0 }
 0x4b2   : > { %v6793_v60 = vld [vmem:[#allocation4 + $0x28] sm:$0xf]  ;;  %v6478_v8 = vshll.u32 %v6423_v20, 16  ;;  %v6157_v46 = vpop.f32.mrb[30].mxu0 }
 0x4b3   : > { %v6856_v7 = vshrl.u32 %v6793_v60, 16  ;;  %v6859_v29 = vshll.u32 %v6793_v60, 16  ;;  %v6672_v27 = vld [vmem:[#allocation4 + $0x28] sm:$0x1]  ;;  %v13705_v44 = vadd.f32 %v16576_v13, %v6157_v46  ;;  %v6159_v26 = vpop.f32.mrb[31].mxu0  ;;  %v6303_v18 = vmax.f32 %v13704_v15, 0.0 }
 0x4b4   : > { %v6724_v49 = vrot.slane %v6672_v27, 1  ;;  %v6480_v33 = vrot.slane %v6478_v8, 1  ;;  %v7089_v55 = vld [vmem:[#allocation4 + $0x28] sm:$0xf] }
 0x4b5   : > { %v6858_v3 = vrot.slane %v6856_v7, 3  ;;  %v6861_v39 = vrot.slane %v6859_v29, 4  ;;  %v6304_v52 = vmax.f32 %v13705_v44, 0.0  ;;  %v7140_v21 = vrot.slane %v7089_v55, 4  ;;  %v7506_v59 = vld [vmem:[#allocation4 + $0x28] sm:$0x7f] }
 0x4b6   : > { %v6725_v47 = vsel %vm6715_vm8, %v6722_v34, %v6724_v49  ;;  %v6481_v35 = vsel %vm4677_vm4, %v6476_v37, %v6480_v33  ;;  %v7558_v30 = vrot.slane %v7506_v59, 7 }
 0x4b7   : > { %6775 = vst.msk [vmem:[#allocation5 + $0x80] sm:$0xff] %vm6361_vm7, %v6725_v47  ;;  %6608 = vrot.lane.b32.xlu1 %v6481_v35, %s14948_s28  ;;  %v6862_v45 = vor.u32 %v6861_v39, %v6858_v3  ;;  %v6344_v54 = vpack.c.bf16 %v6304_v52, %v6303_v18  ;;  %v7141_v38 = vsel %vm5375_vm5, %v7138_v6, %v7140_v21 }
 0x4b8   : > { %v6162_v23 = vpop.f32.mrb[32].mxu0  ;;  %v6424_v51 = vld [vmem:[#allocation4 + $0x30] sm:$0xff]  ;;  %7191 = vst.msk [vmem:[#allocation5 + $0x88] sm:$0xff] %vm6361_vm7, %v7141_v38  ;;  %v7559_v24 = vsel %vm7549_vm9, %v7556_v42, %v7558_v30 }
 0x4b9   : > { %v6863_v2 = vsel %vm4982_vm6, %v6853_v63, %v6862_v45  ;;  %6369 = vst.msk [vmem:[#allocation4 + $0x38] sm:$0xff] %vm6361_vm7, %v6344_v54  ;;  %v13706_v11 = vadd.f32 %v16576_v13, %v6162_v23  ;;  %v6164_v12 = vpop.f32.mrb[33].mxu0  ;;  %6406 = vst.msk [vmem:[#allocation5 + $0xa0] sm:$0xff] %vm6361_vm7, %v6424_v51  ;;  %v6485_v25 = vshll.u32 %v6424_v51, 16  ;;  %v6794_v61 = vld [vmem:[#allocation4 + $0x30] sm:$0xf8] }
 0x4ba   : > { %7026 = vrot.lane.b32.xlu0 %v6863_v2, %s14948_s28  ;;  %v6165_v56 = vpop.f32.mrb[34].mxu0  ;;  %v6673_v6 = vld [vmem:[#allocation4 + $0x30] sm:$0xfe]  ;;  %v6865_v17 = vshrl.u32 %v6794_v61, 16  ;;  %v6868_v32 = vshll.u32 %v6794_v61, 16  ;;  %7609 = vst.msk [vmem:[#allocation5 + $0x90] sm:$0xff] %vm6361_vm7, %v7559_v24 }
 0x4bb   : > { %v13707_v31 = vadd.f32 %v16576_v13, %v6165_v56  ;;  %v6167_v34 = vpop.f32.mrb[35].mxu0  ;;  %v6305_v5 = vmax.f32 %v13706_v11, 0.0  ;;  %v6487_v53 = vrot.slane %v6485_v25, 1  ;;  %v7090_v10 = vld [vmem:[#allocation4 + $0x30] sm:$0xf0]  ;;  %v6483_v16 = vshrl.u32 %v6424_v51, 16 }
 0x4bc   : > { %v6726_v22 = vrot.slane %v6673_v6, 1  ;;  %v7507_v36 = vld [vmem:[#allocation4 + $0x30] sm:$0x80]  ;;  %v6867_v58 = vrot.slane %v6865_v17, 3  ;;  %v6870_v28 = vrot.slane %v6868_v32, 4  ;;  %v7142_v46 = vrot.slane %v7090_v10, 4 }
 0x4bd   : > { %v6306_v48 = vmax.f32 %v13707_v31, 0.0  ;;  %v6488_v19 = vor.u32 %v6487_v53, %v6483_v16  ;;  %v7560_v49 = vrot.slane %v7507_v36, 7  ;;  %v14342_v6 = vld [vmem:[%s18774_s6 + $0xc0] sm:$0xff]  }
 0x4be   : > { %v6871_v33 = vor.u32 %v6870_v28, %v6867_v58  ;;  %13474 = vmatprep.subr.bf16.mxu1 %v14342_v6 }
 0x4bf   : > { %v6345_v4 = vpack.c.bf16 %v6306_v48, %v6305_v5 }
 0x4c0   : > { %v6170_v43 = vpop.f32.mrb[36].mxu0  ;;  %v16704_v41 = vld [vmem:[#allocation4 + $0x38] sm:$0xff] }
 0x4c1   : > { %v16706_v62 = vld [vmem:[#allocation4 + $0x38] sm:$0xff]  ;;  %6370 = vst.msk [vmem:[#allocation4 + $0x40] sm:$0xff] %vm6361_vm7, %v6345_v4  ;;  %v13708_v14 = vadd.f32 %v16576_v13, %v6170_v43  ;;  %v6172_v42 = vpop.f32.mrb[37].mxu0  ;;  %v6490_v50 = vshll.u32 %v16704_v41, 16  ;;  %v6873_v63 = vshrl.u32 %v16704_v41, 16  ;;  %v6727_v57 = vrot.slane %v16704_v41, 1 }
 0x4c2   : > { %v7875_v0 = vld [vmem:[#allocation4 + $0x38] sm:$0xff]  ;;  %6407 = vst.msk [vmem:[#allocation5 + $0xc8] sm:$0xff] %vm6361_vm7, %v16704_v41  ;;  %v6173_v40 = vpop.f32.mrb[38].mxu0  ;;  %v7143_v9 = vrot.slane %v16706_v62, 4  ;;  %v7561_v20 = vrot.slane %v16706_v62, 7 }
 0x4c3   : > { %7891 = vst.msk [vmem:[#allocation5 + $0xc0] sm:$0xff] %vm6361_vm7, %v7875_v0  ;;  %v13709_v60 = vadd.f32 %v16576_v13, %v6173_v40  ;;  %v6175_v15 = vpop.f32.mrb[39].mxu0  ;;  %v6492_v8 = vrot.slane %v6490_v50, 1  ;;  %v6875_v7 = vrot.slane %v6873_v63, 3  ;;  %v6878_v29 = vrot.slane %v6490_v50, 4 }
 0x4c4   : > { %v6728_v27 = vsel %vm6715_vm8, %v6726_v22, %v6727_v57  ;;  %v6307_v44 = vmax.f32 %v13708_v14, 0.0  ;;  %v7144_v55 = vsel %vm5375_vm5, %v7142_v46, %v7143_v9  ;;  %v7562_v39 = vsel %vm7549_vm9, %v7560_v49, %v7561_v20 }
 0x4c5   : > { %v6308_v26 = vmax.f32 %v13709_v60, 0.0  ;;  %v6493_v37 = vsel %vm4677_vm4, %v6488_v19, %v6492_v8  ;;  %6776 = vst.msk [vmem:[#allocation5 + $0xa8] sm:$0xff] %vm6361_vm7, %v6728_v27  ;;  %v6879_v3 = vor.u32 %v6878_v29, %v6875_v7  ;;  %7192 = vst.msk [vmem:[#allocation5 + $0xb0] sm:$0xff] %vm6361_vm7, %v7144_v55  ;;  %v6496_v31 = vor.u32 %v6873_v63, %v6492_v8 }
 0x4c6   : > { %6610 = vrot.lane.b32.xlu1 %v6493_v37, %s14948_s28  ;;  %7610 = vst.msk [vmem:[#allocation5 + $0xb8] sm:$0xff] %vm6361_vm7, %v7562_v39 }
 0x4c7   : > { %v6346_v47 = vpack.c.bf16 %v6308_v26, %v6307_v44  ;;  %v6880_v35 = vsel %vm4982_vm6, %v6871_v33, %v6879_v3 }
 0x4c8   : > { %v7876_v18 = vld [vmem:[#allocation4 + $0x40] sm:$0xff]  ;;  %v6178_v52 = vpop.f32.mrb[40].mxu0  ;;  %7028 = vrot.lane.b32.xlu0 %v6880_v35, %s14948_s28 }
 0x4c9   : > { %v6426_v45 = vld [vmem:[#allocation4 + $0x40] sm:$0x1]  ;;  %7892 = vst.msk [vmem:[#allocation5 + $0xe8] sm:$0xff] %vm6361_vm7, %v7876_v18  ;;  %6371 = vst.msk [vmem:[#allocation4 + $0x48] sm:$0xff] %vm6361_vm7, %v6346_v47  ;;  %v13710_v59 = vadd.f32 %v16576_v13, %v6178_v52  ;;  %v6180_v54 = vpop.f32.mrb[41].mxu0 }
 0x4ca   : > { %v6796_v21 = vld [vmem:[#allocation4 + $0x40] sm:$0xf]  ;;  %v6498_v23 = vshll.u32 %v6426_v45, 16  ;;  %v6181_v11 = vpop.f32.mrb[42].mxu0 }
 0x4cb   : > { %v6882_v2 = vshrl.u32 %v6796_v21, 16  ;;  %v6885_v51 = vshll.u32 %v6796_v21, 16  ;;  %v6675_v38 = vld [vmem:[#allocation4 + $0x40] sm:$0x1]  ;;  %v13711_v30 = vadd.f32 %v16576_v13, %v6181_v11  ;;  %v6183_v56 = vpop.f32.mrb[43].mxu0  ;;  %v6309_v24 = vmax.f32 %v13710_v59, 0.0 }
 0x4cc   : > { %v6729_v12 = vrot.slane %v6675_v38, 1  ;;  %v6500_v34 = vrot.slane %v6498_v23, 1  ;;  %v7092_v61 = vld [vmem:[#allocation4 + $0x40] sm:$0xf] }
 0x4cd   : > { %v6884_v25 = vrot.slane %v6882_v2, 3  ;;  %v6887_v5 = vrot.slane %v6885_v51, 4  ;;  %v6310_v17 = vmax.f32 %v13711_v30, 0.0  ;;  %v7145_v53 = vrot.slane %v7092_v61, 4  ;;  %v7509_v10 = vld [vmem:[#allocation4 + $0x40] sm:$0x7f] }
 0x4ce   : > { %v6730_v48 = vsel %vm6715_vm8, %v6727_v57, %v6729_v12  ;;  %v6501_v32 = vsel %vm4677_vm4, %v6496_v31, %v6500_v34  ;;  %v7563_v50 = vrot.slane %v7509_v10, 7 }
 0x4cf   : > { %6777 = vst.msk [vmem:[#allocation5 + $0xd0] sm:$0xff] %vm6361_vm7, %v6730_v48  ;;  %6612 = vrot.lane.b32.xlu1 %v6501_v32, %s14948_s28  ;;  %v6888_v4 = vor.u32 %v6887_v5, %v6884_v25  ;;  %v6347_v43 = vpack.c.bf16 %v6310_v17, %v6309_v24  ;;  %v7146_v0 = vsel %vm5375_vm5, %v7143_v9, %v7145_v53 }
 0x4d0   : > { %v6186_v41 = vpop.f32.mrb[44].mxu0  ;;  %v6427_v22 = vld [vmem:[#allocation4 + $0x48] sm:$0xff]  ;;  %7193 = vst.msk [vmem:[#allocation5 + $0xd8] sm:$0xff] %vm6361_vm7, %v7146_v0  ;;  %v7564_v15 = vsel %vm7549_vm9, %v7561_v20, %v7563_v50 }
 0x4d1   : > { %v6889_v16 = vsel %vm4982_vm6, %v6879_v3, %v6888_v4  ;;  %6372 = vst.msk [vmem:[#allocation4 + $0x50] sm:$0xff] %vm6361_vm7, %v6347_v43  ;;  %v13712_v14 = vadd.f32 %v16576_v13, %v6186_v41  ;;  %v6188_v42 = vpop.f32.mrb[45].mxu0  ;;  %6408 = vst.msk [vmem:[#allocation5 + $0xf0] sm:$0xff] %vm6361_vm7, %v6427_v22  ;;  %v6505_v40 = vshll.u32 %v6427_v22, 16  ;;  %v6797_v58 = vld [vmem:[#allocation4 + $0x48] sm:$0xf8] }
 0x4d2   : > { %7030 = vrot.lane.b32.xlu0 %v6889_v16, %s14948_s28  ;;  %v6189_v63 = vpop.f32.mrb[46].mxu0  ;;  %v6676_v60 = vld [vmem:[#allocation4 + $0x48] sm:$0xfe]  ;;  %v6891_v19 = vshrl.u32 %v6797_v58, 16  ;;  %v6894_v8 = vshll.u32 %v6797_v58, 16  ;;  %7611 = vst.msk [vmem:[#allocation5 + $0xe0] sm:$0xff] %vm6361_vm7, %v7564_v15 }
 0x4d3   : > { %v13713_v57 = vadd.f32 %v16576_v13, %v6189_v63  ;;  %v6191_v36 = vpop.f32.mrb[47].mxu0  ;;  %v6311_v28 = vmax.f32 %v13712_v14, 0.0  ;;  %v6507_v29 = vrot.slane %v6505_v40, 1  ;;  %v7093_v27 = vld [vmem:[#allocation4 + $0x48] sm:$0xf0]  ;;  %v6503_v44 = vshrl.u32 %v6427_v22, 16 }
 0x4d4   : > { %v6731_v26 = vrot.slane %v6676_v60, 1  ;;  %v7510_v47 = vld [vmem:[#allocation4 + $0x48] sm:$0x80]  ;;  %v6893_v52 = vrot.slane %v6891_v19, 3  ;;  %v6896_v35 = vrot.slane %v6894_v8, 4  ;;  %v7147_v12 = vrot.slane %v7093_v27, 4 }
 0x4d5   : > { %v6312_v9 = vmax.f32 %v13713_v57, 0.0  ;;  %v6508_v23 = vor.u32 %v6507_v29, %v6503_v44  ;;  %v7565_v30 = vrot.slane %v7510_v47, 7 }
 0x4d6   : > { %v6897_v25 = vor.u32 %v6896_v35, %v6893_v52 }
 0x4d7   : > { %v6348_v7 = vpack.c.bf16 %v6312_v9, %v6311_v28 }
 0x4d8   : > { %v6194_v46 = vpop.f32.mrb[48].mxu0  ;;  %v16754_v49 = vld [vmem:[#allocation4 + $0x50] sm:$0xff] }
 0x4d9   : > { %v16756_v37 = vld [vmem:[#allocation4 + $0x50] sm:$0xff]  ;;  %6373 = vst.msk [vmem:[#allocation4 + $0x58] sm:$0xff] %vm6361_vm7, %v6348_v7  ;;  %v13714_v62 = vadd.f32 %v16576_v13, %v6194_v46  ;;  %v6196_v20 = vpop.f32.mrb[49].mxu0  ;;  %v6510_v3 = vshll.u32 %v16754_v49, 16  ;;  %v6899_v55 = vshrl.u32 %v16754_v49, 16  ;;  %v6732_v39 = vrot.slane %v16754_v49, 1 }
 0x4da   : > { %v16758_v33 = vld [vmem:[#allocation4 + $0x50] sm:$0xff]  ;;  %6409 = vst.msk [vmem:[#allocation5 + $0x118] sm:$0xff] %vm6361_vm7, %v16756_v37  ;;  %v6197_v18 = vpop.f32.mrb[50].mxu0 }
 0x4db   : > { %7893 = vst.msk [vmem:[#allocation5 + $0x110] sm:$0xff] %vm6361_vm7, %v16758_v33  ;;  %v7148_v45 = vrot.slane %v16758_v33, 4  ;;  %v7566_v21 = vrot.slane %v16758_v33, 7  ;;  %v13715_v59 = vadd.f32 %v16576_v13, %v6197_v18  ;;  %v6199_v54 = vpop.f32.mrb[51].mxu0  ;;  %v6512_v2 = vrot.slane %v6510_v3, 1 }
 0x4dc   : > { %v6901_v51 = vrot.slane %v6899_v55, 3  ;;  %v6904_v38 = vrot.slane %v6510_v3, 4  ;;  %v6733_v11 = vsel %vm6715_vm8, %v6731_v26, %v6732_v39  ;;  %v6313_v56 = vmax.f32 %v13714_v62, 0.0 }
 0x4dd   : > { %v6314_v31 = vmax.f32 %v13715_v59, 0.0  ;;  %v6513_v34 = vsel %vm4677_vm4, %v6508_v23, %v6512_v2  ;;  %6778 = vst.msk [vmem:[#allocation5 + $0xf8] sm:$0xff] %vm6361_vm7, %v6733_v11  ;;  %v7149_v5 = vsel %vm5375_vm5, %v7147_v12, %v7148_v45  ;;  %v7567_v48 = vsel %vm7549_vm9, %v7565_v30, %v7566_v21 }
 0x4de   : > { %6614 = vrot.lane.b32.xlu1 %v6513_v34, %s14948_s28  ;;  %v6905_v61 = vor.u32 %v6904_v38, %v6901_v51  ;;  %7194 = vst.msk [vmem:[#allocation5 + $0x100] sm:$0xff] %vm6361_vm7, %v7149_v5  ;;  %7612 = vst.msk [vmem:[#allocation5 + $0x108] sm:$0xff] %vm6361_vm7, %v7567_v48  ;;  %v6516_v57 = vor.u32 %v6899_v55, %v6512_v2 }
 0x4df   : > { %v6349_v6 = vpack.c.bf16 %v6314_v31, %v6313_v56 }
 0x4e0   : > { %v7878_v24 = vld [vmem:[#allocation4 + $0x58] sm:$0xff]  ;;  %v6202_v17 = vpop.f32.mrb[52].mxu0  ;;  %v6906_v32 = vsel %vm4982_vm6, %v6897_v25, %v6905_v61 }
 0x4e1   : > { %v6429_v4 = vld [vmem:[#allocation4 + $0x58] sm:$0x1]  ;;  %7894 = vst.msk [vmem:[#allocation5 + $0x138] sm:$0xff] %vm6361_vm7, %v7878_v24  ;;  %6374 = vst.msk [vmem:[#allocation4 + $0x60] sm:$0xff] %vm6361_vm7, %v6349_v6  ;;  %v13716_v10 = vadd.f32 %v16576_v13, %v6202_v17  ;;  %7032 = vrot.lane.b32.xlu0 %v6906_v32, %s14948_s28  ;;  %v6204_v43 = vpop.f32.mrb[53].mxu0 }
 0x4e2   : > { %v6799_v53 = vld [vmem:[#allocation4 + $0x58] sm:$0xf]  ;;  %v6518_v41 = vshll.u32 %v6429_v4, 16  ;;  %v6205_v14 = vpop.f32.mrb[54].mxu0 }
 0x4e3   : > { %v6908_v16 = vshrl.u32 %v6799_v53, 16  ;;  %v6911_v22 = vshll.u32 %v6799_v53, 16  ;;  %v6678_v0 = vld [vmem:[#allocation4 + $0x58] sm:$0x1]  ;;  %v13717_v50 = vadd.f32 %v16576_v13, %v6205_v14  ;;  %v6207_v63 = vpop.f32.mrb[55].mxu0  ;;  %v6315_v60 = vmax.f32 %v13716_v10, 0.0 }
 0x4e4   : > { %v6734_v42 = vrot.slane %v6678_v0, 1  ;;  %v6520_v36 = vrot.slane %v6518_v41, 1  ;;  %v7095_v58 = vld [vmem:[#allocation4 + $0x58] sm:$0xf] }
 0x4e5   : > { %v6910_v40 = vrot.slane %v6908_v16, 3  ;;  %v6913_v28 = vrot.slane %v6911_v22, 4  ;;  %v6316_v15 = vmax.f32 %v13717_v50, 0.0  ;;  %v7150_v7 = vrot.slane %v7095_v58, 4  ;;  %v7512_v29 = vld [vmem:[#allocation4 + $0x58] sm:$0x7f] }
 0x4e6   : > { %v6735_v9 = vsel %vm6715_vm8, %v6732_v39, %v6734_v42  ;;  %v6521_v19 = vsel %vm4677_vm4, %v6516_v57, %v6520_v36  ;;  %v7568_v55 = vrot.slane %v7512_v29, 7 }
 0x4e7   : > { %6779 = vst.msk [vmem:[#allocation5 + $0x120] sm:$0xff] %vm6361_vm7, %v6735_v9  ;;  %6616 = vrot.lane.b32.xlu1 %v6521_v19, %s14948_s28  ;;  %v6914_v8 = vor.u32 %v6913_v28, %v6910_v40  ;;  %v6350_v27 = vpack.c.bf16 %v6316_v15, %v6315_v60  ;;  %v7151_v62 = vsel %vm5375_vm5, %v7148_v45, %v7150_v7 }
 0x4e8   : > { %v6210_v46 = vpop.f32.mrb[56].mxu0  ;;  %v6430_v44 = vld [vmem:[#allocation4 + $0x60] sm:$0xff]  ;;  %7195 = vst.msk [vmem:[#allocation5 + $0x128] sm:$0xff] %vm6361_vm7, %v7151_v62  ;;  %v7569_v23 = vsel %vm7549_vm9, %v7566_v21, %v7568_v55 }
 0x4e9   : > { %v6915_v49 = vsel %vm4982_vm6, %v6905_v61, %v6914_v8  ;;  %v6394_v26 = vld [vmem:[#allocation4 + $0x60] sm:$0xff]  ;;  %6375 = vst.msk [vmem:[#allocation4 + $0x68] sm:$0xff] %vm6361_vm7, %v6350_v27  ;;  %v13718_v20 = vadd.f32 %v16576_v13, %v6210_v46  ;;  %v6212_v3 = vpop.f32.mrb[57].mxu0  ;;  %v6525_v52 = vshll.u32 %v6430_v44, 16  ;;  %7613 = vst.msk [vmem:[#allocation5 + $0x130] sm:$0xff] %vm6361_vm7, %v7569_v23  ;;  %v6523_v31 = vshrl.u32 %v6430_v44, 16 }
 0x4ea   : > { %7034 = vrot.lane.b32.xlu0 %v6915_v49, %s14948_s28  ;;  %6410 = vst.msk [vmem:[#allocation5 + $0x140] sm:$0xff] %vm6361_vm7, %v6394_v26  ;;  %v6213_v39 = vpop.f32.mrb[58].mxu0  ;;  %v6800_v35 = vld [vmem:[#allocation4 + $0x60] sm:$0xf8]  ;;  %v16835_v55 = vld [vmem:[%s18773_s5] ss:$0 sm:$0xff] }
 0x4eb   : > { %v13719_v47 = vadd.f32 %v16576_v13, %v6213_v39  ;;  %v6215_v18 = vpop.f32.mrb[59].mxu0  ;;  %v6317_v59 = vmax.f32 %v13718_v20, 0.0  ;;  %v6679_v54 = vld [vmem:[#allocation4 + $0x60] sm:$0xfe]  ;;  %v6917_v2 = vshrl.u32 %v6800_v35, 16  ;;  %v6920_v51 = vshll.u32 %v6800_v35, 16 }
 0x4ec   : > { %v6527_v11 = vrot.slane %v6525_v52, 1  ;;  %v7096_v12 = vld [vmem:[#allocation4 + $0x60] sm:$0xf0]  ;;  %v6736_v25 = vrot.slane %v6679_v54, 1 }
 0x4ed   : > { %v6318_v45 = vmax.f32 %v13719_v47, 0.0  ;;  %v7513_v24 = vld [vmem:[#allocation4 + $0x60] sm:$0x80]  ;;  %v6919_v32 = vrot.slane %v6917_v2, 3  ;;  %v6922_v4 = vrot.slane %v6920_v51, 4  ;;  %v7152_v50 = vrot.slane %v7096_v12, 4 }
 0x4ee   : > { %v6528_v16 = vor.u32 %v6527_v11, %v6523_v31  ;;  %v7570_v63 = vrot.slane %v7513_v24, 7 }
 0x4ef   : > { %v6351_v38 = vpack.c.bf16 %v6318_v45, %v6317_v59  ;;  %v6923_v58 = vor.u32 %v6922_v4, %v6919_v32 }
 0x4f0   : > { %v6218_v30 = vpop.f32.mrb[60].mxu0  ;;  %v6431_v56 = vld [vmem:[#allocation4 + $0x68] sm:$0xff] }
 0x4f1   : > { %v16804_v34 = vld [vmem:[#allocation4 + $0x68] sm:$0xff]  ;;  %6376 = vst.msk [vmem:[#allocation4 + $0x70] sm:$0xff] %vm6361_vm7, %v6351_v38  ;;  %v13720_v33 = vadd.f32 %v16576_v13, %v6218_v30  ;;  %v6220_v5 = vpop.f32.mrb[61].mxu0  ;;  %v6530_v21 = vshll.u32 %v6431_v56, 16  ;;  %v6925_v48 = vshrl.u32 %v6431_v56, 16 }
 0x4f2   : > { %v7879_v61 = vld [vmem:[#allocation4 + $0x68] sm:$0xff]  ;;  %v6737_v6 = vrot.slane %v16804_v34, 1  ;;  %6411 = vst.msk [vmem:[#allocation5 + $0x168] sm:$0xff] %vm6361_vm7, %v16804_v34  ;;  %v6221_v17 = vpop.f32.mrb[62].mxu0  ;;  %v7153_v53 = vrot.slane %v16804_v34, 4  ;;  %v7571_v10 = vrot.slane %v16804_v34, 7 }
 0x4f3   : > { %7895 = vst.msk [vmem:[#allocation5 + $0x160] sm:$0xff] %vm6361_vm7, %v7879_v61  ;;  %v13721_v43 = vadd.f32 %v16576_v13, %v6221_v17  ;;  %v6223_v41 = vpop.f32.mrb[63].mxu0  ;;  %v6532_v22 = vrot.slane %v6530_v21, 1  ;;  %v6927_v0 = vrot.slane %v6925_v48, 3  ;;  %v6930_v14 = vrot.slane %v6530_v21, 4 }
 0x4f4   : > { %v6738_v42 = vsel %vm6715_vm8, %v6736_v25, %v6737_v6  ;;  %v6319_v57 = vmax.f32 %v13720_v33, 0.0  ;;  %v7154_v9 = vsel %vm5375_vm5, %v7152_v50, %v7153_v53  ;;  %v7572_v60 = vsel %vm7549_vm9, %v7570_v63, %v7571_v10 }
 0x4f5   : > { %v6320_v36 = vmax.f32 %v13721_v43, 0.0  ;;  %v6533_v40 = vsel %vm4677_vm4, %v6528_v16, %v6532_v22  ;;  %6780 = vst.msk [vmem:[#allocation5 + $0x148] sm:$0xff] %vm6361_vm7, %v6738_v42  ;;  %v6931_v28 = vor.u32 %v6930_v14, %v6927_v0  ;;  %7196 = vst.msk [vmem:[#allocation5 + $0x150] sm:$0xff] %vm6361_vm7, %v7154_v9  ;;  %v6536_v18 = vor.u32 %v6925_v48, %v6532_v22 }
 0x4f6   : > { %6618 = vrot.lane.b32.xlu1 %v6533_v40, %s14948_s28  ;;  %7614 = vst.msk [vmem:[#allocation5 + $0x158] sm:$0xff] %vm6361_vm7, %v7572_v60 }
 0x4f7   : > { %v6352_v15 = vpack.c.bf16 %v6320_v36, %v6319_v57  ;;  %v6932_v7 = vsel %vm4982_vm6, %v6923_v58, %v6931_v28 }
 0x4f8   : > { %v7880_v19 = vld [vmem:[#allocation4 + $0x70] sm:$0xff]  ;;  %v6226_v8 = vpop.f32.mrb[64].mxu0  ;;  %7036 = vrot.lane.b32.xlu0 %v6932_v7, %s14948_s28 }
 0x4f9   : > { %v6432_v29 = vld [vmem:[#allocation4 + $0x70] sm:$0x1]  ;;  %7896 = vst.msk [vmem:[#allocation5 + $0x188] sm:$0xff] %vm6361_vm7, %v7880_v19  ;;  %6377 = vst.msk [vmem:[#allocation4 + $0x78] sm:$0xff] %vm6361_vm7, %v6352_v15  ;;  %v13722_v46 = vadd.f32 %v16576_v13, %v6226_v8  ;;  %v6228_v49 = vpop.f32.mrb[65].mxu0 }
 0x4fa   : > { %v6802_v27 = vld [vmem:[#allocation4 + $0x70] sm:$0xf]  ;;  %v6538_v44 = vshll.u32 %v6432_v29, 16  ;;  %v6229_v20 = vpop.f32.mrb[66].mxu0 }
 0x4fb   : > { %v6934_v26 = vshrl.u32 %v6802_v27, 16  ;;  %v6937_v62 = vshll.u32 %v6802_v27, 16  ;;  %v6681_v3 = vld [vmem:[#allocation4 + $0x70] sm:$0x1]  ;;  %v13723_v39 = vadd.f32 %v16835_v55, %v6229_v20  ;;  %v6231_v47 = vpop.f32.mrb[67].mxu0  ;;  %v6321_v45 = vmax.f32 %v13722_v46, 0.0 }
 0x4fc   : > { %v6540_v52 = vrot.slane %v6538_v44, 1  ;;  %v7098_v13 = vld [vmem:[#allocation4 + $0x70] sm:$0xf]  ;;  %v6739_v2 = vrot.slane %v6681_v3, 1 }
 0x4fd   : > { %v6936_v35 = vrot.slane %v6934_v26, 3  ;;  %v6939_v59 = vrot.slane %v6937_v62, 4  ;;  %v6322_v54 = vmax.f32 %v13723_v39, 0.0  ;;  %v7155_v38 = vrot.slane %v7098_v13, 4  ;;  %v7515_v11 = vld [vmem:[#allocation4 + $0x70] sm:$0x7f] }
 0x4fe   : > { %v6541_v23 = vsel %vm4677_vm4, %v6536_v18, %v6540_v52  ;;  %v6740_v30 = vsel %vm6715_vm8, %v6737_v6, %v6739_v2  ;;  %v7573_v48 = vrot.slane %v7515_v11, 7 }
 0x4ff   : > { %6620 = vrot.lane.b32.xlu1 %v6541_v23, %s14948_s28  ;;  %v6940_v51 = vor.u32 %v6939_v59, %v6936_v35  ;;  %v6353_v12 = vpack.c.bf16 %v6322_v54, %v6321_v45  ;;  %6781 = vst.msk [vmem:[#allocation5 + $0x170] sm:$0xff] %vm6361_vm7, %v6740_v30  ;;  %v7156_v61 = vsel %vm5375_vm5, %v7153_v53, %v7155_v38 }
 0x500   : > { %v6234_v56 = vpop.f32.mrb[68].mxu0  ;;  %v6433_v25 = vld [vmem:[#allocation4 + $0x78] sm:$0xff]  ;;  %7197 = vst.msk [vmem:[#allocation5 + $0x178] sm:$0xff] %vm6361_vm7, %v7156_v61  ;;  %v7574_v22 = vsel %vm7549_vm9, %v7571_v10, %v7573_v48 }
 0x501   : > { %v6941_v31 = vsel %vm4982_vm6, %v6931_v28, %v6940_v51  ;;  %6378 = vst.msk [vmem:[#allocation4 + $0x80] sm:$0xff] %vm6361_vm7, %v6353_v12  ;;  %v13724_v33 = vadd.f32 %v16835_v55, %v6234_v56  ;;  %v6236_v5 = vpop.f32.mrb[69].mxu0  ;;  %v6803_v21 = vld [vmem:[#allocation4 + $0x78] sm:$0xf8]  ;;  %v6545_v24 = vshll.u32 %v6433_v25, 16  ;;  %7615 = vst.msk [vmem:[#allocation5 + $0x180] sm:$0xff] %vm6361_vm7, %v7574_v22 }
 0x502   : > { %7038 = vrot.lane.b32.xlu0 %v6941_v31, %s14948_s28  ;;  %v6237_v6 = vpop.f32.mrb[70].mxu0  ;;  %v6396_v17 = vld [vmem:[#allocation4 + $0x78] sm:$0xff]  ;;  %v6943_v53 = vshrl.u32 %v6803_v21, 16  ;;  %v6946_v16 = vshll.u32 %v6803_v21, 16  ;;  %v6543_v40 = vshrl.u32 %v6433_v25, 16  ;;  %v14344_v22 = vld [vmem:[%s18774_s6 + $0xc8] sm:$0xff]  }
 0x503   : > { %v13725_v32 = vadd.f32 %v16835_v55, %v6237_v6  ;;  %v6239_v4 = vpop.f32.mrb[71].mxu0  ;;  %6412 = vst.msk [vmem:[#allocation5 + $0x190] sm:$0xff] %vm6361_vm7, %v6396_v17  ;;  %v6323_v43 = vmax.f32 %v13724_v33, 0.0  ;;  %v6547_v0 = vrot.slane %v6545_v24, 1  ;;  %v6682_v42 = vld [vmem:[#allocation4 + $0x78] sm:$0xfe] }
 0x504   : > { %v7099_v50 = vld [vmem:[#allocation4 + $0x78] sm:$0xf0]  ;;  %v6945_v58 = vrot.slane %v6943_v53, 3  ;;  %v6948_v19 = vrot.slane %v6946_v16, 4  ;;  %v6741_v46 = vrot.slane %v6682_v42, 1  ;;  %v14343_v17 = vld [vmem:[%s18774_s6 + $0x80] sm:$0xff]  }
 0x505   : > { %v6324_v41 = vmax.f32 %v13725_v32, 0.0  ;;  %v7516_v7 = vld [vmem:[#allocation4 + $0x78] sm:$0x80]  ;;  %v6548_v27 = vor.u32 %v6547_v0, %v6543_v40  ;;  %v7157_v52 = vrot.slane %v7099_v50, 4 }
 0x506   : > { %v7575_v35 = vrot.slane %v7516_v7, 7  ;;  %v6949_v23 = vor.u32 %v6948_v19, %v6945_v58 }
 0x507   : > { %v6354_v14 = vpack.c.bf16 %v6324_v41, %v6323_v43 }
 0x508   : > { %v6242_v63 = vpop.f32.mrb[72].mxu0  ;;  %v6603_v57 = vpop.permute.xlu1 %6602  ;;  %v16856_v36 = vld [vmem:[#allocation4 + $0x80] sm:$0xff] }
 0x509   : > { %v16858_v28 = vld [vmem:[#allocation4 + $0x80] sm:$0xff]  ;;  %6379 = vst.msk [vmem:[#allocation4 + $0x88] sm:$0xff] %vm6361_vm7, %v6354_v14  ;;  %v13726_v10 = vadd.f32 %v16835_v55, %v6242_v63  ;;  %v6244_v60 = vpop.f32.mrb[73].mxu0  ;;  %v6550_v15 = vshll.u32 %v16856_v36, 16  ;;  %v6951_v8 = vshrl.u32 %v16856_v36, 16 }
 0x50a   : > { %v7881_v9 = vld [vmem:[#allocation4 + $0x80] sm:$0xff]  ;;  %6651 = vst.msk [vmem:[#allocation5] sm:$0xff] %vm6650_vm10, %v6603_v57  ;;  %v6245_v29 = vpop.f32.mrb[74].mxu0  ;;  %v6742_v49 = vrot.slane %v16858_v28, 1  ;;  %v7158_v44 = vrot.slane %v16858_v28, 4  ;;  %v7576_v47 = vrot.slane %v16858_v28, 7 }
 0x50b   : > { %6413 = vst.msk [vmem:[#allocation5 + $0x1b8] sm:$0xff] %vm6361_vm7, %v16858_v28  ;;  %7897 = vst.msk [vmem:[#allocation5 + $0x1b0] sm:$0xff] %vm6361_vm7, %v7881_v9  ;;  %v13727_v26 = vadd.f32 %v16835_v55, %v6245_v29  ;;  %v7021_v62 = vpop.permute.xlu0 %7020  ;;  %v6247_v20 = vpop.f32.mrb[75].mxu0  ;;  %v6552_v3 = vrot.slane %v6550_v15, 1  ;;  %v6953_v39 = vrot.slane %v6951_v8, 3  ;;  %v6956_v18 = vrot.slane %v6550_v15, 4 }
 0x50c   : > { %7068 = vst.msk [vmem:[#allocation5 + $0x8] sm:$0xff] %vm6650_vm10, %v7021_v62  ;;  %v6325_v13 = vmax.f32 %v13726_v10, 0.0  ;;  %v6743_v54 = vsel %vm6715_vm8, %v6741_v46, %v6742_v49  ;;  %v7159_v51 = vsel %vm5375_vm5, %v7157_v52, %v7158_v44  ;;  %v7577_v11 = vsel %vm7549_vm9, %v7575_v35, %v7576_v47  ;;  %v14345_v9 = vld [vmem:[%s18774_s6 + $0x88] sm:$0xff]  }
 0x50d   : > { %v6326_v59 = vmax.f32 %v13727_v26, 0.0  ;;  %v6553_v45 = vsel %vm4677_vm4, %v6548_v27, %v6552_v3  ;;  %v6957_v2 = vor.u32 %v6956_v18, %v6953_v39  ;;  %6782 = vst.msk [vmem:[#allocation5 + $0x198] sm:$0xff] %vm6361_vm7, %v6743_v54  ;;  %7198 = vst.msk [vmem:[#allocation5 + $0x1a0] sm:$0xff] %vm6361_vm7, %v7159_v51  ;;  %v6556_v41 = vor.u32 %v6951_v8, %v6552_v3  ;;  %v14346_v8 = vld [vmem:[%s18774_s6 + $0xd0] sm:$0xff]   ;;  %v14348_v54 = vld [vmem:[%s18774_s6 + $0xd8] sm:$0xff]  }
 0x50e   : > { %6622 = vrot.lane.b32.xlu1 %v6553_v45, %s14948_s28  ;;  %7616 = vst.msk [vmem:[#allocation5 + $0x1a8] sm:$0xff] %vm6361_vm7, %v7577_v11 }
 0x50f   : > { %v6355_v38 = vpack.c.bf16 %v6326_v59, %v6325_v13  ;;  %v6958_v56 = vsel %vm4982_vm6, %v6949_v23, %v6957_v2 }
 0x510   : > { %v7882_v12 = vld [vmem:[#allocation4 + $0x88] sm:$0xff]  ;;  %v6250_v30 = vpop.f32.mrb[76].mxu0  ;;  %7040 = vrot.lane.b32.xlu0 %v6958_v56, %s14948_s28 }
 0x511   : > { %v6605_v31 = vpop.permute.xlu1 %6604  ;;  %v6435_v25 = vld [vmem:[#allocation4 + $0x88] sm:$0x1]  ;;  %7898 = vst.msk [vmem:[#allocation5 + $0x1d8] sm:$0xff] %vm6361_vm7, %v7882_v12  ;;  %6380 = vst.msk [vmem:[#allocation4 + $0x90] sm:$0xff] %vm6361_vm7, %v6355_v38  ;;  %v13728_v61 = vadd.f32 %v16835_v55, %v6250_v30  ;;  %v6252_v33 = vpop.f32.mrb[77].mxu0  ;;  %v7903_v0 = vld [vmem:[#allocation5] sm:$0xff] }
 0x512   : > { %6652 = vst.msk [vmem:[#allocation5 + $0x28] sm:$0xff] %vm6650_vm10, %v6605_v31  ;;  %v6558_v5 = vshll.u32 %v6435_v25, 16  ;;  %v6805_v21 = vld [vmem:[#allocation4 + $0x88] sm:$0xf]  ;;  %v6253_v48 = vpop.f32.mrb[78].mxu0 }
 0x513   : > { %v6960_v6 = vshrl.u32 %v6805_v21, 16  ;;  %v6963_v24 = vshll.u32 %v6805_v21, 16  ;;  %v13729_v32 = vadd.f32 %v16835_v55, %v6253_v48  ;;  %v6255_v53 = vpop.f32.mrb[79].mxu0  ;;  %v7904_v43 = vld [vmem:[#allocation5 + $0x8] sm:$0xff]  ;;  %v6327_v63 = vmax.f32 %v13728_v61, 0.0  ;;  %v14349_v61 = vld [vmem:[%s18774_s6 + $0x98] sm:$0xff]  }
 0x514   : > { %v7023_v4 = vpop.permute.xlu0 %7022  ;;  %v6560_v16 = vrot.slane %v6558_v5, 1  ;;  %8358 = vmatprep.mubr.bf16.mxu1 %v7904_v43  ;;  %v6684_v50 = vld [vmem:[#allocation4 + $0x88] sm:$0x1]  ;;  %v14350_v5 = vld [vmem:[%s18774_s6 + $0xe0] sm:$0xff]  }
 0x515   : > { %7069 = vst.msk [vmem:[#allocation5 + $0x30] sm:$0xff] %vm6650_vm10, %v7023_v4  ;;  %v6962_v14 = vrot.slane %v6960_v6, 3  ;;  %v6965_v42 = vrot.slane %v6963_v24, 4  ;;  %v6328_v57 = vmax.f32 %v13729_v32, 0.0  ;;  %8359 = vmatmul.mubr.bf16.vlgmr.msra.gmra.mrb[0].mxu1 %v7903_v0  ;;  %v7101_v40 = vld [vmem:[#allocation4 + $0x88] sm:$0xf] }
 0x516   : > { %v6561_v36 = vsel %vm4677_vm4, %v6556_v41, %v6560_v16  ;;  %13475 = vmatpush3.bf16.msra.mxu1 %v14343_v17  ;;  %v6744_v10 = vrot.slane %v6684_v50, 1  ;;  %v7160_v60 = vrot.slane %v7101_v40, 4  ;;  %v7518_v15 = vld [vmem:[#allocation4 + $0x88] sm:$0x7f]  ;;  %v14351_v50 = vld [vmem:[%s18774_s6 + $0xa0] sm:$0xff]  }
 0x517   : > { %6624 = vrot.lane.b32.xlu1 %v6561_v36, %s14948_s28  ;;  %v6966_v58 = vor.u32 %v6965_v42, %v6962_v14  ;;  %v6356_v19 = vpack.c.bf16 %v6328_v57, %v6327_v63  ;;  %13476 = vmatprep.subr.bf16.mxu1 %v14344_v22  ;;  %v7578_v18 = vrot.slane %v7518_v15, 7  ;;  %v14352_v15 = vld [vmem:[%s18774_s6 + $0xe8] sm:$0xff]  }
 0x518   : > { %v6258_v7 = vpop.f32.mrb[80].mxu0  ;;  %v6436_v27 = vld [vmem:[#allocation4 + $0x90] sm:$0xff]  ;;  %v6745_v26 = vsel %vm6715_vm8, %v6742_v49, %v6744_v10  ;;  %v7161_v62 = vsel %vm5375_vm5, %v7158_v44, %v7160_v60 }
 0x519   : > { %v6967_v29 = vsel %vm4982_vm6, %v6957_v2, %v6966_v58  ;;  %v6806_v46 = vld [vmem:[#allocation4 + $0x90] sm:$0xf8]  ;;  %6381 = vst.msk [vmem:[#allocation4 + $0x98] sm:$0xff] %vm6361_vm7, %v6356_v19  ;;  %v13730_v20 = vadd.f32 %v16835_v55, %v6258_v7  ;;  %v6260_v3 = vpop.f32.mrb[81].mxu0  ;;  %v6565_v39 = vshll.u32 %v6436_v27, 16  ;;  %6783 = vst.msk [vmem:[#allocation5 + $0x1c0] sm:$0xff] %vm6361_vm7, %v6745_v26  ;;  %v7579_v30 = vsel %vm7549_vm9, %v7576_v47, %v7578_v18 }
 0x51a   : > { %7042 = vrot.lane.b32.xlu0 %v6967_v29, %s14948_s28  ;;  %7199 = vst.msk [vmem:[#allocation5 + $0x1c8] sm:$0xff] %vm6361_vm7, %v7161_v62  ;;  %v6261_v52 = vpop.f32.mrb[82].mxu0  ;;  %v6969_v35 = vshrl.u32 %v6806_v46, 16  ;;  %v6972_v49 = vshll.u32 %v6806_v46, 16  ;;  %13477 = vmatpush3.bf16.msra.mxu1 %v14345_v9  ;;  %v14347_v44 = vld [vmem:[%s18774_s6 + $0x90] sm:$0xff]   ;;  %v7908_v2 = vld [vmem:[#allocation5 + $0x28] sm:$0xff] }
 0x51b   : > { %v13731_v13 = vadd.f32 %v16835_v55, %v6261_v52  ;;  %v6263_v59 = vpop.f32.mrb[83].mxu0  ;;  %13478 = vmatprep.subr.bf16.mxu1 %v14346_v8  ;;  %v6398_v23 = vld [vmem:[#allocation4 + $0x90] sm:$0xff]  ;;  %v6567_v51 = vrot.slane %v6565_v39, 1  ;;  %v6329_v38 = vmax.f32 %v13730_v20, 0.0  ;;  %v6563_v56 = vshrl.u32 %v6436_v27, 16  ;;  %7617 = vst.msk [vmem:[#allocation5 + $0x1d0] sm:$0xff] %vm6361_vm7, %v7579_v30 }
 0x51c   : > { %v7909_v45 = vld [vmem:[#allocation5 + $0x30] sm:$0xff]  ;;  %6414 = vst.msk [vmem:[#allocation5 + $0x1e0] sm:$0xff] %vm6361_vm7, %v6398_v23  ;;  %v16932_v31 = vrot.slane %v6969_v35, 3  ;;  %v16934_v25 = vrot.slane %v6972_v49, 4  ;;  %v14353_v52 = vld [vmem:[%s18774_s6 + $0xa8] sm:$0xff]  }
 0x51d   : > { %8366 = vmatprep.mubr.bf16.mxu1 %v7909_v45  ;;  %v6330_v11 = vmax.f32 %v13731_v13, 0.0  ;;  %v6685_v12 = vld [vmem:[#allocation4 + $0x90] sm:$0xfe]  ;;  %v6568_v17 = vor.u32 %v6567_v51, %v6563_v56 }
 0x51e   : > { %8367 = vmatmul.mubr.bf16.gmra.mrb[4].mxu1 %v7908_v2  ;;  %v7102_v21 = vld [vmem:[#allocation4 + $0x90] sm:$0xf0]  ;;  %v6746_v4 = vrot.slane %v6685_v12, 1  ;;  %v6975_v42 = vor.u32 %v16934_v25, %v16932_v31 }
 0x51f   : > { %13479 = vmatpush3.bf16.msra.mxu1 %v14347_v44  ;;  %v6357_v33 = vpack.c.bf16 %v6330_v11, %v6329_v38  ;;  %v7519_v47 = vld [vmem:[#allocation4 + $0x90] sm:$0x80]  ;;  %v7162_v63 = vrot.slane %v7102_v21, 4 }
 0x520   : > { %13480 = vmatprep.subr.bf16.mxu1 %v14348_v54  ;;  %v6266_v48 = vpop.f32.mrb[84].mxu0  ;;  %v6607_v6 = vpop.permute.xlu1 %6606  ;;  %v6437_v24 = vld [vmem:[#allocation4 + $0x98] sm:$0xff]  ;;  %v7580_v36 = vrot.slane %v7519_v47, 7  ;;  %v7204_v47 = vld [vmem:[#allocation4] sm:$0xf0] }
 0x521   : > { %v16943_v32 = vld [vmem:[#allocation4 + $0x98] sm:$0xff]  ;;  %6382 = vst.msk [vmem:[#allocation4 + $0xa0] sm:$0xff] %vm6361_vm7, %v6357_v33  ;;  %v13732_v43 = vadd.f32 %v16835_v55, %v6266_v48  ;;  %v6268_v41 = vpop.f32.mrb[85].mxu0  ;;  %v16948_v16 = vshll.u32 %v6437_v24, 16  ;;  %v16950_v22 = vshrl.u32 %v6437_v24, 16 }
 0x522   : > { %v7883_v53 = vld [vmem:[#allocation4 + $0x98] sm:$0xff]  ;;  %6653 = vst.msk [vmem:[#allocation5 + $0x50] sm:$0xff] %vm6650_vm10, %v6607_v6  ;;  %v6747_v0 = vrot.slane %v16943_v32, 1  ;;  %v6269_v14 = vpop.f32.mrb[86].mxu0  ;;  %v7163_v57 = vrot.slane %v16943_v32, 4  ;;  %v7025_v58 = vpop.permute.xlu0 %7024  ;;  %v7581_v19 = vrot.slane %v16943_v32, 7 }
 0x523   : > { %6415 = vst.msk [vmem:[#allocation5 + $0x208] sm:$0xff] %vm6361_vm7, %v16943_v32  ;;  %7899 = vst.msk [vmem:[#allocation5 + $0x200] sm:$0xff] %vm6361_vm7, %v7883_v53  ;;  %13481 = vmatpush3.bf16.msra.mxu1 %v14349_v61  ;;  %v13733_v40 = vadd.f32 %v16835_v55, %v6269_v14  ;;  %v6271_v9 = vpop.f32.mrb[87].mxu0  ;;  %v6572_v10 = vrot.slane %v16948_v16, 1  ;;  %v6979_v60 = vrot.slane %v16950_v22, 3  ;;  %v6982_v8 = vrot.slane %v16948_v16, 4 }
 0x524   : > { %13482 = vmatprep.subr.bf16.mxu1 %v14350_v5  ;;  %7070 = vst.msk [vmem:[#allocation5 + $0x58] sm:$0xff] %vm6650_vm10, %v7025_v58  ;;  %v7396_v7 = vrot.slane %v16950_v22, 4  ;;  %v7399_v29 = vrot.slane %v16948_v16, 5  ;;  %v7774_v27 = vrot.slane %v16950_v22, 7  ;;  %v6331_v46 = vmax.f32 %v13732_v43, 0.0  ;;  %v14354_v41 = vld [vmem:[%s18774_s6 + $0xf0] sm:$0xff]  }
 0x525   : > { %v6332_v26 = vmax.f32 %v13733_v40, 0.0  ;;  %v6573_v62 = vsel %vm4677_vm4, %v6568_v17, %v6572_v10  ;;  %v6748_v20 = vsel %vm6715_vm8, %v6746_v4, %v6747_v0  ;;  %v6983_v3 = vor.u32 %v6982_v8, %v6979_v60 }
 0x526   : > { %6626 = vrot.lane.b32.xlu1 %v6573_v62, %s14948_s28  ;;  %v16979_v39 = vor.u32 %v7399_v29, %v7396_v7  ;;  %v16984_v18 = vor.u32 %v7774_v27, %v16948_v16  ;;  %6784 = vst.msk [vmem:[#allocation5 + $0x1e8] sm:$0xff] %vm6361_vm7, %v6748_v20  ;;  %v7164_v49 = vsel %vm5375_vm5, %v7162_v63, %v7163_v57  ;;  %v14355_v16 = vld [vmem:[%s18774_s6 + $0xb0] sm:$0xff]   ;;  %v7230_v40 = vshrl.u32 %v7204_v47, 16 }
 0x527   : > { %13483 = vmatpush3.bf16.msra.mxu1 %v14351_v50  ;;  %v6358_v35 = vpack.c.bf16 %v6332_v26, %v6331_v46  ;;  %v7582_v44 = vsel %vm7549_vm9, %v7580_v36, %v7581_v19  ;;  %v6984_v45 = vsel %vm4982_vm6, %v6975_v42, %v6983_v3  ;;  %7200 = vst.msk [vmem:[#allocation5 + $0x1f0] sm:$0xff] %vm6361_vm7, %v7164_v49  ;;  %v17015_v42 = vld [vmem:[#allocation4 + $0x8] sm:$0xff] }
 0x528   : > { %13484 = vmatprep.subr.bf16.mxu1 %v14352_v15  ;;  %v7884_v13 = vld [vmem:[#allocation4 + $0xa0] sm:$0xff]  ;;  %v6274_v59 = vpop.f32.mrb[88].mxu0  ;;  %7618 = vst.msk [vmem:[#allocation5 + $0x1f8] sm:$0xff] %vm6361_vm7, %v7582_v44  ;;  %7044 = vrot.lane.b32.xlu0 %v6984_v45, %s14948_s28  ;;  %v6576_v5 = vor.u32 %v16950_v22, %v6572_v10  ;;  %v7233_v15 = vshll.u32 %v7204_v47, 16  ;;  %v7238_v62 = vshrl.u32 %v17015_v42, 16 }
 0x529   : > { %v6609_v54 = vpop.permute.xlu1 %6608  ;;  %v6438_v23 = vld [vmem:[#allocation4 + $0xa0] sm:$0x1]  ;;  %7900 = vst.msk [vmem:[#allocation5 + $0x228] sm:$0xff] %vm6361_vm7, %v7884_v13  ;;  %6383 = vst.msk [vmem:[#allocation4 + $0xa8] sm:$0xff] %vm6361_vm7, %v6358_v35  ;;  %v13734_v2 = vadd.f32 %v16835_v55, %v6274_v59  ;;  %v6276_v51 = vpop.f32.mrb[89].mxu0  ;;  %v7913_v48 = vld [vmem:[#allocation5 + $0x50] sm:$0xff] }
 0x52a   : > { %6654 = vst.msk [vmem:[#allocation5 + $0x78] sm:$0xff] %vm6650_vm10, %v6609_v54  ;;  %v6578_v38 = vshll.u32 %v6438_v23, 16  ;;  %v6808_v11 = vld [vmem:[#allocation4 + $0xa0] sm:$0xf]  ;;  %v6277_v12 = vpop.f32.mrb[90].mxu0  ;;  %v17028_v13 = vrot.slane %v7230_v40, 4 }
 0x52b   : > { %v6986_v30 = vshrl.u32 %v6808_v11, 16  ;;  %v6989_v56 = vshll.u32 %v6808_v11, 16  ;;  %13485 = vmatpush3.bf16.msra.mxu1 %v14353_v52  ;;  %v13735_v31 = vadd.f32 %v16835_v55, %v6277_v12  ;;  %v6279_v61 = vpop.f32.mrb[91].mxu0  ;;  %v7914_v33 = vld [vmem:[#allocation5 + $0x58] sm:$0xff]  ;;  %v6687_v17 = vld [vmem:[#allocation4 + $0xa0] sm:$0x1] }
 0x52c   : > { %v7027_v25 = vpop.permute.xlu0 %7026  ;;  %v6580_v21 = vrot.slane %v6578_v38, 1  ;;  %8374 = vmatprep.mubr.bf16.mxu1 %v7914_v33  ;;  %v6333_v4 = vmax.f32 %v13734_v2, 0.0  ;;  %v6749_v50 = vrot.slane %v6687_v17, 1  ;;  %v7104_v63 = vld [vmem:[#allocation4 + $0xa0] sm:$0xf]  ;;  %13486 = vmatprep.subr.bf16.mxu1 %v14354_v41  ;;  %v7241_v52 = vshll.u32 %v17015_v42, 16 }
 0x52d   : > { %7071 = vst.msk [vmem:[#allocation5 + $0x80] sm:$0xff] %vm6650_vm10, %v7027_v25  ;;  %v6988_v6 = vrot.slane %v6986_v30, 3  ;;  %v6991_v24 = vrot.slane %v6989_v56, 4  ;;  %v6334_v53 = vmax.f32 %v13735_v31, 0.0  ;;  %8375 = vmatmul.mubr.bf16.gmra.mrb[8].mxu1 %v7913_v48  ;;  %v7521_v58 = vld [vmem:[#allocation4 + $0xa0] sm:$0x7f] }
 0x52e   : > { %v6581_v43 = vsel %vm4677_vm4, %v6576_v5, %v6580_v21  ;;  %v6750_v8 = vsel %vm6715_vm8, %v6747_v0, %v6749_v50  ;;  %v7165_v20 = vrot.slane %v7104_v63, 4  ;;  %v7583_v35 = vrot.slane %v7521_v58, 7  ;;  %v17030_v59 = vld [vmem:[#allocation4 + $0x10] sm:$0x1f] }
 0x52f   : > { %6628 = vrot.lane.b32.xlu1 %v6581_v43, %s14948_s28  ;;  %v6992_v14 = vor.u32 %v6991_v24, %v6988_v6  ;;  %v6359_v36 = vpack.c.bf16 %v6334_v53, %v6333_v4  ;;  %13487 = vmatpush3.bf16.msra.mxu1 %v14355_v16  ;;  %6785 = vst.msk [vmem:[#allocation5 + $0x210] sm:$0xff] %vm6361_vm7, %v6750_v8  ;;  %v17032_v38 = vrot.slane %v7233_v15, 5  ;;  %v17044_v31 = vrot.slane %v7241_v52, 5 }
 0x530   : > { %v6282_v9 = vpop.f32.mrb[92].mxu0  ;;  %v6439_v60 = vld [vmem:[#allocation4 + $0xa8] sm:$0xff]  ;;  %v7166_v30 = vsel %vm5375_vm5, %v7163_v57, %v7165_v20  ;;  %v7247_v25 = vshrl.u32 %v17030_v59, 16  ;;  %v7584_v61 = vsel %vm7549_vm9, %v7581_v19, %v7583_v35  ;;  %v7250_v4 = vshll.u32 %v17030_v59, 16  ;;  %v14356_v35 = vld [vmem:[%s18774_s6 + $0xf8] sm:$0xff]  }
 0x531   : > { %v6993_v10 = vsel %vm4982_vm6, %v6983_v3, %v6992_v14  ;;  %6384 = vst.msk [vmem:[#allocation4 + $0xb0] sm:$0xff] %vm6361_vm7, %v6359_v36  ;;  %v13736_v7 = vadd.f32 %v16835_v55, %v6282_v9  ;;  %v6284_v29 = vpop.f32.mrb[93].mxu0  ;;  %v6585_v46 = vshll.u32 %v6439_v60, 16  ;;  %v6809_v26 = vld [vmem:[#allocation4 + $0xa8] sm:$0xf8]  ;;  %v7918_v54 = vld [vmem:[#allocation5 + $0x78] sm:$0xff]  ;;  %13488 = vmatprep.subr.bf16.mxu1 %v14356_v35 }
 0x532   : > { %7046 = vrot.lane.b32.xlu0 %v6993_v10, %s14948_s28  ;;  %v6285_v3 = vpop.f32.mrb[94].mxu0  ;;  %v6400_v45 = vld [vmem:[#allocation4 + $0xa8] sm:$0xff]  ;;  %v6995_v2 = vshrl.u32 %v6809_v26, 16  ;;  %v6998_v51 = vshll.u32 %v6809_v26, 16  ;;  %v6583_v56 = vshrl.u32 %v6439_v60, 16  ;;  %7201 = vst.msk [vmem:[#allocation5 + $0x218] sm:$0xff] %vm6361_vm7, %v7166_v30 }
 0x533   : > { %v13737_v0 = vadd.f32 %v16835_v55, %v6285_v3  ;;  %v6287_v49 = vpop.f32.mrb[95].mxu0  ;;  %v6587_v23 = vrot.slane %v6585_v46, 1  ;;  %6416 = vst.msk [vmem:[#allocation5 + $0x230] sm:$0xff] %vm6361_vm7, %v6400_v45  ;;  %v6335_v11 = vmax.f32 %v13736_v7, 0.0  ;;  %v17037_v55 = vrot.slane %v7238_v62, 4  ;;  %7619 = vst.msk [vmem:[#allocation5 + $0x220] sm:$0xff] %vm6361_vm7, %v7584_v61 }
 0x534   : > { %v7919_v44 = vld [vmem:[#allocation5 + $0x80] sm:$0xff]  ;;  %v6688_v5 = vld [vmem:[#allocation4 + $0xa8] sm:$0xfe]  ;;  %v6997_v24 = vrot.slane %v6995_v2, 3  ;;  %v7000_v17 = vrot.slane %v6998_v51, 4  ;;  %v17081_v3 = vld [vmem:[#allocation4 + $0x10] sm:$0xff] }
 0x535   : > { %8382 = vmatprep.mubr.bf16.mxu1 %v7919_v44  ;;  %v6336_v12 = vmax.f32 %v13737_v0, 0.0  ;;  %v7105_v21 = vld [vmem:[#allocation4 + $0xa8] sm:$0xf0]  ;;  %v6588_v6 = vor.u32 %v6587_v23, %v6583_v56  ;;  %v6751_v16 = vrot.slane %v6688_v5, 1  ;;  %v17069_v60 = vld [vmem:[#allocation4] sm:$0x80]  ;;  %v17121_v5 = vor.u32 %v17044_v31, %v17037_v55 }
 0x536   : > { %8383 = vmatmul.mubr.bf16.gmra.mrb[12].mxu1 %v7918_v54  ;;  %v7522_v47 = vld [vmem:[#allocation4 + $0xa8] sm:$0x80]  ;;  %v7167_v14 = vrot.slane %v7105_v21, 4  ;;  %v7001_v26 = vor.u32 %v7000_v17, %v6997_v24  ;;  %v14357_v0 = vld [vmem:[%s18774_s6 + $0xb8] sm:$0xff]   ;;  %v7648_v54 = vshrl.u32 %v17069_v60, 16  ;;  %v17107_v23 = vrot.slane %v7238_v62, 7 }
 0x537   : > { %v6360_v33 = vpack.c.bf16 %v6336_v12, %v6335_v11  ;;  %v7585_v50 = vrot.slane %v7522_v47, 7  ;;  %v17110_v12 = vrot.slane %v7247_v25, 4  ;;  %v17112_v30 = vrot.slane %v7250_v4, 5  ;;  %13489 = vmatpush3.bf16.msra.mxu1 %v14357_v0  ;;  %v7207_v25 = vld [vmem:[#allocation4 + $0x18] sm:$0xf0] }
 0x538   : > { %v6611_v57 = vpop.permute.xlu1 %6610  ;;  %v6440_v48 = vld [vmem:[#allocation4 + $0xb0] sm:$0xff]  ;;  %v7660_v56 = vshrl.u32 %v17081_v3, 16 }
 0x539   : > { %v17053_v53 = vld [vmem:[#allocation4 + $0xb0] sm:$0xff]  ;;  %6385 = vst.msk [vmem:[#allocation4 + $0xb8] sm:$0xff] %vm6361_vm7, %v6360_v33  ;;  %v6590_v32 = vshll.u32 %v6440_v48, 16  ;;  %v17057_v19 = vshrl.u32 %v6440_v48, 16  ;;  %v7236_v33 = vor.u32 %v17032_v38, %v17028_v13 }
 0x53a   : > { %6655 = vst.msk [vmem:[#allocation5 + $0xa0] sm:$0xff] %vm6650_vm10, %v6611_v57  ;;  %v6752_v43 = vrot.slane %v17053_v53, 1  ;;  %v7168_v41 = vrot.slane %v17053_v53, 4  ;;  %v7586_v63 = vrot.slane %v17053_v53, 7  ;;  %v7029_v36 = vpop.permute.xlu0 %7028  ;;  %v7662_v0 = vrot.slane %v7660_v56, 7 }
 0x53b   : > { %6417 = vst.msk [vmem:[#allocation5 + $0x258] sm:$0xff] %vm6361_vm7, %v17053_v53  ;;  %7901 = vst.msk [vmem:[#allocation5 + $0x250] sm:$0xff] %vm6361_vm7, %v17053_v53  ;;  %v6592_v40 = vrot.slane %v6590_v32, 1  ;;  %v7005_v58 = vrot.slane %v17057_v19, 3  ;;  %v7008_v9 = vrot.slane %v6590_v32, 4  ;;  %v7422_v10 = vrot.slane %v17057_v19, 4 }
 0x53c   : > { %7072 = vst.msk [vmem:[#allocation5 + $0xa8] sm:$0xff] %vm6650_vm10, %v7029_v36  ;;  %v7425_v15 = vrot.slane %v6590_v32, 5  ;;  %v7794_v8 = vrot.slane %v17057_v19, 7  ;;  %v6753_v7 = vsel %vm6715_vm8, %v6751_v16, %v6752_v43  ;;  %v7169_v29 = vsel %vm5375_vm5, %v7167_v14, %v7168_v41 }
 0x53d   : > { %v6593_v46 = vsel %vm4677_vm4, %v6588_v6, %v6592_v40  ;;  %v17079_v20 = vor.u32 %v7008_v9, %v7005_v58  ;;  %6786 = vst.msk [vmem:[#allocation5 + $0x238] sm:$0xff] %vm6361_vm7, %v6753_v7  ;;  %7202 = vst.msk [vmem:[#allocation5 + $0x240] sm:$0xff] %vm6361_vm7, %v7169_v29  ;;  %v7587_v49 = vsel %vm7549_vm9, %v7585_v50, %v7586_v63  ;;  %v17124_v6 = vld [vmem:[#allocation4 + $0x20] sm:$0xff] }
 0x53e   : > { %6630 = vrot.lane.b32.xlu1 %v6593_v46, %s14948_s28  ;;  %v17095_v44 = vor.u32 %v7425_v15, %v7422_v10  ;;  %v17099_v59 = vor.u32 %v7794_v8, %v6590_v32  ;;  %7620 = vst.msk [vmem:[#allocation5 + $0x248] sm:$0xff] %vm6361_vm7, %v7587_v49  ;;  %v6596_v47 = vor.u32 %v17057_v19, %v6592_v40  ;;  %v7264_v24 = vshrl.u32 %v17124_v6, 16 }
 0x53f   : > { %v7010_v45 = vsel %vm4982_vm6, %v7001_v26, %v17079_v20  ;;  %v7657_v36 = vor.u32 %v17107_v23, %v7241_v52  ;;  %v7267_v40 = vshll.u32 %v17124_v6, 16  ;;  %v7245_v42 = vsel %vm7228_vm11, %v7236_v33, %v17121_v5  ;;  %v7209_v26 = vld [vmem:[#allocation4 + $0x28] sm:$0x1f]  ;;  %v14937_v6 = vld [vmem:[#allocation4 + $0x38] sm:$0xff] }
 0x540   : > { %v7886_v2 = vld [vmem:[#allocation4 + $0xb8] sm:$0xff]  ;;  %7048 = vrot.lane.b32.xlu0 %v7010_v45, %s14948_s28  ;;  %v7256_v52 = vshrl.u32 %v7207_v25, 16  ;;  %v7259_v49 = vshll.u32 %v7207_v25, 16  ;;  %v7674_v25 = vrot.slane %v7264_v24, 7 }
 0x541   : > { %v6613_v51 = vpop.permute.xlu1 %6612  ;;  %v6441_v11 = vld [vmem:[#allocation4 + $0xb8] sm:$0x1]  ;;  %7902 = vst.msk [vmem:[#allocation5 + $0x278] sm:$0xff] %vm6361_vm7, %v7886_v2  ;;  %v7800_v21 = vshrl.u32 %v7886_v2, 16  ;;  %v7803_v13 = vshll.u32 %v7886_v2, 16  ;;  %v7923_v55 = vld [vmem:[#allocation5 + $0xa0] sm:$0xff] }
 0x542   : > { %6656 = vst.msk [vmem:[#allocation5 + $0xc8] sm:$0xff] %vm6650_vm10, %v6613_v51  ;;  %v6598_v61 = vshll.u32 %v6441_v11, 16  ;;  %v6811_v62 = vld [vmem:[#allocation4 + $0xb8] sm:$0xf]  ;;  %v7253_v51 = vor.u32 %v17112_v30, %v17110_v12  ;;  %v7663_v11 = vshll.u32 %v17081_v3, 16  ;;  %v7269_v56 = vrot.slane %v7267_v40, 5 }
 0x543   : > { %v7012_v57 = vshrl.u32 %v6811_v62, 16  ;;  %v7015_v48 = vshll.u32 %v6811_v62, 16  ;;  %v6690_v17 = vld [vmem:[#allocation4 + $0xb8] sm:$0x1]  ;;  %v7924_v32 = vld [vmem:[#allocation5 + $0xa8] sm:$0xff]  ;;  %v7802_v14 = vrot.slane %v7800_v21, 7 }
 0x544   : > { %v7031_v4 = vpop.permute.xlu0 %7030  ;;  %v6600_v16 = vrot.slane %v6598_v61, 1  ;;  %v6754_v38 = vrot.slane %v6690_v17, 1  ;;  %8390 = vmatprep.mubr.bf16.mxu1 %v7924_v32  ;;  %v7107_v58 = vld [vmem:[#allocation4 + $0xb8] sm:$0xf]  ;;  %v7627_v61 = vld [vmem:[#allocation4 + $0x28] sm:$0xff]  ;;  %v7276_v62 = vshll.u32 %v7209_v26, 16  ;;  %v7665_v33 = vor.u32 %v7663_v11, %v7662_v0 }
 0x545   : > { %7073 = vst.msk [vmem:[#allocation5 + $0xd0] sm:$0xff] %vm6650_vm10, %v7031_v4  ;;  %v7014_v31 = vrot.slane %v7012_v57, 3  ;;  %v7017_v50 = vrot.slane %v7015_v48, 4  ;;  %8391 = vmatmul.mubr.bf16.gmra.mrb[16].mxu1 %v7923_v55  ;;  %v7805_v10 = vor.u32 %v7803_v13, %v7802_v14  ;;  %v7170_v7 = vrot.slane %v7107_v58, 4  ;;  %v7524_v29 = vld [vmem:[#allocation4 + $0xb8] sm:$0x7f] }
 0x546   : > { %v6601_v9 = vsel %vm4677_vm4, %v6596_v47, %v6600_v16  ;;  %v6755_v15 = vsel %vm6715_vm8, %v6752_v43, %v6754_v38  ;;  %v7588_v35 = vrot.slane %v7524_v29, 7  ;;  %v7258_v3 = vrot.slane %v7256_v52, 4  ;;  %v7625_v12 = vld [vmem:[#allocation4 + $0x18] sm:$0x80]  ;;  %v7210_v21 = vld [vmem:[#allocation4 + $0x30] sm:$0xf0] }
 0x547   : > { %6632 = vrot.lane.b32.xlu1 %v6601_v9, %s14948_s28  ;;  %v7018_v46 = vor.u32 %v7017_v50, %v7014_v31  ;;  %6787 = vst.msk [vmem:[#allocation5 + $0x260] sm:$0xff] %vm6361_vm7, %v6755_v15  ;;  %v17143_v45 = vsel %vm7646_vm12, %v7794_v8, %v7805_v10  ;;  %v7171_v43 = vsel %vm5375_vm5, %v7168_v41, %v7170_v7  ;;  %v7266_v8 = vrot.slane %v7264_v24, 4  ;;  %v7212_v24 = vld [vmem:[#allocation4 + $0x40] sm:$0x1f] }
 0x548   : > { %7203 = vst.msk [vmem:[#allocation5 + $0x268] sm:$0xff] %vm6361_vm7, %v7171_v43  ;;  %v7589_v19 = vsel %vm7549_vm9, %v7586_v63, %v7588_v35  ;;  %v7273_v41 = vshrl.u32 %v7209_v26, 16  ;;  %v7261_v53 = vrot.slane %v7259_v49, 5  ;;  %v7680_v63 = vshrl.u32 %v7627_v61, 16  ;;  %v17169_v14 = vld [vmem:[%s18774_s6 + $0x100] sm:$0xff]  }
 0x549   : > { %v7019_v2 = vsel %vm4982_vm6, %v17079_v20, %v7018_v46  ;;  %7621 = vst.msk [vmem:[#allocation5 + $0x270] sm:$0xff] %vm6361_vm7, %v7589_v19  ;;  %v7650_v20 = vrot.slane %v7648_v54, 7  ;;  %v7928_v57 = vld [vmem:[#allocation5 + $0xc8] sm:$0xff]  ;;  %v7254_v48 = vsel %vm7228_vm11, %v17121_v5, %v7253_v51  ;;  %v7290_v17 = vshrl.u32 %v14937_v6, 16  ;;  %13650 = vmatprep.subr.bf16.mxu1 %v17169_v14  ;;  %v7630_v7 = vld [vmem:[#allocation4 + $0x40] sm:$0xff] }
 0x54a   : > { %7050 = vrot.lane.b32.xlu0 %v7019_v2, %s14948_s28  ;;  %v7293_v4 = vshll.u32 %v14937_v6, 16  ;;  %v7270_v60 = vor.u32 %v7269_v56, %v7266_v8  ;;  %v7668_v54 = vshrl.u32 %v7625_v12, 16  ;;  %v7275_v32 = vrot.slane %v7273_v41, 4  ;;  %v7628_v49 = vld [vmem:[#allocation4 + $0x30] sm:$0x80]  ;;  %v7633_v6 = vld [vmem:[#allocation4 + $0x58] sm:$0xff] }
 0x54b   : > { %7437 = vrot.lane.b32.xlu1 %v7245_v42, %s14948_s28  ;;  %v7658_v47 = vsel %vm7646_vm12, %v7650_v20, %v7657_v36  ;;  %v7278_v16 = vrot.slane %v7276_v62, 5  ;;  %v7282_v13 = vshrl.u32 %v7210_v21, 16  ;;  %v7285_v5 = vshll.u32 %v7210_v21, 16  ;;  %v7213_v2 = vld [vmem:[#allocation4 + $0x48] sm:$0xf0] }
 0x54c   : > { %v7929_v30 = vld [vmem:[#allocation5 + $0xd0] sm:$0xff]  ;;  %v7666_v38 = vsel %vm7646_vm12, %v17107_v23, %v7665_v33  ;;  %v7262_v55 = vor.u32 %v7261_v53, %v7258_v3  ;;  %v7677_v31 = vor.u32 %v7674_v25, %v7267_v40  ;;  %v7682_v50 = vrot.slane %v7680_v63, 7  ;;  %v7215_v12 = vld [vmem:[#allocation4 + $0x58] sm:$0x1f] }
 0x54d   : > { %8398 = vmatprep.mubr.bf16.mxu1 %v7929_v30  ;;  %v7292_v58 = vrot.slane %v7290_v17, 4  ;;  %v7295_v9 = vrot.slane %v7293_v4, 5  ;;  %v7299_v10 = vshrl.u32 %v7212_v24, 16  ;;  %v7302_v15 = vshll.u32 %v7212_v24, 16 }
 0x54e   : > { %7807 = vrot.lane.b32.xlu0 %v7658_v47, %s14948_s28  ;;  %8399 = vmatmul.mubr.bf16.gmra.mrb[20].mxu1 %v7928_v57  ;;  %v7271_v29 = vsel %vm7228_vm11, %v7262_v55, %v7270_v60  ;;  %v7670_v46 = vrot.slane %v7668_v54, 7  ;;  %v7279_v42 = vor.u32 %v7278_v16, %v7275_v32  ;;  %v7683_v23 = vshll.u32 %v7627_v61, 16  ;;  %v7631_v16 = vld [vmem:[#allocation4 + $0x48] sm:$0x80] }
 0x54f   : > { %7439 = vrot.lane.b32.xlu1 %v7254_v48, %s14948_s28  ;;  %v7284_v40 = vrot.slane %v7282_v13, 4  ;;  %v7287_v52 = vrot.slane %v7285_v5, 5  ;;  %v7700_v43 = vshrl.u32 %v7630_v7, 16  ;;  %v7296_v51 = vor.u32 %v7295_v9, %v7292_v58 }
 0x550   : > { %v6615_v36 = vpop.permute.xlu1 %6614  ;;  %v7678_v35 = vsel %vm7646_vm12, %v7670_v46, %v7677_v31  ;;  %v7685_v0 = vor.u32 %v7683_v23, %v7682_v50  ;;  %v7694_v11 = vrot.slane %v7290_v17, 7  ;;  %v7301_v19 = vrot.slane %v7299_v10, 4  ;;  %v7216_v31 = vld [vmem:[#allocation4 + $0x60] sm:$0xf0] }
 0x551   : > { %6657 = vst.msk [vmem:[#allocation5 + $0xf0] sm:$0xff] %vm6650_vm10, %v6615_v36  ;;  %v7304_v8 = vrot.slane %v7302_v15, 5  ;;  %v7280_v61 = vsel %vm7228_vm11, %v7270_v60, %v7279_v42  ;;  %v7316_v56 = vshrl.u32 %v16756_v37, 16  ;;  %v7319_v41 = vshll.u32 %v16756_v37, 16  ;;  %v7218_v42 = vld [vmem:[#allocation4 + $0x70] sm:$0x1f] }
 0x552   : > { %7809 = vrot.lane.b32.xlu0 %v7666_v38, %s14948_s28  ;;  %v7288_v62 = vor.u32 %v7287_v52, %v7284_v40  ;;  %v7688_v20 = vshrl.u32 %v7628_v49, 16  ;;  %v7308_v3 = vshrl.u32 %v7213_v2, 16  ;;  %v7686_v30 = vsel %vm7646_vm12, %v7674_v25, %v7685_v0 }
 0x553   : > { %7441 = vrot.lane.b32.xlu1 %v7271_v29, %s14948_s28  ;;  %v7033_v26 = vpop.permute.xlu0 %7032  ;;  %v7702_v33 = vrot.slane %v7700_v43, 7  ;;  %v7311_v53 = vshll.u32 %v7213_v2, 16  ;;  %v7697_v47 = vor.u32 %v7694_v11, %v7293_v4  ;;  %v7305_v57 = vor.u32 %v7304_v8, %v7301_v19 }
 0x554   : > { %7074 = vst.msk [vmem:[#allocation5 + $0xf8] sm:$0xff] %vm6650_vm10, %v7033_v26  ;;  %v7297_v21 = vsel %vm7228_vm11, %v7288_v62, %v7296_v51  ;;  %v7703_v48 = vshll.u32 %v7630_v7, 16  ;;  %v7318_v37 = vrot.slane %v7316_v56, 4  ;;  %v7321_v17 = vrot.slane %v7319_v41, 5 }
 0x555   : > { %v7325_v60 = vshrl.u32 %v7215_v12, 16  ;;  %v7328_v54 = vshll.u32 %v7215_v12, 16  ;;  %v7690_v25 = vrot.slane %v7688_v20, 7  ;;  %v7310_v32 = vrot.slane %v7308_v3, 4  ;;  %v7634_v12 = vld [vmem:[#allocation4 + $0x60] sm:$0x80] }
 0x556   : > { %7811 = vrot.lane.b32.xlu0 %v7678_v35, %s14948_s28  ;;  %v7705_v5 = vor.u32 %v7703_v48, %v7702_v33  ;;  %v7313_v4 = vrot.slane %v7311_v53, 5  ;;  %v7714_v38 = vrot.slane %v7316_v56, 7  ;;  %v7720_v55 = vshrl.u32 %v7633_v6, 16  ;;  %v7636_v56 = vld [vmem:[#allocation4 + $0x70] sm:$0xff] }
 0x557   : > { %7443 = vrot.lane.b32.xlu1 %v7280_v61, %s14948_s28  ;;  %v7698_v50 = vsel %vm7646_vm12, %v7690_v25, %v7697_v47  ;;  %v7306_v58 = vsel %vm7228_vm11, %v7296_v51, %v7305_v57  ;;  %v7342_v9 = vshrl.u32 %v16804_v34, 16  ;;  %v7345_v10 = vshll.u32 %v16804_v34, 16  ;;  %v7219_v57 = vld [vmem:[#allocation4 + $0x78] sm:$0xf0] }
 0x558   : > { %v7933_v36 = vld [vmem:[#allocation5 + $0xf0] sm:$0xff]  ;;  %v7322_v15 = vor.u32 %v7321_v17, %v7318_v37  ;;  %v7708_v7 = vshrl.u32 %v7631_v16, 16  ;;  %v7327_v29 = vrot.slane %v7325_v60, 4  ;;  %v7330_v46 = vrot.slane %v7328_v54, 5  ;;  %v7221_v54 = vld [vmem:[#allocation4 + $0x88] sm:$0x1f] }
 0x559   : > { %v6617_v63 = vpop.permute.xlu1 %6616  ;;  %v7334_v23 = vshrl.u32 %v7216_v31, 16  ;;  %v7337_v40 = vshll.u32 %v7216_v31, 16  ;;  %v7706_v52 = vsel %vm7646_vm12, %v7694_v11, %v7705_v5  ;;  %v7314_v26 = vor.u32 %v7313_v4, %v7310_v32 }
 0x55a   : > { %7813 = vrot.lane.b32.xlu0 %v7686_v30, %s14948_s28  ;;  %6658 = vst.msk [vmem:[#allocation5 + $0x118] sm:$0xff] %vm6650_vm10, %v6617_v63  ;;  %v7717_v35 = vor.u32 %v7714_v38, %v7319_v41  ;;  %v7722_v0 = vrot.slane %v7720_v55, 7  ;;  %v7344_v49 = vrot.slane %v7342_v9, 4  ;;  %v7347_v43 = vrot.slane %v7345_v10, 5 }
 0x55b   : > { %7445 = vrot.lane.b32.xlu1 %v7297_v21, %s14948_s28  ;;  %v7934_v13 = vld [vmem:[#allocation5 + $0xf8] sm:$0xff]  ;;  %v7351_v34 = vshrl.u32 %v7218_v42, 16  ;;  %v7354_v2 = vshll.u32 %v7218_v42, 16  ;;  %v7323_v51 = vsel %vm7228_vm11, %v7314_v26, %v7322_v15  ;;  %v7710_v19 = vrot.slane %v7708_v7, 7 }
 0x55c   : > { %v7035_v24 = vpop.permute.xlu0 %7034  ;;  %8406 = vmatprep.mubr.bf16.mxu1 %v7934_v13  ;;  %v7331_v8 = vor.u32 %v7330_v46, %v7327_v29  ;;  %v7723_v61 = vshll.u32 %v7633_v6, 16  ;;  %v7336_v62 = vrot.slane %v7334_v23, 4  ;;  %v7339_v20 = vrot.slane %v7337_v40, 5  ;;  %v7637_v46 = vld [vmem:[#allocation4 + $0x78] sm:$0x80] }
 0x55d   : > { %7075 = vst.msk [vmem:[#allocation5 + $0x120] sm:$0xff] %vm6650_vm10, %v7035_v24  ;;  %8407 = vmatmul.mubr.bf16.gmra.mrb[24].mxu1 %v7933_v36  ;;  %v7718_v41 = vsel %vm7646_vm12, %v7710_v19, %v7717_v35  ;;  %v7734_v30 = vrot.slane %v7342_v9, 7  ;;  %v7348_v53 = vor.u32 %v7347_v43, %v7344_v49  ;;  %v7353_v63 = vrot.slane %v7351_v34, 4  ;;  %v7224_v34 = vld [vmem:[#allocation4 + $0xa0] sm:$0x1f] }
 0x55e   : > { %7815 = vrot.lane.b32.xlu0 %v7698_v50, %s14948_s28  ;;  %v7725_v3 = vor.u32 %v7723_v61, %v7722_v0  ;;  %v7356_v21 = vrot.slane %v7354_v2, 5  ;;  %v7740_v47 = vshrl.u32 %v7636_v56, 16  ;;  %v7332_v48 = vsel %vm7228_vm11, %v7322_v15, %v7331_v8 }
 0x55f   : > { %7447 = vrot.lane.b32.xlu1 %v7306_v58, %s14948_s28  ;;  %v7368_v6 = vshrl.u32 %v16858_v28, 16  ;;  %v7371_v37 = vshll.u32 %v16858_v28, 16  ;;  %v7340_v17 = vor.u32 %v7339_v20, %v7336_v62  ;;  %v7728_v60 = vshrl.u32 %v7634_v12, 16  ;;  %v7639_v58 = vld [vmem:[#allocation4 + $0x88] sm:$0xff]  ;;  %v7642_v12 = vld [vmem:[#allocation4 + $0xa0] sm:$0xff] }
 0x560   : > { %v7726_v25 = vsel %vm7646_vm12, %v7714_v38, %v7725_v3  ;;  %v7360_v32 = vshrl.u32 %v7219_v57, 16  ;;  %v7363_v16 = vshll.u32 %v7219_v57, 16  ;;  %v7737_v5 = vor.u32 %v7734_v30, %v7345_v10  ;;  %v7640_v57 = vld [vmem:[#allocation4 + $0x90] sm:$0x80] }
 0x561   : > { %v7938_v33 = vld [vmem:[#allocation5 + $0x118] sm:$0xff]  ;;  %v7349_v13 = vsel %vm7228_vm11, %v7340_v17, %v7348_v53  ;;  %v7357_v4 = vor.u32 %v7356_v21, %v7353_v63  ;;  %v7742_v55 = vrot.slane %v7740_v47, 7  ;;  %v7370_v28 = vrot.slane %v7368_v6, 4 }
 0x562   : > { %7817 = vrot.lane.b32.xlu0 %v7706_v52, %s14948_s28  ;;  %v7373_v31 = vrot.slane %v7371_v37, 5  ;;  %v7377_v50 = vshrl.u32 %v7221_v54, 16  ;;  %v7380_v36 = vshll.u32 %v7221_v54, 16  ;;  %v7730_v38 = vrot.slane %v7728_v60, 7  ;;  %v7222_v52 = vld [vmem:[#allocation4 + $0x90] sm:$0xf0] }
 0x563   : > { %7449 = vrot.lane.b32.xlu1 %v7323_v51, %s14948_s28  ;;  %v7743_v9 = vshll.u32 %v7636_v56, 16  ;;  %v7362_v7 = vrot.slane %v7360_v32, 4  ;;  %v7365_v29 = vrot.slane %v7363_v16, 5  ;;  %v7754_v23 = vrot.slane %v7368_v6, 7  ;;  %v7225_v60 = vld [vmem:[#allocation4 + $0xa8] sm:$0xf0] }
 0x564   : > { %v7939_v11 = vld [vmem:[#allocation5 + $0x120] sm:$0xff]  ;;  %v7738_v10 = vsel %vm7646_vm12, %v7730_v38, %v7737_v5  ;;  %v7760_v40 = vshrl.u32 %v7639_v58, 16  ;;  %v7358_v26 = vsel %vm7228_vm11, %v7348_v53, %v7357_v4  ;;  %v7374_v35 = vor.u32 %v7373_v31, %v7370_v28 }
 0x565   : > { %8414 = vmatprep.mubr.bf16.mxu1 %v7939_v11  ;;  %v7745_v42 = vor.u32 %v7743_v9, %v7742_v55  ;;  %v7379_v0 = vrot.slane %v7377_v50, 4  ;;  %v7382_v49 = vrot.slane %v7380_v36, 5  ;;  %v7748_v43 = vshrl.u32 %v7637_v46, 16  ;;  %v7643_v46 = vld [vmem:[#allocation4 + $0xa8] sm:$0x80] }
 0x566   : > { %7819 = vrot.lane.b32.xlu0 %v7718_v41, %s14948_s28  ;;  %8415 = vmatmul.mubr.bf16.gmra.mrb[28].mxu1 %v7938_v33  ;;  %v7366_v2 = vor.u32 %v7365_v29, %v7362_v7  ;;  %v7386_v51 = vshrl.u32 %v7222_v52, 16  ;;  %v7389_v19 = vshll.u32 %v7222_v52, 16  ;;  %v7757_v56 = vor.u32 %v7754_v23, %v7371_v37 }
 0x567   : > { %7451 = vrot.lane.b32.xlu1 %v7332_v48, %s14948_s28  ;;  %v7746_v8 = vsel %vm7646_vm12, %v7734_v30, %v7745_v42  ;;  %v7762_v62 = vrot.slane %v7760_v40, 7  ;;  %v7383_v11 = vor.u32 %v7382_v49, %v7379_v0  ;;  %v7403_v41 = vshrl.u32 %v7224_v34, 16 }
 0x568   : > { %v6619_v24 = vpop.permute.xlu1 %6618  ;;  %v7375_v20 = vsel %vm7228_vm11, %v7366_v2, %v7374_v35  ;;  %v7406_v3 = vshll.u32 %v7224_v34, 16  ;;  %v7750_v33 = vrot.slane %v7748_v43, 7  ;;  %v7763_v53 = vshll.u32 %v7639_v58, 16 }
 0x569   : > { %6659 = vst.msk [vmem:[#allocation5 + $0x140] sm:$0xff] %vm6650_vm10, %v6619_v24  ;;  %v7388_v30 = vrot.slane %v7386_v51, 4  ;;  %v7391_v47 = vrot.slane %v7389_v19, 5  ;;  %v7780_v17 = vshrl.u32 %v7642_v12, 16  ;;  %v7384_v54 = vsel %vm7228_vm11, %v7374_v35, %v7383_v11  ;;  %v7227_v24 = vld [vmem:[#allocation4 + $0xb8] sm:$0x1f] }
 0x56a   : > { %7821 = vrot.lane.b32.xlu0 %v7726_v25, %s14948_s28  ;;  %v7037_v15 = vpop.permute.xlu0 %7036  ;;  %v7758_v48 = vsel %vm7646_vm12, %v7750_v33, %v7757_v56  ;;  %v7765_v37 = vor.u32 %v7763_v53, %v7762_v62  ;;  %v7405_v25 = vrot.slane %v7403_v41, 4  ;;  %v7408_v32 = vrot.slane %v7406_v3, 5 }
 0x56b   : > { %7453 = vrot.lane.b32.xlu1 %v7349_v13, %s14948_s28  ;;  %7076 = vst.msk [vmem:[#allocation5 + $0x148] sm:$0xff] %vm6650_vm10, %v7037_v15  ;;  %v7768_v16 = vshrl.u32 %v7640_v57, 16  ;;  %v7392_v13 = vor.u32 %v7391_v47, %v7388_v30  ;;  %v7412_v5 = vshrl.u32 %v7225_v60, 16  ;;  %v7415_v4 = vshll.u32 %v7225_v60, 16 }
 0x56c   : > { %v7766_v55 = vsel %vm7646_vm12, %v7754_v23, %v7765_v37  ;;  %v7782_v28 = vrot.slane %v7780_v17, 7  ;;  %v7409_v50 = vor.u32 %v7408_v32, %v7405_v25  ;;  %v7429_v36 = vshrl.u32 %v7227_v24, 16 }
 0x56d   : > { %v7401_v31 = vsel %vm7228_vm11, %v7392_v13, %v16979_v39  ;;  %v7432_v58 = vshll.u32 %v7227_v24, 16  ;;  %v7770_v38 = vrot.slane %v7768_v16, 7  ;;  %v7783_v9 = vshll.u32 %v7642_v12, 16  ;;  %v14359_v13 = vld [vmem:[%s18774_s6 + $0x108] sm:$0xff]  }
 0x56e   : > { %7823 = vrot.lane.b32.xlu0 %v7738_v10, %s14948_s28  ;;  %v7414_v7 = vrot.slane %v7412_v5, 4  ;;  %v7417_v29 = vrot.slane %v7415_v4, 5  ;;  %v7410_v40 = vsel %vm7228_vm11, %v16979_v39, %v7409_v50  ;;  %v7431_v52 = vrot.slane %v7429_v36, 4 }
 0x56f   : > { %7455 = vrot.lane.b32.xlu1 %v7358_v26, %s14948_s28  ;;  %v7778_v10 = vsel %vm7646_vm12, %v7770_v38, %v16984_v18  ;;  %v7785_v23 = vor.u32 %v7783_v9, %v7782_v28  ;;  %v7434_v26 = vrot.slane %v7432_v58, 5  ;;  %v7788_v35 = vshrl.u32 %v7643_v46, 16  ;;  %v14361_v58 = vld [vmem:[%s18774_s6 + $0x118] sm:$0xff]  }
 0x570   : > { %v7943_v6 = vld [vmem:[#allocation5 + $0x140] sm:$0xff]  ;;  %v7418_v0 = vor.u32 %v7417_v29, %v7414_v7  ;;  %vm8932_vm4 = vcmask 1047559   ;;  %vm8936_vm5 = vcmask 519168   ;;  %vm8996_vm6 = vcmask 1043968  }
 0x571   : > { %v6621_v61 = vpop.permute.xlu1 %6620  ;;  %v7786_v49 = vsel %vm7646_vm12, %v7774_v27, %v7785_v23  ;;  %v7435_v34 = vor.u32 %v7434_v26, %v7431_v52  ;;  %v7790_v39 = vrot.slane %v7788_v35, 7 }
 0x572   : > { %7825 = vrot.lane.b32.xlu0 %v7746_v8, %s14948_s28  ;;  %6660 = vst.msk [vmem:[#allocation5 + $0x168] sm:$0xff] %vm6650_vm10, %v6621_v61  ;;  %v7944_v21 = vld [vmem:[#allocation5 + $0x148] sm:$0xff]  ;;  %v7427_v18 = vsel %vm7228_vm11, %v7418_v0, %v17095_v44 }
 0x573   : > { %7457 = vrot.lane.b32.xlu1 %v7375_v20, %s14948_s28  ;;  %8422 = vmatprep.mubr.bf16.mxu1 %v7944_v21  ;;  %v7798_v22 = vsel %vm7646_vm12, %v7790_v39, %v17099_v59  ;;  %v7436_v27 = vsel %vm7228_vm11, %v17095_v44, %v7435_v34 }
 0x574   : > { %v7039_v63 = vpop.permute.xlu0 %7038  ;;  %8423 = vmatmul.mubr.bf16.gmra.mrb[32].mxu1 %v7943_v6 }
 0x575   : > { %7077 = vst.msk [vmem:[#allocation5 + $0x170] sm:$0xff] %vm6650_vm10, %v7039_v63 }
 0x576   : > { %7827 = vrot.lane.b32.xlu0 %v7758_v48, %s14948_s28 }
 0x577   : > { %7459 = vrot.lane.b32.xlu1 %v7384_v54, %s14948_s28 }
 0x579   : > { %v7948_v42 = vld [vmem:[#allocation5 + $0x168] sm:$0xff] }
 0x57a   : > { %7829 = vrot.lane.b32.xlu0 %v7766_v55, %s14948_s28 }
 0x57b   : > { %7461 = vrot.lane.b32.xlu1 %v7401_v31, %s14948_s28  ;;  %v14360_v31 = vld [vmem:[%s18774_s6 + $0x110] sm:$0xff]  }
 0x57c   : > { %v7949_v15 = vld [vmem:[#allocation5 + $0x170] sm:$0xff] }
 0x57d   : > { %8430 = vmatprep.mubr.bf16.mxu1 %v7949_v15 }
 0x57e   : > { %7831 = vrot.lane.b32.xlu0 %v7778_v10, %s14948_s28  ;;  %8431 = vmatmul.mubr.bf16.gmra.mrb[36].mxu1 %v7948_v42 }
 0x57f   : > { %7463 = vrot.lane.b32.xlu1 %v7410_v40, %s14948_s28 }
 0x580   : > { %v6623_v43 = vpop.permute.xlu1 %6622 }
 0x581   : > { %6661 = vst.msk [vmem:[#allocation5 + $0x190] sm:$0xff] %vm6650_vm10, %v6623_v43 }
 0x582   : > { %7833 = vrot.lane.b32.xlu0 %v7786_v49, %s14948_s28  ;;  %v7041_v2 = vpop.permute.xlu0 %7040 }
 0x583   : > { %7465 = vrot.lane.b32.xlu1 %v7427_v18, %s14948_s28  ;;  %7078 = vst.msk [vmem:[#allocation5 + $0x198] sm:$0xff] %vm6650_vm10, %v7041_v2 }
 0x586   : > { %7835 = vrot.lane.b32.xlu0 %v7798_v22, %s14948_s28 }
 0x587   : > { %7467 = vrot.lane.b32.xlu1 %v7436_v27, %s14948_s28 }
 0x588   : > { %v7953_v61 = vld [vmem:[#allocation5 + $0x190] sm:$0xff] }
 0x589   : > { %v6625_v51 = vpop.permute.xlu1 %6624 }
 0x58a   : > { %7837 = vrot.lane.b32.xlu0 %v17143_v45, %s14948_s28  ;;  %6662 = vst.msk [vmem:[#allocation5 + $0x1b8] sm:$0xff] %vm6650_vm10, %v6625_v51  ;;  %v7954_v8 = vld [vmem:[#allocation5 + $0x198] sm:$0xff] }
 0x58b   : > { %8438 = vmatprep.mubr.bf16.mxu1 %v7954_v8 }
 0x58c   : > { %v7043_v19 = vpop.permute.xlu0 %7042  ;;  %8439 = vmatmul.mubr.bf16.gmra.mrb[40].mxu1 %v7953_v61 }
 0x58d   : > { %7079 = vst.msk [vmem:[#allocation5 + $0x1c0] sm:$0xff] %vm6650_vm10, %v7043_v19 }
 0x591   : > { %v7958_v56 = vld [vmem:[#allocation5 + $0x1b8] sm:$0xff] }
 0x594   : > { %v7959_v59 = vld [vmem:[#allocation5 + $0x1c0] sm:$0xff] }
 0x595   : > { %8446 = vmatprep.mubr.bf16.mxu1 %v7959_v59 }
 0x596   : > { %8447 = vmatmul.mubr.bf16.gmra.mrb[44].mxu1 %v7958_v56 }
 0x598   : > { %v6627_v44 = vpop.permute.xlu1 %6626 }
 0x599   : > { %6663 = vst.msk [vmem:[#allocation5 + $0x1e0] sm:$0xff] %vm6650_vm10, %v6627_v44 }
 0x59a   : > { %v7045_v62 = vpop.permute.xlu0 %7044 }
 0x59b   : > { %7080 = vst.msk [vmem:[#allocation5 + $0x1e8] sm:$0xff] %vm6650_vm10, %v7045_v62 }
 0x5a0   : > { %v7963_v41 = vld [vmem:[#allocation5 + $0x1e0] sm:$0xff] }
 0x5a1   : > { %v6629_v45 = vpop.permute.xlu1 %6628 }
 0x5a2   : > { %6664 = vst.msk [vmem:[#allocation5 + $0x208] sm:$0xff] %vm6650_vm10, %v6629_v45  ;;  %v7964_v11 = vld [vmem:[#allocation5 + $0x1e8] sm:$0xff] }
 0x5a3   : > { %8454 = vmatprep.mubr.bf16.mxu1 %v7964_v11 }
 0x5a4   : > { %v7047_v20 = vpop.permute.xlu0 %7046  ;;  %8455 = vmatmul.mubr.bf16.gmra.mrb[48].mxu1 %v7963_v41 }
 0x5a5   : > { %7081 = vst.msk [vmem:[#allocation5 + $0x210] sm:$0xff] %vm6650_vm10, %v7047_v20 }
 0x5a9   : > { %v7968_v12 = vld [vmem:[#allocation5 + $0x208] sm:$0xff] }
 0x5ac   : > { %v7969_v3 = vld [vmem:[#allocation5 + $0x210] sm:$0xff] }
 0x5ad   : > { %8462 = vmatprep.mubr.bf16.mxu1 %v7969_v3 }
 0x5ae   : > { %8463 = vmatmul.mubr.bf16.gmra.mrb[52].mxu1 %v7968_v12 }
 0x5b0   : > { %v6631_v33 = vpop.permute.xlu1 %6630 }
 0x5b1   : > { %6665 = vst.msk [vmem:[#allocation5 + $0x230] sm:$0xff] %vm6650_vm10, %v6631_v33 }
 0x5b2   : > { %v7049_v53 = vpop.permute.xlu0 %7048 }
 0x5b3   : > { %7082 = vst.msk [vmem:[#allocation5 + $0x238] sm:$0xff] %vm6650_vm10, %v7049_v53 }
 0x5b8   : > { %v7973_v47 = vld [vmem:[#allocation5 + $0x230] sm:$0xff] }
 0x5b9   : > { %v6633_v63 = vpop.permute.xlu1 %6632 }
 0x5ba   : > { %6666 = vst.msk [vmem:[#allocation5 + $0x258] sm:$0xff] %vm6650_vm10, %v6633_v63  ;;  %v7974_v21 = vld [vmem:[#allocation5 + $0x238] sm:$0xff] }
 0x5bb   : > { %8470 = vmatprep.mubr.bf16.mxu1 %v7974_v21 }
 0x5bc   : > { %v7051_v30 = vpop.permute.xlu0 %7050  ;;  %8471 = vmatmul.mubr.bf16.gmra.mrb[56].mxu1 %v7973_v47 }
 0x5bd   : > { %7083 = vst.msk [vmem:[#allocation5 + $0x260] sm:$0xff] %vm6650_vm10, %v7051_v30  ;;  %v7438_v57 = vpop.permute.xlu1 %7437 }
 0x5be   : > { %7485 = vst.msk [vmem:[#allocation5 + $0x10] sm:$0xff] %vm6650_vm10, %v7438_v57 }
 0x5c0   : > { %v7808_v48 = vpop.permute.xlu0 %7807 }
 0x5c1   : > { %7855 = vst.msk [vmem:[#allocation5 + $0x18] sm:$0xff] %vm6650_vm10, %v7808_v48  ;;  %v7440_v6 = vpop.permute.xlu1 %7439  ;;  %v7978_v54 = vld [vmem:[#allocation5 + $0x258] sm:$0xff] }
 0x5c2   : > { %7486 = vst.msk [vmem:[#allocation5 + $0x38] sm:$0xff] %vm6650_vm10, %v7440_v6 }
 0x5c4   : > { %v7810_v37 = vpop.permute.xlu0 %7809  ;;  %v7979_v17 = vld [vmem:[#allocation5 + $0x260] sm:$0xff] }
 0x5c5   : > { %7856 = vst.msk [vmem:[#allocation5 + $0x40] sm:$0xff] %vm6650_vm10, %v7810_v37  ;;  %8478 = vmatprep.mubr.bf16.mxu1 %v7979_v17  ;;  %v7442_v60 = vpop.permute.xlu1 %7441  ;;  %v7905_v4 = vld [vmem:[#allocation5 + $0x10] sm:$0xff] }
 0x5c6   : > { %7487 = vst.msk [vmem:[#allocation5 + $0x60] sm:$0xff] %vm6650_vm10, %v7442_v60  ;;  %8479 = vmatmul.mubr.bf16.gmra.mrb[60].mxu1 %v7978_v54 }
 0x5c8   : > { %v7812_v25 = vpop.permute.xlu0 %7811  ;;  %v7906_v32 = vld [vmem:[#allocation5 + $0x18] sm:$0xff] }
 0x5c9   : > { %7857 = vst.msk [vmem:[#allocation5 + $0x68] sm:$0xff] %vm6650_vm10, %v7812_v25  ;;  %8519 = vmatprep.mubr.bf16.mxu1 %v7906_v32  ;;  %v7444_v16 = vpop.permute.xlu1 %7443  ;;  %v7910_v38 = vld [vmem:[#allocation5 + $0x38] sm:$0xff] }
 0x5ca   : > { %7488 = vst.msk [vmem:[#allocation5 + $0x88] sm:$0xff] %vm6650_vm10, %v7444_v16 }
 0x5cc   : > { %v7814_v24 = vpop.permute.xlu0 %7813  ;;  %v7911_v55 = vld [vmem:[#allocation5 + $0x40] sm:$0xff] }
 0x5cd   : > { %7858 = vst.msk [vmem:[#allocation5 + $0x90] sm:$0xff] %vm6650_vm10, %v7814_v24  ;;  %v7446_v5 = vpop.permute.xlu1 %7445  ;;  %v7915_v10 = vld [vmem:[#allocation5 + $0x60] sm:$0xff] }
 0x5ce   : > { %7489 = vst.msk [vmem:[#allocation5 + $0xb0] sm:$0xff] %vm6650_vm10, %v7446_v5  ;;  %8520 = vmatmul.mubr.bf16.vlgmr.msra.gmra.mrb[64].mxu1 %v7905_v4 }
 0x5cf   : > { %8527 = vmatprep.mubr.bf16.mxu1 %v7911_v55  ;;  %13651 = vmatpush3.bf16.msra.mxu1 %v17169_v14 }
 0x5d0   : > { %v7816_v28 = vpop.permute.xlu0 %7815  ;;  %13652 = vmatprep.subr.bf16.mxu1 %v14359_v13  ;;  %v7916_v9 = vld [vmem:[#allocation5 + $0x68] sm:$0xff] }
 0x5d1   : > { %7859 = vst.msk [vmem:[#allocation5 + $0xb8] sm:$0xff] %vm6650_vm10, %v7816_v28  ;;  %v7448_v50 = vpop.permute.xlu1 %7447  ;;  %v7920_v35 = vld [vmem:[#allocation5 + $0x88] sm:$0xff] }
 0x5d2   : > { %7490 = vst.msk [vmem:[#allocation5 + $0xd8] sm:$0xff] %vm6650_vm10, %v7448_v50 }
 0x5d3   : > { %13653 = vmatpush3.bf16.msra.mxu1 %v14359_v13 }
 0x5d4   : > { %v7818_v36 = vpop.permute.xlu0 %7817  ;;  %13654 = vmatprep.subr.bf16.mxu1 %v14360_v31  ;;  %v7921_v42 = vld [vmem:[#allocation5 + $0x90] sm:$0xff] }
 0x5d5   : > { %7860 = vst.msk [vmem:[#allocation5 + $0xe0] sm:$0xff] %vm6650_vm10, %v7818_v36  ;;  %v7450_v14 = vpop.permute.xlu1 %7449  ;;  %v7925_v8 = vld [vmem:[#allocation5 + $0xb0] sm:$0xff] }
 0x5d6   : > { %7491 = vst.msk [vmem:[#allocation5 + $0x100] sm:$0xff] %vm6650_vm10, %v7450_v14  ;;  %8528 = vmatmul.mubr.bf16.gmra.mrb[68].mxu1 %v7910_v38 }
 0x5d7   : > { %8535 = vmatprep.mubr.bf16.mxu1 %v7916_v9  ;;  %13655 = vmatpush3.bf16.msra.mxu1 %v14360_v31 }
 0x5d8   : > { %v7820_v15 = vpop.permute.xlu0 %7819  ;;  %13656 = vmatprep.subr.bf16.mxu1 %v14361_v58  ;;  %v7926_v0 = vld [vmem:[#allocation5 + $0xb8] sm:$0xff] }
 0x5d9   : > { %7861 = vst.msk [vmem:[#allocation5 + $0x108] sm:$0xff] %vm6650_vm10, %v7820_v15  ;;  %v7452_v7 = vpop.permute.xlu1 %7451  ;;  %v7930_v33 = vld [vmem:[#allocation5 + $0xd8] sm:$0xff] }
 0x5da   : > { %7492 = vst.msk [vmem:[#allocation5 + $0x128] sm:$0xff] %vm6650_vm10, %v7452_v7 }
 0x5db   : > { %13657 = vmatpush3.bf16.msra.mxu1 %v14361_v58 }
 0x5dc   : > { %v7822_v29 = vpop.permute.xlu0 %7821  ;;  %v7931_v61 = vld [vmem:[#allocation5 + $0xe0] sm:$0xff] }
 0x5dd   : > { %7862 = vst.msk [vmem:[#allocation5 + $0x130] sm:$0xff] %vm6650_vm10, %v7822_v29  ;;  %v7454_v46 = vpop.permute.xlu1 %7453  ;;  %v7935_v47 = vld [vmem:[#allocation5 + $0x100] sm:$0xff] }
 0x5de   : > { %7493 = vst.msk [vmem:[#allocation5 + $0x150] sm:$0xff] %vm6650_vm10, %v7454_v46  ;;  %8536 = vmatmul.mubr.bf16.gmra.mrb[72].mxu1 %v7915_v10 }
 0x5df   : > { %8543 = vmatprep.mubr.bf16.mxu1 %v7921_v42 }
 0x5e0   : > { %v7824_v23 = vpop.permute.xlu0 %7823  ;;  %v7936_v53 = vld [vmem:[#allocation5 + $0x108] sm:$0xff] }
 0x5e1   : > { %7863 = vst.msk [vmem:[#allocation5 + $0x158] sm:$0xff] %vm6650_vm10, %v7824_v23  ;;  %v7456_v40 = vpop.permute.xlu1 %7455  ;;  %v7940_v25 = vld [vmem:[#allocation5 + $0x128] sm:$0xff] }
 0x5e2   : > { %7494 = vst.msk [vmem:[#allocation5 + $0x178] sm:$0xff] %vm6650_vm10, %v7456_v40 }
 0x5e4   : > { %v7826_v52 = vpop.permute.xlu0 %7825  ;;  %v7941_v57 = vld [vmem:[#allocation5 + $0x130] sm:$0xff] }
 0x5e5   : > { %7864 = vst.msk [vmem:[#allocation5 + $0x180] sm:$0xff] %vm6650_vm10, %v7826_v52  ;;  %v7458_v26 = vpop.permute.xlu1 %7457  ;;  %v7945_v28 = vld [vmem:[#allocation5 + $0x150] sm:$0xff] }
 0x5e6   : > { %7495 = vst.msk [vmem:[#allocation5 + $0x1a0] sm:$0xff] %vm6650_vm10, %v7458_v26  ;;  %8544 = vmatmul.mubr.bf16.gmra.mrb[76].mxu1 %v7920_v35 }
 0x5e7   : > { %8551 = vmatprep.mubr.bf16.mxu1 %v7926_v0 }
 0x5e8   : > { %v7828_v49 = vpop.permute.xlu0 %7827  ;;  %v13378_v43 = vpop.f32.mrb[0].mxu1  ;;  %v7946_v32 = vld [vmem:[#allocation5 + $0x158] sm:$0xff] }
 0x5e9   : > { %7865 = vst.msk [vmem:[#allocation5 + $0x1a8] sm:$0xff] %vm6650_vm10, %v7828_v49  ;;  %v7460_v18 = vpop.permute.xlu1 %7459  ;;  %v13379_v34 = vpop.f32.mrb[1].mxu1  ;;  %v7950_v50 = vld [vmem:[#allocation5 + $0x178] sm:$0xff] }
 0x5ea   : > { %7496 = vst.msk [vmem:[#allocation5 + $0x1c8] sm:$0xff] %vm6650_vm10, %v7460_v18  ;;  %v17299_v39 = vadd.f32 %v13379_v34, %v13378_v43  ;;  %v13381_v2 = vpop.f32.mrb[2].mxu1 }
 0x5eb   : > { %v13382_v27 = vpop.f32.mrb[3].mxu1 }
 0x5ec   : > { %v7830_v22 = vpop.permute.xlu0 %7829  ;;  %v17302_v51 = vadd.f32 %v13382_v27, %v13381_v2  ;;  %v7951_v31 = vld [vmem:[#allocation5 + $0x180] sm:$0xff] }
 0x5ed   : > { %7866 = vst.msk [vmem:[#allocation5 + $0x1d0] sm:$0xff] %vm6650_vm10, %v7830_v22  ;;  %v7462_v19 = vpop.permute.xlu1 %7461  ;;  %v7955_v29 = vld [vmem:[#allocation5 + $0x1a0] sm:$0xff] }
 0x5ee   : > { %7497 = vst.msk [vmem:[#allocation5 + $0x1f0] sm:$0xff] %vm6650_vm10, %v7462_v19  ;;  %8552 = vmatmul.mubr.bf16.gmra.mrb[80].mxu1 %v7925_v8 }
 0x5ef   : > { %8559 = vmatprep.mubr.bf16.mxu1 %v7931_v61 }
 0x5f0   : > { %v7832_v59 = vpop.permute.xlu0 %7831  ;;  %v7956_v36 = vld [vmem:[#allocation5 + $0x1a8] sm:$0xff] }
 0x5f1   : > { %7867 = vst.msk [vmem:[#allocation5 + $0x1f8] sm:$0xff] %vm6650_vm10, %v7832_v59  ;;  %v13384_v56 = vpop.f32.mrb[4].mxu1  ;;  %v7464_v44 = vpop.permute.xlu1 %7463  ;;  %v7960_v35 = vld [vmem:[#allocation5 + $0x1c8] sm:$0xff] }
 0x5f2   : > { %7498 = vst.msk [vmem:[#allocation5 + $0x218] sm:$0xff] %vm6650_vm10, %v7464_v44  ;;  %v13385_v62 = vpop.f32.mrb[5].mxu1 }
 0x5f3   : > { %v17307_v45 = vadd.f32 %v13385_v62, %v13384_v56  ;;  %v13387_v20 = vpop.f32.mrb[6].mxu1 }
 0x5f4   : > { %v7834_v11 = vpop.permute.xlu0 %7833  ;;  %v13388_v41 = vpop.f32.mrb[7].mxu1  ;;  %v7961_v46 = vld [vmem:[#allocation5 + $0x1d0] sm:$0xff] }
 0x5f5   : > { %7868 = vst.msk [vmem:[#allocation5 + $0x220] sm:$0xff] %vm6650_vm10, %v7834_v11  ;;  %v17310_v3 = vadd.f32 %v13388_v41, %v13387_v20  ;;  %v7466_v12 = vpop.permute.xlu1 %7465  ;;  %v7965_v49 = vld [vmem:[#allocation5 + $0x1f0] sm:$0xff] }
 0x5f6   : > { %7499 = vst.msk [vmem:[#allocation5 + $0x240] sm:$0xff] %vm6650_vm10, %v7466_v12  ;;  %8560 = vmatmul.mubr.bf16.gmra.mrb[84].mxu1 %v7930_v33 }
 0x5f7   : > { %8567 = vmatprep.mubr.bf16.mxu1 %v7936_v53  ;;  %v7907_v53 = vld [vmem:[#allocation5 + $0x20] sm:$0xff] }
 0x5f8   : > { %v7836_v63 = vpop.permute.xlu0 %7835  ;;  %v7966_v0 = vld [vmem:[#allocation5 + $0x1f8] sm:$0xff] }
 0x5f9   : > { %7869 = vst.msk [vmem:[#allocation5 + $0x248] sm:$0xff] %vm6650_vm10, %v7836_v63  ;;  %v7468_v21 = vpop.permute.xlu1 %7467  ;;  %v7970_v8 = vld [vmem:[#allocation5 + $0x218] sm:$0xff] }
 0x5fa   : > { %7500 = vst.msk [vmem:[#allocation5 + $0x268] sm:$0xff] %vm6650_vm10, %v7468_v21 }
 0x5fc   : > { %v7838_v30 = vpop.permute.xlu0 %7837  ;;  %v7971_v43 = vld [vmem:[#allocation5 + $0x220] sm:$0xff] }
 0x5fd   : > { %7870 = vst.msk [vmem:[#allocation5 + $0x270] sm:$0xff] %vm6650_vm10, %v7838_v30  ;;  %v7975_v41 = vld [vmem:[#allocation5 + $0x240] sm:$0xff] }
 0x5fe   : > { %8568 = vmatmul.mubr.bf16.gmra.mrb[88].mxu1 %v7935_v47 }
 0x5ff   : > { %8575 = vmatprep.mubr.bf16.mxu1 %v7941_v57 }
 0x600   : > { %v13390_v48 = vpop.f32.mrb[8].mxu1  ;;  %v7976_v61 = vld [vmem:[#allocation5 + $0x248] sm:$0xff] }
 0x601   : > { %v13391_v6 = vpop.f32.mrb[9].mxu1  ;;  %v7980_v33 = vld [vmem:[#allocation5 + $0x268] sm:$0xff] }
 0x602   : > { %v17316_v37 = vadd.f32 %v13391_v6, %v13390_v48  ;;  %v13393_v17 = vpop.f32.mrb[10].mxu1  ;;  %v7912_v6 = vld [vmem:[#allocation5 + $0x48] sm:$0xff] }
 0x603   : > { %v13394_v60 = vpop.f32.mrb[11].mxu1 }
 0x604   : > { %v17318_v54 = vadd.f32 %v13394_v60, %v13393_v17  ;;  %v7981_v12 = vld [vmem:[#allocation5 + $0x270] sm:$0xff] }
 0x605   : > { %v7917_v17 = vld [vmem:[#allocation5 + $0x70] sm:$0xff] }
 0x606   : > { %8576 = vmatmul.mubr.bf16.gmra.mrb[92].mxu1 %v7940_v25 }
 0x607   : > { %8583 = vmatprep.mubr.bf16.mxu1 %v7946_v32 }
 0x609   : > { %v13396_v16 = vpop.f32.mrb[12].mxu1 }
 0x60a   : > { %v13397_v24 = vpop.f32.mrb[13].mxu1 }
 0x60b   : > { %v17320_v13 = vadd.f32 %v13397_v24, %v13396_v16  ;;  %v13399_v5 = vpop.f32.mrb[14].mxu1 }
 0x60c   : > { %v13400_v4 = vpop.f32.mrb[15].mxu1 }
 0x60d   : > { %v17322_v55 = vadd.f32 %v13400_v4, %v13399_v5  ;;  %v7922_v4 = vld [vmem:[#allocation5 + $0x98] sm:$0xff] }
 0x60e   : > { %8584 = vmatmul.mubr.bf16.gmra.mrb[96].mxu1 %v7945_v28  ;;  %v7927_v28 = vld [vmem:[#allocation5 + $0xc0] sm:$0xff] }
 0x60f   : > { %8591 = vmatprep.mubr.bf16.mxu1 %v7951_v31  ;;  %v7932_v31 = vld [vmem:[#allocation5 + $0xe8] sm:$0xff] }
 0x616   : > { %8592 = vmatmul.mubr.bf16.gmra.mrb[100].mxu1 %v7950_v50  ;;  %v7937_v50 = vld [vmem:[#allocation5 + $0x110] sm:$0xff] }
 0x617   : > { %8599 = vmatprep.mubr.bf16.mxu1 %v7956_v36 }
 0x618   : > { %v13402_v58 = vpop.f32.mrb[16].mxu1 }
 0x619   : > { %v13403_v14 = vpop.f32.mrb[17].mxu1 }
 0x61a   : > { %v17324_v38 = vadd.f32 %v13403_v14, %v13402_v58  ;;  %v13405_v9 = vpop.f32.mrb[18].mxu1 }
 0x61b   : > { %v13406_v15 = vpop.f32.mrb[19].mxu1 }
 0x61c   : > { %v17326_v7 = vadd.f32 %v13406_v15, %v13405_v9 }
 0x61e   : > { %8600 = vmatmul.mubr.bf16.gmra.mrb[104].mxu1 %v7955_v29 }
 0x61f   : > { %8607 = vmatprep.mubr.bf16.mxu1 %v7961_v46  ;;  %v7942_v46 = vld [vmem:[#allocation5 + $0x138] sm:$0xff] }
 0x621   : > { %v13408_v10 = vpop.f32.mrb[20].mxu1 }
 0x622   : > { %v13409_v42 = vpop.f32.mrb[21].mxu1 }
 0x623   : > { %v17328_v23 = vadd.f32 %v13409_v42, %v13408_v10  ;;  %v13411_v40 = vpop.f32.mrb[22].mxu1  ;;  %v7947_v10 = vld [vmem:[#allocation5 + $0x160] sm:$0xff] }
 0x624   : > { %v13412_v52 = vpop.f32.mrb[23].mxu1 }
 0x625   : > { %v17330_v26 = vadd.f32 %v13412_v52, %v13411_v40 }
 0x626   : > { %8608 = vmatmul.mubr.bf16.gmra.mrb[108].mxu1 %v7960_v35 }
 0x627   : > { %8615 = vmatprep.mubr.bf16.mxu1 %v7966_v0 }
 0x62e   : > { %8616 = vmatmul.mubr.bf16.gmra.mrb[112].mxu1 %v7965_v49 }
 0x62f   : > { %8623 = vmatprep.mubr.bf16.mxu1 %v7971_v43  ;;  %v7952_v43 = vld [vmem:[#allocation5 + $0x188] sm:$0xff] }
 0x630   : > { %v13414_v18 = vpop.f32.mrb[24].mxu1 }
 0x631   : > { %v13415_v34 = vpop.f32.mrb[25].mxu1 }
 0x632   : > { %v17332_v2 = vadd.f32 %v13415_v34, %v13414_v18  ;;  %v13417_v22 = vpop.f32.mrb[26].mxu1  ;;  %v7957_v18 = vld [vmem:[#allocation5 + $0x1b0] sm:$0xff]  ;;  %v7962_v34 = vld [vmem:[#allocation5 + $0x1d8] sm:$0xff] }
 0x633   : > { %v13418_v27 = vpop.f32.mrb[27].mxu1 }
 0x634   : > { %v17334_v19 = vadd.f32 %v13418_v27, %v13417_v22  ;;  %v7967_v22 = vld [vmem:[#allocation5 + $0x200] sm:$0xff] }
 0x636   : > { %8624 = vmatmul.mubr.bf16.gmra.mrb[116].mxu1 %v7970_v8 }
 0x637   : > { %8631 = vmatprep.mubr.bf16.mxu1 %v7976_v61 }
 0x639   : > { %v13420_v59 = vpop.f32.mrb[28].mxu1 }
 0x63a   : > { %v13421_v56 = vpop.f32.mrb[29].mxu1 }
 0x63b   : > { %v17336_v44 = vadd.f32 %v13421_v56, %v13420_v59  ;;  %v13423_v62 = vpop.f32.mrb[30].mxu1 }
 0x63c   : > { %v13424_v20 = vpop.f32.mrb[31].mxu1 }
 0x63d   : > { %v17338_v11 = vadd.f32 %v13424_v20, %v13423_v62  ;;  %v7972_v20 = vld [vmem:[#allocation5 + $0x228] sm:$0xff] }
 0x63e   : > { %8632 = vmatmul.mubr.bf16.gmra.mrb[120].mxu1 %v7975_v41  ;;  %v7977_v41 = vld [vmem:[#allocation5 + $0x250] sm:$0xff] }
 0x63f   : > { %8639 = vmatprep.mubr.bf16.mxu1 %v7981_v12 }
 0x646   : > { %8640 = vmatmul.mubr.bf16.gmra.mrb[124].mxu1 %v7980_v33 }
 0x647   : > { %13658 = vmatprep.mubr.msk.bf16.mxu1 %vm6361_vm7, %v7907_v53  ;;  %v13426_v63 = vpop.f32.mrb[32].mxu1 }
 0x648   : > { %v13427_v21 = vpop.f32.mrb[33].mxu1 }
 0x649   : > { %v17341_v30 = vadd.f32 %v13427_v21, %v13426_v63  ;;  %v13429_v47 = vpop.f32.mrb[34].mxu1 }
 0x64a   : > { %v13430_v57 = vpop.f32.mrb[35].mxu1 }
 0x64b   : > { %v17343_v48 = vadd.f32 %v13430_v57, %v13429_v47  ;;  %v7982_v57 = vld [vmem:[#allocation5 + $0x278] sm:$0xff] }
 0x64e   : > { %13659 = vmatmul.mubr.msk.bf16.vlgmr.msra.gmra.mrb[128].mxu1 %vm6361_vm7, %v7912_v6 }
 0x64f   : > { %13662 = vmatprep.mubr.msk.bf16.mxu1 %vm6361_vm7, %v7917_v17 }
 0x651   : > { %v13432_v60 = vpop.f32.mrb[36].mxu1 }
 0x652   : > { %v13433_v25 = vpop.f32.mrb[37].mxu1 }
 0x653   : > { %v17347_v32 = vadd.f32 %v13433_v25, %v13432_v60  ;;  %v13435_v16 = vpop.f32.mrb[38].mxu1 }
 0x654   : > { %v13436_v24 = vpop.f32.mrb[39].mxu1 }
 0x655   : > { %v17349_v5 = vadd.f32 %v13436_v24, %v13435_v16 }
 0x656   : > { %13663 = vmatmul.mubr.msk.bf16.gmra.mrb[132].mxu1 %vm6361_vm7, %v7922_v4 }
 0x657   : > { %13666 = vmatprep.mubr.msk.bf16.mxu1 %vm6361_vm7, %v7927_v28 }
 0x65e   : > { %13667 = vmatmul.mubr.msk.bf16.gmra.mrb[136].mxu1 %vm6361_vm7, %v7932_v31 }
 0x65f   : > { %13670 = vmatprep.mubr.msk.bf16.mxu1 %vm6361_vm7, %v7937_v50  ;;  %v13438_v36 = vpop.f32.mrb[40].mxu1 }
 0x660   : > { %v13439_v58 = vpop.f32.mrb[41].mxu1 }
 0x661   : > { %v17355_v14 = vadd.f32 %v13439_v58, %v13438_v36  ;;  %v13441_v9 = vpop.f32.mrb[42].mxu1 }
 0x662   : > { %v13442_v15 = vpop.f32.mrb[43].mxu1 }
 0x663   : > { %v17357_v29 = vadd.f32 %v13442_v15, %v13441_v9  ;;  %v17392_v9 = vld [vmem:[%s18775_s7] ss:$0 sm:$0xff] }
 0x666   : > { %13671 = vmatmul.mubr.msk.bf16.gmra.mrb[140].mxu1 %vm6361_vm7, %v7942_v46 }
 0x667   : > { %13674 = vmatprep.mubr.msk.bf16.mxu1 %vm6361_vm7, %v7947_v10  ;;  %v8361_v10 = vadd.f32 %v17299_v39, %v17392_v9  ;;  %v8372_v39 = vadd.f32 %v17310_v3, %v17392_v9 }
 0x669   : > { %v13444_v42 = vpop.f32.mrb[44].mxu1 }
 0x66a   : > { %v13445_v40 = vpop.f32.mrb[45].mxu1 }
 0x66b   : > { %v17361_v52 = vadd.f32 %v13445_v40, %v13444_v42  ;;  %v13447_v35 = vpop.f32.mrb[46].mxu1 }
 0x66c   : > { %v13448_v0 = vpop.f32.mrb[47].mxu1 }
 0x66d   : > { %v17363_v49 = vadd.f32 %v13448_v0, %v13447_v35  ;;  %v8364_v0 = vadd.f32 %v17302_v51, %v17392_v9 }
 0x66e   : > { %13675 = vmatmul.mubr.msk.bf16.gmra.mrb[144].mxu1 %vm6361_vm7, %v7952_v43 }
 0x66f   : > { %13678 = vmatprep.mubr.msk.bf16.mxu1 %vm6361_vm7, %v7957_v18 }
 0x676   : > { %13679 = vmatmul.mubr.msk.bf16.gmra.mrb[148].mxu1 %vm6361_vm7, %v7962_v34 }
 0x677   : > { %13682 = vmatprep.mubr.msk.bf16.mxu1 %vm6361_vm7, %v7967_v22  ;;  %v13450_v27 = vpop.f32.mrb[48].mxu1 }
 0x678   : > { %v13451_v8 = vpop.f32.mrb[49].mxu1 }
 0x679   : > { %v17369_v61 = vadd.f32 %v13451_v8, %v13450_v27  ;;  %v13453_v59 = vpop.f32.mrb[50].mxu1  ;;  %v8369_v8 = vadd.f32 %v17307_v45, %v17392_v9  ;;  %v8380_v45 = vadd.f32 %v17318_v54, %v17392_v9  ;;  %v14364_v54 = vld [vmem:[%s18776_s8 + $0x4] ss:$16 sps:$4 sm:$0xff]  }
 0x67a   : > { %v13454_v56 = vpop.f32.mrb[51].mxu1  ;;  %11537 = vmatprep.subr.bf16.mxu0 %v14364_v54  ;;  %v8412_v54 = vadd.f32 %v17334_v19, %v17392_v9  ;;  %v14373_v19 = vld [vmem:[%s18776_s8 + $0x64] ss:$16 sps:$4 sm:$0xff]  }
 0x67b   : > { %v17371_v62 = vadd.f32 %v13454_v56, %v13453_v59 }
 0x67e   : > { %13683 = vmatmul.mubr.msk.bf16.gmra.mrb[152].mxu1 %vm6361_vm7, %v7972_v20 }
 0x67f   : > { %13686 = vmatprep.mubr.msk.bf16.mxu1 %vm6361_vm7, %v7977_v41 }
 0x681   : > { %v13456_v12 = vpop.f32.mrb[52].mxu1 }
 0x682   : > { %v13457_v33 = vpop.f32.mrb[53].mxu1 }
 0x683   : > { %v17375_v53 = vadd.f32 %v13457_v33, %v13456_v12  ;;  %v13459_v63 = vpop.f32.mrb[54].mxu1 }
 0x684   : > { %v13460_v21 = vpop.f32.mrb[55].mxu1 }
 0x685   : > { %v17377_v47 = vadd.f32 %v13460_v21, %v13459_v63  ;;  %v8377_v21 = vadd.f32 %v17316_v37, %v17392_v9  ;;  %v14362_v37 = vld [vmem:[%s18776_s8] ss:$16 sps:$4 sm:$0xff]  }
 0x686   : > { %13687 = vmatmul.mubr.msk.bf16.gmra.mrb[156].mxu1 %vm6361_vm7, %v7982_v57  ;;  %11538 = vmatpush1.bf16.msra.mxu0 %v14362_v37 }
 0x687   : > { %10179 = vmatprep.mubr.bf16.mxu1 %v14946_v1 }
 0x68f   : > { %v13462_v6 = vpop.f32.mrb[56].mxu1 }
 0x690   : > { %v13463_v17 = vpop.f32.mrb[57].mxu1 }
 0x691   : > { %v17381_v60 = vadd.f32 %v13463_v17, %v13462_v6  ;;  %v13465_v25 = vpop.f32.mrb[58].mxu1 }
 0x692   : > { %v13466_v16 = vpop.f32.mrb[59].mxu1 }
 0x693   : > { %v17383_v24 = vadd.f32 %v13466_v16, %v13465_v25 }
 0x699   : > { %v13468_v4 = vpop.f32.mrb[60].mxu1 }
 0x69a   : > { %v13469_v28 = vpop.f32.mrb[61].mxu1 }
 0x69b   : > { %v17385_v31 = vadd.f32 %v13469_v28, %v13468_v4  ;;  %v13471_v50 = vpop.f32.mrb[62].mxu1 }
 0x69c   : > { %v13472_v36 = vpop.f32.mrb[63].mxu1 }
 0x69d   : > { %v17387_v58 = vadd.f32 %v13472_v36, %v13471_v50  ;;  %v8385_v50 = vadd.f32 %v17320_v13, %v17392_v9 }
 0x6a1   : > { %v13490_v15 = vpop.f32.mrb[64].mxu1 }
 0x6a2   : > { %v13491_v46 = vpop.f32.mrb[65].mxu1 }
 0x6a3   : > { %v13492_v42 = vadd.f32 %v13491_v46, %v13490_v15  ;;  %v13493_v40 = vpop.f32.mrb[66].mxu1 }
 0x6a4   : > { %v13494_v35 = vpop.f32.mrb[67].mxu1 }
 0x6a5   : > { %v13495_v43 = vadd.f32 %v13494_v35, %v13493_v40  ;;  %v17398_v18 = vadd.f32 %v13492_v42, %v8361_v10  ;;  %v8388_v10 = vadd.f32 %v17322_v55, %v17392_v9  ;;  %v14367_v55 = vld [vmem:[%s18776_s8 + $0x24] ss:$16 sps:$4 sm:$0xff]  }
 0x6a6   : > { %11539 = vmatprep.subr.bf16.mxu0 %v14367_v55  ;;  %v8420_v55 = vadd.f32 %v17338_v11, %v17392_v9  ;;  %v14376_v11 = vld [vmem:[%s18776_s8 + $0x84] ss:$16 sps:$4 sm:$0xff]  }
 0x6a7   : > { %v17400_v34 = vadd.f32 %v13495_v43, %v8364_v0  ;;  %v8393_v43 = vadd.f32 %v17324_v38, %v17392_v9 }
 0x6a9   : > { %v13496_v22 = vpop.f32.mrb[68].mxu1 }
 0x6aa   : > { %v13497_v27 = vpop.f32.mrb[69].mxu1 }
 0x6ab   : > { %v13498_v59 = vadd.f32 %v13497_v27, %v13496_v22  ;;  %v13499_v56 = vpop.f32.mrb[70].mxu1 }
 0x6ac   : > { %v13500_v20 = vpop.f32.mrb[71].mxu1 }
 0x6ad   : > { %v13501_v41 = vadd.f32 %v13500_v20, %v13499_v56  ;;  %v17406_v12 = vadd.f32 %v13498_v59, %v8369_v8  ;;  %v14365_v8 = vld [vmem:[%s18776_s8 + $0x20] ss:$16 sps:$4 sm:$0xff]   ;;  %v8396_v56 = vadd.f32 %v17326_v7, %v17392_v9 }
 0x6ae   : > { %11540 = vmatpush1.bf16.msra.mxu0 %v14365_v8 }
 0x6af   : > { %v17408_v51 = vadd.f32 %v13501_v41, %v8372_v39 }
 0x6b1   : > { %v13502_v33 = vpop.f32.mrb[72].mxu1 }
 0x6b2   : > { %v13503_v63 = vpop.f32.mrb[73].mxu1 }
 0x6b3   : > { %v13504_v57 = vadd.f32 %v13503_v63, %v13502_v33  ;;  %v13505_v6 = vpop.f32.mrb[74].mxu1  ;;  %v8401_v63 = vadd.f32 %v17328_v23, %v17392_v9  ;;  %v14368_v23 = vld [vmem:[%s18776_s8 + $0x40] ss:$16 sps:$4 sm:$0xff]  }
 0x6b4   : > { %v13506_v17 = vpop.f32.mrb[75].mxu1 }
 0x6b5   : > { %v13507_v25 = vadd.f32 %v13506_v17, %v13505_v6  ;;  %v17414_v16 = vadd.f32 %v13504_v57, %v8377_v21  ;;  %v8404_v17 = vadd.f32 %v17330_v26, %v17392_v9  ;;  %v14370_v26 = vld [vmem:[%s18776_s8 + $0x44] ss:$16 sps:$4 sm:$0xff]  }
 0x6b6   : > { %11541 = vmatprep.subr.bf16.mxu0 %v14370_v26  ;;  %v8433_v26 = vadd.f32 %v17347_v32, %v17392_v9  ;;  %v8444_v32 = vadd.f32 %v17357_v29, %v17392_v9 }
 0x6b7   : > { %v17416_v3 = vadd.f32 %v13507_v25, %v8380_v45  ;;  %11542 = vmatpush1.bf16.msra.mxu0 %v14368_v23 }
 0x6b8   : > { %11543 = vmatprep.subr.bf16.mxu0 %v14373_v19  ;;  %v8441_v19 = vadd.f32 %v17355_v14, %v17392_v9 }
 0x6b9   : > { %v13508_v4 = vpop.f32.mrb[76].mxu1 }
 0x6ba   : > { %v13509_v28 = vpop.f32.mrb[77].mxu1 }
 0x6bb   : > { %v13510_v36 = vadd.f32 %v13509_v28, %v13508_v4  ;;  %v13511_v15 = vpop.f32.mrb[78].mxu1 }
 0x6bc   : > { %v13512_v46 = vpop.f32.mrb[79].mxu1 }
 0x6bd   : > { %v13513_v42 = vadd.f32 %v13512_v46, %v13511_v15  ;;  %v17428_v40 = vadd.f32 %v13510_v36, %v8385_v50  ;;  %v8409_v50 = vadd.f32 %v17332_v2, %v17392_v9 }
 0x6bf   : > { %v17430_v13 = vadd.f32 %v13513_v42, %v8388_v10 }
 0x6c1   : > { %v13514_v35 = vpop.f32.mrb[80].mxu1 }
 0x6c2   : > { %v13515_v0 = vpop.f32.mrb[81].mxu1 }
 0x6c3   : > { %v13516_v22 = vadd.f32 %v13515_v0, %v13514_v35  ;;  %v13517_v27 = vpop.f32.mrb[82].mxu1  ;;  %v8417_v0 = vadd.f32 %v17336_v44, %v17392_v9 }
 0x6c4   : > { %v13518_v59 = vpop.f32.mrb[83].mxu1 }
 0x6c5   : > { %v13519_v20 = vadd.f32 %v13518_v59, %v13517_v27  ;;  %v17442_v39 = vadd.f32 %v13516_v22, %v8393_v43  ;;  %v14371_v27 = vld [vmem:[%s18776_s8 + $0x60] ss:$16 sps:$4 sm:$0xff]  }
 0x6c6   : > { %11544 = vmatpush1.bf16.msra.mxu0 %v14371_v27 }
 0x6c7   : > { %v17444_v38 = vadd.f32 %v13519_v20, %v8396_v56  ;;  %11545 = vmatprep.subr.bf16.mxu0 %v14376_v11 }
 0x6c9   : > { %v13520_v41 = vpop.f32.mrb[84].mxu1 }
 0x6ca   : > { %v13521_v33 = vpop.f32.mrb[85].mxu1 }
 0x6cb   : > { %v13522_v21 = vadd.f32 %v13521_v33, %v13520_v41  ;;  %v13523_v57 = vpop.f32.mrb[86].mxu1  ;;  %v8425_v33 = vadd.f32 %v17341_v30, %v17392_v9  ;;  %v8428_v30 = vadd.f32 %v17343_v48, %v17392_v9 }
 0x6cc   : > { %v13524_v6 = vpop.f32.mrb[87].mxu1 }
 0x6cd   : > { %v13525_v45 = vadd.f32 %v13524_v6, %v13523_v57  ;;  %v17450_v7 = vadd.f32 %v13522_v21, %v8401_v63  ;;  %v14374_v57 = vld [vmem:[%s18776_s8 + $0x80] ss:$16 sps:$4 sm:$0xff]  }
 0x6ce   : > { %11546 = vmatpush1.bf16.msra.mxu0 %v14374_v57  ;;  %v8449_v57 = vadd.f32 %v17361_v52, %v17392_v9 }
 0x6cf   : > { %v17452_v25 = vadd.f32 %v13525_v45, %v8404_v17  ;;  %v14377_v17 = vld [vmem:[%s18777_s9] ss:$16 sps:$4 sm:$0xff]   ;;  %v14379_v45 = vld [vmem:[%s18777_s9 + $0x4] ss:$16 sps:$4 sm:$0xff]  }
 0x6d0   : > { %10147 = vmatprep.subr.bf16.mxu1 %v14379_v45  ;;  %v14436_v45 = vld [vmem:[%s18777_s9 + $0x24] ss:$16 sps:$4 sm:$0xff]  }
 0x6d1   : > { %v13526_v4 = vpop.f32.mrb[88].mxu1  ;;  %10148 = vmatpush1.bf16.msra.mxu1 %v14377_v17  ;;  %v14434_v17 = vld [vmem:[%s18777_s9 + $0x20] ss:$16 sps:$4 sm:$0xff]  }
 0x6d2   : > { %v13527_v28 = vpop.f32.mrb[89].mxu1  ;;  %10149 = vmatprep.subr.bf16.mxu1 %v14436_v45  ;;  %v10070_v45 = vld [vmem:[%s456_s27] sm:$0xf] }
 0x6d3   : > { %v13528_v36 = vadd.f32 %v13527_v28, %v13526_v4  ;;  %v13529_v15 = vpop.f32.mrb[90].mxu1 }
 0x6d4   : > { %v13530_v37 = vpop.f32.mrb[91].mxu1 }
 0x6d5   : > { %v13531_v46 = vadd.f32 %v13530_v37, %v13529_v15  ;;  %v17464_v10 = vadd.f32 %v13528_v36, %v8409_v50  ;;  %v14382_v50 = vld [vmem:[%s18776_s8 + $0xa4] ss:$16 sps:$4 sm:$0xff]   ;;  %v14380_v36 = vld [vmem:[%s18776_s8 + $0xa0] ss:$16 sps:$4 sm:$0xff]   ;;  %10150 = vmatpush1.bf16.msra.mxu1 %v14434_v17 }
 0x6d6   : > { %11547 = vmatprep.subr.bf16.mxu0 %v14382_v50 }
 0x6d7   : > { %v17466_v2 = vadd.f32 %v13531_v46, %v8412_v54  ;;  %11548 = vmatpush1.bf16.msra.mxu0 %v14380_v36 }
 0x6d9   : > { %v13532_v42 = vpop.f32.mrb[92].mxu1 }
 0x6da   : > { %v13533_v35 = vpop.f32.mrb[93].mxu1 }
 0x6db   : > { %v13534_v43 = vadd.f32 %v13533_v35, %v13532_v42  ;;  %v13535_v22 = vpop.f32.mrb[94].mxu1  ;;  %v8436_v42 = vadd.f32 %v17349_v5, %v17392_v9 }
 0x6dc   : > { %v13536_v8 = vpop.f32.mrb[95].mxu1 }
 0x6dd   : > { %v13537_v59 = vadd.f32 %v13536_v8, %v13535_v22  ;;  %v17478_v56 = vadd.f32 %v13534_v43, %v8417_v0 }
 0x6df   : > { %v17480_v44 = vadd.f32 %v13537_v59, %v8420_v55 }
 0x6e1   : > { %v13538_v20 = vpop.f32.mrb[96].mxu1 }
 0x6e2   : > { %v13539_v41 = vpop.f32.mrb[97].mxu1 }
 0x6e3   : > { %v13540_v63 = vadd.f32 %v13539_v41, %v13538_v20  ;;  %v13541_v21 = vpop.f32.mrb[98].mxu1 }
 0x6e4   : > { %v13542_v6 = vpop.f32.mrb[99].mxu1 }
 0x6e5   : > { %v13543_v4 = vadd.f32 %v13542_v6, %v13541_v21  ;;  %v17498_v28 = vadd.f32 %v13540_v63, %v8425_v33  ;;  %v14415_v33 = vld [vmem:[%s18776_s8 + $0xc0] ss:$16 sps:$4 sm:$0xff]   ;;  %v14417_v63 = vld [vmem:[%s18776_s8 + $0xc4] ss:$16 sps:$4 sm:$0xff]  }
 0x6e6   : > { %11549 = vmatprep.subr.bf16.mxu0 %v14417_v63 }
 0x6e7   : > { %v17506_v15 = vadd.f32 %v13543_v4, %v8428_v30  ;;  %11550 = vmatpush1.bf16.msra.mxu0 %v14415_v33  ;;  %v8452_v30 = vadd.f32 %v17363_v49, %v17392_v9  ;;  %v8465_v33 = vadd.f32 %v17375_v53, %v17392_v9  ;;  %v14470_v53 = vld [vmem:[%s18777_s9 + $0x2c] ss:$16 sps:$4 sm:$0xff]  }
 0x6e9   : > { %v13544_v23 = vpop.f32.mrb[100].mxu1 }
 0x6ea   : > { %v13545_v48 = vpop.f32.mrb[101].mxu1 }
 0x6eb   : > { %v13546_v37 = vadd.f32 %v13545_v48, %v13544_v23  ;;  %v13547_v54 = vpop.f32.mrb[102].mxu1  ;;  %v8457_v48 = vadd.f32 %v17369_v61, %v17392_v9  ;;  %v14458_v61 = vld [vmem:[%s18776_s8 + $0x104] ss:$16 sps:$4 sm:$0xff]  }
 0x6ec   : > { %v13548_v46 = vpop.f32.mrb[103].mxu1 }
 0x6ed   : > { %v13549_v35 = vadd.f32 %v13548_v46, %v13547_v54  ;;  %v17512_v0 = vadd.f32 %v13546_v37, %v8433_v26  ;;  %v8460_v46 = vadd.f32 %v17371_v62, %v17392_v9  ;;  %v14459_v62 = vld [vmem:[%s18777_s9 + $0x40] ss:$16 sps:$4 sm:$0xff]  }
 0x6ef   : > { %v17514_v43 = vadd.f32 %v13549_v35, %v8436_v42  ;;  %v14453_v35 = vld [vmem:[%s18776_s8 + $0xe0] ss:$16 sps:$4 sm:$0xff]  }
 0x6f1   : > { %v13550_v22 = vpop.f32.mrb[104].mxu1 }
 0x6f2   : > { %v13551_v27 = vpop.f32.mrb[105].mxu1 }
 0x6f3   : > { %v13552_v8 = vadd.f32 %v13551_v27, %v13550_v22  ;;  %v13553_v55 = vpop.f32.mrb[106].mxu1  ;;  %v14455_v22 = vld [vmem:[%s18776_s8 + $0xe4] ss:$16 sps:$4 sm:$0xff]  }
 0x6f4   : > { %v13554_v59 = vpop.f32.mrb[107].mxu1  ;;  %v14461_v27 = vld [vmem:[%s18777_s9 + $0x44] ss:$16 sps:$4 sm:$0xff]   ;;  %11551 = vmatprep.subr.bf16.mxu0 %v14455_v22 }
 0x6f5   : > { %v13555_v20 = vadd.f32 %v13554_v59, %v13553_v55  ;;  %v17520_v41 = vadd.f32 %v13552_v8, %v8441_v19  ;;  %11552 = vmatpush1.bf16.msra.mxu0 %v14453_v35  ;;  %v14456_v8 = vld [vmem:[%s18776_s8 + $0x100] ss:$16 sps:$4 sm:$0xff]   ;;  %10151 = vmatprep.subr.bf16.mxu1 %v14461_v27  ;;  %v14467_v55 = vld [vmem:[%s18777_s9 + $0xc] ss:$16 sps:$4 sm:$0xff]   ;;  %v14479_v22 = vld [vmem:[%s18776_s8 + $0x204] ss:$16 sps:$4 sm:$0xff]  }
 0x6f6   : > { %11553 = vmatprep.subr.bf16.mxu0 %v14458_v61  ;;  %10152 = vmatpush1.bf16.msra.mxu1 %v14459_v62  ;;  %v14480_v61 = vld [vmem:[%s18776_s8 + $0x160] ss:$16 sps:$4 sm:$0xff]  }
 0x6f7   : > { %v17522_v5 = vadd.f32 %v13555_v20, %v8444_v32  ;;  %v14464_v32 = vld [vmem:[%s18776_s8 + $0x124] ss:$16 sps:$4 sm:$0xff]   ;;  %10188 = vmatprep.subr.bf16.mxu1 %v14467_v55 }
 0x6f9   : > { %v13556_v14 = vpop.f32.mrb[108].mxu1  ;;  %11554 = vmatpush1.bf16.msra.mxu0 %v14456_v8  ;;  %13060 = vmatmul.mubr.msk.bf16.vlgmr.msra.gmra.mrb[160].mxu1 %vm10143_vm13, %v10070_v45  ;;  %v14494_v8 = vld [vmem:[%s18776_s8 + $0x184] ss:$16 sps:$4 sm:$0xff]  }
 0x6fa   : > { %v13557_v21 = vpop.f32.mrb[109].mxu1  ;;  %11555 = vmatprep.subr.bf16.mxu0 %v14464_v32  ;;  %10220 = vmatprep.mubr.bf16.mxu1 %v14946_v1  ;;  %v8473_v1 = vadd.f32 %v17381_v60, %v17392_v9  ;;  %v8476_v60 = vadd.f32 %v17383_v24, %v17392_v9  ;;  %v14485_v24 = vld [vmem:[%s18776_s8 + $0x224] ss:$16 sps:$4 sm:$0xff]   ;;  %v14492_v32 = vld [vmem:[%s18776_s8 + $0x180] ss:$16 sps:$4 sm:$0xff]  }
 0x6fb   : > { %v13558_v29 = vadd.f32 %v13557_v21, %v13556_v14  ;;  %v13559_v11 = vpop.f32.mrb[110].mxu1  ;;  %v14465_v21 = vld [vmem:[%s18777_s9 + $0x8] ss:$16 sps:$4 sm:$0xff]  }
 0x6fc   : > { %v13560_v6 = vpop.f32.mrb[111].mxu1  ;;  %10189 = vmatpush1.bf16.msra.mxu1 %v14465_v21 }
 0x6fd   : > { %v13561_v4 = vadd.f32 %v13560_v6, %v13559_v11  ;;  %v17540_v50 = vadd.f32 %v13558_v29, %v8449_v57  ;;  %v14462_v29 = vld [vmem:[%s18776_s8 + $0x120] ss:$16 sps:$4 sm:$0xff]   ;;  %v8468_v11 = vadd.f32 %v17377_v47, %v17392_v9  ;;  %10190 = vmatprep.subr.bf16.mxu1 %v14470_v53 }
 0x6fe   : > { %11556 = vmatpush1.bf16.msra.mxu0 %v14462_v29  ;;  %v14471_v47 = vld [vmem:[%s18776_s8 + $0x140] ss:$16 sps:$4 sm:$0xff]  }
 0x6ff   : > { %v17542_v52 = vadd.f32 %v13561_v4, %v8452_v30  ;;  %v14473_v30 = vld [vmem:[%s18776_s8 + $0x144] ss:$16 sps:$4 sm:$0xff]   ;;  %v14483_v29 = vld [vmem:[%s18776_s8 + $0x220] ss:$16 sps:$4 sm:$0xff]  }
 0x700   : > { %11557 = vmatprep.subr.bf16.mxu0 %v14473_v30 }
 0x701   : > { %v13562_v36 = vpop.f32.mrb[112].mxu1 }
 0x702   : > { %v13563_v23 = vpop.f32.mrb[113].mxu1  ;;  %11558 = vmatpush1.bf16.msra.mxu0 %v14471_v47 }
 0x703   : > { %v13564_v26 = vadd.f32 %v13563_v23, %v13562_v36  ;;  %v13565_v37 = vpop.f32.mrb[114].mxu1  ;;  %v14468_v36 = vld [vmem:[%s18777_s9 + $0x28] ss:$16 sps:$4 sm:$0xff]   ;;  %v14476_v23 = vld [vmem:[%s18777_s9 + $0x4c] ss:$16 sps:$4 sm:$0xff]  }
 0x704   : > { %v13566_v54 = vpop.f32.mrb[115].mxu1  ;;  %10191 = vmatpush1.bf16.msra.mxu1 %v14468_v36  ;;  %v14518_v36 = vld [vmem:[%s18776_s8 + $0x1c4] ss:$16 sps:$4 sm:$0xff]  }
 0x705   : > { %v13567_v49 = vadd.f32 %v13566_v54, %v13565_v37  ;;  %v17548_v42 = vadd.f32 %v13564_v26, %v8457_v48  ;;  %v14482_v26 = vld [vmem:[%s18776_s8 + $0x164] ss:$16 sps:$4 sm:$0xff]   ;;  %10192 = vmatprep.subr.bf16.mxu1 %v14476_v23  ;;  %v14486_v23 = vld [vmem:[%s18776_s8 + $0x240] ss:$16 sps:$4 sm:$0xff]  }
 0x706   : > { %11559 = vmatprep.subr.bf16.mxu0 %v14482_v26 }
 0x707   : > { %v17565_v19 = vadd.f32 %v13567_v49, %v8460_v46  ;;  %v14474_v49 = vld [vmem:[%s18777_s9 + $0x48] ss:$16 sps:$4 sm:$0xff]   ;;  %11560 = vmatpush1.bf16.msra.mxu0 %v14480_v61 }
 0x708   : > { %10193 = vmatpush1.bf16.msra.mxu1 %v14474_v49  ;;  %11561 = vmatprep.subr.bf16.mxu0 %v14494_v8  ;;  %v14495_v8 = vld [vmem:[%s18776_s8 + $0x280] ss:$16 sps:$4 sm:$0xff]  }
 0x709   : > { %v13568_v59 = vpop.f32.mrb[116].mxu1  ;;  %11578 = vmatprep.subr.bf16.mxu1 %v14479_v22  ;;  %v14497_v22 = vld [vmem:[%s18776_s8 + $0x284] ss:$16 sps:$4 sm:$0xff]  }
 0x70a   : > { %v13569_v20 = vpop.f32.mrb[117].mxu1 }
 0x70b   : > { %v13570_v63 = vadd.f32 %v13569_v20, %v13568_v59  ;;  %v13571_v14 = vpop.f32.mrb[118].mxu1  ;;  %v14477_v59 = vld [vmem:[%s18776_s8 + $0x200] ss:$16 sps:$4 sm:$0xff]   ;;  %13061 = vmatmul.mubr.msk.bf16.vlgmr.msra.gmra.mrb[164].mxu1 %vm10143_vm13, %v10070_v45  ;;  %11562 = vmatpush1.bf16.msra.mxu0 %v14492_v32 }
 0x70c   : > { %v13572_v57 = vpop.f32.mrb[119].mxu1  ;;  %11579 = vmatpush1.bf16.msra.mxu1 %v14477_v59 }
 0x70d   : > { %v13573_v6 = vadd.f32 %v13572_v57, %v13571_v14  ;;  %v17597_v17 = vadd.f32 %v13570_v63, %v8465_v33  ;;  %v14506_v33 = vld [vmem:[%s18776_s8 + $0x1a4] ss:$16 sps:$4 sm:$0xff]   ;;  %v8481_v14 = vadd.f32 %v17385_v31, %v17392_v9  ;;  %11580 = vmatprep.subr.bf16.mxu1 %v14485_v24  ;;  %v8484_v31 = vadd.f32 %v17387_v58, %v17392_v9  ;;  %v14516_v9 = vld [vmem:[%s18776_s8 + $0x1c0] ss:$16 sps:$4 sm:$0xff]  }
 0x70e   : > { %11563 = vmatprep.subr.bf16.mxu0 %v14506_v33  ;;  %v14491_v58 = vld [vmem:[%s18776_s8 + $0x264] ss:$16 sps:$4 sm:$0xff]  }
 0x70f   : > { %v17603_v4 = vadd.f32 %v13573_v6, %v8468_v11  ;;  %v14488_v11 = vld [vmem:[%s18776_s8 + $0x244] ss:$16 sps:$4 sm:$0xff]   ;;  %v14504_v6 = vld [vmem:[%s18776_s8 + $0x1a0] ss:$16 sps:$4 sm:$0xff]  }
 0x710   : > { %11581 = vmatpush1.bf16.msra.mxu1 %v14483_v29  ;;  %11564 = vmatpush1.bf16.msra.mxu0 %v14504_v6  ;;  %v14503_v29 = vld [vmem:[%s18776_s8 + $0x2c4] ss:$16 sps:$4 sm:$0xff]  }
 0x711   : > { %v13574_v48 = vpop.f32.mrb[120].mxu1  ;;  %11582 = vmatprep.subr.bf16.mxu1 %v14488_v11  ;;  %11565 = vmatprep.subr.bf16.mxu0 %v14518_v36 }
 0x712   : > { %v13575_v37 = vpop.f32.mrb[121].mxu1 }
 0x713   : > { %v13576_v54 = vadd.f32 %v13575_v37, %v13574_v48  ;;  %v13577_v46 = vpop.f32.mrb[122].mxu1 }
 0x714   : > { %v13578_v35 = vpop.f32.mrb[123].mxu1  ;;  %11583 = vmatpush1.bf16.msra.mxu1 %v14486_v23  ;;  %11566 = vmatpush1.bf16.msra.mxu0 %v14516_v9  ;;  %v14507_v9 = vld [vmem:[%s18776_s8 + $0x2e0] ss:$16 sps:$4 sm:$0xff]  }
 0x715   : > { %v13579_v62 = vadd.f32 %v13578_v35, %v13577_v46  ;;  %v17631_v27 = vadd.f32 %v13576_v54, %v8473_v1  ;;  %v14489_v46 = vld [vmem:[%s18776_s8 + $0x260] ss:$16 sps:$4 sm:$0xff]   ;;  %11584 = vmatprep.subr.bf16.mxu1 %v14491_v58 }
 0x717   : > { %v17636_v55 = vadd.f32 %v13579_v62, %v8476_v60 }
 0x718   : > { %11585 = vmatpush1.bf16.msra.mxu1 %v14489_v46 }
 0x719   : > { %v13580_v20 = vpop.f32.mrb[124].mxu1  ;;  %11586 = vmatprep.subr.bf16.mxu1 %v14497_v22 }
 0x71a   : > { %v13581_v63 = vpop.f32.mrb[125].mxu1 }
 0x71b   : > { %v13582_v21 = vadd.f32 %v13581_v63, %v13580_v20  ;;  %v13583_v57 = vpop.f32.mrb[126].mxu1 }
 0x71c   : > { %v13584_v53 = vpop.f32.mrb[127].mxu1  ;;  %11587 = vmatpush1.bf16.msra.mxu1 %v14495_v8 }
 0x71d   : > { %v13585_v45 = vadd.f32 %v13584_v53, %v13583_v57  ;;  %v17664_v30 = vadd.f32 %v13582_v21, %v8481_v14  ;;  %v14498_v14 = vld [vmem:[%s18776_s8 + $0x2a0] ss:$16 sps:$4 sm:$0xff]  }
 0x71f   : > { %v17669_v47 = vadd.f32 %v13585_v45, %v8484_v31  ;;  %v14501_v31 = vld [vmem:[%s18776_s8 + $0x2c0] ss:$16 sps:$4 sm:$0xff]  }
 0x721   : > { %v13660_v48 = vpop.f32.mrb[128].mxu1 }
 0x722   : > { %v8691_v26 = vadd.f32 %v13660_v48, %v17406_v12  ;;  %v8682_v37 = vpop.f32.mrb[129].mxu1 }
 0x723   : > { %v8683_v1 = vadd.f32 %v8682_v37, %v17398_v18  ;;  %v13661_v54 = vpop.f32.mrb[130].mxu1  ;;  %v14512_v37 = vld [vmem:[%s18776_s8 + $0x304] ss:$16 sps:$4 sm:$0xff]  }
 0x724   : > { %v8694_v49 = vadd.f32 %v13661_v54, %v17408_v51  ;;  %v8685_v35 = vpop.f32.mrb[131].mxu1  ;;  %v8811_v61 = vmax.f32 %v8691_v26, 0.0  ;;  %v14500_v51 = vld [vmem:[%s18776_s8 + $0x2a4] ss:$16 sps:$4 sm:$0xff]  }
 0x725   : > { %v8686_v12 = vadd.f32 %v8685_v35, %v17400_v34  ;;  %v8809_v18 = vmax.f32 %v8683_v1, 0.0  ;;  %11588 = vmatprep.subr.bf16.mxu1 %v14500_v51  ;;  %v14510_v35 = vld [vmem:[%s18776_s8 + $0x300] ss:$16 sps:$4 sm:$0xff]  }
 0x726   : > { %v8812_v60 = vmax.f32 %v8694_v49, 0.0  ;;  %11589 = vmatpush1.bf16.msra.mxu1 %v14498_v14 }
 0x727   : > { %v8810_v62 = vmax.f32 %v8686_v12, 0.0  ;;  %11590 = vmatprep.subr.bf16.mxu1 %v14503_v29 }
 0x728   : > { %v8842_v59 = vpack.c.bf16 %v8812_v60, %v8811_v61  ;;  %v14515_v61 = vld [vmem:[%s18776_s8 + $0x324] ss:$16 sps:$4 sm:$0xff]  }
 0x729   : > { %v8841_v24 = vpack.c.bf16 %v8810_v62, %v8809_v18  ;;  %v13664_v32 = vpop.f32.mrb[132].mxu1 }
 0x72a   : > { %8858 = vst.msk [vmem:[#allocation6 + $0x8] sm:$0xff] %vm6361_vm7, %v8842_v59  ;;  %v8707_v34 = vadd.f32 %v13664_v32, %v17428_v40  ;;  %v8698_v20 = vpop.f32.mrb[133].mxu1  ;;  %11591 = vmatpush1.bf16.msra.mxu1 %v14501_v31  ;;  %v14521_v59 = vld [vmem:[%s18776_s8 + $0x344] ss:$16 sps:$4 sm:$0xff]  }
 0x72b   : > { %8857 = vst.msk [vmem:[#allocation6] sm:$0xff] %vm6361_vm7, %v8841_v24  ;;  %v8699_v33 = vadd.f32 %v8698_v20, %v17414_v16  ;;  %v13665_v63 = vpop.f32.mrb[134].mxu1 }
 0x72c   : > { %v8710_v21 = vadd.f32 %v13665_v63, %v17430_v13  ;;  %v8701_v57 = vpop.f32.mrb[135].mxu1  ;;  %v8815_v53 = vmax.f32 %v8707_v34, 0.0  ;;  %v14509_v13 = vld [vmem:[%s18776_s8 + $0x2e4] ss:$16 sps:$4 sm:$0xff]  }
 0x72d   : > { %v8702_v40 = vadd.f32 %v8701_v57, %v17416_v3  ;;  %v8813_v6 = vmax.f32 %v8699_v33, 0.0  ;;  %11592 = vmatprep.subr.bf16.mxu1 %v14509_v13 }
 0x72e   : > { %v8816_v11 = vmax.f32 %v8710_v21, 0.0  ;;  %11593 = vmatpush1.bf16.msra.mxu1 %v14507_v9  ;;  %v14519_v21 = vld [vmem:[%s18776_s8 + $0x340] ss:$16 sps:$4 sm:$0xff]  }
 0x72f   : > { %v8814_v16 = vmax.f32 %v8702_v40, 0.0  ;;  %11594 = vmatprep.subr.bf16.mxu1 %v14512_v37 }
 0x730   : > { %v8844_v45 = vpack.c.bf16 %v8816_v11, %v8815_v53  ;;  %v14524_v11 = vld [vmem:[%s18776_s8 + $0x364] ss:$16 sps:$4 sm:$0xff]  }
 0x731   : > { %v8843_v36 = vpack.c.bf16 %v8814_v16, %v8813_v6  ;;  %v13668_v23 = vpop.f32.mrb[136].mxu1  ;;  %v14418_v8 = vld [vmem:[#allocation6 + $0x8] ss:$0 sps:$4 sm:$0x11]  }
 0x732   : > { %8860 = vst.msk [vmem:[#allocation6 + $0x18] sm:$0xff] %vm6361_vm7, %v8844_v45  ;;  %v8723_v3 = vadd.f32 %v13668_v23, %v17450_v7  ;;  %v8714_v58 = vpop.f32.mrb[137].mxu1  ;;  %v14383_v32 = vld [vmem:[#allocation6] ss:$0 sps:$4 sm:$0x22]   ;;  %11595 = vmatpush1.bf16.msra.mxu1 %v14510_v35  ;;  %v9551_v31 = vunpack.c.l.b16 %v14418_v8 }
 0x733   : > { %8859 = vst.msk [vmem:[#allocation6 + $0x10] sm:$0xff] %vm6361_vm7, %v8843_v36  ;;  %v8715_v48 = vadd.f32 %v8714_v58, %v17442_v39  ;;  %v13669_v26 = vpop.f32.mrb[138].mxu1  ;;  %v14391_v34 = vld [vmem:[#allocation6] ss:$0 sps:$4 sm:$0x11]   ;;  %11596 = vmatprep.subr.bf16.mxu1 %v14515_v61  ;;  %v9087_v13 = vunpack.c.l.b16 %v14383_v32 }
 0x734   : > { %v8726_v1 = vadd.f32 %v13669_v26, %v17452_v25  ;;  %v8717_v54 = vpop.f32.mrb[139].mxu1  ;;  %v8819_v46 = vmax.f32 %v8723_v3, 0.0  ;;  %v14399_v20 = vld [vmem:[#allocation6 + $0x4] ss:$0 sps:$4 sm:$0x22]   ;;  %v8970_v36 = vunpack.c.l.b16 %v14391_v34 }
 0x735   : > { %v8718_v7 = vadd.f32 %v8717_v54, %v17444_v38  ;;  %v8817_v22 = vmax.f32 %v8715_v48, 0.0  ;;  %v14513_v38 = vld [vmem:[%s18776_s8 + $0x320] ss:$16 sps:$4 sm:$0xff]   ;;  %v14426_v14 = vld [vmem:[#allocation6 + $0x4] ss:$0 sps:$4 sm:$0x88]   ;;  %v9319_v23 = vunpack.c.l.b16 %v14399_v20 }
 0x736   : > { %v8820_v49 = vmax.f32 %v8726_v1, 0.0  ;;  %11597 = vmatpush1.bf16.msra.mxu1 %v14513_v38  ;;  %v14522_v3 = vld [vmem:[%s18776_s8 + $0x360] ss:$16 sps:$4 sm:$0xff]   ;;  %v14527_v26 = vld [vmem:[%s18776_s8 + $0x384] ss:$16 sps:$4 sm:$0xff]   ;;  %v17766_v61 = vrot.slane %v8970_v36, 1 }
 0x737   : > { %v8818_v39 = vmax.f32 %v8718_v7, 0.0  ;;  %11598 = vmatprep.subr.bf16.mxu1 %v14521_v59 }
 0x738   : > { %v8846_v12 = vpack.c.bf16 %v8820_v49, %v8819_v46  ;;  %v9435_v46 = vunpack.c.l.b16 %v14426_v14 }
 0x739   : > { %v8845_v25 = vpack.c.bf16 %v8818_v39, %v8817_v22  ;;  %v13672_v60 = vpop.f32.mrb[140].mxu1 }
 0x73a   : > { %8862 = vst.msk [vmem:[#allocation6 + $0x28] sm:$0xff] %vm6361_vm7, %v8846_v12  ;;  %v8739_v18 = vadd.f32 %v13672_v60, %v17478_v56  ;;  %v8730_v62 = vpop.f32.mrb[141].mxu1  ;;  %v14384_v40 = vld [vmem:[#allocation6 + $0x10] ss:$0 sps:$4 sm:$0x22]   ;;  %11599 = vmatpush1.bf16.msra.mxu1 %v14519_v21  ;;  %v17764_v12 = vrot.slane %v9087_v13, 3 }
 0x73b   : > { %8861 = vst.msk [vmem:[#allocation6 + $0x20] sm:$0xff] %vm6361_vm7, %v8845_v25  ;;  %v8731_v51 = vadd.f32 %v8730_v62, %v17464_v10  ;;  %v13673_v24 = vpop.f32.mrb[142].mxu1  ;;  %v14400_v6 = vld [vmem:[#allocation6 + $0x14] ss:$0 sps:$4 sm:$0x22]   ;;  %v9088_v54 = vunpack.c.l.b16 %v14384_v40  ;;  %11600 = vmatprep.subr.bf16.mxu1 %v14524_v11  ;;  %v17768_v25 = vrot.slane %v9319_v23, 2 }
 0x73c   : > { %v8742_v33 = vadd.f32 %v13673_v24, %v17480_v44  ;;  %v8733_v63 = vpop.f32.mrb[143].mxu1  ;;  %v8823_v57 = vmax.f32 %v8739_v18, 0.0  ;;  %v14408_v16 = vld [vmem:[#allocation6 + $0x14] ss:$0 sps:$4 sm:$0x11]   ;;  %v9320_v22 = vunpack.c.l.b16 %v14400_v6 }
 0x73d   : > { %v8734_v56 = vadd.f32 %v8733_v63, %v17466_v2  ;;  %v8821_v10 = vmax.f32 %v8731_v51, 0.0  ;;  %v14427_v7 = vld [vmem:[#allocation6 + $0x14] ss:$0 sps:$4 sm:$0x88]   ;;  %v9204_v62 = vunpack.c.l.b16 %v14408_v16  ;;  %v17770_v59 = vrot.slane %v9088_v54, 2 }
 0x73e   : > { %v8824_v29 = vmax.f32 %v8742_v33, 0.0  ;;  %v17772_v51 = vrot.slane %v9435_v46, 7  ;;  %11601 = vmatpush1.bf16.msra.mxu1 %v14522_v3  ;;  %v17777_v32 = vrot.slane %v9320_v22, 1  ;;  %v9436_v20 = vunpack.c.l.b16 %v14427_v7  ;;  %v17791_v23 = vld [vmem:[#allocation6 + $0x4] ss:$0 sps:$4 sm:$0x11]  }
 0x73f   : > { %v8822_v53 = vmax.f32 %v8734_v56, 0.0  ;;  %11602 = vmatprep.subr.bf16.mxu1 %v14527_v26  ;;  %v17783_v40 = vrot.slane %v9204_v62, 7  ;;  %v17795_v26 = vld [vmem:[#allocation6 + $0xc] ss:$0 sps:$4 sm:$0x11]  }
 0x740   : > { %v8848_v44 = vpack.c.bf16 %v8824_v29, %v8823_v57  ;;  %v14419_v7 = vld [vmem:[#allocation6 + $0x18] ss:$0 sps:$4 sm:$0x11]  }
 0x741   : > { %v8847_v2 = vpack.c.bf16 %v8822_v53, %v8821_v10  ;;  %v13676_v45 = vpop.f32.mrb[144].mxu1  ;;  %v14420_v56 = vld [vmem:[#allocation6 + $0x28] ss:$0 sps:$4 sm:$0x11]  }
 0x742   : > { %8864 = vst.msk [vmem:[#allocation6 + $0x38] sm:$0xff] %vm6361_vm7, %v8848_v44  ;;  %v8755_v58 = vadd.f32 %v13676_v45, %v17512_v0  ;;  %v8746_v9 = vpop.f32.mrb[145].mxu1  ;;  %v14385_v48 = vld [vmem:[#allocation6 + $0x20] ss:$0 sps:$4 sm:$0x22]   ;;  %v17761_v0 = vrot.slane %v9551_v31, 1  ;;  %v9553_v3 = vunpack.c.l.b16 %v14420_v56 }
 0x743   : > { %8863 = vst.msk [vmem:[#allocation6 + $0x30] sm:$0xff] %vm6361_vm7, %v8847_v2  ;;  %v8747_v37 = vadd.f32 %v8746_v9, %v17498_v28  ;;  %v13677_v1 = vpop.f32.mrb[146].mxu1  ;;  %v9089_v38 = vunpack.c.l.b16 %v14385_v48  ;;  %v14393_v18 = vld [vmem:[#allocation6 + $0x20] ss:$0 sps:$4 sm:$0x11]  }
 0x744   : > { %v8758_v49 = vadd.f32 %v13677_v1, %v17514_v43  ;;  %v8749_v35 = vpop.f32.mrb[147].mxu1  ;;  %v8827_v28 = vmax.f32 %v8755_v58, 0.0  ;;  %v14409_v34 = vld [vmem:[#allocation6 + $0x24] ss:$0 sps:$4 sm:$0x11]   ;;  %v8972_v29 = vunpack.c.l.b16 %v14393_v18 }
 0x745   : > { %v8750_v39 = vadd.f32 %v8749_v35, %v17506_v15  ;;  %v8825_v8 = vmax.f32 %v8747_v37, 0.0  ;;  %v14525_v15 = vld [vmem:[%s18776_s8 + $0x380] ss:$16 sps:$4 sm:$0xff]   ;;  %v17781_v57 = vrot.slane %v9089_v38, 1  ;;  %v9205_v31 = vunpack.c.l.b16 %v14409_v34 }
 0x746   : > { %v8828_v60 = vmax.f32 %v8758_v49, 0.0  ;;  %v14428_v44 = vld [vmem:[#allocation6 + $0x24] ss:$0 sps:$4 sm:$0x88]   ;;  %11603 = vmatpush1.bf16.msra.mxu1 %v14525_v15  ;;  %v17793_v9 = vrot.slane %v8972_v29, 7  ;;  %v9203_v34 = vunpack.c.l.b16 %v17791_v23 }
 0x747   : > { %v8826_v43 = vmax.f32 %v8750_v39, 0.0  ;;  %v14392_v45 = vld [vmem:[#allocation6 + $0x10] ss:$0 sps:$4 sm:$0x11]   ;;  %v17797_v54 = vrot.slane %v9205_v31, 6  ;;  %v17799_v39 = vrot.slane %v9553_v3, 7  ;;  %v9552_v31 = vunpack.c.l.b16 %v14419_v7 }
 0x748   : > { %v8850_v24 = vpack.c.bf16 %v8828_v60, %v8827_v28  ;;  %v9437_v28 = vunpack.c.l.b16 %v14428_v44  ;;  %v9329_v7 = vsel %vm8914_vm14, %v17777_v32, %v17768_v25 }
 0x749   : > { %v8849_v33 = vpack.c.bf16 %v8826_v43, %v8825_v8  ;;  %v13680_v63 = vpop.f32.mrb[148].mxu1  ;;  %v14421_v11 = vld [vmem:[#allocation6 + $0x38] ss:$0 sps:$4 sm:$0x11]  }
 0x74a   : > { %8866 = vst.msk [vmem:[#allocation6 + $0x48] sm:$0xff] %vm6361_vm7, %v8850_v24  ;;  %v8771_v14 = vadd.f32 %v13680_v63, %v17540_v50  ;;  %v8762_v21 = vpop.f32.mrb[149].mxu1  ;;  %v17788_v50 = vrot.slane %v9436_v20, 6  ;;  %v14394_v13 = vld [vmem:[#allocation6 + $0x30] ss:$0 sps:$4 sm:$0x11]   ;;  %v8971_v24 = vunpack.c.l.b16 %v14392_v45 }
 0x74b   : > { %8865 = vst.msk [vmem:[#allocation6 + $0x40] sm:$0xff] %vm6361_vm7, %v8849_v33  ;;  %v8763_v10 = vadd.f32 %v8762_v21, %v17520_v41  ;;  %v13681_v53 = vpop.f32.mrb[150].mxu1  ;;  %v14402_v36 = vld [vmem:[#allocation6 + $0x34] ss:$0 sps:$4 sm:$0x22]   ;;  %v8973_v22 = vunpack.c.l.b16 %v14394_v13  ;;  %v9783_v21 = vunpack.c.l.b16 %v17795_v26 }
 0x74c   : > { %v8774_v6 = vadd.f32 %v13681_v53, %v17542_v52  ;;  %v8765_v16 = vpop.f32.mrb[151].mxu1  ;;  %v8831_v41 = vmax.f32 %v8771_v14, 0.0  ;;  %v14410_v48 = vld [vmem:[#allocation6 + $0x34] ss:$0 sps:$4 sm:$0x11]   ;;  %v9322_v62 = vunpack.c.l.b16 %v14402_v36 }
 0x74d   : > { %v8766_v2 = vadd.f32 %v8765_v16, %v17522_v5  ;;  %v8829_v52 = vmax.f32 %v8763_v10, 0.0  ;;  %v9554_v5 = vunpack.c.l.b16 %v14421_v11  ;;  %v14429_v46 = vld [vmem:[#allocation6 + $0x34] ss:$0 sps:$4 sm:$0x88]   ;;  %v9206_v20 = vunpack.c.l.b16 %v14410_v48 }
 0x74e   : > { %v8832_v58 = vmax.f32 %v8774_v6, 0.0  ;;  %v17806_v33 = vld [vmem:[#allocation6 + $0x1c] ss:$0 sps:$4 sm:$0x11]   ;;  %v17813_v10 = vrot.slane %v8973_v22, 6  ;;  %v9438_v53 = vunpack.c.l.b16 %v14429_v46  ;;  %v17817_v11 = vrot.slane %v9437_v28, 5 }
 0x74f   : > { %v8830_v37 = vmax.f32 %v8766_v2, 0.0  ;;  %v17809_v14 = vrot.slane %v9554_v5, 6  ;;  %v14386_v13 = vld [vmem:[#allocation6 + $0x30] ss:$0 sps:$4 sm:$0x22]   ;;  %v17823_v23 = vrot.slane %v9206_v20, 5  ;;  %v9560_v22 = vsel %vm8914_vm14, %v9552_v31, %v17761_v0 }
 0x750   : > { %v8852_v1 = vpack.c.bf16 %v8832_v58, %v8831_v41  ;;  %v9097_v41 = vsel %vm8914_vm14, %v17770_v59, %v17764_v12  ;;  %v17833_v5 = vrot.slane %v9438_v53, 4  ;;  %v9445_v0 = vsel %vm8914_vm14, %v17788_v50, %v17772_v51 }
 0x751   : > { %v8851_v49 = vpack.c.bf16 %v8830_v37, %v8829_v52  ;;  %v13684_v35 = vpop.f32.mrb[152].mxu1  ;;  %v14422_v52 = vld [vmem:[#allocation6 + $0x48] ss:$0 sps:$4 sm:$0x11]   ;;  %v9099_v28 = vsel %vm8917_vm15, %v17781_v57, %v9097_v41 }
 0x752   : > { %8868 = vst.msk [vmem:[#allocation6 + $0x58] sm:$0xff] %vm6361_vm7, %v8852_v1  ;;  %v8787_v60 = vadd.f32 %v13684_v35, %v17597_v17  ;;  %v8778_v38 = vpop.f32.mrb[153].mxu1  ;;  %v14387_v18 = vld [vmem:[#allocation6 + $0x40] ss:$0 sps:$4 sm:$0x22]   ;;  %v9555_v20 = vunpack.c.l.b16 %v14422_v52 }
 0x753   : > { %8867 = vst.msk [vmem:[#allocation6 + $0x50] sm:$0xff] %vm6361_vm7, %v8851_v49  ;;  %v8779_v8 = vadd.f32 %v8778_v38, %v17548_v42  ;;  %v13685_v43 = vpop.f32.mrb[154].mxu1  ;;  %v14395_v15 = vld [vmem:[#allocation6 + $0x40] ss:$0 sps:$4 sm:$0x11]   ;;  %v9091_v17 = vunpack.c.l.b16 %v14387_v18 }
 0x754   : > { %v8790_v63 = vadd.f32 %v13685_v43, %v17603_v4  ;;  %v8781_v56 = vpop.f32.mrb[155].mxu1  ;;  %v17815_v42 = vld [vmem:[#allocation6 + $0x24] ss:$0 sps:$4 sm:$0x22]   ;;  %v8835_v44 = vmax.f32 %v8787_v60, 0.0  ;;  %v17819_v4 = vrot.slane %v9322_v62, 7  ;;  %v8974_v48 = vunpack.c.l.b16 %v14395_v15 }
 0x755   : > { %v8782_v29 = vadd.f32 %v8781_v56, %v17565_v19  ;;  %v14403_v16 = vld [vmem:[#allocation6 + $0x44] ss:$0 sps:$4 sm:$0x22]   ;;  %v8833_v2 = vmax.f32 %v8779_v8, 0.0  ;;  %v8979_v19 = vsel %vm8914_vm14, %v8971_v24, %v17766_v61  ;;  %v17828_v58 = vrot.slane %v9091_v17, 7 }
 0x756   : > { %v8836_v6 = vmax.f32 %v8790_v63, 0.0  ;;  %v14411_v36 = vld [vmem:[#allocation6 + $0x44] ss:$0 sps:$4 sm:$0x11]   ;;  %v9784_v61 = vunpack.c.l.b16 %v17806_v33  ;;  %v9321_v59 = vunpack.c.l.b16 %v17815_v42  ;;  %v9323_v35 = vunpack.c.l.b16 %v14403_v16 }
 0x757   : > { %v8834_v45 = vmax.f32 %v8782_v29, 0.0  ;;  %v9207_v38 = vunpack.c.l.b16 %v14411_v36  ;;  %v8984_v43 = vrot.slane %v8974_v48, 5  ;;  %v9090_v15 = vunpack.c.l.b16 %v14386_v13  ;;  %v14430_v63 = vld [vmem:[#allocation6 + $0x44] ss:$0 sps:$4 sm:$0x88]  }
 0x758   : > { %v8854_v3 = vpack.c.bf16 %v8836_v6, %v8835_v44  ;;  %v8981_v57 = vsel %vm8917_vm15, %v17793_v9, %v8979_v19  ;;  %v9330_v50 = vsel %vm8917_vm15, %v9321_v59, %v9329_v7  ;;  %v9565_v19 = vrot.slane %v9555_v20, 5 }
 0x759   : > { %v8853_v37 = vpack.c.bf16 %v8834_v45, %v8833_v2  ;;  %v13688_v1 = vpop.f32.mrb[156].mxu1  ;;  %v9217_v44 = vrot.slane %v9207_v38, 4  ;;  %v14423_v6 = vld [vmem:[#allocation6 + $0x58] ss:$0 sps:$4 sm:$0x11]   ;;  %v9100_v2 = vsel %vm8920_vm0, %v9090_v15, %v9099_v28  ;;  %v9562_v48 = vsel %vm8917_vm15, %v17799_v39, %v9560_v22 }
 0x75a   : > { %8870 = vst.msk [vmem:[#allocation6 + $0x68] sm:$0xff] %vm6361_vm7, %v8854_v3  ;;  %v8803_v46 = vadd.f32 %v13688_v1, %v17664_v30  ;;  %v8794_v49 = vpop.f32.mrb[157].mxu1  ;;  %v14388_v12 = vld [vmem:[#allocation6 + $0x50] ss:$0 sps:$4 sm:$0x22]   ;;  %v9212_v30 = vsel %vm8914_vm14, %v17783_v40, %v9203_v34  ;;  %v9556_v13 = vunpack.c.l.b16 %v14423_v6  ;;  %v9439_v52 = vunpack.c.l.b16 %v14430_v63 }
 0x75b   : > { %8869 = vst.msk [vmem:[#allocation6 + $0x60] sm:$0xff] %vm6361_vm7, %v8853_v37  ;;  %v8795_v25 = vadd.f32 %v8794_v49, %v17631_v27  ;;  %v13689_v32 = vpop.f32.mrb[158].mxu1  ;;  %v14396_v60 = vld [vmem:[#allocation6 + $0x50] ss:$0 sps:$4 sm:$0x11]   ;;  %v9092_v8 = vunpack.c.l.b16 %v14388_v12  ;;  %v9214_v41 = vsel %vm8917_vm15, %v17797_v54, %v9212_v30  ;;  %v8983_v1 = vsel %vm8920_vm0, %v17813_v10, %v8981_v57 }
 0x75c   : > { %v8806_v18 = vadd.f32 %v13689_v32, %v17669_v47  ;;  %v8797_v62 = vpop.f32.mrb[159].mxu1  ;;  %v14404_v24 = vld [vmem:[#allocation6 + $0x54] ss:$0 sps:$4 sm:$0x22]   ;;  %v8839_v56 = vmax.f32 %v8803_v46, 0.0  ;;  %v8975_v34 = vunpack.c.l.b16 %v14396_v60  ;;  %v9333_v47 = vrot.slane %v9323_v35, 6 }
 0x75d   : > { %v8798_v27 = vadd.f32 %v8797_v62, %v17636_v55  ;;  %v14412_v17 = vld [vmem:[#allocation6 + $0x54] ss:$0 sps:$4 sm:$0x11]   ;;  %v8837_v29 = vmax.f32 %v8795_v25, 0.0  ;;  %v9324_v53 = vunpack.c.l.b16 %v14404_v24  ;;  %v9103_v55 = vrot.slane %v9092_v8, 6 }
 0x75e   : > { %v8840_v40 = vmax.f32 %v8806_v18, 0.0  ;;  %v9208_v16 = vunpack.c.l.b16 %v14412_v17  ;;  %v14431_v9 = vld [vmem:[#allocation6 + $0x54] ss:$0 sps:$4 sm:$0x88]   ;;  %v8986_v3 = vrot.slane %v8975_v34, 4  ;;  %v9564_v49 = vsel %vm8920_vm0, %v17809_v14, %v9562_v48 }
 0x75f   : > { %v8838_v42 = vmax.f32 %v8798_v27, 0.0  ;;  %v9335_v7 = vrot.slane %v9324_v53, 5  ;;  %v9440_v54 = vunpack.c.l.b16 %v14431_v9  ;;  %v9447_v39 = vsel %vm8917_vm15, %v17817_v11, %v9445_v0  ;;  %v14439_v57 = vld [vmem:[#allocation6 + $0x2c] ss:$0 sps:$4 sm:$0x11]  }
 0x760   : > { %v8856_v51 = vpack.c.bf16 %v8840_v40, %v8839_v56  ;;  %v9219_v35 = vrot.slane %v9208_v16, 3  ;;  %v9332_v25 = vsel %vm8920_vm0, %v17819_v4, %v9330_v50  ;;  %v9216_v10 = vsel %vm8920_vm0, %v17823_v23, %v9214_v41 }
 0x761   : > { %v8855_v31 = vpack.c.bf16 %v8838_v42, %v8837_v29  ;;  %v14424_v45 = vld [vmem:[#allocation6 + $0x68] ss:$0 sps:$4 sm:$0x11]   ;;  %v9567_v28 = vrot.slane %v9556_v13, 4  ;;  %v9102_v14 = vsel %vm8923_vm1, %v17828_v58, %v9100_v2  ;;  %v9449_v30 = vsel %vm8920_vm0, %v17833_v5, %v9447_v39 }
 0x762   : > { %8872 = vst.msk [vmem:[#allocation6 + $0x78] sm:$0xff] %vm6361_vm7, %v8856_v51  ;;  %v14389_v36 = vld [vmem:[#allocation6 + $0x60] ss:$0 sps:$4 sm:$0x22]   ;;  %v9557_v46 = vunpack.c.l.b16 %v14424_v45  ;;  %v9450_v18 = vrot.slane %v9439_v52, 3  ;;  %v8985_v62 = vsel %vm8923_vm1, %v8984_v43, %v8983_v1  ;;  %v9452_v23 = vrot.slane %v9440_v54, 2 }
 0x763   : > { %8871 = vst.msk [vmem:[#allocation6 + $0x70] sm:$0xff] %vm6361_vm7, %v8855_v31  ;;  %v14397_v37 = vld [vmem:[#allocation6 + $0x60] ss:$0 sps:$4 sm:$0x11]   ;;  %v9093_v12 = vunpack.c.l.b16 %v14389_v36  ;;  %v9104_v24 = vsel %vm8926_vm2, %v9103_v55, %v9102_v14  ;;  %v9334_v58 = vsel %vm8923_vm1, %v9333_v47, %v9332_v25  ;;  %v9218_v20 = vsel %vm8923_vm1, %v9217_v44, %v9216_v10 }
 0x764   : > { %v14405_v59 = vld [vmem:[#allocation6 + $0x64] ss:$0 sps:$4 sm:$0x22]   ;;  %v8976_v22 = vunpack.c.l.b16 %v14397_v37  ;;  %v9569_v4 = vrot.slane %v9557_v46, 3  ;;  %v9791_v5 = vrot.slane %v9784_v61, 7  ;;  %v8987_v43 = vsel %vm8926_vm2, %v8986_v3, %v8985_v62 }
 0x765   : > { %v14413_v32 = vld [vmem:[#allocation6 + $0x64] ss:$0 sps:$4 sm:$0x11]   ;;  %v9325_v60 = vunpack.c.l.b16 %v14405_v59  ;;  %v9105_v11 = vrot.slane %v9093_v12, 5  ;;  %v9566_v34 = vsel %vm8923_vm1, %v9565_v19, %v9564_v49  ;;  %v9785_v17 = vunpack.c.l.b16 %v14439_v57 }
 0x766   : > { %v14432_v38 = vld [vmem:[#allocation6 + $0x64] ss:$0 sps:$4 sm:$0x88]   ;;  %v9209_v8 = vunpack.c.l.b16 %v14413_v32  ;;  %v8988_v0 = vrot.slane %v8976_v22, 3  ;;  %v9336_v42 = vsel %vm8926_vm2, %v9335_v7, %v9334_v58  ;;  %v9220_v53 = vsel %vm8926_vm2, %v9219_v35, %v9218_v20 }
 0x767   : > { %v9337_v27 = vrot.slane %v9325_v60, 4  ;;  %v9441_v15 = vunpack.c.l.b16 %v14432_v38  ;;  %v9568_v55 = vsel %vm8926_vm2, %v9567_v28, %v9566_v34  ;;  %v9451_v33 = vsel %vm8923_vm1, %v9450_v18, %v9449_v30  ;;  %v14440_v37 = vld [vmem:[#allocation6 + $0x3c] ss:$0 sps:$4 sm:$0x11]  }
 0x768   : > { %v9221_v40 = vrot.slane %v9209_v8, 2  ;;  %v9793_v61 = vrot.slane %v9785_v17, 6  ;;  %v9106_v50 = vsel %vm8929_vm3, %v9105_v11, %v9104_v24  ;;  %v9570_v31 = vsel %vm8929_vm3, %v9569_v4, %v9568_v55  ;;  %v14441_v59 = vld [vmem:[#allocation6 + $0x4c] ss:$0 sps:$4 sm:$0x11]  }
 0x769   : > { %v14425_v63 = vld [vmem:[#allocation6 + $0x78] ss:$0 sps:$4 sm:$0x11]   ;;  %v9454_v47 = vrot.slane %v9441_v15, 1  ;;  %v8989_v13 = vsel %vm8929_vm3, %v8988_v0, %v8987_v43  ;;  %v9453_v3 = vsel %vm8926_vm2, %v9452_v23, %v9451_v33  ;;  %v9338_v48 = vsel %vm8929_vm3, %v9337_v27, %v9336_v42 }
 0x76a   : > { %v14390_v56 = vld [vmem:[#allocation6 + $0x70] ss:$0 sps:$4 sm:$0x22]   ;;  %v9558_v6 = vunpack.c.l.b16 %v14425_v63  ;;  %v14406_v44 = vld [vmem:[#allocation6 + $0x74] ss:$0 sps:$4 sm:$0x22]   ;;  %v9792_v1 = vsel %vm8914_vm14, %v9791_v5, %v9783_v21  ;;  %v9222_v49 = vsel %vm8929_vm3, %v9221_v40, %v9220_v53  ;;  %v9786_v25 = vunpack.c.l.b16 %v14440_v37 }
 0x76b   : > { %v14398_v29 = vld [vmem:[#allocation6 + $0x70] ss:$0 sps:$4 sm:$0x11]   ;;  %v9094_v51 = vunpack.c.l.b16 %v14390_v56  ;;  %v14414_v9 = vld [vmem:[#allocation6 + $0x74] ss:$0 sps:$4 sm:$0x11]   ;;  %v9326_v19 = vunpack.c.l.b16 %v14406_v44  ;;  %v9455_v26 = vsel %vm8929_vm3, %v9454_v47, %v9453_v3  ;;  %v9787_v14 = vunpack.c.l.b16 %v14441_v59 }
 0x76c   : > { %v8977_v16 = vunpack.c.l.b16 %v14398_v29  ;;  %v9571_v2 = vrot.slane %v9558_v6, 2  ;;  %v14433_v36 = vld [vmem:[#allocation6 + $0x74] ss:$0 sps:$4 sm:$0x88]   ;;  %v9210_v52 = vunpack.c.l.b16 %v14414_v9  ;;  %v9794_v18 = vsel %vm8917_vm15, %v9793_v61, %v9792_v1 }
 0x76d   : > { %v9107_v45 = vrot.slane %v9094_v51, 4  ;;  %v9339_v46 = vrot.slane %v9326_v19, 3  ;;  %v9442_v12 = vunpack.c.l.b16 %v14433_v36  ;;  %v14442_v22 = vld [vmem:[#allocation6 + $0x5c] ss:$0 sps:$4 sm:$0x11]   ;;  %v9795_v4 = vrot.slane %v9786_v25, 5 }
 0x76e   : > { %v8990_v41 = vrot.slane %v8977_v16, 2  ;;  %v9223_v39 = vrot.slane %v9210_v52, 1  ;;  %v14443_v28 = vld [vmem:[#allocation6 + $0x6c] ss:$0 sps:$4 sm:$0x11]   ;;  %v9572_v38 = vsel %vm8932_vm4, %v9571_v2, %v9570_v31  ;;  %v9788_v30 = vunpack.c.l.b16 %v14442_v22 }
 0x76f   : > { %v9108_v7 = vsel %vm8932_vm4, %v9107_v45, %v9106_v50  ;;  %v9340_v10 = vsel %vm8932_vm4, %v9339_v46, %v9338_v48  ;;  %v14444_v21 = vld [vmem:[#allocation6 + $0x7c] ss:$0 sps:$4 sm:$0x11]   ;;  %v9456_v11 = vsel %vm8932_vm4, %v9442_v12, %v9455_v26  ;;  %v9789_v62 = vunpack.c.l.b16 %v14443_v28  ;;  %v14445_v0 = vld [vmem:[#allocation6 + $0x8] ss:$0 sps:$4 sm:$0x88]  }
 0x770   : > { %v9109_v35 = vpack.c.b16 %v9108_v7, %v9108_v7  ;;  %v8991_v54 = vsel %vm8932_vm4, %v8990_v41, %v8989_v13  ;;  %v9224_v60 = vsel %vm8932_vm4, %v9223_v39, %v9222_v49  ;;  %v9790_v8 = vunpack.c.l.b16 %v14444_v21  ;;  %v14446_v24 = vld [vmem:[#allocation6 + $0x18] ss:$0 sps:$4 sm:$0x88]   ;;  %v14447_v5 = vld [vmem:[#allocation6 + $0x28] ss:$0 sps:$4 sm:$0x88]  }
 0x771   : > { %v8992_v32 = vpack.c.b16 %v8991_v54, %v8991_v54  ;;  %v9341_v27 = vpack.c.b16 %v9340_v10, %v9340_v10  ;;  %v9225_v15 = vpack.c.b16 %v9224_v60, %v9224_v60  ;;  %v9797_v23 = vrot.slane %v9787_v14, 4  ;;  %v14448_v40 = vld [vmem:[#allocation6 + $0x38] ss:$0 sps:$4 sm:$0x88]  }
 0x772   : > { %9110 = vrot.lane.b32.xlu1 %v9109_v35, %s14948_s28  ;;  %v9799_v57 = vrot.slane %v9788_v30, 3  ;;  %v9796_v58 = vsel %vm8920_vm0, %v9795_v4, %v9794_v18  ;;  %v9801_v20 = vrot.slane %v9789_v62, 2  ;;  %v9803_v63 = vrot.slane %v9790_v8, 1  ;;  %v14449_v34 = vld [vmem:[#allocation6 + $0x48] ss:$0 sps:$4 sm:$0x88]  }
 0x773   : > { %8993 = vrot.lane.b32.xlu0 %v8992_v32, %s14948_s28  ;;  %v9667_v56 = vunpack.c.l.b16 %v14445_v0  ;;  %v9798_v43 = vsel %vm8923_vm1, %v9797_v23, %v9796_v58  ;;  %v9668_v17 = vunpack.c.l.b16 %v14446_v24  ;;  %v9573_v29 = vpack.c.b16 %v9572_v38, %v9572_v38  ;;  %v14450_v53 = vld [vmem:[#allocation6 + $0x58] ss:$0 sps:$4 sm:$0x88]   ;;  %v14451_v6 = vld [vmem:[#allocation6 + $0x68] ss:$0 sps:$4 sm:$0x88]  }
 0x774   : > { %v9800_v42 = vsel %vm8926_vm2, %v9799_v57, %v9798_v43  ;;  %v9669_v47 = vunpack.c.l.b16 %v14447_v5  ;;  %v9457_v51 = vpack.c.b16 %v9456_v11, %v9456_v11  ;;  %v14452_v55 = vld [vmem:[#allocation6 + $0x78] ss:$0 sps:$4 sm:$0x88]   ;;  %v9670_v33 = vunpack.c.l.b16 %v14448_v40  ;;  %v14528_v1 = vld [vmem:[#allocation6 + $0x10] ss:$0 sps:$4 sm:$0x22]  }
 0x775   : > { %v9802_v44 = vsel %vm8929_vm3, %v9801_v20, %v9800_v42  ;;  %v9671_v61 = vunpack.c.l.b16 %v14449_v34  ;;  %v9672_v16 = vunpack.c.l.b16 %v14450_v53  ;;  %v9675_v9 = vrot.slane %v9667_v56, 6  ;;  %v14529_v46 = vld [vmem:[#allocation6 + $0x20] ss:$0 sps:$4 sm:$0x22]  }
 0x776   : > { %9342 = vrot.lane.b32.xlu1 %v9341_v27, %s14948_s28  ;;  %v9804_v50 = vsel %vm8932_vm4, %v9803_v63, %v9802_v44  ;;  %v9676_v31 = vrot.slane %v9668_v17, 5  ;;  %v9674_v2 = vunpack.c.l.b16 %v14452_v55  ;;  %v9678_v45 = vrot.slane %v9669_v47, 4  ;;  %v14530_v49 = vld [vmem:[#allocation6 + $0x30] ss:$0 sps:$4 sm:$0x22]  }
 0x777   : > { %9226 = vrot.lane.b32.xlu0 %v9225_v15, %s14948_s28  ;;  %v9680_v13 = vrot.slane %v9670_v33, 3  ;;  %v9682_v36 = vrot.slane %v9671_v61, 2  ;;  %v9684_v3 = vrot.slane %v9672_v16, 1  ;;  %v9805_v41 = vpack.c.b16 %v9804_v50, %v9804_v50  ;;  %v14531_v59 = vld [vmem:[#allocation6 + $0x40] ss:$0 sps:$4 sm:$0x22]  }
 0x778   : > { %v9677_v19 = vsel %vm8914_vm14, %v9676_v31, %v9675_v9  ;;  %v9673_v48 = vunpack.c.l.b16 %v14451_v6  ;;  %v9687_v37 = vrot.slane %v9674_v2, 7  ;;  %v14532_v35 = vld [vmem:[#allocation6 + $0x50] ss:$0 sps:$4 sm:$0x22]   ;;  %v9031_v54 = vunpack.c.l.b16 %v14528_v1  ;;  %v14546_v55 = vld [vmem:[%s18776_s8 + $0x1e4] ss:$16 sps:$4 sm:$0xff]  }
 0x779   : > { %v9679_v52 = vsel %vm8917_vm15, %v9678_v45, %v9677_v19  ;;  %v14533_v22 = vld [vmem:[#allocation6 + $0x60] ss:$0 sps:$4 sm:$0x22]   ;;  %v14534_v25 = vld [vmem:[#allocation6 + $0x70] ss:$0 sps:$4 sm:$0x22]   ;;  %v9033_v32 = vunpack.c.l.b16 %v14530_v49  ;;  %v9034_v26 = vunpack.c.l.b16 %v14531_v59  ;;  %v9035_v28 = vunpack.c.l.b16 %v14532_v35  ;;  %11567 = vmatprep.subr.bf16.mxu0 %v14546_v55 }
 0x77a   : > { %9574 = vrot.lane.b32.xlu1 %v9573_v29, %s14948_s28  ;;  %v9681_v7 = vsel %vm8920_vm0, %v9680_v13, %v9679_v52  ;;  %v14535_v21 = vld [vmem:[#allocation6] ss:$0 sps:$4 sm:$0x22]   ;;  %v9036_v60 = vunpack.c.l.b16 %v14533_v22  ;;  %v9037_v38 = vunpack.c.l.b16 %v14534_v25  ;;  %v9039_v18 = vrot.slane %v9031_v54, 1  ;;  %v14549_v31 = vld [vmem:[%s18776_s8 + $0x3a4] ss:$16 sps:$4 sm:$0xff]  }
 0x77b   : > { %9458 = vrot.lane.b32.xlu0 %v9457_v51, %s14948_s28  ;;  %v9683_v12 = vsel %vm8923_vm1, %v9682_v36, %v9681_v7  ;;  %v9042_v11 = vrot.slane %v9033_v32, 7  ;;  %v9030_v62 = vunpack.c.l.b16 %v14535_v21  ;;  %v9032_v8 = vunpack.c.l.b16 %v14529_v46  ;;  %v14536_v57 = vld [vmem:[#allocation6 + $0x10] ss:$0 sps:$4 sm:$0x11]   ;;  %11604 = vmatprep.subr.bf16.mxu1 %v14549_v31  ;;  %v14568_v31 = vld [vmem:[%s18776_s8 + $0x3c4] ss:$16 sps:$4 sm:$0xff]  }
 0x77c   : > { %v9685_v39 = vsel %vm8926_vm2, %v9684_v3, %v9683_v12  ;;  %v9044_v4 = vrot.slane %v9034_v26, 6  ;;  %v9046_v0 = vrot.slane %v9035_v28, 5  ;;  %v9048_v27 = vrot.slane %v9036_v60, 4  ;;  %v14537_v24 = vld [vmem:[#allocation6 + $0x20] ss:$0 sps:$4 sm:$0x11]  }
 0x77d   : > { %v9686_v10 = vsel %vm8929_vm3, %v9673_v48, %v9685_v39  ;;  %v9050_v15 = vrot.slane %v9037_v38, 3  ;;  %v9038_v23 = vrot.slane %v9030_v62, 2  ;;  %v14538_v58 = vld [vmem:[#allocation6 + $0x30] ss:$0 sps:$4 sm:$0x11]   ;;  %v8906_v43 = vunpack.c.l.b16 %v14536_v57 }
 0x77e   : > { %9806 = vrot.lane.b32.xlu1 %v9805_v41, %s14948_s28  ;;  %v9688_v14 = vsel %vm8932_vm4, %v9687_v37, %v9686_v10  ;;  %v14544_v20 = vld [vmem:[%s18776_s8 + $0x1e0] ss:$16 sps:$4 sm:$0xff]   ;;  %v8907_v29 = vunpack.c.l.b16 %v14537_v24  ;;  %v8908_v42 = vunpack.c.l.b16 %v14538_v58  ;;  %v14550_v46 = vld [vmem:[#allocation6 + $0x4] ss:$0 sps:$4 sm:$0x11]  }
 0x77f   : > { %v9689_v30 = vpack.c.b16 %v9688_v14, %v9688_v14  ;;  %v9040_v63 = vsel %vm8914_vm14, %v9039_v18, %v9038_v23  ;;  %v14539_v5 = vld [vmem:[#allocation6 + $0x40] ss:$0 sps:$4 sm:$0x11]   ;;  %v14540_v56 = vld [vmem:[#allocation6 + $0x50] ss:$0 sps:$4 sm:$0x11]   ;;  %11568 = vmatpush1.bf16.msra.mxu0 %v14544_v20  ;;  %v9262_v25 = vunpack.c.l.b16 %v14550_v46 }
 0x780   : > { %v9041_v40 = vsel %vm8917_vm15, %v9032_v8, %v9040_v63  ;;  %v14541_v34 = vld [vmem:[#allocation6 + $0x60] ss:$0 sps:$4 sm:$0x11]   ;;  %v14542_v17 = vld [vmem:[#allocation6 + $0x70] ss:$0 sps:$4 sm:$0x11]   ;;  %v8909_v6 = vunpack.c.l.b16 %v14539_v5  ;;  %v8910_v47 = vunpack.c.l.b16 %v14540_v56 }
 0x781   : > { %9690 = vrot.lane.b32.xlu0 %v9689_v30, %s14948_s28  ;;  %v9043_v53 = vsel %vm8920_vm0, %v9042_v11, %v9041_v40  ;;  %v8913_v51 = vrot.slane %v8906_v43, 7  ;;  %v14543_v44 = vld [vmem:[#allocation6] ss:$0 sps:$4 sm:$0x11]   ;;  %v8911_v61 = vunpack.c.l.b16 %v14541_v34  ;;  %v8912_v50 = vunpack.c.l.b16 %v14542_v17 }
 0x782   : > { %v9045_v33 = vsel %vm8923_vm1, %v9044_v4, %v9043_v53  ;;  %v8916_v16 = vrot.slane %v8907_v29, 6  ;;  %v14547_v9 = vld [vmem:[%s18776_s8 + $0x3a0] ss:$16 sps:$4 sm:$0xff]   ;;  %v8919_v45 = vrot.slane %v8908_v42, 5  ;;  %v8922_v13 = vrot.slane %v8909_v6, 4 }
 0x783   : > { %v9047_v2 = vsel %vm8926_vm2, %v9046_v0, %v9045_v33  ;;  %v8925_v19 = vrot.slane %v8910_v47, 3  ;;  %v8928_v3 = vrot.slane %v8911_v61, 2  ;;  %v8931_v41 = vrot.slane %v8912_v50, 1  ;;  %11605 = vmatpush1.bf16.msra.mxu1 %v14547_v9  ;;  %v14551_v49 = vld [vmem:[#allocation6 + $0x14] ss:$0 sps:$4 sm:$0x11]  }
 0x784   : > { %v9049_v36 = vsel %vm8929_vm3, %v9048_v27, %v9047_v2  ;;  %v8905_v48 = vunpack.c.l.b16 %v14543_v44  ;;  %v14552_v59 = vld [vmem:[#allocation6 + $0x24] ss:$0 sps:$4 sm:$0x11]   ;;  %v14553_v35 = vld [vmem:[#allocation6 + $0x34] ss:$0 sps:$4 sm:$0x11]   ;;  %v9263_v32 = vunpack.c.l.b16 %v14551_v49  ;;  %11606 = vmatprep.subr.bf16.mxu1 %v14568_v31 }
 0x785   : > { %v9051_v52 = vsel %vm8932_vm4, %v9050_v15, %v9049_v36  ;;  %v14554_v39 = vld [vmem:[#allocation6 + $0x44] ss:$0 sps:$4 sm:$0x11]   ;;  %v14555_v22 = vld [vmem:[#allocation6 + $0x54] ss:$0 sps:$4 sm:$0x11]   ;;  %v9264_v21 = vunpack.c.l.b16 %v14552_v59  ;;  %v9265_v14 = vunpack.c.l.b16 %v14553_v35 }
 0x786   : > { %v9052_v37 = vpack.c.b16 %v9051_v52, %v9051_v52  ;;  %v8915_v1 = vsel %vm8914_vm14, %v8913_v51, %v8905_v48  ;;  %v14556_v26 = vld [vmem:[#allocation6 + $0x64] ss:$0 sps:$4 sm:$0x11]   ;;  %v14557_v28 = vld [vmem:[#allocation6 + $0x74] ss:$0 sps:$4 sm:$0x11]   ;;  %v9266_v38 = vunpack.c.l.b16 %v14554_v39  ;;  %v9267_v30 = vunpack.c.l.b16 %v14555_v22 }
 0x787   : > { %v8918_v7 = vsel %vm8917_vm15, %v8916_v16, %v8915_v1  ;;  %v9270_v18 = vrot.slane %v9262_v25, 1  ;;  %v9268_v62 = vunpack.c.l.b16 %v14556_v26  ;;  %v9269_v8 = vunpack.c.l.b16 %v14557_v28  ;;  %v14558_v5 = vld [vmem:[#allocation6] ss:$0 sps:$4 sm:$0x88]  }
 0x788   : > { %9054 = vst.msk [vmem:[#allocation7 + $0x4] sm:$0xf] %vm8936_vm5, %v9052_v37  ;;  %v8921_v12 = vsel %vm8920_vm0, %v8919_v45, %v8918_v7  ;;  %v9272_v4 = vrot.slane %v9264_v21, 7  ;;  %v9274_v15 = vrot.slane %v9265_v14, 6  ;;  %v9276_v23 = vrot.slane %v9266_v38, 5 }
 0x789   : > { %v8924_v54 = vsel %vm8923_vm1, %v8922_v13, %v8921_v12  ;;  %v9271_v27 = vsel %vm8914_vm14, %v9263_v32, %v9270_v18  ;;  %v9278_v24 = vrot.slane %v9267_v30, 4  ;;  %v9280_v58 = vrot.slane %v9268_v62, 3  ;;  %v14559_v56 = vld [vmem:[#allocation6 + $0x10] ss:$0 sps:$4 sm:$0x88]  }
 0x78a   : > { %v8927_v10 = vsel %vm8926_vm2, %v8925_v19, %v8924_v54  ;;  %v9273_v57 = vsel %vm8917_vm15, %v9272_v4, %v9271_v27  ;;  %v9282_v20 = vrot.slane %v9269_v8, 2  ;;  %v14560_v40 = vld [vmem:[#allocation6 + $0x20] ss:$0 sps:$4 sm:$0x88]   ;;  %v9146_v53 = vunpack.c.l.b16 %v14558_v5 }
 0x78b   : > { %v8930_v60 = vsel %vm8929_vm3, %v8928_v3, %v8927_v10  ;;  %v9275_v63 = vsel %vm8920_vm0, %v9274_v15, %v9273_v57  ;;  %v14561_v34 = vld [vmem:[#allocation6 + $0x30] ss:$0 sps:$4 sm:$0x88]   ;;  %v14562_v29 = vld [vmem:[#allocation6 + $0x40] ss:$0 sps:$4 sm:$0x88]   ;;  %v9147_v6 = vunpack.c.l.b16 %v14559_v56  ;;  %v9148_v55 = vunpack.c.l.b16 %v14560_v40 }
 0x78c   : > { %v8933_v11 = vsel %vm8932_vm4, %v8931_v41, %v8930_v60  ;;  %v9277_v43 = vsel %vm8923_vm1, %v9276_v23, %v9275_v63  ;;  %v14563_v42 = vld [vmem:[#allocation6 + $0x50] ss:$0 sps:$4 sm:$0x88]   ;;  %v14564_v51 = vld [vmem:[#allocation6 + $0x60] ss:$0 sps:$4 sm:$0x88]   ;;  %v9149_v33 = vunpack.c.l.b16 %v14561_v34  ;;  %v9150_v50 = vunpack.c.l.b16 %v14562_v29 }
 0x78d   : > { %v8934_v0 = vpack.c.b16 %v8933_v11, %v8933_v11  ;;  %v9279_v17 = vsel %vm8926_vm2, %v9278_v24, %v9277_v43  ;;  %v14565_v44 = vld [vmem:[#allocation6 + $0x70] ss:$0 sps:$4 sm:$0x88]   ;;  %v9151_v16 = vunpack.c.l.b16 %v14563_v42  ;;  %v9152_v45 = vunpack.c.l.b16 %v14564_v51  ;;  %v14569_v49 = vld [vmem:[#allocation6 + $0x8] ss:$0 sps:$4 sm:$0x11]  }
 0x78e   : > { %v9281_v47 = vsel %vm8929_vm3, %v9280_v58, %v9279_v17  ;;  %v14566_v9 = vld [vmem:[%s18776_s8 + $0x3c0] ss:$16 sps:$4 sm:$0xff]   ;;  %v9154_v13 = vrot.slane %v9146_v53, 7  ;;  %v9155_v19 = vrot.slane %v9147_v6, 6  ;;  %v9157_v36 = vrot.slane %v9148_v55, 5 }
 0x78f   : > { %8937 = vst.msk [vmem:[#allocation7] sm:$0xf] %vm8936_vm5, %v8934_v0  ;;  %v9283_v61 = vsel %vm8932_vm4, %v9282_v20, %v9281_v47  ;;  %v9159_v3 = vrot.slane %v9149_v33, 4  ;;  %v9161_v41 = vrot.slane %v9150_v50, 3  ;;  %v9163_v52 = vrot.slane %v9151_v16, 2  ;;  %11607 = vmatpush1.bf16.msra.mxu1 %v14566_v9 }
 0x790   : > { %v9284_v2 = vpack.c.b16 %v9283_v61, %v9283_v61  ;;  %v9156_v48 = vsel %vm8914_vm14, %v9155_v19, %v9154_v13  ;;  %v9165_v37 = vrot.slane %v9152_v45, 1  ;;  %v9153_v7 = vunpack.c.l.b16 %v14565_v44  ;;  %v14570_v12 = vld [vmem:[#allocation6 + $0x18] ss:$0 sps:$4 sm:$0x11]   ;;  %v14587_v16 = vld [vmem:[%s18776_s8 + $0x3e0] ss:$16 sps:$4 sm:$0xff]  }
 0x791   : > { %v9158_v1 = vsel %vm8917_vm15, %v9157_v36, %v9156_v48  ;;  %v14571_v35 = vld [vmem:[#allocation6 + $0x28] ss:$0 sps:$4 sm:$0x11]   ;;  %v14572_v54 = vld [vmem:[#allocation6 + $0x38] ss:$0 sps:$4 sm:$0x11]   ;;  %v9495_v32 = vunpack.c.l.b16 %v14570_v12  ;;  %v9494_v21 = vunpack.c.l.b16 %v14569_v49 }
 0x792   : > { %9286 = vst.msk [vmem:[#allocation7 + $0xc] sm:$0xf] %vm8936_vm5, %v9284_v2  ;;  %v9160_v46 = vsel %vm8920_vm0, %v9159_v3, %v9158_v1  ;;  %v14573_v22 = vld [vmem:[#allocation6 + $0x48] ss:$0 sps:$4 sm:$0x11]   ;;  %v9496_v14 = vunpack.c.l.b16 %v14571_v35  ;;  %v9497_v60 = vunpack.c.l.b16 %v14572_v54 }
 0x793   : > { %v9162_v59 = vsel %vm8923_vm1, %v9161_v41, %v9160_v46  ;;  %v14574_v25 = vld [vmem:[#allocation6 + $0x58] ss:$0 sps:$4 sm:$0x11]   ;;  %v14575_v26 = vld [vmem:[#allocation6 + $0x68] ss:$0 sps:$4 sm:$0x11]   ;;  %v9498_v30 = vunpack.c.l.b16 %v14573_v22 }
 0x794   : > { %v9164_v39 = vsel %vm8926_vm2, %v9163_v52, %v9162_v59  ;;  %v14576_v28 = vld [vmem:[#allocation6 + $0x78] ss:$0 sps:$4 sm:$0x11]   ;;  %v9499_v18 = vunpack.c.l.b16 %v14574_v25  ;;  %v9502_v11 = vrot.slane %v9495_v32, 7  ;;  %v9500_v8 = vunpack.c.l.b16 %v14575_v26  ;;  %v14589_v13 = vld [vmem:[%s18776_s8 + $0x3e4] ss:$16 sps:$4 sm:$0xff]  }
 0x795   : > { %v9166_v10 = vsel %vm8929_vm3, %v9165_v37, %v9164_v39  ;;  %v9501_v4 = vunpack.c.l.b16 %v14576_v28  ;;  %v9504_v0 = vrot.slane %v9496_v14, 6  ;;  %v9506_v15 = vrot.slane %v9497_v60, 5  ;;  %v14577_v5 = vld [vmem:[#allocation6 + $0x4] ss:$0 sps:$4 sm:$0x88]   ;;  %11608 = vmatprep.subr.bf16.mxu1 %v14589_v13 }
 0x796   : > { %v9167_v38 = vsel %vm8932_vm4, %v9153_v7, %v9166_v10  ;;  %v9503_v27 = vsel %vm8914_vm14, %v9502_v11, %v9494_v21  ;;  %v9508_v23 = vrot.slane %v9498_v30, 4  ;;  %v9510_v57 = vrot.slane %v9499_v18, 3  ;;  %v14578_v43 = vld [vmem:[#allocation6 + $0x14] ss:$0 sps:$4 sm:$0x88]   ;;  %11609 = vmatpush1.bf16.msra.mxu1 %v14587_v16 }
 0x797   : > { %v9168_v62 = vpack.c.b16 %v9167_v38, %v9167_v38  ;;  %v9505_v24 = vsel %vm8917_vm15, %v9504_v0, %v9503_v27  ;;  %v9512_v58 = vrot.slane %v9500_v8, 2  ;;  %v9514_v63 = vrot.slane %v9501_v4, 1  ;;  %v14579_v40 = vld [vmem:[#allocation6 + $0x24] ss:$0 sps:$4 sm:$0x88]  }
 0x798   : > { %v9507_v20 = vsel %vm8920_vm0, %v9506_v15, %v9505_v24  ;;  %v14580_v17 = vld [vmem:[#allocation6 + $0x34] ss:$0 sps:$4 sm:$0x88]   ;;  %v14581_v29 = vld [vmem:[#allocation6 + $0x44] ss:$0 sps:$4 sm:$0x88]   ;;  %v9378_v42 = vunpack.c.l.b16 %v14577_v5  ;;  %v9379_v51 = vunpack.c.l.b16 %v14578_v43  ;;  %v9380_v44 = vunpack.c.l.b16 %v14579_v40 }
 0x799   : > { %9170 = vst.msk [vmem:[#allocation7 + $0x8] sm:$0xf] %vm8936_vm5, %v9168_v62  ;;  %v9509_v56 = vsel %vm8923_vm1, %v9508_v23, %v9507_v20  ;;  %v14582_v6 = vld [vmem:[#allocation6 + $0x54] ss:$0 sps:$4 sm:$0x88]   ;;  %v9381_v61 = vunpack.c.l.b16 %v14580_v17  ;;  %v9382_v50 = vunpack.c.l.b16 %v14581_v29 }
 0x79a   : > { %v9511_v34 = vsel %vm8926_vm2, %v9510_v57, %v9509_v56  ;;  %v14583_v47 = vld [vmem:[#allocation6 + $0x64] ss:$0 sps:$4 sm:$0x88]   ;;  %v14584_v33 = vld [vmem:[#allocation6 + $0x74] ss:$0 sps:$4 sm:$0x88]   ;;  %v9383_v31 = vunpack.c.l.b16 %v14582_v6 }
 0x79b   : > { %v9513_v53 = vsel %vm8929_vm3, %v9512_v58, %v9511_v34  ;;  %v9386_v2 = vrot.slane %v9378_v42, 6  ;;  %v9387_v45 = vrot.slane %v9379_v51, 5  ;;  %v9385_v19 = vunpack.c.l.b16 %v14584_v33  ;;  %v14592_v48 = vld [vmem:[%s18776_s8 + $0x404] ss:$16 sps:$4 sm:$0xff]  }
 0x79c   : > { %v9515_v55 = vsel %vm8932_vm4, %v9514_v63, %v9513_v53  ;;  %v9389_v36 = vrot.slane %v9380_v44, 4  ;;  %v9391_v3 = vrot.slane %v9381_v61, 3  ;;  %v9393_v41 = vrot.slane %v9382_v50, 2  ;;  %11619 = vmatprep.subr.bf16.mxu0 %v14592_v48  ;;  %v14593_v59 = vld [vmem:[#allocation6 + $0x8] ss:$0 sps:$4 sm:$0x88]  }
 0x79d   : > { %v9516_v9 = vpack.c.b16 %v9515_v55, %v9515_v55  ;;  %v9388_v52 = vsel %vm8914_vm14, %v9387_v45, %v9386_v2  ;;  %v9395_v37 = vrot.slane %v9383_v31, 1  ;;  %v9384_v1 = vunpack.c.l.b16 %v14583_v47  ;;  %v14594_v54 = vld [vmem:[#allocation6 + $0x18] ss:$0 sps:$4 sm:$0x88]  }
 0x79e   : > { %v9390_v7 = vsel %vm8917_vm15, %v9389_v36, %v9388_v52  ;;  %v9398_v46 = vrot.slane %v9385_v19, 7  ;;  %v14595_v39 = vld [vmem:[#allocation6 + $0x28] ss:$0 sps:$4 sm:$0x88]   ;;  %v9726_v10 = vunpack.c.l.b16 %v14593_v59  ;;  %v9727_v14 = vunpack.c.l.b16 %v14594_v54 }
 0x79f   : > { %9518 = vst.msk [vmem:[#allocation7 + $0x14] sm:$0xf] %vm8936_vm5, %v9516_v9  ;;  %v9392_v49 = vsel %vm8920_vm0, %v9391_v3, %v9390_v7  ;;  %v14596_v25 = vld [vmem:[#allocation6 + $0x38] ss:$0 sps:$4 sm:$0x88]   ;;  %v9728_v60 = vunpack.c.l.b16 %v14595_v39 }
 0x7a0   : > { %v9394_v12 = vsel %vm8923_vm1, %v9393_v41, %v9392_v49  ;;  %v14597_v32 = vld [vmem:[#allocation6 + $0x48] ss:$0 sps:$4 sm:$0x88]   ;;  %v14598_v28 = vld [vmem:[#allocation6 + $0x58] ss:$0 sps:$4 sm:$0x88]   ;;  %v9729_v18 = vunpack.c.l.b16 %v14596_v25 }
 0x7a1   : > { %v9396_v35 = vsel %vm8926_vm2, %v9395_v37, %v9394_v12  ;;  %v14599_v21 = vld [vmem:[#allocation6 + $0x68] ss:$0 sps:$4 sm:$0x88]   ;;  %v14600_v30 = vld [vmem:[#allocation6 + $0x78] ss:$0 sps:$4 sm:$0x88]   ;;  %v9730_v11 = vunpack.c.l.b16 %v14597_v32  ;;  %v9731_v8 = vunpack.c.l.b16 %v14598_v28 }
 0x7a2   : > { %v9397_v22 = vsel %vm8929_vm3, %v9384_v1, %v9396_v35  ;;  %v9734_v62 = vrot.slane %v9726_v10, 7  ;;  %v9732_v4 = vunpack.c.l.b16 %v14599_v21  ;;  %v9735_v0 = vrot.slane %v9727_v14, 6  ;;  %v14601_v63 = vld [vmem:[#allocation6 + $0x8] ss:$0 sps:$4 sm:$0x44]  }
 0x7a3   : > { %v9399_v26 = vsel %vm8932_vm4, %v9398_v46, %v9397_v22  ;;  %v9737_v27 = vrot.slane %v9728_v60, 5  ;;  %v9739_v15 = vrot.slane %v9729_v18, 4  ;;  %v9741_v23 = vrot.slane %v9730_v11, 3  ;;  %v14602_v43 = vld [vmem:[#allocation6 + $0x18] ss:$0 sps:$4 sm:$0x44]  }
 0x7a4   : > { %v9400_v38 = vpack.c.b16 %v9399_v26, %v9399_v26  ;;  %v9736_v57 = vsel %vm8914_vm14, %v9735_v0, %v9734_v62  ;;  %v9743_v24 = vrot.slane %v9731_v8, 2  ;;  %v9745_v20 = vrot.slane %v9732_v4, 1  ;;  %v14603_v40 = vld [vmem:[#allocation6 + $0x28] ss:$0 sps:$4 sm:$0x44]  }
 0x7a5   : > { %v9738_v58 = vsel %vm8917_vm15, %v9737_v27, %v9736_v57  ;;  %v9733_v5 = vunpack.c.l.b16 %v14600_v30  ;;  %v14604_v17 = vld [vmem:[#allocation6 + $0x38] ss:$0 sps:$4 sm:$0x44]   ;;  %v14605_v29 = vld [vmem:[#allocation6 + $0x48] ss:$0 sps:$4 sm:$0x44]   ;;  %v9610_v42 = vunpack.c.l.b16 %v14601_v63  ;;  %v9611_v51 = vunpack.c.l.b16 %v14602_v43 }
 0x7a6   : > { %9402 = vst.msk [vmem:[#allocation7 + $0x10] sm:$0xf] %vm8936_vm5, %v9400_v38  ;;  %v9740_v56 = vsel %vm8920_vm0, %v9739_v15, %v9738_v58  ;;  %v14606_v6 = vld [vmem:[#allocation6 + $0x58] ss:$0 sps:$4 sm:$0x44]   ;;  %v9612_v44 = vunpack.c.l.b16 %v14603_v40  ;;  %v9613_v61 = vunpack.c.l.b16 %v14604_v17  ;;  %v9614_v50 = vunpack.c.l.b16 %v14605_v29 }
 0x7a7   : > { %v9742_v34 = vsel %vm8923_vm1, %v9741_v23, %v9740_v56  ;;  %v14607_v47 = vld [vmem:[#allocation6 + $0x68] ss:$0 sps:$4 sm:$0x44]   ;;  %v14608_v33 = vld [vmem:[#allocation6 + $0x78] ss:$0 sps:$4 sm:$0x44]   ;;  %v9615_v41 = vunpack.c.l.b16 %v14606_v6 }
 0x7a8   : > { %v9744_v53 = vsel %vm8926_vm2, %v9743_v24, %v9742_v34  ;;  %v9616_v9 = vunpack.c.l.b16 %v14607_v47  ;;  %v9618_v31 = vrot.slane %v9610_v42, 5  ;;  %v9619_v2 = vrot.slane %v9611_v51, 4  ;;  %v14616_v3 = vld [vmem:[%s18776_s8 + $0x604] ss:$16 sps:$4 sm:$0xff]   ;;  %v14590_v60 = vld [vmem:[%s18776_s8 + $0x400] ss:$16 sps:$4 sm:$0xff]  }
 0x7a9   : > { %v9746_v55 = vsel %vm8929_vm3, %v9745_v20, %v9744_v53  ;;  %v9617_v13 = vunpack.c.l.b16 %v14608_v33  ;;  %v9621_v19 = vrot.slane %v9612_v44, 3  ;;  %v9623_v36 = vrot.slane %v9613_v61, 2  ;;  %11660 = vmatprep.subr.bf16.mxu1 %v14616_v3  ;;  %v14613_v38 = vld [vmem:[%s18776_s8 + $0x424] ss:$16 sps:$4 sm:$0xff]   ;;  %v14611_v8 = vld [vmem:[%s18776_s8 + $0x420] ss:$16 sps:$4 sm:$0xff]  }
 0x7aa   : > { %v9747_v16 = vsel %vm8932_vm4, %v9733_v5, %v9746_v55  ;;  %v9620_v48 = vsel %vm8914_vm14, %v9619_v2, %v9618_v31  ;;  %v9625_v52 = vrot.slane %v9614_v50, 1  ;;  %v9628_v1 = vrot.slane %v9616_v9, 7  ;;  %v14614_v4 = vld [vmem:[%s18776_s8 + $0x600] ss:$16 sps:$4 sm:$0xff]   ;;  %v14619_v0 = vld [vmem:[%s18776_s8 + $0x444] ss:$16 sps:$4 sm:$0xff]  }
 0x7ab   : > { %v9748_v45 = vpack.c.b16 %v9747_v16, %v9747_v16  ;;  %v9622_v37 = vsel %vm8917_vm15, %v9621_v19, %v9620_v48  ;;  %v9630_v46 = vrot.slane %v9617_v13, 6  ;;  %v14624_v27 = vld [vmem:[%s18776_s8 + $0x624] ss:$16 sps:$4 sm:$0xff]   ;;  %v14617_v57 = vld [vmem:[%s18776_s8 + $0x440] ss:$16 sps:$4 sm:$0xff]  }
 0x7ac   : > { %v9624_v7 = vsel %vm8920_vm0, %v9623_v36, %v9622_v37  ;;  %v14622_v58 = vld [vmem:[%s18776_s8 + $0x620] ss:$16 sps:$4 sm:$0xff]   ;;  %v14627_v20 = vld [vmem:[%s18776_s8 + $0x464] ss:$16 sps:$4 sm:$0xff]  }
 0x7ad   : > { %9750 = vst.msk [vmem:[#allocation7 + $0x1c] sm:$0xf] %vm8936_vm5, %v9748_v45  ;;  %v9626_v49 = vsel %vm8923_vm1, %v9625_v52, %v9624_v7  ;;  %v14630_v63 = vld [vmem:[%s18776_s8 + $0x644] ss:$16 sps:$4 sm:$0xff]   ;;  %v14625_v5 = vld [vmem:[%s18776_s8 + $0x460] ss:$16 sps:$4 sm:$0xff]  }
 0x7ae   : > { %v9627_v12 = vsel %vm8926_vm2, %v9615_v41, %v9626_v49  ;;  %v14628_v56 = vld [vmem:[%s18776_s8 + $0x640] ss:$16 sps:$4 sm:$0xff]   ;;  %v14635_v40 = vld [vmem:[%s18776_s8 + $0x484] ss:$16 sps:$4 sm:$0xff]  }
 0x7af   : > { %v9629_v59 = vsel %vm8929_vm3, %v9628_v1, %v9627_v12  ;;  %v14638_v34 = vld [vmem:[%s18776_s8 + $0x664] ss:$16 sps:$4 sm:$0xff]   ;;  %v14633_v6 = vld [vmem:[%s18776_s8 + $0x480] ss:$16 sps:$4 sm:$0xff]  }
 0x7b0   : > { %v9631_v35 = vsel %vm8932_vm4, %v9630_v46, %v9629_v59  ;;  %v14636_v47 = vld [vmem:[%s18776_s8 + $0x660] ss:$16 sps:$4 sm:$0xff]   ;;  %v14641_v44 = vld [vmem:[%s18776_s8 + $0x4a4] ss:$16 sps:$4 sm:$0xff]  }
 0x7b1   : > { %v9632_v54 = vpack.c.b16 %v9631_v35, %v9631_v35  ;;  %v14644_v55 = vld [vmem:[%s18776_s8 + $0x684] ss:$16 sps:$4 sm:$0xff]   ;;  %v14639_v33 = vld [vmem:[%s18776_s8 + $0x4a0] ss:$16 sps:$4 sm:$0xff]  }
 0x7b2   : > { %v14642_v61 = vld [vmem:[%s18776_s8 + $0x680] ss:$16 sps:$4 sm:$0xff]   ;;  %v14647_v50 = vld [vmem:[%s18776_s8 + $0x4c4] ss:$16 sps:$4 sm:$0xff]  }
 0x7b3   : > { %9634 = vst.msk [vmem:[#allocation7 + $0x18] sm:$0xf] %vm8936_vm5, %v9632_v54  ;;  %v14650_v16 = vld [vmem:[%s18776_s8 + $0x6a4] ss:$16 sps:$4 sm:$0xff]   ;;  %v14645_v9 = vld [vmem:[%s18776_s8 + $0x4c0] ss:$16 sps:$4 sm:$0xff]  }
 0x7b4   : > { %v14648_v31 = vld [vmem:[%s18776_s8 + $0x6a0] ss:$16 sps:$4 sm:$0xff]   ;;  %v14653_v45 = vld [vmem:[%s18776_s8 + $0x4e4] ss:$16 sps:$4 sm:$0xff]  }
 0x7b5   : > { %v14656_v13 = vld [vmem:[%s18776_s8 + $0x6c4] ss:$16 sps:$4 sm:$0xff]   ;;  %v14651_v41 = vld [vmem:[%s18776_s8 + $0x4e0] ss:$16 sps:$4 sm:$0xff]  }
 0x7b6   : > { %v14654_v48 = vld [vmem:[%s18776_s8 + $0x6c0] ss:$16 sps:$4 sm:$0xff]   ;;  %v14659_v52 = vld [vmem:[%s18776_s8 + $0x504] ss:$16 sps:$4 sm:$0xff]  }
 0x7b7   : > { %v14662_v37 = vld [vmem:[%s18776_s8 + $0x6e4] ss:$16 sps:$4 sm:$0xff]   ;;  %v14657_v1 = vld [vmem:[%s18776_s8 + $0x500] ss:$16 sps:$4 sm:$0xff]  }
 0x7b8   : > { %v14660_v7 = vld [vmem:[%s18776_s8 + $0x6e0] ss:$16 sps:$4 sm:$0xff]   ;;  %v14665_v46 = vld [vmem:[%s18776_s8 + $0x524] ss:$16 sps:$4 sm:$0xff]  }
 0x7b9   : > { %v14668_v49 = vld [vmem:[%s18776_s8 + $0x704] ss:$16 sps:$4 sm:$0xff]   ;;  %v14663_v12 = vld [vmem:[%s18776_s8 + $0x520] ss:$16 sps:$4 sm:$0xff]  }
 0x7ba   : > { %v14666_v59 = vld [vmem:[%s18776_s8 + $0x700] ss:$16 sps:$4 sm:$0xff]   ;;  %v14671_v35 = vld [vmem:[%s18776_s8 + $0x544] ss:$16 sps:$4 sm:$0xff]  }
 0x7bb   : > { %v14674_v54 = vld [vmem:[%s18776_s8 + $0x724] ss:$16 sps:$4 sm:$0xff]  }
 0x7cc   : > { %v18082_v43 = vpop.f32.mrb[160].mxu1 }
 0x7cd   : > { %v18090_v17 = vpop.f32.mrb[161].mxu1 }
 0x7ce   : > { %v10185_v29 = vpop.f32.mrb[162].mxu1 }
 0x7cf   : > { %v10186_v42 = vpop.f32.mrb[163].mxu1  ;;  %v14705_v29 = vld [vmem:[%s18776_s8 + $0x7e0] ss:$16 sps:$4 sm:$0xff]  }
 0x7d0   : > { %v14708_v42 = vld [vmem:[%s18776_s8 + $0x8] ss:$16 sps:$4 sm:$0xff]  }
 0x7de   : > { %v18129_v2 = vpop.f32.mrb[164].mxu1 }
 0x7df   : > { %v18137_v19 = vpop.f32.mrb[165].mxu1 }
 0x7e0   : > { %v10226_v36 = vpop.f32.mrb[166].mxu1 }
 0x7e1   : > { %v10227_v3 = vpop.f32.mrb[167].mxu1  ;;  %v14729_v36 = vld [vmem:[%s18776_s8 + $0x88] ss:$16 sps:$4 sm:$0xff]  }
 0x7e2   : > { %v14732_v3 = vld [vmem:[%s18776_s8 + $0x268] ss:$16 sps:$4 sm:$0xff]  }
 0x7e4   : > { %v9111_v39 = vpop.permute.xlu1 %9110 }
 0x7e5   : > { %9113 = vst.msk [vmem:[#allocation7 + $0x4] sm:$0xf] %vm8996_vm6, %v9111_v39  ;;  %v8994_v22 = vpop.permute.xlu0 %8993  ;;  %v14669_v39 = vld [vmem:[%s18776_s8 + $0x540] ss:$16 sps:$4 sm:$0xff]  }
 0x7e6   : > { %8997 = vst.msk [vmem:[#allocation7] sm:$0xf] %vm8996_vm6, %v8994_v22  ;;  %v14672_v22 = vld [vmem:[%s18776_s8 + $0x720] ss:$16 sps:$4 sm:$0xff]  }
 0x7e8   : > { %v9343_v25 = vpop.permute.xlu1 %9342 }
 0x7e9   : > { %9345 = vst.msk [vmem:[#allocation7 + $0xc] sm:$0xf] %vm8996_vm6, %v9343_v25  ;;  %v9227_v32 = vpop.permute.xlu0 %9226  ;;  %v14677_v25 = vld [vmem:[%s18776_s8 + $0x564] ss:$16 sps:$4 sm:$0xff]  }
 0x7ea   : > { %9229 = vst.msk [vmem:[#allocation7 + $0x8] sm:$0xf] %vm8996_vm6, %v9227_v32  ;;  %v14680_v32 = vld [vmem:[%s18776_s8 + $0x744] ss:$16 sps:$4 sm:$0xff]  }
 0x7ec   : > { %v9575_v10 = vpop.permute.xlu1 %9574 }
 0x7ed   : > { %9577 = vst.msk [vmem:[#allocation7 + $0x14] sm:$0xf] %vm8996_vm6, %v9575_v10  ;;  %v9459_v26 = vpop.permute.xlu0 %9458  ;;  %v9810_v28 = vld [vmem:[#allocation7] sm:$0xff] }
 0x7ee   : > { %9461 = vst.msk [vmem:[#allocation7 + $0x10] sm:$0xf] %vm8996_vm6, %v9459_v26  ;;  %v18025_v21 = vcombine.low %v9810_v28, %v9810_v28  ;;  %v18027_v14 = vcombine.high %v9810_v28, %v9810_v28  ;;  %v14675_v10 = vld [vmem:[%s18776_s8 + $0x560] ss:$16 sps:$4 sm:$0xff]   ;;  %v14683_v28 = vld [vmem:[%s18776_s8 + $0x584] ss:$16 sps:$4 sm:$0xff]  }
 0x7ef   : > { %v14678_v26 = vld [vmem:[%s18776_s8 + $0x740] ss:$16 sps:$4 sm:$0xff]  }
 0x7f0   : > { %11569 = vmatprep.mubr.bf16.mxu0 %v18027_v14  ;;  %v9807_v30 = vpop.permute.xlu1 %9806 }
 0x7f1   : > { %9809 = vst.msk [vmem:[#allocation7 + $0x1c] sm:$0xf] %vm8996_vm6, %v9807_v30  ;;  %11570 = vmatmul.mubr.bf16.vlgmr.msra.gmra.mrb[96].mxu0 %v18025_v21  ;;  %v9811_v18 = vld [vmem:[#allocation7 + $0x8] sm:$0xff]  ;;  %v14684_v30 = vld [vmem:[%s18776_s8 + $0x760] ss:$16 sps:$4 sm:$0xff]  }
 0x7f2   : > { %11620 = vmatpush1.bf16.msra.mxu0 %v14590_v60  ;;  %v18038_v11 = vcombine.low %v9811_v18, %v9811_v18  ;;  %v18040_v62 = vcombine.high %v9811_v18, %v9811_v18  ;;  %v14686_v60 = vld [vmem:[%s18776_s8 + $0x764] ss:$16 sps:$4 sm:$0xff]  }
 0x7f3   : > { %11621 = vmatprep.subr.bf16.mxu0 %v14613_v38  ;;  %v9691_v23 = vpop.permute.xlu0 %9690  ;;  %v14681_v38 = vld [vmem:[%s18776_s8 + $0x580] ss:$16 sps:$4 sm:$0xff]   ;;  %v14689_v18 = vld [vmem:[%s18776_s8 + $0x5a4] ss:$16 sps:$4 sm:$0xff]  }
 0x7f4   : > { %11610 = vmatprep.mubr.bf16.mxu1 %v18040_v62  ;;  %9693 = vst.msk [vmem:[#allocation7 + $0x18] sm:$0xf] %vm8996_vm6, %v9691_v23  ;;  %v14698_v23 = vld [vmem:[%s18776_s8 + $0x7a4] ss:$16 sps:$4 sm:$0xff]  }
 0x7f5   : > { %11611 = vmatmul.mubr.bf16.vlgmr.msra.gmra.mrb[168].mxu1 %v18038_v11  ;;  %v18056_v15 = vld [vmem:[#allocation7 + $0x10] sm:$0xff] }
 0x7f6   : > { %11622 = vmatpush1.bf16.msra.mxu0 %v14611_v8  ;;  %11661 = vmatpush1.bf16.msra.mxu1 %v14614_v4  ;;  %v18063_v24 = vcombine.high %v18056_v15, %v18056_v15  ;;  %v14692_v8 = vld [vmem:[%s18776_s8 + $0x784] ss:$16 sps:$4 sm:$0xff]   ;;  %v14687_v4 = vld [vmem:[%s18776_s8 + $0x5a0] ss:$16 sps:$4 sm:$0xff]  }
 0x7f7   : > { %11623 = vmatprep.subr.bf16.mxu0 %v14619_v0  ;;  %11662 = vmatprep.subr.bf16.mxu1 %v14624_v27  ;;  %v14690_v0 = vld [vmem:[%s18776_s8 + $0x780] ss:$16 sps:$4 sm:$0xff]   ;;  %v14695_v27 = vld [vmem:[%s18776_s8 + $0x5c4] ss:$16 sps:$4 sm:$0xff]  }
 0x7f8   : > { %11651 = vmatprep.mubr.bf16.mxu0 %v18063_v24 }
 0x7fa   : > { %11624 = vmatpush1.bf16.msra.mxu0 %v14617_v57  ;;  %11663 = vmatpush1.bf16.msra.mxu1 %v14622_v58  ;;  %v14693_v57 = vld [vmem:[%s18776_s8 + $0x5c0] ss:$16 sps:$4 sm:$0xff]  }
 0x7fb   : > { %11625 = vmatprep.subr.bf16.mxu0 %v14627_v20  ;;  %11664 = vmatprep.subr.bf16.mxu1 %v14630_v63  ;;  %v18092_v53 = vld [vmem:[#allocation7 + $0x18] sm:$0xff]  ;;  %v14696_v58 = vld [vmem:[%s18776_s8 + $0x7a0] ss:$16 sps:$4 sm:$0xff]   ;;  %v14701_v20 = vld [vmem:[%s18776_s8 + $0x5e4] ss:$16 sps:$4 sm:$0xff]  }
 0x7fc   : > { %v18102_v51 = vcombine.high %v18092_v53, %v18092_v53  ;;  %v14704_v63 = vld [vmem:[%s18776_s8 + $0x7c4] ss:$16 sps:$4 sm:$0xff]  }
 0x7fe   : > { %11626 = vmatpush1.bf16.msra.mxu0 %v14625_v5  ;;  %11665 = vmatpush1.bf16.msra.mxu1 %v14628_v56  ;;  %v14699_v5 = vld [vmem:[%s18776_s8 + $0x5e0] ss:$16 sps:$4 sm:$0xff]  }
 0x7ff   : > { %11627 = vmatprep.subr.bf16.mxu0 %v14635_v40  ;;  %11666 = vmatprep.subr.bf16.mxu1 %v14638_v34  ;;  %v14702_v56 = vld [vmem:[%s18776_s8 + $0x7c0] ss:$16 sps:$4 sm:$0xff]   ;;  %v14707_v40 = vld [vmem:[%s18776_s8 + $0x7e4] ss:$16 sps:$4 sm:$0xff]   ;;  %v14710_v34 = vld [vmem:[%s18776_s8 + $0xc] ss:$16 sps:$4 sm:$0xff]  }
 0x800   : > { %11692 = vmatprep.mubr.bf16.mxu1 %v18102_v51 }
 0x802   : > { %11628 = vmatpush1.bf16.msra.mxu0 %v14633_v6  ;;  %11667 = vmatpush1.bf16.msra.mxu1 %v14636_v47  ;;  %v18255_v6 = vcombine.low %v18056_v15, %v18056_v15  ;;  %v14713_v47 = vld [vmem:[%s18776_s8 + $0x2c] ss:$16 sps:$4 sm:$0xff]   ;;  %v14714_v15 = vld [vmem:[%s18776_s8 + $0x208] ss:$16 sps:$4 sm:$0xff]  }
 0x803   : > { %11629 = vmatprep.subr.bf16.mxu0 %v14641_v44  ;;  %11668 = vmatprep.subr.bf16.mxu1 %v14644_v55  ;;  %v14716_v44 = vld [vmem:[%s18776_s8 + $0x20c] ss:$16 sps:$4 sm:$0xff]   ;;  %v14711_v55 = vld [vmem:[%s18776_s8 + $0x28] ss:$16 sps:$4 sm:$0xff]  }
 0x806   : > { %11630 = vmatpush1.bf16.msra.mxu0 %v14639_v33  ;;  %11669 = vmatpush1.bf16.msra.mxu1 %v14642_v61  ;;  %v18272_v33 = vcombine.low %v18092_v53, %v18092_v53  ;;  %v14719_v61 = vld [vmem:[%s18776_s8 + $0x4c] ss:$16 sps:$4 sm:$0xff]   ;;  %v14717_v53 = vld [vmem:[%s18776_s8 + $0x48] ss:$16 sps:$4 sm:$0xff]  }
 0x807   : > { %11631 = vmatprep.subr.bf16.mxu0 %v14647_v50  ;;  %11670 = vmatprep.subr.bf16.mxu1 %v14650_v16  ;;  %v14722_v50 = vld [vmem:[%s18776_s8 + $0x22c] ss:$16 sps:$4 sm:$0xff]  }
 0x808   : > { %v14725_v16 = vld [vmem:[%s18776_s8 + $0x6c] ss:$16 sps:$4 sm:$0xff]  }
 0x80a   : > { %11632 = vmatpush1.bf16.msra.mxu0 %v14645_v9  ;;  %11671 = vmatpush1.bf16.msra.mxu1 %v14648_v31  ;;  %v14728_v9 = vld [vmem:[%s18776_s8 + $0x24c] ss:$16 sps:$4 sm:$0xff]   ;;  %v14723_v31 = vld [vmem:[%s18776_s8 + $0x68] ss:$16 sps:$4 sm:$0xff]  }
 0x80b   : > { %11633 = vmatprep.subr.bf16.mxu0 %v14653_v45  ;;  %11672 = vmatprep.subr.bf16.mxu1 %v14656_v13  ;;  %v14731_v45 = vld [vmem:[%s18776_s8 + $0x8c] ss:$16 sps:$4 sm:$0xff]  }
 0x80c   : > { %v14734_v13 = vld [vmem:[%s18776_s8 + $0x26c] ss:$16 sps:$4 sm:$0xff]  }
 0x80e   : > { %11634 = vmatpush1.bf16.msra.mxu0 %v14651_v41  ;;  %11673 = vmatpush1.bf16.msra.mxu1 %v14654_v48  ;;  %v14737_v41 = vld [vmem:[%s18776_s8 + $0xac] ss:$16 sps:$4 sm:$0xff]  }
 0x80f   : > { %11635 = vmatprep.subr.bf16.mxu0 %v14659_v52  ;;  %11674 = vmatprep.subr.bf16.mxu1 %v14662_v37  ;;  %v14740_v48 = vld [vmem:[%s18776_s8 + $0x28c] ss:$16 sps:$4 sm:$0xff]   ;;  %v14735_v52 = vld [vmem:[%s18776_s8 + $0xa8] ss:$16 sps:$4 sm:$0xff]  }
 0x810   : > { %v14738_v37 = vld [vmem:[%s18776_s8 + $0x288] ss:$16 sps:$4 sm:$0xff]  }
 0x812   : > { %11636 = vmatpush1.bf16.msra.mxu0 %v14657_v1  ;;  %11675 = vmatpush1.bf16.msra.mxu1 %v14660_v7  ;;  %v14743_v1 = vld [vmem:[%s18776_s8 + $0xcc] ss:$16 sps:$4 sm:$0xff]  }
 0x813   : > { %11637 = vmatprep.subr.bf16.mxu0 %v14665_v46  ;;  %11676 = vmatprep.subr.bf16.mxu1 %v14668_v49  ;;  %v14746_v7 = vld [vmem:[%s18776_s8 + $0x2ac] ss:$16 sps:$4 sm:$0xff]   ;;  %v14741_v46 = vld [vmem:[%s18776_s8 + $0xc8] ss:$16 sps:$4 sm:$0xff]  }
 0x814   : > { %v14744_v49 = vld [vmem:[%s18776_s8 + $0x2a8] ss:$16 sps:$4 sm:$0xff]  }
 0x816   : > { %11638 = vmatpush1.bf16.msra.mxu0 %v14663_v12  ;;  %11677 = vmatpush1.bf16.msra.mxu1 %v14666_v59  ;;  %v14749_v12 = vld [vmem:[%s18776_s8 + $0xec] ss:$16 sps:$4 sm:$0xff]  }
 0x817   : > { %11639 = vmatprep.subr.bf16.mxu0 %v14671_v35  ;;  %11678 = vmatprep.subr.bf16.mxu1 %v14674_v54  ;;  %v14752_v59 = vld [vmem:[%s18776_s8 + $0x2cc] ss:$16 sps:$4 sm:$0xff]   ;;  %v14747_v35 = vld [vmem:[%s18776_s8 + $0xe8] ss:$16 sps:$4 sm:$0xff]  }
 0x818   : > { %v14750_v54 = vld [vmem:[%s18776_s8 + $0x2c8] ss:$16 sps:$4 sm:$0xff]  }
 0x81a   : > { %11640 = vmatpush1.bf16.msra.mxu0 %v14669_v39  ;;  %11679 = vmatpush1.bf16.msra.mxu1 %v14672_v22  ;;  %v14755_v39 = vld [vmem:[%s18776_s8 + $0x10c] ss:$16 sps:$4 sm:$0xff]  }
 0x81b   : > { %11641 = vmatprep.subr.bf16.mxu0 %v14677_v25  ;;  %11680 = vmatprep.subr.bf16.mxu1 %v14680_v32  ;;  %v14758_v22 = vld [vmem:[%s18776_s8 + $0x2ec] ss:$16 sps:$4 sm:$0xff]   ;;  %v14753_v25 = vld [vmem:[%s18776_s8 + $0x108] ss:$16 sps:$4 sm:$0xff]  }
 0x81c   : > { %v14756_v32 = vld [vmem:[%s18776_s8 + $0x2e8] ss:$16 sps:$4 sm:$0xff]  }
 0x81e   : > { %11642 = vmatpush1.bf16.msra.mxu0 %v14675_v10  ;;  %11681 = vmatpush1.bf16.msra.mxu1 %v14678_v26  ;;  %v14761_v10 = vld [vmem:[%s18776_s8 + $0x12c] ss:$16 sps:$4 sm:$0xff]  }
 0x81f   : > { %11643 = vmatprep.subr.bf16.mxu0 %v14683_v28  ;;  %11682 = vmatprep.subr.bf16.mxu1 %v14686_v60  ;;  %v14764_v26 = vld [vmem:[%s18776_s8 + $0x30c] ss:$16 sps:$4 sm:$0xff]   ;;  %v14759_v28 = vld [vmem:[%s18776_s8 + $0x128] ss:$16 sps:$4 sm:$0xff]  }
 0x820   : > { %v14762_v60 = vld [vmem:[%s18776_s8 + $0x308] ss:$16 sps:$4 sm:$0xff]  }
 0x822   : > { %11644 = vmatpush1.bf16.msra.mxu0 %v14681_v38  ;;  %11683 = vmatpush1.bf16.msra.mxu1 %v14684_v30  ;;  %v14767_v38 = vld [vmem:[%s18776_s8 + $0x14c] ss:$16 sps:$4 sm:$0xff]  }
 0x823   : > { %11645 = vmatprep.subr.bf16.mxu0 %v14689_v18  ;;  %11684 = vmatprep.subr.bf16.mxu1 %v14692_v8  ;;  %v14770_v30 = vld [vmem:[%s18776_s8 + $0x32c] ss:$16 sps:$4 sm:$0xff]   ;;  %v14765_v18 = vld [vmem:[%s18776_s8 + $0x148] ss:$16 sps:$4 sm:$0xff]  }
 0x824   : > { %v14768_v8 = vld [vmem:[%s18776_s8 + $0x328] ss:$16 sps:$4 sm:$0xff]  }
 0x826   : > { %11646 = vmatpush1.bf16.msra.mxu0 %v14687_v4  ;;  %11685 = vmatpush1.bf16.msra.mxu1 %v14690_v0  ;;  %v14773_v4 = vld [vmem:[%s18776_s8 + $0x16c] ss:$16 sps:$4 sm:$0xff]  }
 0x827   : > { %11647 = vmatprep.subr.bf16.mxu0 %v14695_v27  ;;  %11686 = vmatprep.subr.bf16.mxu1 %v14698_v23  ;;  %v14776_v0 = vld [vmem:[%s18776_s8 + $0x34c] ss:$16 sps:$4 sm:$0xff]   ;;  %v14771_v27 = vld [vmem:[%s18776_s8 + $0x168] ss:$16 sps:$4 sm:$0xff]  }
 0x828   : > { %v14774_v23 = vld [vmem:[%s18776_s8 + $0x348] ss:$16 sps:$4 sm:$0xff]  }
 0x82a   : > { %11648 = vmatpush1.bf16.msra.mxu0 %v14693_v57  ;;  %11687 = vmatpush1.bf16.msra.mxu1 %v14696_v58  ;;  %v14779_v57 = vld [vmem:[%s18776_s8 + $0x18c] ss:$16 sps:$4 sm:$0xff]  }
 0x82b   : > { %11649 = vmatprep.subr.bf16.mxu0 %v14701_v20  ;;  %11688 = vmatprep.subr.bf16.mxu1 %v14704_v63  ;;  %v14782_v58 = vld [vmem:[%s18776_s8 + $0x36c] ss:$16 sps:$4 sm:$0xff]   ;;  %v14777_v20 = vld [vmem:[%s18776_s8 + $0x188] ss:$16 sps:$4 sm:$0xff]  }
 0x82c   : > { %v14780_v63 = vld [vmem:[%s18776_s8 + $0x368] ss:$16 sps:$4 sm:$0xff]  }
 0x82e   : > { %11650 = vmatpush1.bf16.msra.mxu0 %v14699_v5  ;;  %11689 = vmatpush1.bf16.msra.mxu1 %v14702_v56  ;;  %v14785_v5 = vld [vmem:[%s18776_s8 + $0x1ac] ss:$16 sps:$4 sm:$0xff]  }
 0x82f   : > { %11690 = vmatprep.subr.bf16.mxu1 %v14707_v40  ;;  %11701 = vmatprep.subr.bf16.mxu0 %v14710_v34  ;;  %v14788_v56 = vld [vmem:[%s18776_s8 + $0x38c] ss:$16 sps:$4 sm:$0xff]   ;;  %v14783_v40 = vld [vmem:[%s18776_s8 + $0x1a8] ss:$16 sps:$4 sm:$0xff]  }
 0x830   : > { %v14786_v34 = vld [vmem:[%s18776_s8 + $0x388] ss:$16 sps:$4 sm:$0xff]  }
 0x831   : > { %11652 = vmatmul.mubr.bf16.vlgmr.msra.gmra.mrb[100].mxu0 %v18255_v6 }
 0x832   : > { %11691 = vmatpush1.bf16.msra.mxu1 %v14705_v29  ;;  %11702 = vmatpush1.bf16.msra.mxu0 %v14708_v42  ;;  %v14791_v29 = vld [vmem:[%s18776_s8 + $0x1cc] ss:$16 sps:$4 sm:$0xff]  }
 0x833   : > { %11733 = vmatprep.mubr.bf16.mxu0 %v18027_v14  ;;  %11703 = vmatprep.subr.bf16.mxu0 %v14713_v47  ;;  %v14720_v14 = vld [vmem:[%s18776_s8 + $0x228] ss:$16 sps:$4 sm:$0xff]   ;;  %v14794_v42 = vld [vmem:[%s18776_s8 + $0x3ac] ss:$16 sps:$4 sm:$0xff]  }
 0x834   : > { %11742 = vmatprep.subr.bf16.mxu1 %v14716_v44  ;;  %v14789_v47 = vld [vmem:[%s18776_s8 + $0x1c8] ss:$16 sps:$4 sm:$0xff]  }
 0x835   : > { %11693 = vmatmul.mubr.bf16.vlgmr.msra.gmra.mrb[172].mxu1 %v18272_v33  ;;  %v14792_v44 = vld [vmem:[%s18776_s8 + $0x3a8] ss:$16 sps:$4 sm:$0xff]  }
 0x836   : > { %11704 = vmatpush1.bf16.msra.mxu0 %v14711_v55  ;;  %11743 = vmatpush1.bf16.msra.mxu1 %v14714_v15  ;;  %v14797_v55 = vld [vmem:[%s18776_s8 + $0x1ec] ss:$16 sps:$4 sm:$0xff]  }
 0x837   : > { %11774 = vmatprep.mubr.bf16.mxu1 %v18040_v62  ;;  %11705 = vmatprep.subr.bf16.mxu0 %v14719_v61  ;;  %v14726_v62 = vld [vmem:[%s18776_s8 + $0x248] ss:$16 sps:$4 sm:$0xff]   ;;  %v14800_v15 = vld [vmem:[%s18776_s8 + $0x3cc] ss:$16 sps:$4 sm:$0xff]  }
 0x838   : > { %11744 = vmatprep.subr.bf16.mxu1 %v14722_v50  ;;  %v14795_v61 = vld [vmem:[%s18776_s8 + $0x1e8] ss:$16 sps:$4 sm:$0xff]  }
 0x839   : > { %v14798_v50 = vld [vmem:[%s18776_s8 + $0x3c8] ss:$16 sps:$4 sm:$0xff]  }
 0x83a   : > { %11706 = vmatpush1.bf16.msra.mxu0 %v14717_v53  ;;  %11745 = vmatpush1.bf16.msra.mxu1 %v14720_v14  ;;  %v14803_v53 = vld [vmem:[%s18776_s8 + $0x3ec] ss:$16 sps:$4 sm:$0xff]  }
 0x83b   : > { %11707 = vmatprep.subr.bf16.mxu0 %v14725_v16  ;;  %11746 = vmatprep.subr.bf16.mxu1 %v14728_v9  ;;  %v14806_v14 = vld [vmem:[%s18776_s8 + $0x40c] ss:$16 sps:$4 sm:$0xff]   ;;  %v14801_v16 = vld [vmem:[%s18776_s8 + $0x3e8] ss:$16 sps:$4 sm:$0xff]  }
 0x83c   : > { %v14804_v9 = vld [vmem:[%s18776_s8 + $0x408] ss:$16 sps:$4 sm:$0xff]  }
 0x83e   : > { %11708 = vmatpush1.bf16.msra.mxu0 %v14723_v31  ;;  %11747 = vmatpush1.bf16.msra.mxu1 %v14726_v62  ;;  %v14809_v31 = vld [vmem:[%s18776_s8 + $0x42c] ss:$16 sps:$4 sm:$0xff]  }
 0x83f   : > { %11709 = vmatprep.subr.bf16.mxu0 %v14731_v45  ;;  %11748 = vmatprep.subr.bf16.mxu1 %v14734_v13  ;;  %v14812_v62 = vld [vmem:[%s18776_s8 + $0x60c] ss:$16 sps:$4 sm:$0xff]   ;;  %v14807_v45 = vld [vmem:[%s18776_s8 + $0x428] ss:$16 sps:$4 sm:$0xff]  }
 0x840   : > { %v14810_v13 = vld [vmem:[%s18776_s8 + $0x608] ss:$16 sps:$4 sm:$0xff]  }
 0x842   : > { %11710 = vmatpush1.bf16.msra.mxu0 %v14729_v36  ;;  %11749 = vmatpush1.bf16.msra.mxu1 %v14732_v3  ;;  %v14815_v36 = vld [vmem:[%s18776_s8 + $0x44c] ss:$16 sps:$4 sm:$0xff]   ;;  %v14813_v3 = vld [vmem:[%s18776_s8 + $0x448] ss:$16 sps:$4 sm:$0xff]  }
 0x843   : > { %11711 = vmatprep.subr.bf16.mxu0 %v14737_v41  ;;  %11750 = vmatprep.subr.bf16.mxu1 %v14740_v48  ;;  %v14821_v41 = vld [vmem:[%s18776_s8 + $0x46c] ss:$16 sps:$4 sm:$0xff]   ;;  %v14819_v48 = vld [vmem:[%s18776_s8 + $0x468] ss:$16 sps:$4 sm:$0xff]  }
 0x846   : > { %11712 = vmatpush1.bf16.msra.mxu0 %v14735_v52  ;;  %11751 = vmatpush1.bf16.msra.mxu1 %v14738_v37  ;;  %v14827_v52 = vld [vmem:[%s18776_s8 + $0x48c] ss:$16 sps:$4 sm:$0xff]  }
 0x847   : > { %11713 = vmatprep.subr.bf16.mxu0 %v14743_v1  ;;  %11752 = vmatprep.subr.bf16.mxu1 %v14746_v7  ;;  %v14830_v37 = vld [vmem:[%s18776_s8 + $0x66c] ss:$16 sps:$4 sm:$0xff]   ;;  %v14825_v1 = vld [vmem:[%s18776_s8 + $0x488] ss:$16 sps:$4 sm:$0xff]  }
 0x848   : > { %v14828_v7 = vld [vmem:[%s18776_s8 + $0x668] ss:$16 sps:$4 sm:$0xff]  }
 0x84a   : > { %11714 = vmatpush1.bf16.msra.mxu0 %v14741_v46  ;;  %11753 = vmatpush1.bf16.msra.mxu1 %v14744_v49  ;;  %v14833_v46 = vld [vmem:[%s18776_s8 + $0x4ac] ss:$16 sps:$4 sm:$0xff]  }
 0x84b   : > { %11715 = vmatprep.subr.bf16.mxu0 %v14749_v12  ;;  %11754 = vmatprep.subr.bf16.mxu1 %v14752_v59  ;;  %v14836_v49 = vld [vmem:[%s18776_s8 + $0x68c] ss:$16 sps:$4 sm:$0xff]   ;;  %v14831_v12 = vld [vmem:[%s18776_s8 + $0x4a8] ss:$16 sps:$4 sm:$0xff]  }
 0x84c   : > { %v14834_v59 = vld [vmem:[%s18776_s8 + $0x688] ss:$16 sps:$4 sm:$0xff]  }
 0x84e   : > { %11716 = vmatpush1.bf16.msra.mxu0 %v14747_v35  ;;  %11755 = vmatpush1.bf16.msra.mxu1 %v14750_v54  ;;  %v14839_v35 = vld [vmem:[%s18776_s8 + $0x4cc] ss:$16 sps:$4 sm:$0xff]  }
 0x84f   : > { %11717 = vmatprep.subr.bf16.mxu0 %v14755_v39  ;;  %11756 = vmatprep.subr.bf16.mxu1 %v14758_v22  ;;  %v14842_v54 = vld [vmem:[%s18776_s8 + $0x6ac] ss:$16 sps:$4 sm:$0xff]   ;;  %v14837_v39 = vld [vmem:[%s18776_s8 + $0x4c8] ss:$16 sps:$4 sm:$0xff]  }
 0x850   : > { %v14840_v22 = vld [vmem:[%s18776_s8 + $0x6a8] ss:$16 sps:$4 sm:$0xff]  }
 0x852   : > { %11718 = vmatpush1.bf16.msra.mxu0 %v14753_v25  ;;  %11757 = vmatpush1.bf16.msra.mxu1 %v14756_v32  ;;  %v14845_v25 = vld [vmem:[%s18776_s8 + $0x4ec] ss:$16 sps:$4 sm:$0xff]  }
 0x853   : > { %11719 = vmatprep.subr.bf16.mxu0 %v14761_v10  ;;  %11758 = vmatprep.subr.bf16.mxu1 %v14764_v26  ;;  %v14848_v32 = vld [vmem:[%s18776_s8 + $0x6cc] ss:$16 sps:$4 sm:$0xff]   ;;  %v14843_v10 = vld [vmem:[%s18776_s8 + $0x4e8] ss:$16 sps:$4 sm:$0xff]  }
 0x854   : > { %v14846_v26 = vld [vmem:[%s18776_s8 + $0x6c8] ss:$16 sps:$4 sm:$0xff]  }
 0x856   : > { %11720 = vmatpush1.bf16.msra.mxu0 %v14759_v28  ;;  %11759 = vmatpush1.bf16.msra.mxu1 %v14762_v60  ;;  %v14851_v28 = vld [vmem:[%s18776_s8 + $0x50c] ss:$16 sps:$4 sm:$0xff]  }
 0x857   : > { %11721 = vmatprep.subr.bf16.mxu0 %v14767_v38  ;;  %11760 = vmatprep.subr.bf16.mxu1 %v14770_v30  ;;  %v14854_v60 = vld [vmem:[%s18776_s8 + $0x6ec] ss:$16 sps:$4 sm:$0xff]   ;;  %v14849_v38 = vld [vmem:[%s18776_s8 + $0x508] ss:$16 sps:$4 sm:$0xff]  }
 0x858   : > { %v14852_v30 = vld [vmem:[%s18776_s8 + $0x6e8] ss:$16 sps:$4 sm:$0xff]  }
 0x85a   : > { %11722 = vmatpush1.bf16.msra.mxu0 %v14765_v18  ;;  %11761 = vmatpush1.bf16.msra.mxu1 %v14768_v8  ;;  %v14857_v18 = vld [vmem:[%s18776_s8 + $0x52c] ss:$16 sps:$4 sm:$0xff]  }
 0x85b   : > { %11723 = vmatprep.subr.bf16.mxu0 %v14773_v4  ;;  %11762 = vmatprep.subr.bf16.mxu1 %v14776_v0  ;;  %v14860_v8 = vld [vmem:[%s18776_s8 + $0x70c] ss:$16 sps:$4 sm:$0xff]   ;;  %v14855_v4 = vld [vmem:[%s18776_s8 + $0x528] ss:$16 sps:$4 sm:$0xff]  }
 0x85c   : > { %v14858_v0 = vld [vmem:[%s18776_s8 + $0x708] ss:$16 sps:$4 sm:$0xff]  }
 0x85e   : > { %11724 = vmatpush1.bf16.msra.mxu0 %v14771_v27  ;;  %11763 = vmatpush1.bf16.msra.mxu1 %v14774_v23  ;;  %v14863_v27 = vld [vmem:[%s18776_s8 + $0x54c] ss:$16 sps:$4 sm:$0xff]  }
 0x85f   : > { %11725 = vmatprep.subr.bf16.mxu0 %v14779_v57  ;;  %11764 = vmatprep.subr.bf16.mxu1 %v14782_v58  ;;  %v14866_v23 = vld [vmem:[%s18776_s8 + $0x72c] ss:$16 sps:$4 sm:$0xff]   ;;  %v14861_v57 = vld [vmem:[%s18776_s8 + $0x548] ss:$16 sps:$4 sm:$0xff]  }
 0x860   : > { %v14864_v58 = vld [vmem:[%s18776_s8 + $0x728] ss:$16 sps:$4 sm:$0xff]  }
 0x862   : > { %11726 = vmatpush1.bf16.msra.mxu0 %v14777_v20  ;;  %11765 = vmatpush1.bf16.msra.mxu1 %v14780_v63  ;;  %v14869_v20 = vld [vmem:[%s18776_s8 + $0x56c] ss:$16 sps:$4 sm:$0xff]  }
 0x863   : > { %11727 = vmatprep.subr.bf16.mxu0 %v14785_v5  ;;  %11766 = vmatprep.subr.bf16.mxu1 %v14788_v56  ;;  %v14872_v63 = vld [vmem:[%s18776_s8 + $0x74c] ss:$16 sps:$4 sm:$0xff]   ;;  %v14867_v5 = vld [vmem:[%s18776_s8 + $0x568] ss:$16 sps:$4 sm:$0xff]  }
 0x864   : > { %v14870_v56 = vld [vmem:[%s18776_s8 + $0x748] ss:$16 sps:$4 sm:$0xff]  }
 0x866   : > { %11728 = vmatpush1.bf16.msra.mxu0 %v14783_v40  ;;  %11767 = vmatpush1.bf16.msra.mxu1 %v14786_v34  ;;  %v14875_v40 = vld [vmem:[%s18776_s8 + $0x58c] ss:$16 sps:$4 sm:$0xff]  }
 0x867   : > { %11729 = vmatprep.subr.bf16.mxu0 %v14791_v29  ;;  %11768 = vmatprep.subr.bf16.mxu1 %v14794_v42  ;;  %v14878_v34 = vld [vmem:[%s18776_s8 + $0x76c] ss:$16 sps:$4 sm:$0xff]   ;;  %v14873_v29 = vld [vmem:[%s18776_s8 + $0x588] ss:$16 sps:$4 sm:$0xff]  }
 0x868   : > { %v14876_v42 = vld [vmem:[%s18776_s8 + $0x768] ss:$16 sps:$4 sm:$0xff]  }
 0x86a   : > { %11730 = vmatpush1.bf16.msra.mxu0 %v14789_v47  ;;  %11769 = vmatpush1.bf16.msra.mxu1 %v14792_v44  ;;  %v14881_v47 = vld [vmem:[%s18776_s8 + $0x5ac] ss:$16 sps:$4 sm:$0xff]  }
 0x86b   : > { %11731 = vmatprep.subr.bf16.mxu0 %v14797_v55  ;;  %11770 = vmatprep.subr.bf16.mxu1 %v14800_v15  ;;  %v14884_v44 = vld [vmem:[%s18776_s8 + $0x78c] ss:$16 sps:$4 sm:$0xff]   ;;  %v14879_v55 = vld [vmem:[%s18776_s8 + $0x5a8] ss:$16 sps:$4 sm:$0xff]  }
 0x86c   : > { %v14882_v15 = vld [vmem:[%s18776_s8 + $0x788] ss:$16 sps:$4 sm:$0xff]  }
 0x86e   : > { %11732 = vmatpush1.bf16.msra.mxu0 %v14795_v61  ;;  %11771 = vmatpush1.bf16.msra.mxu1 %v14798_v50  ;;  %v14887_v61 = vld [vmem:[%s18776_s8 + $0x5cc] ss:$16 sps:$4 sm:$0xff]  }
 0x86f   : > { %11772 = vmatprep.subr.bf16.mxu1 %v14803_v53  ;;  %11783 = vmatprep.subr.bf16.mxu0 %v14806_v14  ;;  %v14890_v50 = vld [vmem:[%s18776_s8 + $0x7ac] ss:$16 sps:$4 sm:$0xff]   ;;  %v14885_v53 = vld [vmem:[%s18776_s8 + $0x5c8] ss:$16 sps:$4 sm:$0xff]  }
 0x870   : > { %v14888_v14 = vld [vmem:[%s18776_s8 + $0x7a8] ss:$16 sps:$4 sm:$0xff]  }
 0x871   : > { %11734 = vmatmul.mubr.bf16.vlgmr.msra.gmra.mrb[104].mxu0 %v18025_v21  ;;  %v14818_v21 = vld [vmem:[%s18776_s8 + $0x62c] ss:$16 sps:$4 sm:$0xff]  }
 0x872   : > { %11773 = vmatpush1.bf16.msra.mxu1 %v14801_v16  ;;  %11784 = vmatpush1.bf16.msra.mxu0 %v14804_v9  ;;  %v14893_v16 = vld [vmem:[%s18776_s8 + $0x5ec] ss:$16 sps:$4 sm:$0xff]  }
 0x873   : > { %11815 = vmatprep.mubr.bf16.mxu0 %v18063_v24  ;;  %11785 = vmatprep.subr.bf16.mxu0 %v14809_v31  ;;  %v14816_v24 = vld [vmem:[%s18776_s8 + $0x628] ss:$16 sps:$4 sm:$0xff]   ;;  %v14896_v9 = vld [vmem:[%s18776_s8 + $0x7cc] ss:$16 sps:$4 sm:$0xff]  }
 0x874   : > { %11824 = vmatprep.subr.bf16.mxu1 %v14812_v62  ;;  %v14891_v31 = vld [vmem:[%s18776_s8 + $0x5e8] ss:$16 sps:$4 sm:$0xff]  }
 0x875   : > { %11775 = vmatmul.mubr.bf16.vlgmr.msra.gmra.mrb[176].mxu1 %v18038_v11  ;;  %v14824_v11 = vld [vmem:[%s18776_s8 + $0x64c] ss:$16 sps:$4 sm:$0xff]   ;;  %v14894_v62 = vld [vmem:[%s18776_s8 + $0x7c8] ss:$16 sps:$4 sm:$0xff]  }
 0x876   : > { %11786 = vmatpush1.bf16.msra.mxu0 %v14807_v45  ;;  %11825 = vmatpush1.bf16.msra.mxu1 %v14810_v13  ;;  %v14899_v45 = vld [vmem:[%s18776_s8 + $0x7ec] ss:$16 sps:$4 sm:$0xff]   ;;  %v14900_v13 = vld [vmem:[%s18779_s11 + $0x40] sm:$0xff]  }
 0x877   : > { %11856 = vmatprep.mubr.bf16.mxu1 %v18102_v51  ;;  %11787 = vmatprep.subr.bf16.mxu0 %v14815_v36  ;;  %v14822_v51 = vld [vmem:[%s18776_s8 + $0x648] ss:$16 sps:$4 sm:$0xff]  }
 0x878   : > { %11826 = vmatprep.subr.bf16.mxu1 %v14818_v21  ;;  %v14897_v36 = vld [vmem:[%s18776_s8 + $0x7e8] ss:$16 sps:$4 sm:$0xff]   ;;  %v14901_v21 = vld [vmem:[%s18779_s11] sm:$0xff]  }
 0x87a   : > { %11788 = vmatpush1.bf16.msra.mxu0 %v14813_v3  ;;  %11827 = vmatpush1.bf16.msra.mxu1 %v14816_v24  ;;  %v14902_v3 = vld [vmem:[%s18779_s11 + $0x48] sm:$0xff]  }
 0x87b   : > { %11789 = vmatprep.subr.bf16.mxu0 %v14821_v41  ;;  %11828 = vmatprep.subr.bf16.mxu1 %v14824_v11  ;;  %v14903_v24 = vld [vmem:[%s18779_s11 + $0x8] sm:$0xff]   ;;  %v14904_v41 = vld [vmem:[%s18779_s11 + $0x50] sm:$0xff]  }
 0x87c   : > { %v14905_v11 = vld [vmem:[%s18779_s11 + $0x10] sm:$0xff]  }
 0x87e   : > { %11790 = vmatpush1.bf16.msra.mxu0 %v14819_v48  ;;  %11829 = vmatpush1.bf16.msra.mxu1 %v14822_v51  ;;  %v14907_v48 = vld [vmem:[%s18779_s11 + $0x18] sm:$0xff]   ;;  %v14909_v51 = vld [vmem:[%s18779_s11 + $0x20] sm:$0xff]  }
 0x87f   : > { %11791 = vmatprep.subr.bf16.mxu0 %v14827_v52  ;;  %11830 = vmatprep.subr.bf16.mxu1 %v14830_v37  ;;  %v14910_v52 = vld [vmem:[%s18779_s11 + $0x68] sm:$0xff]  }
 0x880   : > { %v14911_v37 = vld [vmem:[%s18779_s11 + $0x28] sm:$0xff]  }
 0x882   : > { %11792 = vmatpush1.bf16.msra.mxu0 %v14825_v1  ;;  %11831 = vmatpush1.bf16.msra.mxu1 %v14828_v7  ;;  %v14912_v1 = vld [vmem:[%s18779_s11 + $0x70] sm:$0xff]  }
 0x883   : > { %11793 = vmatprep.subr.bf16.mxu0 %v14833_v46  ;;  %11832 = vmatprep.subr.bf16.mxu1 %v14836_v49 }
 0x886   : > { %11794 = vmatpush1.bf16.msra.mxu0 %v14831_v12  ;;  %11833 = vmatpush1.bf16.msra.mxu1 %v14834_v59 }
 0x887   : > { %11795 = vmatprep.subr.bf16.mxu0 %v14839_v35  ;;  %11834 = vmatprep.subr.bf16.mxu1 %v14842_v54  ;;  %v14913_v35 = vld [vmem:[%s18779_s11 + $0x30] sm:$0xff]  }
 0x88a   : > { %11796 = vmatpush1.bf16.msra.mxu0 %v14837_v39  ;;  %11835 = vmatpush1.bf16.msra.mxu1 %v14840_v22  ;;  %v14914_v39 = vld [vmem:[%s18779_s11 + $0x78] sm:$0xff]  }
 0x88b   : > { %11797 = vmatprep.subr.bf16.mxu0 %v14845_v25  ;;  %11836 = vmatprep.subr.bf16.mxu1 %v14848_v32 }
 0x88e   : > { %11798 = vmatpush1.bf16.msra.mxu0 %v14843_v10  ;;  %11837 = vmatpush1.bf16.msra.mxu1 %v14846_v26 }
 0x88f   : > { %11799 = vmatprep.subr.bf16.mxu0 %v14851_v28  ;;  %11838 = vmatprep.subr.bf16.mxu1 %v14854_v60  ;;  %v14916_v28 = vld [vmem:[%s18779_s11 + $0xc0] sm:$0xff]  }
 0x890   : > { %v14917_v60 = vld [vmem:[%s18779_s11 + $0x80] sm:$0xff]  }
 0x892   : > { %11800 = vmatpush1.bf16.msra.mxu0 %v14849_v38  ;;  %11839 = vmatpush1.bf16.msra.mxu1 %v14852_v30  ;;  %v14918_v38 = vld [vmem:[%s18779_s11 + $0xc8] sm:$0xff]  }
 0x893   : > { %11801 = vmatprep.subr.bf16.mxu0 %v14857_v18  ;;  %11840 = vmatprep.subr.bf16.mxu1 %v14860_v8  ;;  %v14919_v30 = vld [vmem:[%s18779_s11 + $0x88] sm:$0xff]   ;;  %v14920_v18 = vld [vmem:[%s18779_s11 + $0xd0] sm:$0xff]  }
 0x894   : > { %v14921_v8 = vld [vmem:[%s18779_s11 + $0x90] sm:$0xff]  }
 0x896   : > { %11802 = vmatpush1.bf16.msra.mxu0 %v14855_v4  ;;  %11841 = vmatpush1.bf16.msra.mxu1 %v14858_v0  ;;  %v14922_v4 = vld [vmem:[%s18779_s11 + $0xd8] sm:$0xff]  }
 0x897   : > { %11803 = vmatprep.subr.bf16.mxu0 %v14863_v27  ;;  %11842 = vmatprep.subr.bf16.mxu1 %v14866_v23  ;;  %v14923_v0 = vld [vmem:[%s18779_s11 + $0x98] sm:$0xff]   ;;  %v14924_v27 = vld [vmem:[%s18779_s11 + $0xe0] sm:$0xff]   ;;  %v11867_v23 = vlaneseq }
 0x89a   : > { %11804 = vmatpush1.bf16.msra.mxu0 %v14861_v57  ;;  %11843 = vmatpush1.bf16.msra.mxu1 %v14864_v58  ;;  %v18726_v57 = vshrl.u32 %v11867_v23, 7 }
 0x89b   : > { %11805 = vmatprep.subr.bf16.mxu0 %v14869_v20  ;;  %11844 = vmatprep.subr.bf16.mxu1 %v14872_v63  ;;  %v11865_v63 = vld [vmem:[%s18778_s10] sm:$0xf] }
 0x89c   : > { %v11869_v58 = vsub.s32 0, %v18726_v57 }
 0x89e   : > { %11806 = vmatpush1.bf16.msra.mxu0 %v14867_v5  ;;  %11845 = vmatpush1.bf16.msra.mxu1 %v14870_v56  ;;  %v11873_v5 = vsub.s32 1, %v18726_v57 }
 0x89f   : > { %11807 = vmatprep.subr.bf16.mxu0 %v14875_v40  ;;  %11846 = vmatprep.subr.bf16.mxu1 %v14878_v34  ;;  %v14925_v34 = vld [vmem:[%s18779_s11 + $0xa0] sm:$0xff]  }
 0x8a2   : > { %11808 = vmatpush1.bf16.msra.mxu0 %v14873_v29  ;;  %11847 = vmatpush1.bf16.msra.mxu1 %v14876_v42 }
 0x8a3   : > { %11809 = vmatprep.subr.bf16.mxu0 %v14881_v47  ;;  %11848 = vmatprep.subr.bf16.mxu1 %v14884_v44  ;;  %v11870_v44 = vrot.slane %v11865_v63, %v11869_v58 }
 0x8a6   : > { %11810 = vmatpush1.bf16.msra.mxu0 %v14879_v55  ;;  %11849 = vmatpush1.bf16.msra.mxu1 %v14882_v15  ;;  %v14926_v55 = vld [vmem:[%s18779_s11 + $0xe8] sm:$0xff]  }
 0x8a7   : > { %11811 = vmatprep.subr.bf16.mxu0 %v14887_v61  ;;  %11850 = vmatprep.subr.bf16.mxu1 %v14890_v50  ;;  %v11874_v61 = vrot.slane %v11865_v63, %v11873_v5 }
 0x8aa   : > { %11812 = vmatpush1.bf16.msra.mxu0 %v14885_v53  ;;  %11851 = vmatpush1.bf16.msra.mxu1 %v14888_v14 }
 0x8ab   : > { %11813 = vmatprep.subr.bf16.mxu0 %v14893_v16  ;;  %11852 = vmatprep.subr.bf16.mxu1 %v14896_v9 }
 0x8ae   : > { %11814 = vmatpush1.bf16.msra.mxu0 %v14891_v31  ;;  %11853 = vmatpush1.bf16.msra.mxu1 %v14894_v62 }
 0x8af   : > { %11854 = vmatprep.subr.bf16.mxu1 %v14899_v45  ;;  %13606 = vmatprep.subr.bf16.mxu0 %v14900_v13 }
 0x8b1   : > { %11816 = vmatmul.mubr.bf16.vlgmr.msra.gmra.mrb[108].mxu0 %v18255_v6  ;;  %v14906_v6 = vld [vmem:[%s18779_s11 + $0x58] sm:$0xff]  }
 0x8b2   : > { %11855 = vmatpush1.bf16.msra.mxu1 %v14897_v36  ;;  %13607 = vmatpush3.bf16.msra.mxu0 %v14901_v21  ;;  %v14927_v36 = vld [vmem:[%s18779_s11 + $0xa8] sm:$0xff]  }
 0x8b3   : > { %13608 = vmatprep.subr.bf16.mxu0 %v14902_v3  ;;  %13628 = vmatprep.subr.bf16.mxu1 %v14916_v28  ;;  %v14928_v3 = vld [vmem:[%s18779_s11 + $0xf0] sm:$0xff]  }
 0x8b5   : > { %11857 = vmatmul.mubr.bf16.vlgmr.msra.gmra.mrb[180].mxu1 %v18272_v33  ;;  %v14908_v33 = vld [vmem:[%s18779_s11 + $0x60] sm:$0xff]  }
 0x8b6   : > { %13609 = vmatpush3.bf16.msra.mxu0 %v14903_v24  ;;  %13629 = vmatpush3.bf16.msra.mxu1 %v14917_v60 }
 0x8b7   : > { %13610 = vmatprep.subr.bf16.mxu0 %v14904_v41  ;;  %13630 = vmatprep.subr.bf16.mxu1 %v14918_v38  ;;  %v14929_v41 = vld [vmem:[%s18779_s11 + $0xb0] sm:$0xff]  }
 0x8ba   : > { %13611 = vmatpush3.bf16.msra.mxu0 %v14905_v11  ;;  %13631 = vmatpush3.bf16.msra.mxu1 %v14919_v30  ;;  %v14930_v11 = vld [vmem:[%s18779_s11 + $0xf8] sm:$0xff]  }
 0x8bb   : > { %13612 = vmatprep.subr.bf16.mxu0 %v14906_v6  ;;  %13632 = vmatprep.subr.bf16.mxu1 %v14920_v18  ;;  %v14931_v6 = vld [vmem:[%s18779_s11 + $0xb8] sm:$0xff]  }
 0x8be   : > { %13613 = vmatpush3.bf16.msra.mxu0 %v14907_v48  ;;  %13633 = vmatpush3.bf16.msra.mxu1 %v14921_v8 }
 0x8bf   : > { %13614 = vmatprep.subr.bf16.mxu0 %v14908_v33  ;;  %13634 = vmatprep.subr.bf16.mxu1 %v14922_v4 }
 0x8c2   : > { %13615 = vmatpush3.bf16.msra.mxu0 %v14909_v51  ;;  %13635 = vmatpush3.bf16.msra.mxu1 %v14923_v0 }
 0x8c3   : > { %13616 = vmatprep.subr.bf16.mxu0 %v14910_v52  ;;  %13636 = vmatprep.subr.bf16.mxu1 %v14924_v27 }
 0x8c4   : > { %v11571_v7 = vpop.f32.mrb[96].mxu0 }
 0x8c5   : > { %v11572_v46 = vadd.f32 %v11571_v7, %v18082_v43  ;;  %v11573_v49 = vpop.f32.mrb[97].mxu0 }
 0x8c6   : > { %v11574_v12 = vadd.f32 %v11573_v49, %v18090_v17  ;;  %v11575_v59 = vpop.f32.mrb[98].mxu0  ;;  %13617 = vmatpush3.bf16.msra.mxu0 %v14911_v37  ;;  %v14915_v17 = vld [vmem:[%s18779_s11 + $0x38] sm:$0xff]   ;;  %13637 = vmatpush3.bf16.msra.mxu1 %v14925_v34 }
 0x8c7   : > { %v11576_v54 = vpop.f32.mrb[99].mxu0  ;;  %13618 = vmatprep.subr.bf16.mxu0 %v14912_v1  ;;  %13638 = vmatprep.subr.bf16.mxu1 %v14926_v55 }
 0x8c8   : > { %v11612_v22 = vpop.f32.mrb[168].mxu1  ;;  %v11877_v54 = vsub.s32 2, %v18726_v57 }
 0x8c9   : > { %v11613_v25 = vadd.f32 %v11612_v22, %v11572_v46  ;;  %v11614_v32 = vpop.f32.mrb[169].mxu1  ;;  %v11881_v22 = vsub.s32 3, %v18726_v57 }
 0x8ca   : > { %v11615_v10 = vadd.f32 %v11614_v32, %v11574_v12  ;;  %v11616_v43 = vpop.f32.mrb[170].mxu1  ;;  %13619 = vmatpush3.bf16.msra.mxu0 %v14913_v35  ;;  %13639 = vmatpush3.bf16.msra.mxu1 %v14927_v36 }
 0x8cb   : > { %v11617_v26 = vpop.f32.mrb[171].mxu1  ;;  %13620 = vmatprep.subr.bf16.mxu0 %v14914_v39  ;;  %13640 = vmatprep.subr.bf16.mxu1 %v14928_v3 }
 0x8cc   : > { %v11882_v26 = vrot.slane %v11865_v63, %v11881_v22 }
 0x8ce   : > { %13621 = vmatpush3.bf16.msra.mxu0 %v14915_v17  ;;  %13641 = vmatpush3.bf16.msra.mxu1 %v14929_v41  ;;  %v11878_v17 = vrot.slane %v11865_v63, %v11877_v54  ;;  %v13326_v63 = vld [vmem:[%s18780_s12] ss:$0 sm:$0xff] }
 0x8cf   : > { %13642 = vmatprep.subr.bf16.mxu1 %v14930_v11 }
 0x8d2   : > { %13643 = vmatpush3.bf16.msra.mxu1 %v14931_v6 }
 0x904   : > { %v11653_v20 = vpop.f32.mrb[100].mxu0 }
 0x905   : > { %v11654_v56 = vadd.f32 %v11653_v20, %v11613_v25  ;;  %v11655_v40 = vpop.f32.mrb[101].mxu0 }
 0x906   : > { %v11656_v29 = vadd.f32 %v11655_v40, %v11615_v10  ;;  %v11657_v42 = vpop.f32.mrb[102].mxu0 }
 0x907   : > { %v11658_v47 = vpop.f32.mrb[103].mxu0 }
 0x908   : > { %v11694_v15 = vpop.f32.mrb[172].mxu1 }
 0x909   : > { %v11695_v50 = vadd.f32 %v11694_v15, %v11654_v56  ;;  %v11696_v53 = vpop.f32.mrb[173].mxu1 }
 0x90a   : > { %v11697_v14 = vadd.f32 %v11696_v53, %v11656_v29  ;;  %v11698_v16 = vpop.f32.mrb[174].mxu1 }
 0x90b   : > { %v11887_v9 = vadd.f32 %v11870_v44, %v11695_v50  ;;  %v11699_v31 = vpop.f32.mrb[175].mxu1 }
 0x90c   : > { %v11888_v62 = vadd.f32 %v11874_v61, %v11697_v14 }
 0x90d   : > { %v11891_v45 = vmax.f32 %v11887_v9, 0.0 }
 0x90e   : > { %v11892_v13 = vmax.f32 %v11888_v62, 0.0 }
 0x90f   : > { %v11895_v24 = vpack.c.bf16 %v11891_v45, %v11891_v45 }
 0x910   : > { %v11896_v21 = vpack.c.bf16 %v11892_v13, %v11892_v13 }
 0x912   : > { %12194 = vmatprep.mubr.bf16.mxu0 %v11896_v21 }
 0x913   : > { %12195 = vmatmul.mubr.bf16.vlgmr.msra.gmra.mrb[112].mxu0 %v11895_v24 }
 0x944   : > { %v11735_v48 = vpop.f32.mrb[104].mxu0 }
 0x945   : > { %v11736_v33 = vadd.f32 %v11735_v48, %v18129_v2  ;;  %v11737_v51 = vpop.f32.mrb[105].mxu0 }
 0x946   : > { %v11738_v52 = vadd.f32 %v11737_v51, %v18137_v19  ;;  %v11739_v37 = vpop.f32.mrb[106].mxu0 }
 0x947   : > { %v11740_v1 = vpop.f32.mrb[107].mxu0 }
 0x948   : > { %v11776_v7 = vpop.f32.mrb[176].mxu1 }
 0x949   : > { %v11777_v46 = vadd.f32 %v11776_v7, %v11736_v33  ;;  %v11778_v49 = vpop.f32.mrb[177].mxu1 }
 0x94a   : > { %v11779_v12 = vadd.f32 %v11778_v49, %v11738_v52  ;;  %v11780_v59 = vpop.f32.mrb[178].mxu1 }
 0x94b   : > { %v11781_v35 = vpop.f32.mrb[179].mxu1 }
 0x984   : > { %v11817_v39 = vpop.f32.mrb[108].mxu0 }
 0x985   : > { %v11818_v25 = vadd.f32 %v11817_v39, %v11777_v46  ;;  %v11819_v32 = vpop.f32.mrb[109].mxu0 }
 0x986   : > { %v11820_v10 = vadd.f32 %v11819_v32, %v11779_v12  ;;  %v11821_v2 = vpop.f32.mrb[110].mxu0 }
 0x987   : > { %v11822_v43 = vpop.f32.mrb[111].mxu0 }
 0x988   : > { %v11858_v19 = vpop.f32.mrb[180].mxu1 }
 0x989   : > { %v11859_v28 = vadd.f32 %v11858_v19, %v11818_v25  ;;  %v11860_v60 = vpop.f32.mrb[181].mxu1 }
 0x98a   : > { %v11861_v38 = vadd.f32 %v11860_v60, %v11820_v10  ;;  %v11862_v30 = vpop.f32.mrb[182].mxu1 }
 0x98b   : > { %v11889_v18 = vadd.f32 %v11878_v17, %v11859_v28  ;;  %v11863_v8 = vpop.f32.mrb[183].mxu1 }
 0x98c   : > { %v11890_v4 = vadd.f32 %v11882_v26, %v11861_v38 }
 0x98d   : > { %v11893_v0 = vmax.f32 %v11889_v18, 0.0 }
 0x98e   : > { %v11894_v27 = vmax.f32 %v11890_v4, 0.0 }
 0x98f   : > { %v11897_v57 = vpack.c.bf16 %v11893_v0, %v11893_v0 }
 0x990   : > { %v11898_v23 = vpack.c.bf16 %v11894_v27, %v11894_v27 }
 0x992   : > { %12234 = vmatprep.mubr.bf16.mxu1 %v11898_v23 }
 0x993   : > { %12235 = vmatmul.mubr.bf16.vlgmr.msra.gmra.mrb[184].mxu1 %v11897_v57 }
 0x9e6   : > { %v13622_v58 = vpop.f32.mrb[112].mxu0 }
 0x9e7   : > { %v13623_v20 = vpop.f32.mrb[113].mxu0 }
 0x9e8   : > { %v13624_v5 = vadd.f32 %v13623_v20, %v13622_v58  ;;  %v13625_v56 = vpop.f32.mrb[114].mxu0 }
 0x9e9   : > { %v13626_v40 = vpop.f32.mrb[115].mxu0 }
 0x9ea   : > { %v12197_v42 = vadd.f32 %v13624_v5, %v13326_v63 }
 0xa66   : > { %v13644_v34 = vpop.f32.mrb[184].mxu1 }
 0xa67   : > { %v13645_v29 = vpop.f32.mrb[185].mxu1 }
 0xa68   : > { %v13646_v47 = vadd.f32 %v13645_v29, %v13644_v34  ;;  %v13647_v44 = vpop.f32.mrb[186].mxu1 }
 0xa69   : > { %v13648_v55 = vpop.f32.mrb[187].mxu1 }
 0xa6a   : > { %v12237_v15 = vadd.f32 %v13646_v47, %v12197_v42 }
 0xa6c   : > { %12242 = vst [vmem:[%s460_s14] sm:$0xff] %v12237_v15 }
 0xa6d PF: > { %s23_s25 = sadd.s32 1, %s14944_s25  }
 0xa6e   : > { %p20_p5 = scmp.ge.s32.totalorder %s23_s25, 4  }
 0xa70   :  { %22 = sbr.rel (!%p20_p5) target bundleno = 1 (0x1), region = 108 }

</bundles_post_ra>
